<compile_context>
chip_gen: v5e
topology: v5e:2x2
jax: 0.10.0
libtpu: 0.0.40
codegen_flags: <defaults>
</compile_context>

<pallas_src>
import jax
import jax.numpy as jnp
from jax import lax
from jax.experimental import pallas as pl
from jax.experimental.pallas import tpu as pltpu

embed_size = 384
attention_heads = 6
head_dim = embed_size // attention_heads   # 64
dropout_rate = 0.2                          # identity in eval mode

_NEG_LARGE = -1e30                          # finite "masked" score (NaN-safe)


def _fused_mha_kernel(x_ref, wqkv_ref, wp_ref, bp_ref, o_ref, qkv_ref, cat_ref):
    """One batch element of full multi-head causal attention.

    x_ref    : (1, S, E)   f32 activations
    wqkv_ref : (E, 3*H*Dh) bf16, columns = [q heads | k heads | v heads]
    wp_ref   : (E, E)      bf16 output projection (applied as x @ Wp)
    bp_ref   : (1, E)      f32 output projection bias
    o_ref    : (1, S, E)   f32
    qkv_ref  : (S, 3*H*Dh) bf16 VMEM scratch (staged QKV, bounds reg pressure)
    cat_ref  : (S, H*Dh)   bf16 VMEM scratch (concatenated head outputs)
    """
    S = x_ref.shape[1]
    H = attention_heads
    Dh = head_dim
    HD = H * Dh                               # == E for this module (6*64=384)
    scale = Dh ** (-0.5)

    # 1) One full-width bf16 MXU pass for all heads' Q, K, V: (S,E)@(E,3E),
    #    f32 accumulation, result staged in VMEM scratch.
    x = x_ref[0].astype(jnp.bfloat16)
    qkv_ref[...] = jnp.dot(
        x, wqkv_ref[...], preferred_element_type=jnp.float32
    ).astype(jnp.bfloat16)

    # Causal (tril) mask, shared across heads.
    row = lax.broadcasted_iota(jnp.int32, (S, S), 0)
    col = lax.broadcasted_iota(jnp.int32, (S, S), 1)
    causal = col <= row

    # 2) Per-head attention; each head's (S, Dh) result goes straight into its
    #    lane-column slot of the concat scratch (no per-head output matmul).
    for h in range(H):                                   # static unroll, H = 6
        q = qkv_ref[:, pl.ds(h * Dh, Dh)]                # (S, Dh) bf16
        k = qkv_ref[:, pl.ds(HD + h * Dh, Dh)]           # (S, Dh) bf16
        v = qkv_ref[:, pl.ds(2 * HD + h * Dh, Dh)]       # (S, Dh) bf16

        # q @ k^T without materializing a transpose of k; f32 accumulate.
        scores = lax.dot_general(
            q, k,
            dimension_numbers=(((1,), (1,)), ((), ())),
            preferred_element_type=jnp.float32,
        ) * scale                                        # (S, S) f32
        scores = jnp.where(causal, scores, _NEG_LARGE)

        # Numerically stable softmax; all elementwise math in f32, EXACT divide.
        m = jnp.max(scores, axis=-1, keepdims=True)
        p = jnp.exp(scores - m)
        p = p / jnp.sum(p, axis=-1, keepdims=True)
        # TODO(synk): attention-weight dropout omitted (eval-mode identity).

        head_out = jnp.dot(p.astype(jnp.bfloat16), v,
                           preferred_element_type=jnp.float32)   # (S, Dh) f32
        cat_ref[:, pl.ds(h * Dh, Dh)] = head_out.astype(jnp.bfloat16)

    # 3) Single fused output projection with full contraction K = E = 384
    #    (one MXU matmul instead of six K=64 accumulations) + bias.
    out = jnp.dot(cat_ref[...], wp_ref[...], preferred_element_type=jnp.float32)
    # TODO(synk): output dropout omitted (eval-mode identity).
    o_ref[0] = out + bp_ref[...]                          # lane-dense (S, E) store


def pack_params(wq, wk, wv, wp, bp):
    """One-time parameter packing, hoisted out of the per-forward path.

    wq/wk/wv: (H, E, Dh) per-head projection weights (applied as x @ W).
    Returns (wqkv_bf16 (E, 3*H*Dh), wp_bf16 (E, E), bp_f32 (1, E)).
    """
    H, E, Dh = wq.shape
    w_q = jnp.transpose(wq, (1, 0, 2)).reshape(E, H * Dh)
    w_k = jnp.transpose(wk, (1, 0, 2)).reshape(E, H * Dh)
    w_v = jnp.transpose(wv, (1, 0, 2)).reshape(E, H * Dh)
    wqkv = jnp.concatenate([w_q, w_k, w_v], axis=1).astype(jnp.bfloat16)
    return wqkv, wp.astype(jnp.bfloat16), bp.reshape(1, E).astype(jnp.float32)


def multi_headed_attention(x, wqkv, wp, bp):
    """x: (B, S, E) f32; wqkv/wp pre-packed bf16; bp: (1, E) f32."""
    B, S, E = x.shape
    H, Dh = attention_heads, head_dim

    flops = int(B * (2 * S * E * (3 * E)            # QKV projection
                     + H * 2 * (2 * S * S * Dh)     # scores + PV
                     + 2 * S * E * E))              # fused output projection
    cost = pl.CostEstimate(
        flops=flops,
        transcendentals=int(B * H * S * S),         # softmax exp
        bytes_accessed=int(x.size * 4 + wqkv.size * 2 + wp.size * 2
                           + bp.size * 4 + B * S * E * 4),
    )

    return pl.pallas_call(
        _fused_mha_kernel,
        out_shape=jax.ShapeDtypeStruct((B, S, E), jnp.float32),
        grid=(B,),
        in_specs=[
            pl.BlockSpec((1, S, E), lambda b: (b, 0, 0)),
            # Grid-constant index maps: weights DMA'd once, VMEM-resident.
            pl.BlockSpec((E, 3 * E), lambda b: (0, 0)),
            pl.BlockSpec((E, E), lambda b: (0, 0)),
            pl.BlockSpec((1, E), lambda b: (0, 0)),
        ],
        out_specs=pl.BlockSpec((1, S, E), lambda b: (b, 0, 0)),
        scratch_shapes=[
            pltpu.VMEM((S, 3 * E), jnp.bfloat16),   # staged QKV
            pltpu.VMEM((S, E), jnp.bfloat16),       # concatenated head outputs
        ],
        compiler_params=pltpu.CompilerParams(
            dimension_semantics=("parallel",),      # v7x: 2 TCs split the batch
        ),
        cost_estimate=cost,
    )(x, wqkv, wp, bp)


def _reference(x, wq, wk, wv, wp, bp):
    """Pure-JAX f32 reference mirroring the PyTorch forward (eval mode)."""
    B, S, E = x.shape
    outs = []
    for h in range(wq.shape[0]):
        q = x @ wq[h]
        k = x @ wk[h]
        v = x @ wv[h]
        w = (q @ jnp.swapaxes(k, -1, -2)) * (k.shape[-1] ** -0.5)
        mask = jnp.tril(jnp.ones((S, S)))
        w = jnp.where(mask == 0, -jnp.inf, w)
        w = jax.nn.softmax(w, axis=-1)
        outs.append(w @ v)
    cat = jnp.concatenate(outs, axis=-1)
    return cat @ wp + bp


if __name__ == "__main__":
    key = jax.random.PRNGKey(0)
    k_x, k_q, k_k, k_v, k_p, k_b = jax.random.split(key, 6)

    # Small shapes consistent with the module: seq <= 256, embed fixed at 384.
    # S=128 keeps the per-step matmul M dimension MXU-friendly on all chips.
    B, S = 2, 128
    x = jax.random.normal(k_x, (B, S, embed_size), dtype=jnp.float32)

    scale = embed_size ** -0.5
    wq = jax.random.normal(k_q, (attention_heads, embed_size, head_dim),
                           dtype=jnp.float32) * scale
    wk = jax.random.normal(k_k, (attention_heads, embed_size, head_dim),
                           dtype=jnp.float32) * scale
    wv = jax.random.normal(k_v, (attention_heads, embed_size, head_dim),
                           dtype=jnp.float32) * scale
    wp = jax.random.normal(k_p, (embed_size, embed_size),
                           dtype=jnp.float32) * scale
    bp = jax.random.normal(k_b, (embed_size,), dtype=jnp.float32) * 0.01

    # One-time packing (hoisted out of the per-forward path).
    wqkv_p, wp_p, bp_p = pack_params(wq, wk, wv, wp, bp)

    out = multi_headed_attention(x, wqkv_p, wp_p, bp_p)
    out = jax.block_until_ready(out)

    ref = _reference(x, wq, wk, wv, wp, bp)
    assert out.shape == (B, S, embed_size)
    # Tolerance relaxed (per perf review) because MXU operands are bf16 with
    # f32 accumulation; softmax math and accumulators remain f32.
    assert jnp.allclose(out, ref, atol=3e-2, rtol=3e-2), "mismatch vs reference"

    print("KERNEL_OK")
</pallas_src>

<mosaic_0001>
module attributes {stable_mosaic.version = 11 : i64} {
  func.func @_fused_mha_kernel(%arg0: i32, %arg1: memref<1x128x384xf32, #tpu.memory_space<vmem>>, %arg2: memref<384x1152xbf16, #tpu.memory_space<vmem>>, %arg3: memref<384x384xbf16, #tpu.memory_space<vmem>>, %arg4: memref<1x384xf32, #tpu.memory_space<vmem>>, %arg5: memref<1x128x384xf32, #tpu.memory_space<vmem>>, %arg6: memref<128x1152xbf16, #tpu.memory_space<vmem>>, %arg7: memref<128x384xbf16, #tpu.memory_space<vmem>>) attributes {dimension_semantics = [#tpu.dimension_semantics<parallel>], iteration_bounds = array<i64: 2>, scalar_prefetch = 0 : i64, scratch_operands = 2 : i64, tpu.core_type = #tpu.core_type<tc>, window_params = [{transform_indices = @transform_0, window_bounds = array<i64: 1, 128, 384>}, {pipeline_mode = #tpu.pipeline_mode<synchronous>, transform_indices = @transform_1, window_bounds = array<i64: 384, 1152>}, {pipeline_mode = #tpu.pipeline_mode<synchronous>, transform_indices = @transform_2, window_bounds = array<i64: 384, 384>}, {pipeline_mode = #tpu.pipeline_mode<synchronous>, transform_indices = @transform_3, window_bounds = array<i64: 1, 384>}, {transform_indices = @transform_4, window_bounds = array<i64: 1, 128, 384>}]} {
    %c0 = arith.constant 0 : index
    %c0_0 = arith.constant 0 : index
    %c0_1 = arith.constant 0 : index
    %0 = vector.load %arg1[%c0, %c0_0, %c0_1] : memref<1x128x384xf32, #tpu.memory_space<vmem>>, vector<1x128x384xf32>
    %1 = vector.shape_cast %0 : vector<1x128x384xf32> to vector<128x384xf32>
    %2 = arith.truncf %1 : vector<128x384xf32> to vector<128x384xbf16>
    %c0_2 = arith.constant 0 : index
    %c0_3 = arith.constant 0 : index
    %3 = vector.load %arg2[%c0_2, %c0_3] : memref<384x1152xbf16, #tpu.memory_space<vmem>>, vector<384x1152xbf16>
    %cst = arith.constant dense<0.000000e+00> : vector<128x1152xf32>
    %4 = tpu.matmul %2, %3, %cst {dimension_numbers = #tpu.dot_dimension_numbers<[1], [0], [0], [1], [0, 0, 1, 1], [], []>} : vector<128x384xbf16>, vector<384x1152xbf16>, vector<128x1152xf32> -> vector<128x1152xf32>
    %5 = arith.truncf %4 : vector<128x1152xf32> to vector<128x1152xbf16>
    %c0_4 = arith.constant 0 : index
    %c0_5 = arith.constant 0 : index
    %6 = vector.load %arg6[%c0_4, %c0_5] : memref<128x1152xbf16, #tpu.memory_space<vmem>>, vector<128x1152xbf16>
    tpu.vector_store %arg6[%c0_4, %c0_5], %5 {strides = array<i32>} : memref<128x1152xbf16, #tpu.memory_space<vmem>>, vector<128x1152xbf16>,
    %7 = tpu.iota {dimensions = array<i32: 0>} : vector<128x128xi32>
    %8 = tpu.iota {dimensions = array<i32: 1>} : vector<128x128xi32>
    %9 = arith.cmpi sle, %8, %7 : vector<128x128xi32>
    %c0_6 = arith.constant 0 : index
    %c0_7 = arith.constant 0 : index
    %10 = vector.load %arg6[%c0_6, %c0_7] : memref<128x1152xbf16, #tpu.memory_space<vmem>>, vector<128x64xbf16>
    %c0_8 = arith.constant 0 : index
    %c384 = arith.constant 384 : index
    %11 = vector.load %arg6[%c0_8, %c384] : memref<128x1152xbf16, #tpu.memory_space<vmem>>, vector<128x64xbf16>
    %c0_9 = arith.constant 0 : index
    %c768 = arith.constant 768 : index
    %12 = vector.load %arg6[%c0_9, %c768] : memref<128x1152xbf16, #tpu.memory_space<vmem>>, vector<128x64xbf16>
    %cst_10 = arith.constant dense<0.000000e+00> : vector<128x128xf32>
    %13 = tpu.matmul %10, %11, %cst_10 {dimension_numbers = #tpu.dot_dimension_numbers<[1], [1], [0], [0], [0, 0, 1, 0], [], []>} : vector<128x64xbf16>, vector<128x64xbf16>, vector<128x128xf32> -> vector<128x128xf32>
    %cst_11 = arith.constant 1.250000e-01 : f32
    %14 = vector.broadcast %cst_11 : f32 to vector<128x128xf32>
    %15 = arith.mulf %13, %14 : vector<128x128xf32>
    %cst_12 = arith.constant -1.000000e+30 : f32
    %16 = vector.broadcast %cst_12 : f32 to vector<128x128xf32>
    %17 = arith.select %9, %15, %16 : vector<128x128xi1>, vector<128x128xf32>
    %cst_13 = arith.constant dense<0xFF800000> : vector<128xf32>
    %18 = vector.multi_reduction <maximumf>, %17, %cst_13 [1] : vector<128x128xf32> to vector<128xf32>
    %19 = vector.shape_cast %18 : vector<128xf32> to vector<128x1xf32>
    %20 = vector.broadcast %19 : vector<128x1xf32> to vector<128x128xf32>
    %21 = arith.subf %17, %20 : vector<128x128xf32>
    %22 = math.exp %21 : vector<128x128xf32>
    %cst_14 = arith.constant dense<0.000000e+00> : vector<128xf32>
    %23 = vector.multi_reduction <add>, %22, %cst_14 [1] : vector<128x128xf32> to vector<128xf32>
    %24 = vector.shape_cast %23 : vector<128xf32> to vector<128x1xf32>
    %25 = vector.broadcast %24 : vector<128x1xf32> to vector<128x128xf32>
    %26 = arith.divf %22, %25 : vector<128x128xf32>
    %27 = arith.truncf %26 : vector<128x128xf32> to vector<128x128xbf16>
    %cst_15 = arith.constant dense<0.000000e+00> : vector<128x64xf32>
    %28 = tpu.matmul %27, %12, %cst_15 {dimension_numbers = #tpu.dot_dimension_numbers<[1], [0], [0], [1], [0, 0, 1, 1], [], []>} : vector<128x128xbf16>, vector<128x64xbf16>, vector<128x64xf32> -> vector<128x64xf32>
    %29 = arith.truncf %28 : vector<128x64xf32> to vector<128x64xbf16>
    %c0_16 = arith.constant 0 : index
    %c0_17 = arith.constant 0 : index
    %30 = vector.load %arg7[%c0_16, %c0_17] : memref<128x384xbf16, #tpu.memory_space<vmem>>, vector<128x64xbf16>
    tpu.vector_store %arg7[%c0_16, %c0_17], %29 {strides = array<i32>} : memref<128x384xbf16, #tpu.memory_space<vmem>>, vector<128x64xbf16>,
    %c0_18 = arith.constant 0 : index
    %c64 = arith.constant 64 : index
    %31 = vector.load %arg6[%c0_18, %c64] : memref<128x1152xbf16, #tpu.memory_space<vmem>>, vector<128x64xbf16>
    %c0_19 = arith.constant 0 : index
    %c448 = arith.constant 448 : index
    %32 = vector.load %arg6[%c0_19, %c448] : memref<128x1152xbf16, #tpu.memory_space<vmem>>, vector<128x64xbf16>
    %c0_20 = arith.constant 0 : index
    %c832 = arith.constant 832 : index
    %33 = vector.load %arg6[%c0_20, %c832] : memref<128x1152xbf16, #tpu.memory_space<vmem>>, vector<128x64xbf16>
    %cst_21 = arith.constant dense<0.000000e+00> : vector<128x128xf32>
    %34 = tpu.matmul %31, %32, %cst_21 {dimension_numbers = #tpu.dot_dimension_numbers<[1], [1], [0], [0], [0, 0, 1, 0], [], []>} : vector<128x64xbf16>, vector<128x64xbf16>, vector<128x128xf32> -> vector<128x128xf32>
    %cst_22 = arith.constant 1.250000e-01 : f32
    %35 = vector.broadcast %cst_22 : f32 to vector<128x128xf32>
    %36 = arith.mulf %34, %35 : vector<128x128xf32>
    %cst_23 = arith.constant -1.000000e+30 : f32
    %37 = vector.broadcast %cst_23 : f32 to vector<128x128xf32>
    %38 = arith.select %9, %36, %37 : vector<128x128xi1>, vector<128x128xf32>
    %cst_24 = arith.constant dense<0xFF800000> : vector<128xf32>
    %39 = vector.multi_reduction <maximumf>, %38, %cst_24 [1] : vector<128x128xf32> to vector<128xf32>
    %40 = vector.shape_cast %39 : vector<128xf32> to vector<128x1xf32>
    %41 = vector.broadcast %40 : vector<128x1xf32> to vector<128x128xf32>
    %42 = arith.subf %38, %41 : vector<128x128xf32>
    %43 = math.exp %42 : vector<128x128xf32>
    %cst_25 = arith.constant dense<0.000000e+00> : vector<128xf32>
    %44 = vector.multi_reduction <add>, %43, %cst_25 [1] : vector<128x128xf32> to vector<128xf32>
    %45 = vector.shape_cast %44 : vector<128xf32> to vector<128x1xf32>
    %46 = vector.broadcast %45 : vector<128x1xf32> to vector<128x128xf32>
    %47 = arith.divf %43, %46 : vector<128x128xf32>
    %48 = arith.truncf %47 : vector<128x128xf32> to vector<128x128xbf16>
    %cst_26 = arith.constant dense<0.000000e+00> : vector<128x64xf32>
    %49 = tpu.matmul %48, %33, %cst_26 {dimension_numbers = #tpu.dot_dimension_numbers<[1], [0], [0], [1], [0, 0, 1, 1], [], []>} : vector<128x128xbf16>, vector<128x64xbf16>, vector<128x64xf32> -> vector<128x64xf32>
    %50 = arith.truncf %49 : vector<128x64xf32> to vector<128x64xbf16>
    %c0_27 = arith.constant 0 : index
    %c64_28 = arith.constant 64 : index
    %51 = vector.load %arg7[%c0_27, %c64_28] : memref<128x384xbf16, #tpu.memory_space<vmem>>, vector<128x64xbf16>
    tpu.vector_store %arg7[%c0_27, %c64_28], %50 {strides = array<i32>} : memref<128x384xbf16, #tpu.memory_space<vmem>>, vector<128x64xbf16>,
    %c0_29 = arith.constant 0 : index
    %c128 = arith.constant 128 : index
    %52 = vector.load %arg6[%c0_29, %c128] : memref<128x1152xbf16, #tpu.memory_space<vmem>>, vector<128x64xbf16>
    %c0_30 = arith.constant 0 : index
    %c512 = arith.constant 512 : index
    %53 = vector.load %arg6[%c0_30, %c512] : memref<128x1152xbf16, #tpu.memory_space<vmem>>, vector<128x64xbf16>
    %c0_31 = arith.constant 0 : index
    %c896 = arith.constant 896 : index
    %54 = vector.load %arg6[%c0_31, %c896] : memref<128x1152xbf16, #tpu.memory_space<vmem>>, vector<128x64xbf16>
    %cst_32 = arith.constant dense<0.000000e+00> : vector<128x128xf32>
    %55 = tpu.matmul %52, %53, %cst_32 {dimension_numbers = #tpu.dot_dimension_numbers<[1], [1], [0], [0], [0, 0, 1, 0], [], []>} : vector<128x64xbf16>, vector<128x64xbf16>, vector<128x128xf32> -> vector<128x128xf32>
    %cst_33 = arith.constant 1.250000e-01 : f32
    %56 = vector.broadcast %cst_33 : f32 to vector<128x128xf32>
    %57 = arith.mulf %55, %56 : vector<128x128xf32>
    %cst_34 = arith.constant -1.000000e+30 : f32
    %58 = vector.broadcast %cst_34 : f32 to vector<128x128xf32>
    %59 = arith.select %9, %57, %58 : vector<128x128xi1>, vector<128x128xf32>
    %cst_35 = arith.constant dense<0xFF800000> : vector<128xf32>
    %60 = vector.multi_reduction <maximumf>, %59, %cst_35 [1] : vector<128x128xf32> to vector<128xf32>
    %61 = vector.shape_cast %60 : vector<128xf32> to vector<128x1xf32>
    %62 = vector.broadcast %61 : vector<128x1xf32> to vector<128x128xf32>
    %63 = arith.subf %59, %62 : vector<128x128xf32>
    %64 = math.exp %63 : vector<128x128xf32>
    %cst_36 = arith.constant dense<0.000000e+00> : vector<128xf32>
    %65 = vector.multi_reduction <add>, %64, %cst_36 [1] : vector<128x128xf32> to vector<128xf32>
    %66 = vector.shape_cast %65 : vector<128xf32> to vector<128x1xf32>
    %67 = vector.broadcast %66 : vector<128x1xf32> to vector<128x128xf32>
    %68 = arith.divf %64, %67 : vector<128x128xf32>
    %69 = arith.truncf %68 : vector<128x128xf32> to vector<128x128xbf16>
    %cst_37 = arith.constant dense<0.000000e+00> : vector<128x64xf32>
    %70 = tpu.matmul %69, %54, %cst_37 {dimension_numbers = #tpu.dot_dimension_numbers<[1], [0], [0], [1], [0, 0, 1, 1], [], []>} : vector<128x128xbf16>, vector<128x64xbf16>, vector<128x64xf32> -> vector<128x64xf32>
    %71 = arith.truncf %70 : vector<128x64xf32> to vector<128x64xbf16>
    %c0_38 = arith.constant 0 : index
    %c128_39 = arith.constant 128 : index
    %72 = vector.load %arg7[%c0_38, %c128_39] : memref<128x384xbf16, #tpu.memory_space<vmem>>, vector<128x64xbf16>
    tpu.vector_store %arg7[%c0_38, %c128_39], %71 {strides = array<i32>} : memref<128x384xbf16, #tpu.memory_space<vmem>>, vector<128x64xbf16>,
    %c0_40 = arith.constant 0 : index
    %c192 = arith.constant 192 : index
    %73 = vector.load %arg6[%c0_40, %c192] : memref<128x1152xbf16, #tpu.memory_space<vmem>>, vector<128x64xbf16>
    %c0_41 = arith.constant 0 : index
    %c576 = arith.constant 576 : index
    %74 = vector.load %arg6[%c0_41, %c576] : memref<128x1152xbf16, #tpu.memory_space<vmem>>, vector<128x64xbf16>
    %c0_42 = arith.constant 0 : index
    %c960 = arith.constant 960 : index
    %75 = vector.load %arg6[%c0_42, %c960] : memref<128x1152xbf16, #tpu.memory_space<vmem>>, vector<128x64xbf16>
    %cst_43 = arith.constant dense<0.000000e+00> : vector<128x128xf32>
    %76 = tpu.matmul %73, %74, %cst_43 {dimension_numbers = #tpu.dot_dimension_numbers<[1], [1], [0], [0], [0, 0, 1, 0], [], []>} : vector<128x64xbf16>, vector<128x64xbf16>, vector<128x128xf32> -> vector<128x128xf32>
    %cst_44 = arith.constant 1.250000e-01 : f32
    %77 = vector.broadcast %cst_44 : f32 to vector<128x128xf32>
    %78 = arith.mulf %76, %77 : vector<128x128xf32>
    %cst_45 = arith.constant -1.000000e+30 : f32
    %79 = vector.broadcast %cst_45 : f32 to vector<128x128xf32>
    %80 = arith.select %9, %78, %79 : vector<128x128xi1>, vector<128x128xf32>
    %cst_46 = arith.constant dense<0xFF800000> : vector<128xf32>
    %81 = vector.multi_reduction <maximumf>, %80, %cst_46 [1] : vector<128x128xf32> to vector<128xf32>
    %82 = vector.shape_cast %81 : vector<128xf32> to vector<128x1xf32>
    %83 = vector.broadcast %82 : vector<128x1xf32> to vector<128x128xf32>
    %84 = arith.subf %80, %83 : vector<128x128xf32>
    %85 = math.exp %84 : vector<128x128xf32>
    %cst_47 = arith.constant dense<0.000000e+00> : vector<128xf32>
    %86 = vector.multi_reduction <add>, %85, %cst_47 [1] : vector<128x128xf32> to vector<128xf32>
    %87 = vector.shape_cast %86 : vector<128xf32> to vector<128x1xf32>
    %88 = vector.broadcast %87 : vector<128x1xf32> to vector<128x128xf32>
    %89 = arith.divf %85, %88 : vector<128x128xf32>
    %90 = arith.truncf %89 : vector<128x128xf32> to vector<128x128xbf16>
    %cst_48 = arith.constant dense<0.000000e+00> : vector<128x64xf32>
    %91 = tpu.matmul %90, %75, %cst_48 {dimension_numbers = #tpu.dot_dimension_numbers<[1], [0], [0], [1], [0, 0, 1, 1], [], []>} : vector<128x128xbf16>, vector<128x64xbf16>, vector<128x64xf32> -> vector<128x64xf32>
    %92 = arith.truncf %91 : vector<128x64xf32> to vector<128x64xbf16>
    %c0_49 = arith.constant 0 : index
    %c192_50 = arith.constant 192 : index
    %93 = vector.load %arg7[%c0_49, %c192_50] : memref<128x384xbf16, #tpu.memory_space<vmem>>, vector<128x64xbf16>
    tpu.vector_store %arg7[%c0_49, %c192_50], %92 {strides = array<i32>} : memref<128x384xbf16, #tpu.memory_space<vmem>>, vector<128x64xbf16>,
    %c0_51 = arith.constant 0 : index
    %c256 = arith.constant 256 : index
    %94 = vector.load %arg6[%c0_51, %c256] : memref<128x1152xbf16, #tpu.memory_space<vmem>>, vector<128x64xbf16>
    %c0_52 = arith.constant 0 : index
    %c640 = arith.constant 640 : index
    %95 = vector.load %arg6[%c0_52, %c640] : memref<128x1152xbf16, #tpu.memory_space<vmem>>, vector<128x64xbf16>
    %c0_53 = arith.constant 0 : index
    %c1024 = arith.constant 1024 : index
    %96 = vector.load %arg6[%c0_53, %c1024] : memref<128x1152xbf16, #tpu.memory_space<vmem>>, vector<128x64xbf16>
    %cst_54 = arith.constant dense<0.000000e+00> : vector<128x128xf32>
    %97 = tpu.matmul %94, %95, %cst_54 {dimension_numbers = #tpu.dot_dimension_numbers<[1], [1], [0], [0], [0, 0, 1, 0], [], []>} : vector<128x64xbf16>, vector<128x64xbf16>, vector<128x128xf32> -> vector<128x128xf32>
    %cst_55 = arith.constant 1.250000e-01 : f32
    %98 = vector.broadcast %cst_55 : f32 to vector<128x128xf32>
    %99 = arith.mulf %97, %98 : vector<128x128xf32>
    %cst_56 = arith.constant -1.000000e+30 : f32
    %100 = vector.broadcast %cst_56 : f32 to vector<128x128xf32>
    %101 = arith.select %9, %99, %100 : vector<128x128xi1>, vector<128x128xf32>
    %cst_57 = arith.constant dense<0xFF800000> : vector<128xf32>
    %102 = vector.multi_reduction <maximumf>, %101, %cst_57 [1] : vector<128x128xf32> to vector<128xf32>
    %103 = vector.shape_cast %102 : vector<128xf32> to vector<128x1xf32>
    %104 = vector.broadcast %103 : vector<128x1xf32> to vector<128x128xf32>
    %105 = arith.subf %101, %104 : vector<128x128xf32>
    %106 = math.exp %105 : vector<128x128xf32>
    %cst_58 = arith.constant dense<0.000000e+00> : vector<128xf32>
    %107 = vector.multi_reduction <add>, %106, %cst_58 [1] : vector<128x128xf32> to vector<128xf32>
    %108 = vector.shape_cast %107 : vector<128xf32> to vector<128x1xf32>
    %109 = vector.broadcast %108 : vector<128x1xf32> to vector<128x128xf32>
    %110 = arith.divf %106, %109 : vector<128x128xf32>
    %111 = arith.truncf %110 : vector<128x128xf32> to vector<128x128xbf16>
    %cst_59 = arith.constant dense<0.000000e+00> : vector<128x64xf32>
    %112 = tpu.matmul %111, %96, %cst_59 {dimension_numbers = #tpu.dot_dimension_numbers<[1], [0], [0], [1], [0, 0, 1, 1], [], []>} : vector<128x128xbf16>, vector<128x64xbf16>, vector<128x64xf32> -> vector<128x64xf32>
    %113 = arith.truncf %112 : vector<128x64xf32> to vector<128x64xbf16>
    %c0_60 = arith.constant 0 : index
    %c256_61 = arith.constant 256 : index
    %114 = vector.load %arg7[%c0_60, %c256_61] : memref<128x384xbf16, #tpu.memory_space<vmem>>, vector<128x64xbf16>
    tpu.vector_store %arg7[%c0_60, %c256_61], %113 {strides = array<i32>} : memref<128x384xbf16, #tpu.memory_space<vmem>>, vector<128x64xbf16>,
    %c0_62 = arith.constant 0 : index
    %c320 = arith.constant 320 : index
    %115 = vector.load %arg6[%c0_62, %c320] : memref<128x1152xbf16, #tpu.memory_space<vmem>>, vector<128x64xbf16>
    %c0_63 = arith.constant 0 : index
    %c704 = arith.constant 704 : index
    %116 = vector.load %arg6[%c0_63, %c704] : memref<128x1152xbf16, #tpu.memory_space<vmem>>, vector<128x64xbf16>
    %c0_64 = arith.constant 0 : index
    %c1088 = arith.constant 1088 : index
    %117 = vector.load %arg6[%c0_64, %c1088] : memref<128x1152xbf16, #tpu.memory_space<vmem>>, vector<128x64xbf16>
    %cst_65 = arith.constant dense<0.000000e+00> : vector<128x128xf32>
    %118 = tpu.matmul %115, %116, %cst_65 {dimension_numbers = #tpu.dot_dimension_numbers<[1], [1], [0], [0], [0, 0, 1, 0], [], []>} : vector<128x64xbf16>, vector<128x64xbf16>, vector<128x128xf32> -> vector<128x128xf32>
    %cst_66 = arith.constant 1.250000e-01 : f32
    %119 = vector.broadcast %cst_66 : f32 to vector<128x128xf32>
    %120 = arith.mulf %118, %119 : vector<128x128xf32>
    %cst_67 = arith.constant -1.000000e+30 : f32
    %121 = vector.broadcast %cst_67 : f32 to vector<128x128xf32>
    %122 = arith.select %9, %120, %121 : vector<128x128xi1>, vector<128x128xf32>
    %cst_68 = arith.constant dense<0xFF800000> : vector<128xf32>
    %123 = vector.multi_reduction <maximumf>, %122, %cst_68 [1] : vector<128x128xf32> to vector<128xf32>
    %124 = vector.shape_cast %123 : vector<128xf32> to vector<128x1xf32>
    %125 = vector.broadcast %124 : vector<128x1xf32> to vector<128x128xf32>
    %126 = arith.subf %122, %125 : vector<128x128xf32>
    %127 = math.exp %126 : vector<128x128xf32>
    %cst_69 = arith.constant dense<0.000000e+00> : vector<128xf32>
    %128 = vector.multi_reduction <add>, %127, %cst_69 [1] : vector<128x128xf32> to vector<128xf32>
    %129 = vector.shape_cast %128 : vector<128xf32> to vector<128x1xf32>
    %130 = vector.broadcast %129 : vector<128x1xf32> to vector<128x128xf32>
    %131 = arith.divf %127, %130 : vector<128x128xf32>
    %132 = arith.truncf %131 : vector<128x128xf32> to vector<128x128xbf16>
    %cst_70 = arith.constant dense<0.000000e+00> : vector<128x64xf32>
    %133 = tpu.matmul %132, %117, %cst_70 {dimension_numbers = #tpu.dot_dimension_numbers<[1], [0], [0], [1], [0, 0, 1, 1], [], []>} : vector<128x128xbf16>, vector<128x64xbf16>, vector<128x64xf32> -> vector<128x64xf32>
    %134 = arith.truncf %133 : vector<128x64xf32> to vector<128x64xbf16>
    %c0_71 = arith.constant 0 : index
    %c320_72 = arith.constant 320 : index
    %135 = vector.load %arg7[%c0_71, %c320_72] : memref<128x384xbf16, #tpu.memory_space<vmem>>, vector<128x64xbf16>
    tpu.vector_store %arg7[%c0_71, %c320_72], %134 {strides = array<i32>} : memref<128x384xbf16, #tpu.memory_space<vmem>>, vector<128x64xbf16>,
    %c0_73 = arith.constant 0 : index
    %c0_74 = arith.constant 0 : index
    %136 = vector.load %arg7[%c0_73, %c0_74] : memref<128x384xbf16, #tpu.memory_space<vmem>>, vector<128x384xbf16>
    %c0_75 = arith.constant 0 : index
    %c0_76 = arith.constant 0 : index
    %137 = vector.load %arg3[%c0_75, %c0_76] : memref<384x384xbf16, #tpu.memory_space<vmem>>, vector<384x384xbf16>
    %cst_77 = arith.constant dense<0.000000e+00> : vector<128x384xf32>
    %138 = tpu.matmul %136, %137, %cst_77 {dimension_numbers = #tpu.dot_dimension_numbers<[1], [0], [0], [1], [0, 0, 1, 1], [], []>} : vector<128x384xbf16>, vector<384x384xbf16>, vector<128x384xf32> -> vector<128x384xf32>
    %c0_78 = arith.constant 0 : index
    %c0_79 = arith.constant 0 : index
    %139 = vector.load %arg4[%c0_78, %c0_79] : memref<1x384xf32, #tpu.memory_space<vmem>>, vector<1x384xf32>
    %140 = vector.broadcast %139 : vector<1x384xf32> to vector<128x384xf32>
    %141 = arith.addf %138, %140 : vector<128x384xf32>
    %c0_80 = arith.constant 0 : index
    %c0_81 = arith.constant 0 : index
    %c0_82 = arith.constant 0 : index
    %142 = vector.load %arg5[%c0_80, %c0_81, %c0_82] : memref<1x128x384xf32, #tpu.memory_space<vmem>>, vector<1x128x384xf32>
    %143 = vector.shape_cast %142 : vector<1x128x384xf32> to vector<128x384xf32>
    %144 = vector.shape_cast %141 : vector<128x384xf32> to vector<1x128x384xf32>
    tpu.vector_store %arg5[%c0_80, %c0_81, %c0_82], %144 {strides = array<i32>} : memref<1x128x384xf32, #tpu.memory_space<vmem>>, vector<1x128x384xf32>,
    return
  }
  func.func @transform_0(%arg0: i32) -> (i32, i32, i32) {
    %c0_i32 = arith.constant 0 : i32
    %c0_i32_0 = arith.constant 0 : i32
    %c0_i32_1 = arith.constant 0 : i32
    return %arg0, %c0_i32, %c0_i32_0 : i32, i32, i32
  }
  func.func @transform_1(%arg0: i32) -> (i32, i32) {
    %c0_i32 = arith.constant 0 : i32
    %c0_i32_0 = arith.constant 0 : i32
    %c0_i32_1 = arith.constant 0 : i32
    return %c0_i32, %c0_i32_0 : i32, i32
  }
  func.func @transform_2(%arg0: i32) -> (i32, i32) {
    %c0_i32 = arith.constant 0 : i32
    %c0_i32_0 = arith.constant 0 : i32
    %c0_i32_1 = arith.constant 0 : i32
    return %c0_i32, %c0_i32_0 : i32, i32
  }
  func.func @transform_3(%arg0: i32) -> (i32, i32) {
    %c0_i32 = arith.constant 0 : i32
    %c0_i32_0 = arith.constant 0 : i32
    %c0_i32_1 = arith.constant 0 : i32
    return %c0_i32, %c0_i32_0 : i32, i32
  }
  func.func @transform_4(%arg0: i32) -> (i32, i32, i32) {
    %c0_i32 = arith.constant 0 : i32
    %c0_i32_0 = arith.constant 0 : i32
    %c0_i32_1 = arith.constant 0 : i32
    return %arg0, %c0_i32, %c0_i32_0 : i32, i32, i32
  }
}

</mosaic_0001>

<bundles_post_ra>
// kernel: tpu_custom_call.1
= control target key start
LH: loop header
LB: loop body
LE: loop exit
PB: predicated region body
PF: predicated region fallthrough
CT: control target
= control target key end

     0   :  { %9 = vsyncpa [#allocation5], 0  ;;  %s17227_s0 = inlined_call_operand.hbm [shape: f32[2,128,384], index: 0, kind: input, shape index: {}]   ;;  %s17228_s1 = inlined_call_operand.hbm [shape: bf16[384,1152], index: 1, kind: input, shape index: {}]   ;;  %s17229_s2 = inlined_call_operand.hbm [shape: bf16[384,384], index: 2, kind: input, shape index: {}]   ;;  %s17230_s3 = inlined_call_operand.hbm [shape: f32[1,384], index: 3, kind: input, shape index: {}]   ;;  %s17231_s4 = inlined_call_operand.hbm [shape: f32[2,128,384], index: 4, kind: output, shape index: {}]  }
   0x1   :  { %11 = vsyncpa [#allocation5 + $0x1], 0 }
   0x2   :  { %12 = vsyncpa [#allocation8], 0 }
   0x3   :  { %13 = vsyncpa [#allocation11], 0 }
   0x4   :  { %14 = vsyncpa [#allocation6], 0 }
   0x5   :  { %16 = vsyncpa [#allocation6 + $0x1], 0  ;;  %s12319_s15 = smov 0   ;;  %s12321_s16 = smov 0  }
   0x6   :  { %s12323_s17 = smov 0   ;;  %s12325_s18 = smov 0  }
   0x7 LB: > { %s12340_s19 = sadd.s32 4294967295, %s12280_s18   ;;  %s9270_s20 = sadd.s32 4294967294, %s12280_s18   ;;  %s12280_s18 = sphi %s12325_s18, %s17954_s18   ;;  %s12276_s17 = sphi %s12323_s17, %s17953_s17   ;;  %s12272_s16 = sphi %s12321_s16, %s17952_s16   ;;  %s12268_s15 = sphi %s12319_s15, %s17951_s15  }
   0x8   : > { %p42_p0 = scmp.ne.s32.totalorder %s12272_s16, %s12268_s15  ;;  %p43_p1 = scmp.eq.s32.totalorder %s12340_s19, 0 }
   0x9   : > { %p129_p2 = scmp.eq.s32.totalorder %s12340_s19, 1  ;;  %p135_p3 = scmp.eq.s32.totalorder %s9270_s20, 1 }
   0xa   : > { %p12349_p4 = por %p43_p1, %p42_p0  ;;  %p9271_p5 = scmp.ge.s32.totalorder %s12280_s18, 1 }
   0xb   : > { %p12354_p6 = por %p135_p3, %p42_p0  ;;  %p142_p7 = scmp.lt.s32.totalorder %s12280_s18, 3 }
   0xc   : > { %s153_s25 = sshll.u32 %s17228_s1, 4  ;;  %s12282_s27 = smov [#allocation7]   ;;  %s154_s25 = int_to_ptr.hbm [resolvable:$true] %s153_s25 }
   0xd   : > { %p12362_p8 = pnand %p9271_p5, %p142_p7  ;;  %s155_s28 = sshll.u32 %s12282_s27, 4  ;;  %s156_s28 = int_to_ptr.vmem [resolvable:$true] %s155_s28 }
   0xe   : > { %s167_s6 = sshll.u32 %s17229_s2, 4  ;;  %s12283_s7 = smov 576   ;;  %s168_s6 = int_to_ptr.hbm [resolvable:$true] %s167_s6 }
   0xf   : > { %p11632_p9 = pneg %p12362_p8  ;;  %s12284_s8 = smov 36  }
  0x10   : > { %s12285_s9 = smov [#allocation9]   ;;  %s12286_s11 = smov 192  }
  0x11   : > { %p12370_p10 = pnand %p11632_p9, %p43_p1  ;;  %s169_s10 = sshll.u32 %s12285_s9, 4  ;;  %s170_s10 = int_to_ptr.vmem [resolvable:$true] %s169_s10 }
  0x12   : > { %s12287_s12 = smov 12   ;;  %s182_s20 = sshll.u32 %s17230_s3, 4  ;;  %s183_s20 = int_to_ptr.hbm [resolvable:$true] %s182_s20 }
  0x13   : > { %11635 = dma.hbm_to_vmem [thread:$0]  (!%p12370_p10), %s154_s25, 27648, %s156_s28, [#allocation8], %s12283_s7, %s12283_s7, %s12284_s8  }
  0x14   : > { %11638 = dma.hbm_to_vmem [thread:$0]  (!%p12370_p10), %s168_s6, 9216, %s170_s10, [#allocation8], %s12286_s11, %s12286_s11, %s12287_s12  }
  0x15   : > { %s12288_s23 = smov [#allocation10]   ;;  %s12388_s25 = sadd.s32 1, %s12280_s18  }
  0x16   : > { %s184_s24 = sshll.u32 %s12288_s23, 4  ;;  %s26_s27 = ssub.s32 %s12280_s18, %s12388_s25  ;;  %s185_s24 = int_to_ptr.vmem [resolvable:$true] %s184_s24 }
  0x17   : > { %11641 = dma.hbm_to_vmem [thread:$0]  (!%p12370_p10), %s183_s20, 48, %s185_s24, [#allocation11]  }
  0x18   : > { %s29_s28 = sadd.s32 1, %s12276_s17  ;;  %p27_p12 = scmp.eq.s32.totalorder %s26_s27, 0 }
  0x19   : > { %p36_p13 = scmp.ne.s32.totalorder %s12276_s17, %s12272_s16  ;;  %p37_p0 = scmp.eq.s32.totalorder %s12280_s18, 0 }
  0x1a   : > { %p11653_p3 = scmp.lt.s32.totalorder %s12280_s18, 2  ;;  %s195_s6 = sand.u32 1, %s12276_s17  }
  0x1b   : > { %s12398_s30 = scalar_select %p27_p12, %s12276_s17, %s29_s28  }
  0x1c   : > { %p38_p5 = por %p37_p0, %p36_p13  ;;  %p12402_p7 = por %p129_p2, %p36_p13 }
  0x1d   : > { %s11613_s29 = smul.u32 384, %s12280_s18  ;;  %s196_s20 = scalar_lea.sflag [#allocation5], %s195_s6 }
  0x1e   : > { %s11612_s7 = smul.u32 384, %s195_s6  ;;  %p12411_p9 = pnand %p11653_p3, %p38_p5 }
  0x1f   : > { %s204_s10 = scalar_lea.hbm %s17227_s0, %s11613_s29  ;;  %s12183_s29 = scalar_lea.hbm %s17227_s0, 768 }
  0x20   : > { %s205_s12 = sshll.u32 %s204_s10, 4  ;;  %s199_s13 = scalar_lea.vmem [#allocation4], %s11612_s7  ;;  %s206_s12 = int_to_ptr.hbm [resolvable:$true] %s205_s12 }
  0x21   : > { %s207_s14 = sshll.u32 %s199_s13, 4  ;;  %s12176_s23 = sshra.s32 %s206_s12, 4  ;;  %s208_s14 = int_to_ptr.vmem [resolvable:$true] %s207_s14  ;;  %s12177_s23 = int_to_ptr.hbm [resolvable:$true] %s12176_s23 }
  0x22   : > { %s12178_s24 = scalar_lea.hbm %s12177_s23, 384  ;;  %p12180_p10 = pneg %p12411_p9 }
  0x23   : > { %p12179_p2 = scmp.ne.s32.totalorder %s12177_s23, %s12178_s24  ;;  %p12184_p0 = scmp.lt.s32.totalorder %s12177_s23, %s17227_s0 }
  0x24   : > { %p12185_p3 = scmp.lt.s32.totalorder %s12183_s29, %s12178_s24 }
  0x25   : > { %p12181_p12 = pnand %p12180_p10, %p12179_p2 }
  0x26   : > { %p12186_p5 = por %p12185_p3, %p12184_p0 }
  0x27   : > { %p12182_p13 = pneg %p12181_p12 }
  0x29   : > { %p12187_p11 = pnand %p12186_p5, %p12182_p13 }
  0x2b   : > { %12190 = shalt.err (!%p12187_p11)
}
  0x2c   : > { %s12289_s6 = smov 384   ;;  %s12290_s7 = smov 24  }
  0x2d   : > { %11645 = dma.hbm_to_vmem [thread:$0]  (!%p12411_p9), %s206_s12, 6144, %s208_s14, %s196_s20, %s12289_s6, %s12289_s6, %s12290_s7  }
  0x2e   : > { %219 = sbr.rel (%p12362_p8) target bundleno = 2573 (0xa0d), region = 36 }
  0x33   : > { %s12428_s10 = sand.u32 1, %s12272_s16  }
  0x34   : > { %s11614_s13 = smul.u32 384, %s12428_s10  ;;  %s222_s23 = scalar_lea.sflag [#allocation5], %s12428_s10 }
  0x36   : > { %s12434_s24 = scalar_lea.vmem [#allocation4], %s11614_s13 }
  0x37   : > { %12251 = dma.done.wait (%p12349_p4), %s222_s23, 6144  }
  0x38   : > { %12253 = vsyncadd (%p12349_p4), %s222_s23, 4294961152 }
  0x39   : > { %12255 = dma.done.wait (%p43_p1), [#allocation8], 36864  }
  0x3a   : > { %12257 = vsyncadd (%p43_p1), [#allocation8], 4294930432 }
  0x3b   : > { %12259 = dma.done.wait (%p43_p1), [#allocation11], 48  }
  0x3c   : > { %12261 = vsyncadd (%p43_p1), [#allocation11], 4294967248  ;;  %v9535_v0 = vld [vmem:[#allocation7 + $0x1f8] sm:$0xf]  ;;  %v11223_v1 = vld [vmem:[#allocation7 + $0x218] sm:$0xf0] }
  0x3d   : > { %v9823_v2 = vld [vmem:[#allocation7 + $0x438] sm:$0xf]  ;;  %v9536_v3 = vor.u32 %v11223_v1, %v9535_v0  ;;  %v11295_v4 = vld [vmem:[#allocation7 + $0x458] sm:$0xf0]  ;;  %v9537_v10 = vld [vmem:[#allocation7 + $0x21c] sm:$0xf0] }
  0x3e   : > { %v10111_v5 = vld [vmem:[#allocation7 + $0x678] sm:$0xf]  ;;  %v11367_v6 = vld [vmem:[#allocation7 + $0x698] sm:$0xf0]  ;;  %v9824_v7 = vor.u32 %v11295_v4, %v9823_v2  ;;  %v9499_v11 = vld [vmem:[#allocation7 + $0x1b0] sm:$0xf] }
  0x3f   : > { %v10112_v8 = vor.u32 %v11367_v6, %v10111_v5  ;;  %v11219_v9 = vld [vmem:[#allocation7 + $0x1fc] sm:$0xf]  ;;  %1682 = vmatpush.bf16.msra.mxu0 %v9536_v3  ;;  %v11214_v13 = vld [vmem:[#allocation7 + $0x1d0] sm:$0xf0]  ;;  %v9787_v14 = vld [vmem:[#allocation7 + $0x3f0] sm:$0xf] }
  0x40   : > { %v9540_v12 = vor.u32 %v11219_v9, %v9537_v10  ;;  %v11286_v15 = vld [vmem:[#allocation7 + $0x410] sm:$0xf0]  ;;  %1731 = vmatpush.bf16.msra.mxu1 %v9824_v7  ;;  %v9500_v16 = vor.u32 %v11214_v13, %v9499_v11  ;;  %v10075_v18 = vld [vmem:[#allocation7 + $0x630] sm:$0xf]  ;;  %v9501_v22 = vld [vmem:[#allocation7 + $0x1d4] sm:$0xf0] }
  0x41   : > { %1780 = vmatpush.bf16.msra.mxu2 %v10112_v8  ;;  %v9788_v17 = vor.u32 %v11286_v15, %v9787_v14  ;;  %v11358_v19 = vld [vmem:[#allocation7 + $0x650] sm:$0xf0]  ;;  %v9463_v23 = vld [vmem:[#allocation7 + $0x168] sm:$0xf]  ;;  %v11205_v24 = vld [vmem:[#allocation7 + $0x188] sm:$0xf0] }
  0x42   : > { %v11210_v20 = vld [vmem:[#allocation7 + $0x1b4] sm:$0xf]  ;;  %1829 = vmatpush.bf16.msra.mxu3 %v9540_v12  ;;  %v10076_v21 = vor.u32 %v11358_v19, %v10075_v18  ;;  %v9751_v26 = vld [vmem:[#allocation7 + $0x3a8] sm:$0xf]  ;;  %v11277_v27 = vld [vmem:[#allocation7 + $0x3c8] sm:$0xf0]  ;;  %v9464_v29 = vor.u32 %v11205_v24, %v9463_v23 }
  0x43   : > { %v9504_v25 = vor.u32 %v11210_v20, %v9501_v22  ;;  %v10039_v28 = vld [vmem:[#allocation7 + $0x5e8] sm:$0xf]  ;;  %1683 = vmatpush.bf16.msra.mxu0 %v9500_v16  ;;  %v11349_v30 = vld [vmem:[#allocation7 + $0x608] sm:$0xf0]  ;;  %v9465_v32 = vld [vmem:[#allocation7 + $0x18c] sm:$0xf0]  ;;  %v9752_v33 = vor.u32 %v11277_v27, %v9751_v26 }
  0x44   : > { %v11201_v31 = vld [vmem:[#allocation7 + $0x16c] sm:$0xf]  ;;  %1732 = vmatpush.bf16.msra.mxu1 %v9788_v17  ;;  %v10040_v34 = vor.u32 %v11349_v30, %v10039_v28  ;;  %v9427_v35 = vld [vmem:[#allocation7 + $0x120] sm:$0xf]  ;;  %v11196_v36 = vld [vmem:[#allocation7 + $0x140] sm:$0xf0] }
  0x45   : > { %1781 = vmatpush.bf16.msra.mxu2 %v10076_v21  ;;  %v9715_v37 = vld [vmem:[#allocation7 + $0x360] sm:$0xf]  ;;  %v9468_v38 = vor.u32 %v11201_v31, %v9465_v32  ;;  %v11268_v39 = vld [vmem:[#allocation7 + $0x380] sm:$0xf0]  ;;  %v9429_v43 = vld [vmem:[#allocation7 + $0x144] sm:$0xf0]  ;;  %v9428_v44 = vor.u32 %v11196_v36, %v9427_v35 }
  0x46   : > { %1830 = vmatpush.bf16.msra.mxu3 %v9504_v25  ;;  %v10003_v40 = vld [vmem:[#allocation7 + $0x5a0] sm:$0xf]  ;;  %v11340_v41 = vld [vmem:[#allocation7 + $0x5c0] sm:$0xf0]  ;;  %v9716_v45 = vor.u32 %v11268_v39, %v9715_v37  ;;  %v9391_v47 = vld [vmem:[#allocation7 + $0xd8] sm:$0xf] }
  0x47   : > { %v11192_v42 = vld [vmem:[#allocation7 + $0x124] sm:$0xf]  ;;  %1684 = vmatpush.bf16.msra.mxu0 %v9464_v29  ;;  %v10004_v46 = vor.u32 %v11340_v41, %v10003_v40  ;;  %v11187_v48 = vld [vmem:[#allocation7 + $0xf8] sm:$0xf0]  ;;  %v9679_v49 = vld [vmem:[#allocation7 + $0x318] sm:$0xf] }
  0x48   : > { %1733 = vmatpush.bf16.msra.mxu1 %v9752_v33  ;;  %v9432_v50 = vor.u32 %v11192_v42, %v9429_v43  ;;  %v11259_v51 = vld [vmem:[#allocation7 + $0x338] sm:$0xf0]  ;;  %v9967_v52 = vld [vmem:[#allocation7 + $0x558] sm:$0xf]  ;;  %v9393_v55 = vld [vmem:[#allocation7 + $0xfc] sm:$0xf0]  ;;  %v9392_v56 = vor.u32 %v11187_v48, %v9391_v47 }
  0x49   : > { %1782 = vmatpush.bf16.msra.mxu2 %v10040_v34  ;;  %v11331_v53 = vld [vmem:[#allocation7 + $0x578] sm:$0xf0]  ;;  %v9680_v57 = vor.u32 %v11259_v51, %v9679_v49  ;;  %v9355_v59 = vld [vmem:[#allocation7 + $0x90] sm:$0xf]  ;;  %v11178_v60 = vld [vmem:[#allocation7 + $0xb0] sm:$0xf0] }
  0x4a   : > { %1831 = vmatpush.bf16.msra.mxu3 %v9468_v38  ;;  %v11183_v54 = vld [vmem:[#allocation7 + $0xdc] sm:$0xf]  ;;  %v9968_v58 = vor.u32 %v11331_v53, %v9967_v52  ;;  %v9643_v61 = vld [vmem:[#allocation7 + $0x2d0] sm:$0xf]  ;;  %v11250_v63 = vld [vmem:[#allocation7 + $0x2f0] sm:$0xf0]  ;;  %v9356_v4 = vor.u32 %v11178_v60, %v9355_v59 }
  0x4b   : > { %1685 = vmatpush.bf16.msra.mxu0 %v9428_v44  ;;  %v9396_v62 = vor.u32 %v11183_v54, %v9393_v55  ;;  %v9931_v0 = vld [vmem:[#allocation7 + $0x510] sm:$0xf]  ;;  %v11322_v1 = vld [vmem:[#allocation7 + $0x530] sm:$0xf0]  ;;  %v9357_v3 = vld [vmem:[#allocation7 + $0xb4] sm:$0xf0]  ;;  %v9644_v5 = vor.u32 %v11250_v63, %v9643_v61 }
  0x4c   : > { %1734 = vmatpush.bf16.msra.mxu1 %v9716_v45  ;;  %v11174_v2 = vld [vmem:[#allocation7 + $0x94] sm:$0xf]  ;;  %v9932_v6 = vor.u32 %v11322_v1, %v9931_v0  ;;  %v9319_v7 = vld [vmem:[#allocation7 + $0x48] sm:$0xf]  ;;  %v11169_v8 = vld [vmem:[#allocation7 + $0x68] sm:$0xf0] }
  0x4d   : > { %1783 = vmatpush.bf16.msra.mxu2 %v10004_v46  ;;  %v9607_v9 = vld [vmem:[#allocation7 + $0x288] sm:$0xf]  ;;  %v9360_v10 = vor.u32 %v11174_v2, %v9357_v3  ;;  %v11241_v11 = vld [vmem:[#allocation7 + $0x2a8] sm:$0xf0]  ;;  %v9321_v15 = vld [vmem:[#allocation7 + $0x6c] sm:$0xf0]  ;;  %v9320_v16 = vor.u32 %v11169_v8, %v9319_v7 }
  0x4e   : > { %1832 = vmatpush.bf16.msra.mxu3 %v9432_v50  ;;  %v9895_v12 = vld [vmem:[#allocation7 + $0x4c8] sm:$0xf]  ;;  %v11313_v13 = vld [vmem:[#allocation7 + $0x4e8] sm:$0xf0]  ;;  %v9283_v17 = vld [vmem:[#allocation7] sm:$0xf]  ;;  %v9608_v20 = vor.u32 %v11241_v11, %v9607_v9 }
  0x4f   : > { %1686 = vmatpush.bf16.msra.mxu0 %v9392_v56  ;;  %v11165_v14 = vld [vmem:[#allocation7 + $0x4c] sm:$0xf]  ;;  %v11160_v18 = vld [vmem:[#allocation7 + $0x20] sm:$0xf0]  ;;  %v9571_v19 = vld [vmem:[#allocation7 + $0x240] sm:$0xf]  ;;  %v9896_v21 = vor.u32 %v11313_v13, %v9895_v12 }
  0x50   : > { %1735 = vmatpush.bf16.msra.mxu1 %v9680_v57  ;;  %v11232_v22 = vld [vmem:[#allocation7 + $0x260] sm:$0xf0]  ;;  %v9859_v23 = vld [vmem:[#allocation7 + $0x480] sm:$0xf]  ;;  %v9324_v25 = vor.u32 %v11165_v14, %v9321_v15  ;;  %v9285_v27 = vld [vmem:[#allocation7 + $0x24] sm:$0xf0]  ;;  %v9284_v32 = vor.u32 %v11160_v18, %v9283_v17 }
  0x51   : > { %1784 = vmatpush.bf16.msra.mxu2 %v9968_v58  ;;  %v11304_v24 = vld [vmem:[#allocation7 + $0x4a0] sm:$0xf0]  ;;  %v269_v29 = vld [vmem:[%s12434_s24 + $0x18] sm:$0xff]  ;;  %v9543_v30 = vld [vmem:[#allocation7 + $0x200] sm:$0xf]  ;;  %v9572_v36 = vor.u32 %v11232_v22, %v9571_v19  ;;  %s12291_s21 = smov 64  }
  0x52   : > { %1833 = vmatpush.bf16.msra.mxu3 %v9396_v62  ;;  %v11156_v26 = vld [vmem:[#allocation7 + $0x4] sm:$0xf]  ;;  %v267_v33 = vld [vmem:[%s12434_s24 + $0x8] sm:$0xff]  ;;  %v9831_v34 = vld [vmem:[#allocation7 + $0x440] sm:$0xf]  ;;  %v9860_v37 = vor.u32 %v11304_v24, %v9859_v23  ;;  %vm17250_vm0 = vcmask 523264  }
  0x53   : > { %1687 = vmatpush.bf16.msra.mxu0 %v9356_v4  ;;  %v266_v28 = vld [vmem:[%s12434_s24] sm:$0xff]  ;;  %v268_v39 = vld [vmem:[%s12434_s24 + $0x10] sm:$0xff]  ;;  %v271_v40 = vld [vmem:[%s12434_s24 + $0x28] sm:$0xff]  ;;  %v9288_v41 = vor.u32 %v11156_v26, %v9285_v27  ;;  %s16977_s26 = scalar_lea.vmem [#allocation12], %s11614_s13  ;;  %s11615_s11 = smul.u32 384, %s12340_s19 }
  0x54   : > { %1736 = vmatpush.bf16.msra.mxu1 %v9644_v5  ;;  %v11224_v31 = vld [vmem:[#allocation7 + $0x220] sm:$0xf0]  ;;  %v11363_v43 = vld [vmem:[#allocation7 + $0x67c] sm:$0xf]  ;;  %v10113_v44 = vld [vmem:[#allocation7 + $0x69c] sm:$0xf0]  ;;  %v12454_v46 = vpack.c.bf16 %v269_v29, %v266_v28  ;;  %v12458_v52 = vpack.c.bf16 %v271_v40, %v268_v39 }
  0x55   : > { %1785 = vmatpush.bf16.msra.mxu2 %v9932_v6  ;;  %v11296_v35 = vld [vmem:[#allocation7 + $0x460] sm:$0xf0]  ;;  %v9544_v42 = vor.u32 %v11224_v31, %v9543_v30  ;;  %v11291_v45 = vld [vmem:[#allocation7 + $0x43c] sm:$0xf]  ;;  %v9825_v48 = vld [vmem:[#allocation7 + $0x45c] sm:$0xf0]  ;;  %v10116_v55 = vor.u32 %v11363_v43, %v10113_v44  ;;  %s9164_s20 = scalar_lea.hbm %s17231_s4, %s11615_s11 }
  0x56   : > { %1834 = vmatpush.bf16.msra.mxu3 %v9360_v10  ;;  %v270_v38 = vld [vmem:[%s12434_s24 + $0x20] sm:$0xff]  ;;  %v9832_v47 = vor.u32 %v11296_v35, %v9831_v34  ;;  %v9507_v49 = vld [vmem:[#allocation7 + $0x1b8] sm:$0xf]  ;;  %v11215_v50 = vld [vmem:[#allocation7 + $0x1d8] sm:$0xf0]  ;;  %17385 = vst [vmem:[#allocation17_spill] sm:$0xff] %v12458_v52  ;;  %v9828_v56 = vor.u32 %v11291_v45, %v9825_v48 }
  0x57   : > { %1688 = vmatpush.bf16.msra.mxu0 %v9320_v16  ;;  %v12456_v51 = vpack.c.bf16 %v270_v38, %v267_v33  ;;  %v9795_v53 = vld [vmem:[#allocation7 + $0x3f8] sm:$0xf]  ;;  %v11287_v54 = vld [vmem:[#allocation7 + $0x418] sm:$0xf0]  ;;  %v9508_v57 = vor.u32 %v11215_v50, %v9507_v49  ;;  %v11354_v58 = vld [vmem:[#allocation7 + $0x634] sm:$0xf] }
  0x58   : > { %1737 = vmatpush.bf16.msra.mxu1 %v9608_v20  ;;  %v10077_v59 = vld [vmem:[#allocation7 + $0x654] sm:$0xf0]  ;;  %v9796_v60 = vor.u32 %v11287_v54, %v9795_v53  ;;  %v11282_v61 = vld [vmem:[#allocation7 + $0x3f4] sm:$0xf]  ;;  %v9471_v0 = vld [vmem:[#allocation7 + $0x170] sm:$0xf] }
  0x59   : > { %1786 = vmatpush.bf16.msra.mxu2 %v9896_v21  ;;  %v9789_v62 = vld [vmem:[#allocation7 + $0x414] sm:$0xf0]  ;;  %v10080_v63 = vor.u32 %v11354_v58, %v10077_v59  ;;  %v11206_v1 = vld [vmem:[#allocation7 + $0x190] sm:$0xf0]  ;;  %v9759_v2 = vld [vmem:[#allocation7 + $0x3b0] sm:$0xf] }
  0x5a   : > { %1835 = vmatpush.bf16.msra.mxu3 %v9324_v25  ;;  %v9792_v3 = vor.u32 %v11282_v61, %v9789_v62  ;;  %v9472_v4 = vor.u32 %v11206_v1, %v9471_v0  ;;  %v11278_v5 = vld [vmem:[#allocation7 + $0x3d0] sm:$0xf0]  ;;  %v11345_v6 = vld [vmem:[#allocation7 + $0x5ec] sm:$0xf]  ;;  %v10041_v7 = vld [vmem:[#allocation7 + $0x60c] sm:$0xf0] }
  0x5b   : > { %1689 = vmatpush.bf16.msra.mxu0 %v9284_v32  ;;  %v9760_v8 = vor.u32 %v11278_v5, %v9759_v2  ;;  %v11273_v9 = vld [vmem:[#allocation7 + $0x3ac] sm:$0xf]  ;;  %v9753_v10 = vld [vmem:[#allocation7 + $0x3cc] sm:$0xf0]  ;;  %v10044_v11 = vor.u32 %v11345_v6, %v10041_v7  ;;  %v273_v15 = vld [vmem:[%s12434_s24 + $0x38] sm:$0xff]  ;;  %s9165_s27 = sshll.u32 %s16977_s26, 4  ;;  %s9166_s27 = int_to_ptr.vmem [resolvable:$true] %s9165_s27 }
  0x5c   : > { %1738 = vmatpush.bf16.msra.mxu1 %v9572_v36  ;;  %v9756_v12 = vor.u32 %v11273_v9, %v9753_v10  ;;  %v272_v13 = vld [vmem:[%s12434_s24 + $0x30] sm:$0xff]  ;;  %v275_v14 = vld [vmem:[%s12434_s24 + $0x48] sm:$0xff]  ;;  %v274_v17 = vld [vmem:[%s12434_s24 + $0x40] sm:$0xff]  ;;  %s9167_s28 = sshll.u32 %s9164_s20, 4  ;;  %s9153_s19 = scalar_lea.sflag [#allocation6], %s12428_s10  ;;  %s9168_s28 = int_to_ptr.hbm [resolvable:$true] %s9167_s28 }
  0x5d   : > { %1787 = vmatpush.bf16.msra.mxu2 %v9860_v37  ;;  %v276_v16 = vld [vmem:[%s12434_s24 + $0x50] sm:$0xff]  ;;  %v277_v18 = vld [vmem:[%s12434_s24 + $0x58] sm:$0xff]  ;;  %v12470_v19 = vpack.c.bf16 %v275_v14, %v272_v13  ;;  %v9435_v22 = vld [vmem:[#allocation7 + $0x128] sm:$0xf]  ;;  %s12220_s29 = sshra.s32 %s9168_s28, 4  ;;  %s12226_s7 = scalar_lea.hbm %s17231_s4, 768  ;;  %s12221_s29 = int_to_ptr.hbm [resolvable:$true] %s12220_s29 }
  0x5e   : > { %1836 = vmatpush.bf16.msra.mxu3 %v9288_v41  ;;  %1690 = vmatmul.bf16.vlgmr.msra.gmra.mxu0 %v12454_v46  ;;  %v12472_v20 = vpack.c.bf16 %v276_v16, %v273_v15  ;;  %v12474_v21 = vpack.c.bf16 %v277_v18, %v274_v17  ;;  %v11197_v23 = vld [vmem:[#allocation7 + $0x148] sm:$0xf0]  ;;  %v9723_v24 = vld [vmem:[#allocation7 + $0x368] sm:$0xf]  ;;  %v11336_v27 = vld [vmem:[#allocation7 + $0x5a4] sm:$0xf]  ;;  %p12227_p11 = scmp.lt.s32.totalorder %s12221_s29, %s17231_s4 }
  0x5f   : > { %1739 = vmatmul.bf16.vlgmr.msra.gmra.mxu1 %v12456_v51  ;;  %1878 = vmatpush.bf16.msrb.mxu0 %v9828_v56  ;;  %v9436_v25 = vor.u32 %v11197_v23, %v9435_v22  ;;  %v11269_v26 = vld [vmem:[#allocation7 + $0x388] sm:$0xf0]  ;;  %v10005_v28 = vld [vmem:[#allocation7 + $0x5c4] sm:$0xf0]  ;;  %v11264_v31 = vld [vmem:[#allocation7 + $0x364] sm:$0xf] }
  0x60   : > { %1788 = vmatmul.bf16.vlgmr.msra.gmra.mxu2 %v12458_v52  ;;  %1927 = vmatpush.bf16.msrb.mxu1 %v10116_v55  ;;  %v9724_v29 = vor.u32 %v11269_v26, %v9723_v24  ;;  %v10008_v30 = vor.u32 %v11336_v27, %v10005_v28  ;;  %v9717_v32 = vld [vmem:[#allocation7 + $0x384] sm:$0xf0]  ;;  %v278_v34 = vld [vmem:[%s12434_s24 + $0x60] sm:$0xff]  ;;  %v281_v35 = vld [vmem:[%s12434_s24 + $0x78] sm:$0xff]  ;;  %s12222_s8 = scalar_lea.hbm %s12221_s29, 384 }
  0x61   : > { %1976 = vmatpush.bf16.msrb.mxu2 %v9544_v42  ;;  %1837 = vmatmul.bf16.vlgmr.msra.gmra.mxu3 %v12454_v46  ;;  %v9720_v33 = vor.u32 %v11264_v31, %v9717_v32  ;;  %v279_v36 = vld [vmem:[%s12434_s24 + $0x68] sm:$0xff]  ;;  %v282_v37 = vld [vmem:[%s12434_s24 + $0x80] sm:$0xff]  ;;  %v280_v38 = vld [vmem:[%s12434_s24 + $0x70] sm:$0xff]  ;;  %v12486_v40 = vpack.c.bf16 %v281_v35, %v278_v34  ;;  %p12223_p1 = scmp.ne.s32.totalorder %s12221_s29, %s12222_s8  ;;  %p12228_p9 = scmp.lt.s32.totalorder %s12226_s7, %s12222_s8 }
  0x62   : > { %2025 = vmatpush.bf16.msrb.mxu3 %v9832_v47  ;;  %v283_v39 = vld [vmem:[%s12434_s24 + $0x88] sm:$0xff]  ;;  %v12488_v41 = vpack.c.bf16 %v282_v37, %v279_v36  ;;  %v9399_v43 = vld [vmem:[#allocation7 + $0xe0] sm:$0xf]  ;;  %v11188_v44 = vld [vmem:[#allocation7 + $0x100] sm:$0xf0] }
  0x63   : > { %1879 = vmatpush.bf16.msrb.mxu0 %v9792_v3  ;;  %v12490_v42 = vpack.c.bf16 %v283_v39, %v280_v38  ;;  %v9687_v45 = vld [vmem:[#allocation7 + $0x320] sm:$0xf]  ;;  %v9400_v47 = vor.u32 %v11188_v44, %v9399_v43  ;;  %v11260_v48 = vld [vmem:[#allocation7 + $0x340] sm:$0xf0]  ;;  %v11327_v49 = vld [vmem:[#allocation7 + $0x55c] sm:$0xf]  ;;  %p12224_p4 = pnand %p12223_p1, %p12402_p7  ;;  %p12229_p2 = por %p12228_p9, %p12227_p11 }
  0x64   : > { %1928 = vmatpush.bf16.msrb.mxu1 %v10080_v63  ;;  %v9969_v50 = vld [vmem:[#allocation7 + $0x57c] sm:$0xf0]  ;;  %v9688_v53 = vor.u32 %v11260_v48, %v9687_v45  ;;  %v11255_v55 = vld [vmem:[#allocation7 + $0x31c] sm:$0xf]  ;;  %v284_v58 = vld [vmem:[%s12434_s24 + $0x90] sm:$0xff] }
  0x65   : > { %1977 = vmatpush.bf16.msrb.mxu2 %v9508_v57  ;;  %v9972_v54 = vor.u32 %v11327_v49, %v9969_v50  ;;  %v9681_v56 = vld [vmem:[#allocation7 + $0x33c] sm:$0xf0]  ;;  %v287_v59 = vld [vmem:[%s12434_s24 + $0xa8] sm:$0xff]  ;;  %v288_v61 = vld [vmem:[%s12434_s24 + $0xb0] sm:$0xff]  ;;  %p12225_p8 = pneg %p12224_p4 }
  0x66   : > { %2026 = vmatpush.bf16.msrb.mxu3 %v9796_v60  ;;  %v9684_v57 = vor.u32 %v11255_v55, %v9681_v56  ;;  %v285_v60 = vld [vmem:[%s12434_s24 + $0x98] sm:$0xff]  ;;  %v286_v62 = vld [vmem:[%s12434_s24 + $0xa0] sm:$0xff]  ;;  %v12502_v0 = vpack.c.bf16 %v287_v59, %v284_v58  ;;  %v291_v17 = vld [vmem:[%s12434_s24 + $0xc8] sm:$0xff] }
  0x67   : > { %1880 = vmatpush.bf16.msrb.mxu0 %v9756_v12  ;;  %v289_v63 = vld [vmem:[%s12434_s24 + $0xb8] sm:$0xff]  ;;  %v12504_v1 = vpack.c.bf16 %v288_v61, %v285_v60  ;;  %v11246_v12 = vld [vmem:[#allocation7 + $0x2d4] sm:$0xf]  ;;  %v290_v15 = vld [vmem:[%s12434_s24 + $0xc0] sm:$0xff]  ;;  %p12230_p10 = pnand %p12229_p2, %p12225_p8 }
  0x68   : > { %1929 = vmatpush.bf16.msrb.mxu1 %v10044_v11  ;;  %v12506_v2 = vpack.c.bf16 %v289_v63, %v286_v62  ;;  %v9363_v3 = vld [vmem:[#allocation7 + $0x98] sm:$0xf]  ;;  %v11251_v7 = vld [vmem:[#allocation7 + $0x2f8] sm:$0xf0]  ;;  %v294_v18 = vld [vmem:[%s12434_s24 + $0xe0] sm:$0xff] }
  0x69   : > { %1978 = vmatpush.bf16.msrb.mxu2 %v9472_v4  ;;  %v11179_v4 = vld [vmem:[#allocation7 + $0xb8] sm:$0xf0]  ;;  %v9651_v5 = vld [vmem:[#allocation7 + $0x2d8] sm:$0xf]  ;;  %v292_v22 = vld [vmem:[%s12434_s24 + $0xd0] sm:$0xff] }
  0x6a   : > { %2027 = vmatpush.bf16.msrb.mxu3 %v9760_v8  ;;  %v9364_v6 = vor.u32 %v11179_v4, %v9363_v3  ;;  %v11318_v8 = vld [vmem:[#allocation7 + $0x514] sm:$0xf]  ;;  %v9933_v9 = vld [vmem:[#allocation7 + $0x534] sm:$0xf0]  ;;  %v9652_v10 = vor.u32 %v11251_v7, %v9651_v5  ;;  %v295_v23 = vld [vmem:[%s12434_s24 + $0xe8] sm:$0xff] }
  0x6b   : > { %1881 = vmatpush.bf16.msrb.mxu0 %v9720_v33  ;;  %v9936_v11 = vor.u32 %v11318_v8, %v9933_v9  ;;  %v9645_v13 = vld [vmem:[#allocation7 + $0x2f4] sm:$0xf0]  ;;  %v12522_v26 = vpack.c.bf16 %v295_v23, %v292_v22  ;;  %v9327_v27 = vld [vmem:[#allocation7 + $0x50] sm:$0xf]  ;;  %v11170_v28 = vld [vmem:[#allocation7 + $0x70] sm:$0xf0] }
  0x6c   : > { %1930 = vmatpush.bf16.msrb.mxu1 %v10008_v30  ;;  %v9648_v14 = vor.u32 %v11246_v12, %v9645_v13  ;;  %v293_v16 = vld [vmem:[%s12434_s24 + $0xd8] sm:$0xff]  ;;  %v9328_v30 = vor.u32 %v11170_v28, %v9327_v27  ;;  %v11242_v31 = vld [vmem:[#allocation7 + $0x2b0] sm:$0xf0]  ;;  %v11309_v32 = vld [vmem:[#allocation7 + $0x4cc] sm:$0xf] }
  0x6d   : > { %1979 = vmatpush.bf16.msrb.mxu2 %v9436_v25  ;;  %v12518_v24 = vpack.c.bf16 %v293_v16, %v290_v15  ;;  %v12520_v25 = vpack.c.bf16 %v294_v18, %v291_v17  ;;  %v9897_v33 = vld [vmem:[#allocation7 + $0x4ec] sm:$0xf0]  ;;  %v11237_v36 = vld [vmem:[#allocation7 + $0x28c] sm:$0xf]  ;;  %v297_v44 = vld [vmem:[%s12434_s24 + $0xf8] sm:$0xff] }
  0x6e   : > { %1695 = vmatmul.bf16.gmra.mxu0 %v12470_v19  ;;  %2028 = vmatpush.bf16.msrb.mxu3 %v9724_v29  ;;  %v9615_v29 = vld [vmem:[#allocation7 + $0x290] sm:$0xf]  ;;  %v9900_v35 = vor.u32 %v11309_v32, %v9897_v33  ;;  %v299_v43 = vld [vmem:[%s12434_s24 + $0x108] sm:$0xff]  ;;  %v301_v48 = vld [vmem:[%s12434_s24 + $0x118] sm:$0xff] }
  0x6f   : > { %1744 = vmatmul.bf16.gmra.mxu1 %v12472_v20  ;;  %1882 = vmatpush.bf16.msrb.mxu0 %v9684_v57  ;;  %v9616_v34 = vor.u32 %v11242_v31, %v9615_v29  ;;  %v9609_v37 = vld [vmem:[#allocation7 + $0x2ac] sm:$0xf0]  ;;  %v11161_v55 = vld [vmem:[#allocation7 + $0x28] sm:$0xf0]  ;;  %v9579_v56 = vld [vmem:[#allocation7 + $0x248] sm:$0xf] }
  0x70   : > { %1793 = vmatmul.bf16.gmra.mxu2 %v12474_v21  ;;  %1931 = vmatpush.bf16.msrb.mxu1 %v9972_v54  ;;  %v9612_v38 = vor.u32 %v11237_v36, %v9609_v37  ;;  %v296_v39 = vld [vmem:[%s12434_s24 + $0xf0] sm:$0xff]  ;;  %v9291_v54 = vld [vmem:[#allocation7 + $0x8] sm:$0xf]  ;;  %v11233_v58 = vld [vmem:[#allocation7 + $0x268] sm:$0xf0] }
  0x71   : > { %1842 = vmatmul.bf16.gmra.mxu3 %v12470_v19  ;;  %1980 = vmatpush.bf16.msrb.mxu2 %v9400_v47  ;;  %v300_v45 = vld [vmem:[%s12434_s24 + $0x110] sm:$0xff]  ;;  %v298_v47 = vld [vmem:[%s12434_s24 + $0x100] sm:$0xff]  ;;  %v12534_v49 = vpack.c.bf16 %v299_v43, %v296_v39  ;;  %v9292_v57 = vor.u32 %v11161_v55, %v9291_v54  ;;  %v9861_v60 = vld [vmem:[#allocation7 + $0x4a4] sm:$0xf0]  ;;  %v9580_v61 = vor.u32 %v11233_v58, %v9579_v56 }
  0x72   : > { %2029 = vmatpush.bf16.msrb.mxu3 %v9688_v53  ;;  %v12536_v50 = vpack.c.bf16 %v300_v45, %v297_v44  ;;  %v12538_v53 = vpack.c.bf16 %v301_v48, %v298_v47  ;;  %v11300_v59 = vld [vmem:[#allocation7 + $0x484] sm:$0xf]  ;;  %v9573_v3 = vld [vmem:[#allocation7 + $0x264] sm:$0xf0]  ;;  %v304_v9 = vld [vmem:[%s12434_s24 + $0x130] sm:$0xff] }
  0x73   : > { %1883 = vmatpush.bf16.msrb.mxu0 %v9648_v14  ;;  %v9864_v62 = vor.u32 %v11300_v59, %v9861_v60  ;;  %v11228_v63 = vld [vmem:[#allocation7 + $0x244] sm:$0xf]  ;;  %v303_v7 = vld [vmem:[%s12434_s24 + $0x128] sm:$0xff]  ;;  %v10119_v28 = vld [vmem:[#allocation7 + $0x680] sm:$0xf] }
  0x74   : > { %1932 = vmatpush.bf16.msrb.mxu1 %v9936_v11  ;;  %v9576_v4 = vor.u32 %v11228_v63, %v9573_v3  ;;  %v302_v5 = vld [vmem:[%s12434_s24 + $0x120] sm:$0xff]  ;;  %v9833_v15 = vld [vmem:[#allocation7 + $0x464] sm:$0xf0]  ;;  %v308_v31 = vld [vmem:[%s12434_s24 + $0x150] sm:$0xff] }
  0x75   : > { %1981 = vmatpush.bf16.msrb.mxu2 %v9364_v6  ;;  %v305_v6 = vld [vmem:[%s12434_s24 + $0x138] sm:$0xff]  ;;  %v306_v8 = vld [vmem:[%s12434_s24 + $0x140] sm:$0xff]  ;;  %v10121_v18 = vld [vmem:[#allocation7 + $0x6a4] sm:$0xf0] }
  0x76   : > { %2030 = vmatpush.bf16.msrb.mxu3 %v9652_v10  ;;  %v307_v10 = vld [vmem:[%s12434_s24 + $0x148] sm:$0xff]  ;;  %v12550_v11 = vpack.c.bf16 %v305_v6, %v302_v5  ;;  %v12552_v12 = vpack.c.bf16 %v306_v8, %v303_v7  ;;  %v11292_v14 = vld [vmem:[#allocation7 + $0x444] sm:$0xf]  ;;  %v309_v33 = vld [vmem:[%s12434_s24 + $0x158] sm:$0xff] }
  0x77   : > { %1884 = vmatpush.bf16.msrb.mxu0 %v9612_v38  ;;  %v12554_v13 = vpack.c.bf16 %v307_v10, %v304_v9  ;;  %v11364_v16 = vld [vmem:[#allocation7 + $0x684] sm:$0xf]  ;;  %v9836_v17 = vor.u32 %v11292_v14, %v9833_v15  ;;  %v9545_v27 = vld [vmem:[#allocation7 + $0x224] sm:$0xf0]  ;;  %v313_v37 = vld [vmem:[%s12434_s24 + $0x178] sm:$0xff] }
  0x78   : > { %1933 = vmatpush.bf16.msrb.mxu1 %v9900_v35  ;;  %17386 = vst [vmem:[#allocation18_spill] sm:$0xff] %v12550_v11  ;;  %v10124_v22 = vor.u32 %v11364_v16, %v10121_v18  ;;  %v11220_v23 = vld [vmem:[#allocation7 + $0x204] sm:$0xf]  ;;  %v311_v32 = vld [vmem:[%s12434_s24 + $0x168] sm:$0xff]  ;;  %v312_v35 = vld [vmem:[%s12434_s24 + $0x170] sm:$0xff] }
  0x79   : > { %1982 = vmatpush.bf16.msrb.mxu2 %v9328_v30  ;;  %17387 = vst [vmem:[#allocation19_spill] sm:$0xff] %v12552_v12  ;;  %v9548_v29 = vor.u32 %v11220_v23, %v9545_v27  ;;  %v11368_v30 = vld [vmem:[#allocation7 + $0x6a0] sm:$0xf0]  ;;  %v12566_v38 = vpack.c.bf16 %v311_v32, %v308_v31  ;;  %v12568_v39 = vpack.c.bf16 %v312_v35, %v309_v33  ;;  %v11283_v44 = vld [vmem:[#allocation7 + $0x3fc] sm:$0xf] }
  0x7a   : > { %2031 = vmatpush.bf16.msrb.mxu3 %v9616_v34  ;;  %17388 = vst [vmem:[#allocation20_spill] sm:$0xff] %v12554_v13  ;;  %v10120_v34 = vor.u32 %v11368_v30, %v10119_v28  ;;  %v310_v36 = vld [vmem:[%s12434_s24 + $0x160] sm:$0xff]  ;;  %v11355_v47 = vld [vmem:[#allocation7 + $0x63c] sm:$0xf]  ;;  %v10083_v58 = vld [vmem:[#allocation7 + $0x638] sm:$0xf] }
  0x7b   : > { %1885 = vmatpush.bf16.msrb.mxu0 %v9576_v4  ;;  %17389 = vst [vmem:[#allocation21_spill] sm:$0xff] %v12566_v38  ;;  %v12570_v43 = vpack.c.bf16 %v313_v37, %v310_v36  ;;  %v9797_v45 = vld [vmem:[#allocation7 + $0x41c] sm:$0xf0]  ;;  %v11211_v56 = vld [vmem:[#allocation7 + $0x1bc] sm:$0xf] }
  0x7c   : > { %1934 = vmatpush.bf16.msrb.mxu1 %v9864_v62  ;;  %17390 = vst [vmem:[#allocation22_spill] sm:$0xff] %v12568_v39  ;;  %v9800_v48 = vor.u32 %v11283_v44, %v9797_v45  ;;  %v10085_v54 = vld [vmem:[#allocation7 + $0x65c] sm:$0xf0]  ;;  %v11359_v60 = vld [vmem:[#allocation7 + $0x658] sm:$0xf0] }
  0x7d   : > { %1983 = vmatpush.bf16.msrb.mxu2 %v9292_v57  ;;  %17391 = vst [vmem:[#allocation23_spill] sm:$0xff] %v12570_v43  ;;  %v10088_v55 = vor.u32 %v11355_v47, %v10085_v54  ;;  %v9509_v57 = vld [vmem:[#allocation7 + $0x1dc] sm:$0xf0]  ;;  %v11274_v4 = vld [vmem:[#allocation7 + $0x3b4] sm:$0xf] }
  0x7e   : > { %1700 = vmatmul.bf16.gmra.mxu0 %v12486_v40  ;;  %2032 = vmatpush.bf16.msrb.mxu3 %v9580_v61  ;;  %v9512_v59 = vor.u32 %v11211_v56, %v9509_v57  ;;  %v10084_v61 = vor.u32 %v11359_v60, %v10083_v58  ;;  %v9761_v5 = vld [vmem:[#allocation7 + $0x3d4] sm:$0xf0]  ;;  %v11346_v6 = vld [vmem:[#allocation7 + $0x5f4] sm:$0xf]  ;;  %v10047_v27 = vld [vmem:[#allocation7 + $0x5f0] sm:$0xf] }
  0x7f   : > { %1749 = vmatmul.bf16.gmra.mxu1 %v12488_v41  ;;  %2074 = vmatpush.bf16.msra.mxu0 %v10120_v34  ;;  %v9764_v7 = vor.u32 %v11274_v4, %v9761_v5  ;;  %v10049_v8 = vld [vmem:[#allocation7 + $0x614] sm:$0xf0]  ;;  %v11265_v37 = vld [vmem:[#allocation7 + $0x36c] sm:$0xf]  ;;  %v9725_v44 = vld [vmem:[#allocation7 + $0x38c] sm:$0xf0] }
  0x80   : > { %1798 = vmatmul.bf16.gmra.mxu2 %v12490_v42  ;;  %2123 = vmatpush.bf16.msra.mxu1 %v9548_v29  ;;  %v10052_v10 = vor.u32 %v11346_v6, %v10049_v8  ;;  %v9473_v23 = vld [vmem:[#allocation7 + $0x194] sm:$0xf0]  ;;  %v11350_v29 = vld [vmem:[#allocation7 + $0x610] sm:$0xf0]  ;;  %v11337_v45 = vld [vmem:[#allocation7 + $0x5ac] sm:$0xf]  ;;  %v9728_v47 = vor.u32 %v11265_v37, %v9725_v44 }
  0x81   : > { %1847 = vmatmul.bf16.gmra.mxu3 %v12486_v40  ;;  %2172 = vmatpush.bf16.msra.mxu2 %v9836_v17  ;;  %v10048_v30 = vor.u32 %v11350_v29, %v10047_v27  ;;  %v11341_v4 = vld [vmem:[#allocation7 + $0x5c8] sm:$0xf0]  ;;  %v9977_v27 = vld [vmem:[#allocation7 + $0x584] sm:$0xf0]  ;;  %v11184_v37 = vld [vmem:[#allocation7 + $0xe4] sm:$0xf] }
  0x82   : > { %2221 = vmatpush.bf16.msra.mxu3 %v10124_v22  ;;  %v11202_v22 = vld [vmem:[#allocation7 + $0x174] sm:$0xf]  ;;  %v9401_v44 = vld [vmem:[#allocation7 + $0x104] sm:$0xf0] }
  0x83   : > { %2075 = vmatpush.bf16.msra.mxu0 %v10084_v61  ;;  %v9476_v28 = vor.u32 %v11202_v22, %v9473_v23  ;;  %v11193_v61 = vld [vmem:[#allocation7 + $0x12c] sm:$0xf]  ;;  %v11328_v22 = vld [vmem:[#allocation7 + $0x564] sm:$0xf] }
  0x84   : > { %2124 = vmatpush.bf16.msra.mxu1 %v9512_v59  ;;  %v9980_v29 = vor.u32 %v11328_v22, %v9977_v27  ;;  %v11175_v27 = vld [vmem:[#allocation7 + $0x9c] sm:$0xf] }
  0x85   : > { %2173 = vmatpush.bf16.msra.mxu2 %v9800_v48  ;;  %v10013_v48 = vld [vmem:[#allocation7 + $0x5cc] sm:$0xf0] }
  0x86   : > { %2222 = vmatpush.bf16.msra.mxu3 %v10088_v55  ;;  %v10016_v55 = vor.u32 %v11337_v45, %v10013_v48  ;;  %v9975_v45 = vld [vmem:[#allocation7 + $0x560] sm:$0xf]  ;;  %v11332_v48 = vld [vmem:[#allocation7 + $0x580] sm:$0xf0] }
  0x87   : > { %2076 = vmatpush.bf16.msra.mxu0 %v10048_v30 }
  0x88   : > { %2125 = vmatpush.bf16.msra.mxu1 %v9476_v28 }
  0x89   : > { %2174 = vmatpush.bf16.msra.mxu2 %v9764_v7 }
  0x8a   : > { %2223 = vmatpush.bf16.msra.mxu3 %v10052_v10 }
  0x8d   : > { %2175 = vmatpush.bf16.msra.mxu2 %v9728_v47  ;;  %v9404_v47 = vor.u32 %v11184_v37, %v9401_v44 }
  0x8e   : > { %1705 = vmatmul.bf16.gmra.mxu0 %v12502_v0  ;;  %2224 = vmatpush.bf16.msra.mxu3 %v10016_v55 }
  0x8f   : > { %1754 = vmatmul.bf16.gmra.mxu1 %v12504_v1 }
  0x90   : > { %1803 = vmatmul.bf16.gmra.mxu2 %v12506_v2 }
  0x91   : > { %1852 = vmatmul.bf16.gmra.mxu3 %v12502_v0 }
  0x92   : > { %2225 = vmatpush.bf16.msra.mxu3 %v9980_v29  ;;  %v9939_v29 = vld [vmem:[#allocation7 + $0x518] sm:$0xf] }
  0x9e   : > { %1710 = vmatmul.bf16.gmra.mxu0 %v12518_v24 }
  0x9f   : > { %1759 = vmatmul.bf16.gmra.mxu1 %v12520_v25 }
  0xa0   : > { %1808 = vmatmul.bf16.gmra.mxu2 %v12522_v26 }
  0xa1   : > { %1857 = vmatmul.bf16.gmra.mxu3 %v12518_v24 }
  0xae   : > { %1715 = vmatmul.bf16.gmra.mxu0 %v12534_v49 }
  0xaf   : > { %1764 = vmatmul.bf16.gmra.mxu1 %v12536_v50 }
  0xb0   : > { %1813 = vmatmul.bf16.gmra.mxu2 %v12538_v53 }
  0xb1   : > { %1862 = vmatmul.bf16.gmra.mxu3 %v12534_v49 }
  0xbe   : > { %1720 = vmatmul.bf16.gmra.mxu0 %v12550_v11 }
  0xbf   : > { %1769 = vmatmul.bf16.gmra.mxu1 %v12552_v12 }
  0xc0   : > { %1818 = vmatmul.bf16.gmra.mxu2 %v12554_v13 }
  0xc1   : > { %1867 = vmatmul.bf16.gmra.mxu3 %v12550_v11 }
  0xce   : > { %1725 = vmatmul.bf16.gmra.mxu0 %v12566_v38 }
  0xcf   : > { %1774 = vmatmul.bf16.gmra.mxu1 %v12568_v39 }
  0xd0   : > { %1823 = vmatmul.bf16.gmra.mxu2 %v12570_v43 }
  0xd1   : > { %1872 = vmatmul.bf16.gmra.mxu3 %v12566_v38 }
  0xdb   : > { %v1691_v62 = vpop.f32.mrf.mxu0 }
  0xdc   : > { %v1740_v63 = vpop.f32.mrf.mxu1 }
  0xdd   : > { %v1741_v3 = vadd.f32 %v1740_v63, %v1691_v62  ;;  %v9437_v62 = vld [vmem:[#allocation7 + $0x14c] sm:$0xf0]  ;;  %v10011_v63 = vld [vmem:[#allocation7 + $0x5a8] sm:$0xf] }
  0xde   : > { %1886 = vmatmul.bf16.vlgmr.msrb.gmra.mxu0 %v12456_v51  ;;  %v10012_v5 = vor.u32 %v11341_v4, %v10011_v63  ;;  %v11247_v63 = vld [vmem:[#allocation7 + $0x2dc] sm:$0xf] }
  0xdf   : > { %1935 = vmatmul.bf16.vlgmr.msrb.gmra.mxu1 %v12458_v52  ;;  %v11319_v4 = vld [vmem:[#allocation7 + $0x51c] sm:$0xf] }
  0xe0   : > { %1984 = vmatmul.bf16.vlgmr.msrb.gmra.mxu2 %v12454_v46  ;;  %2077 = vmatpush.bf16.msra.mxu0 %v10012_v5 }
  0xe1   : > { %2033 = vmatmul.bf16.vlgmr.msrb.gmra.mxu3 %v12456_v51 }
  0xe3   : > { %v1789_v9 = vpop.f32.mrf.mxu2  ;;  %v1693_v16 = vpop.f32.mrf.mxu0 }
  0xe4   : > { %v12580_v14 = vadd.f32 %v1789_v9, %v1741_v3  ;;  %v12582_v15 = vpop.f32.mrf.mxu3  ;;  %v1742_v17 = vpop.f32.mrf.mxu1  ;;  %v9440_v3 = vor.u32 %v11193_v61, %v9437_v62 }
  0xe5   : > { %v1743_v18 = vadd.f32 %v1742_v17, %v1693_v16  ;;  %v11256_v17 = vld [vmem:[#allocation7 + $0x324] sm:$0xf] }
  0xe6   : > { %2126 = vmatpush.bf16.msra.mxu1 %v9440_v3  ;;  %v9653_v3 = vld [vmem:[#allocation7 + $0x2fc] sm:$0xf0] }
  0xe7   : > { %v9656_v5 = vor.u32 %v11247_v63, %v9653_v3  ;;  %v9905_v63 = vld [vmem:[#allocation7 + $0x4f4] sm:$0xf0] }
  0xea   : > { %2127 = vmatpush.bf16.msra.mxu1 %v9404_v47 }
  0xeb   : > { %v1791_v31 = vpop.f32.mrf.mxu2  ;;  %v1696_v34 = vpop.f32.mrf.mxu0 }
  0xec   : > { %v12584_v32 = vadd.f32 %v1791_v31, %v1743_v18  ;;  %v12586_v33 = vpop.f32.mrf.mxu3  ;;  %v1745_v35 = vpop.f32.mrf.mxu1  ;;  %v9689_v18 = vld [vmem:[#allocation7 + $0x344] sm:$0xf0] }
  0xed   : > { %v1746_v36 = vadd.f32 %v1745_v35, %v1696_v34  ;;  %v9692_v23 = vor.u32 %v11256_v17, %v9689_v18 }
  0xee   : > { %1891 = vmatmul.bf16.gmra.mxu0 %v12472_v20 }
  0xef   : > { %1940 = vmatmul.bf16.gmra.mxu1 %v12474_v21  ;;  %2176 = vmatpush.bf16.msra.mxu2 %v9692_v23 }
  0xf0   : > { %1989 = vmatmul.bf16.gmra.mxu2 %v12470_v19 }
  0xf1   : > { %2038 = vmatmul.bf16.gmra.mxu3 %v12472_v20 }
  0xf3   : > { %v1794_v54 = vpop.f32.mrf.mxu2  ;;  %v1698_v58 = vpop.f32.mrf.mxu0  ;;  %2177 = vmatpush.bf16.msra.mxu2 %v9656_v5 }
  0xf4   : > { %v12592_v56 = vadd.f32 %v1794_v54, %v1746_v36  ;;  %v12594_v57 = vpop.f32.mrf.mxu3  ;;  %v1747_v59 = vpop.f32.mrf.mxu1  ;;  %v9976_v54 = vor.u32 %v11332_v48, %v9975_v45 }
  0xf5   : > { %v1748_v60 = vadd.f32 %v1747_v59, %v1698_v58 }
  0xf6   : > { %2078 = vmatpush.bf16.msra.mxu0 %v9976_v54 }
  0xfb   : > { %v1796_v6 = vpop.f32.mrf.mxu2  ;;  %v1701_v9 = vpop.f32.mrf.mxu0 }
  0xfc   : > { %v12596_v7 = vadd.f32 %v1796_v6, %v1748_v60  ;;  %v12598_v8 = vpop.f32.mrf.mxu3  ;;  %v1750_v10 = vpop.f32.mrf.mxu1  ;;  %v9941_v6 = vld [vmem:[#allocation7 + $0x53c] sm:$0xf0] }
  0xfd   : > { %v1751_v16 = vadd.f32 %v1750_v10, %v1701_v9  ;;  %v9944_v10 = vor.u32 %v11319_v4, %v9941_v6 }
  0xfe   : > { %1896 = vmatmul.bf16.gmra.mxu0 %v12488_v41 }
  0xff   : > { %1945 = vmatmul.bf16.gmra.mxu1 %v12490_v42  ;;  %2226 = vmatpush.bf16.msra.mxu3 %v9944_v10 }
 0x100   : > { %1994 = vmatmul.bf16.gmra.mxu2 %v12486_v40 }
 0x101   : > { %2043 = vmatmul.bf16.gmra.mxu3 %v12488_v41 }
 0x103   : > { %v1799_v28 = vpop.f32.mrf.mxu2  ;;  %v1703_v34 = vpop.f32.mrf.mxu0 }
 0x104   : > { %v12604_v30 = vadd.f32 %v1799_v28, %v1751_v16  ;;  %v12606_v31 = vpop.f32.mrf.mxu3  ;;  %v1752_v35 = vpop.f32.mrf.mxu1  ;;  %v9365_v28 = vld [vmem:[#allocation7 + $0xbc] sm:$0xf0] }
 0x105   : > { %v1753_v36 = vadd.f32 %v1752_v35, %v1703_v34  ;;  %v9368_v34 = vor.u32 %v11175_v27, %v9365_v28  ;;  %v11323_v35 = vld [vmem:[#allocation7 + $0x538] sm:$0xf0]  ;;  %v9903_v27 = vld [vmem:[#allocation7 + $0x4d0] sm:$0xf] }
 0x107   : > { %2128 = vmatpush.bf16.msra.mxu1 %v9368_v34 }
 0x10b   : > { %v1801_v55 = vpop.f32.mrf.mxu2  ;;  %v1706_v60 = vpop.f32.mrf.mxu0 }
 0x10c   : > { %v12608_v58 = vadd.f32 %v1801_v55, %v1753_v36  ;;  %v12610_v59 = vpop.f32.mrf.mxu3  ;;  %v1755_v61 = vpop.f32.mrf.mxu1  ;;  %v9940_v36 = vor.u32 %v11323_v35, %v9939_v29  ;;  %v11238_v55 = vld [vmem:[#allocation7 + $0x294] sm:$0xf] }
 0x10d   : > { %v1756_v62 = vadd.f32 %v1755_v61, %v1706_v60  ;;  %v9617_v60 = vld [vmem:[#allocation7 + $0x2b4] sm:$0xf0]  ;;  %v11310_v61 = vld [vmem:[#allocation7 + $0x4d4] sm:$0xf] }
 0x10e   : > { %1901 = vmatmul.bf16.gmra.mxu0 %v12504_v1  ;;  %v9908_v4 = vor.u32 %v11310_v61, %v9905_v63  ;;  %v11314_v29 = vld [vmem:[#allocation7 + $0x4f0] sm:$0xf0]  ;;  %v11301_v61 = vld [vmem:[#allocation7 + $0x48c] sm:$0xf]  ;;  %v9869_v63 = vld [vmem:[#allocation7 + $0x4ac] sm:$0xf0] }
 0x10f   : > { %1950 = vmatmul.bf16.gmra.mxu1 %v12506_v2  ;;  %2079 = vmatpush.bf16.msra.mxu0 %v9940_v36  ;;  %v9904_v34 = vor.u32 %v11314_v29, %v9903_v27  ;;  %v11157_v27 = vld [vmem:[#allocation7 + $0xc] sm:$0xf]  ;;  %v9867_v29 = vld [vmem:[#allocation7 + $0x488] sm:$0xf] }
 0x110   : > { %1999 = vmatmul.bf16.gmra.mxu2 %v12502_v0  ;;  %2227 = vmatpush.bf16.msra.mxu3 %v9908_v4  ;;  %v9872_v4 = vor.u32 %v11301_v61, %v9869_v63 }
 0x111   : > { %2048 = vmatmul.bf16.gmra.mxu3 %v12504_v1 }
 0x113   : > { %v1804_v9 = vpop.f32.mrf.mxu2  ;;  %v1708_v18 = vpop.f32.mrf.mxu0  ;;  %2080 = vmatpush.bf16.msra.mxu0 %v9904_v34 }
 0x114   : > { %v12616_v16 = vadd.f32 %v1804_v9, %v1756_v62  ;;  %v12618_v17 = vpop.f32.mrf.mxu3  ;;  %v1757_v22 = vpop.f32.mrf.mxu1  ;;  %v9620_v62 = vor.u32 %v11238_v55, %v9617_v60  ;;  %v11229_v55 = vld [vmem:[#allocation7 + $0x24c] sm:$0xf]  ;;  %v9581_v60 = vld [vmem:[#allocation7 + $0x26c] sm:$0xf0]  ;;  %2228 = vmatpush.bf16.msra.mxu3 %v9872_v4 }
 0x115   : > { %v1758_v23 = vadd.f32 %v1757_v22, %v1708_v18  ;;  %v11166_v22 = vld [vmem:[#allocation7 + $0x54] sm:$0xf]  ;;  %v11369_v4 = vld [vmem:[#allocation7 + $0x6a8] sm:$0xf0] }
 0x116   : > { %2178 = vmatpush.bf16.msra.mxu2 %v9620_v62  ;;  %v9584_v62 = vor.u32 %v11229_v55, %v9581_v60 }
 0x11a   : > { %2179 = vmatpush.bf16.msra.mxu2 %v9584_v62 }
 0x11b   : > { %v1806_v37 = vpop.f32.mrf.mxu2  ;;  %v1711_v47 = vpop.f32.mrf.mxu0 }
 0x11c   : > { %v12620_v44 = vadd.f32 %v1806_v37, %v1758_v23  ;;  %v12622_v45 = vpop.f32.mrf.mxu3  ;;  %v1760_v48 = vpop.f32.mrf.mxu1  ;;  %v9329_v23 = vld [vmem:[#allocation7 + $0x74] sm:$0xf0] }
 0x11d   : > { %v1761_v54 = vadd.f32 %v1760_v48, %v1711_v47  ;;  %v9332_v28 = vor.u32 %v11166_v22, %v9329_v23 }
 0x11e   : > { %1906 = vmatmul.bf16.gmra.mxu0 %v12520_v25 }
 0x11f   : > { %1955 = vmatmul.bf16.gmra.mxu1 %v12522_v26 }
 0x120   : > { %2004 = vmatmul.bf16.gmra.mxu2 %v12518_v24  ;;  %2129 = vmatpush.bf16.msra.mxu1 %v9332_v28  ;;  %v9293_v28 = vld [vmem:[#allocation7 + $0x2c] sm:$0xf0] }
 0x121   : > { %2053 = vmatmul.bf16.gmra.mxu3 %v12520_v25  ;;  %v9296_v34 = vor.u32 %v11157_v27, %v9293_v28 }
 0x123   : > { %v1809_v3 = vpop.f32.mrf.mxu2  ;;  %v1713_v9 = vpop.f32.mrf.mxu0 }
 0x124   : > { %v12628_v5 = vadd.f32 %v1809_v3, %v1761_v54  ;;  %v12630_v6 = vpop.f32.mrf.mxu3  ;;  %v1762_v10 = vpop.f32.mrf.mxu1  ;;  %2130 = vmatpush.bf16.msra.mxu1 %v9296_v34 }
 0x125   : > { %v1763_v18 = vadd.f32 %v1762_v10, %v1713_v9 }
 0x12b   : > { %v1811_v35 = vpop.f32.mrf.mxu2  ;;  %v1716_v47 = vpop.f32.mrf.mxu0 }
 0x12c   : > { %v12632_v36 = vadd.f32 %v1811_v35, %v1763_v18  ;;  %v12634_v37 = vpop.f32.mrf.mxu3  ;;  %v1765_v48 = vpop.f32.mrf.mxu1  ;;  %v11305_v35 = vld [vmem:[#allocation7 + $0x4a8] sm:$0xf0] }
 0x12d   : > { %v1766_v54 = vadd.f32 %v1765_v48, %v1716_v47  ;;  %v9868_v47 = vor.u32 %v11305_v35, %v9867_v29  ;;  %v9553_v29 = vld [vmem:[#allocation7 + $0x22c] sm:$0xf0] }
 0x12e   : > { %1911 = vmatmul.bf16.gmra.mxu0 %v12536_v50 }
 0x12f   : > { %1960 = vmatmul.bf16.gmra.mxu1 %v12538_v53  ;;  %2081 = vmatpush.bf16.msra.mxu0 %v9868_v47 }
 0x130   : > { %2009 = vmatmul.bf16.gmra.mxu2 %v12534_v49 }
 0x131   : > { %2058 = vmatmul.bf16.gmra.mxu3 %v12536_v50 }
 0x133   : > { %v1814_v3 = vpop.f32.mrf.mxu2  ;;  %v1718_v18 = vpop.f32.mrf.mxu0 }
 0x134   : > { %v12640_v9 = vadd.f32 %v1814_v3, %v1766_v54  ;;  %v12642_v10 = vpop.f32.mrf.mxu3  ;;  %v1767_v22 = vpop.f32.mrf.mxu1  ;;  %v10127_v3 = vld [vmem:[#allocation7 + $0x688] sm:$0xf] }
 0x135   : > { %v1768_v23 = vadd.f32 %v1767_v22, %v1718_v18  ;;  %v11221_v18 = vld [vmem:[#allocation7 + $0x20c] sm:$0xf]  ;;  %v10128_v28 = vor.u32 %v11369_v4, %v10127_v3 }
 0x136   : > { %v9556_v35 = vor.u32 %v11221_v18, %v9553_v29  ;;  %v10091_v18 = vld [vmem:[#allocation7 + $0x640] sm:$0xf] }
 0x137   : > { %2368 = vmatpush.bf16.msrb.mxu2 %v10128_v28  ;;  %v11212_v28 = vld [vmem:[#allocation7 + $0x1c4] sm:$0xf] }
 0x138   : > { %2417 = vmatpush.bf16.msrb.mxu3 %v9556_v35 }
 0x13b   : > { %v1816_v48 = vpop.f32.mrf.mxu2  ;;  %v1721_v60 = vpop.f32.mrf.mxu0 }
 0x13c   : > { %v12644_v55 = vadd.f32 %v1816_v48, %v1768_v23  ;;  %v12646_v54 = vpop.f32.mrf.mxu3  ;;  %v1770_v61 = vpop.f32.mrf.mxu1 }
 0x13d   : > { %v1771_v63 = vadd.f32 %v1770_v61, %v1721_v60  ;;  %v9839_v60 = vld [vmem:[#allocation7 + $0x448] sm:$0xf]  ;;  %v11297_v61 = vld [vmem:[#allocation7 + $0x468] sm:$0xf0] }
 0x13e   : > { %17392 = vst [vmem:[#allocation24_spill] sm:$0xff] %v12644_v55  ;;  %1916 = vmatmul.bf16.gmra.mxu0 %v12552_v12 }
 0x13f   : > { %1965 = vmatmul.bf16.gmra.mxu1 %v12554_v13 }
 0x140   : > { %2014 = vmatmul.bf16.gmra.mxu2 %v12550_v11 }
 0x141   : > { %2063 = vmatmul.bf16.gmra.mxu3 %v12552_v12  ;;  %v9551_v12 = vld [vmem:[#allocation7 + $0x208] sm:$0xf] }
 0x143   : > { %v1819_v62 = vpop.f32.mrf.mxu2  ;;  %v1723_v27 = vpop.f32.mrf.mxu0 }
 0x144   : > { %v12652_v22 = vadd.f32 %v1819_v62, %v1771_v63  ;;  %v12654_v23 = vpop.f32.mrf.mxu3  ;;  %v1772_v34 = vpop.f32.mrf.mxu1  ;;  %v9840_v62 = vor.u32 %v11297_v61, %v9839_v60  ;;  %v9803_v61 = vld [vmem:[#allocation7 + $0x400] sm:$0xf] }
 0x145   : > { %17394 = vst [vmem:[#allocation26_spill] sm:$0xff] %v12654_v23  ;;  %v1773_v47 = vadd.f32 %v1772_v34, %v1723_v27  ;;  %v11360_v27 = vld [vmem:[#allocation7 + $0x660] sm:$0xf0] }
 0x146   : > { %17393 = vst [vmem:[#allocation25_spill] sm:$0xff] %v12652_v22  ;;  %v11225_v22 = vld [vmem:[#allocation7 + $0x228] sm:$0xf0]  ;;  %2319 = vmatpush.bf16.msrb.mxu1 %v9840_v62 }
 0x147   : > { %v9552_v55 = vor.u32 %v11225_v22, %v9551_v12  ;;  %v10092_v22 = vor.u32 %v11360_v27, %v10091_v18 }
 0x149   : > { %2270 = vmatpush.bf16.msrb.mxu0 %v9552_v55  ;;  %2369 = vmatpush.bf16.msrb.mxu2 %v10092_v22  ;;  %v9515_v55 = vld [vmem:[#allocation7 + $0x1c0] sm:$0xf] }
 0x14b   : > { %v1821_v48 = vpop.f32.mrf.mxu2  ;;  %v1726_v63 = vpop.f32.mrf.mxu0 }
 0x14c   : > { %v12656_v11 = vadd.f32 %v1821_v48, %v1773_v47  ;;  %v12658_v13 = vpop.f32.mrf.mxu3  ;;  %v1775_v23 = vpop.f32.mrf.mxu1 }
 0x14d   : > { %v1776_v3 = vadd.f32 %v1775_v23, %v1726_v63  ;;  %v9517_v23 = vld [vmem:[#allocation7 + $0x1e4] sm:$0xf0]  ;;  %v11288_v63 = vld [vmem:[#allocation7 + $0x420] sm:$0xf0] }
 0x14e   : > { %1921 = vmatmul.bf16.gmra.mxu0 %v12568_v39  ;;  %v9520_v47 = vor.u32 %v11212_v28, %v9517_v23  ;;  %v10055_v23 = vld [vmem:[#allocation7 + $0x5f8] sm:$0xf] }
 0x14f   : > { %1970 = vmatmul.bf16.gmra.mxu1 %v12570_v43 }
 0x150   : > { %2019 = vmatmul.bf16.gmra.mxu2 %v12566_v38  ;;  %2418 = vmatpush.bf16.msrb.mxu3 %v9520_v47 }
 0x151   : > { %2068 = vmatmul.bf16.gmra.mxu3 %v12568_v39 }
 0x153   : > { %v1824_v4 = vpop.f32.mrf.mxu2  ;;  %v1728_v12 = vpop.f32.mrf.mxu0 }
 0x154   : > { %v12664_v29 = vadd.f32 %v1824_v4, %v1776_v3  ;;  %v12666_v34 = vpop.f32.mrf.mxu3  ;;  %v1777_v35 = vpop.f32.mrf.mxu1  ;;  %v9804_v4 = vor.u32 %v11288_v63, %v9803_v61 }
 0x155   : > { %v1778_v48 = vadd.f32 %v1777_v35, %v1728_v12  ;;  %v11351_v35 = vld [vmem:[#allocation7 + $0x618] sm:$0xf0] }
 0x156   : > { %17395 = vst [vmem:[#allocation27_spill] sm:$0xff] %v12664_v29  ;;  %v11216_v29 = vld [vmem:[#allocation7 + $0x1e0] sm:$0xf0]  ;;  %2320 = vmatpush.bf16.msrb.mxu1 %v9804_v4 }
 0x157   : > { %v9516_v27 = vor.u32 %v11216_v29, %v9515_v55  ;;  %v10056_v29 = vor.u32 %v11351_v35, %v10055_v23  ;;  %v9479_v35 = vld [vmem:[#allocation7 + $0x178] sm:$0xf] }
 0x159   : > { %2271 = vmatpush.bf16.msrb.mxu0 %v9516_v27  ;;  %2370 = vmatpush.bf16.msrb.mxu2 %v10056_v29  ;;  %v11279_v27 = vld [vmem:[#allocation7 + $0x3d8] sm:$0xf0] }
 0x15b   : > { %v1826_v60 = vpop.f32.mrf.mxu2  ;;  %v1887_v3 = vpop.f32.mrf.mxu0 }
 0x15c   : > { %v12668_v62 = vadd.f32 %v1826_v60, %v1778_v48  ;;  %v12670_v39 = vpop.f32.mrf.mxu3  ;;  %v1888_v38 = vadd.f32 %v1887_v3, %v12582_v15  ;;  %v1936_v18 = vpop.f32.mrf.mxu1  ;;  %v11203_v48 = vld [vmem:[#allocation7 + $0x17c] sm:$0xf] }
 0x15e   : > { %v1937_v28 = vadd.f32 %v1936_v18, %v1888_v38  ;;  %2082 = vmatmul.bf16.vlgmr.msra.gmra.mxu0 %v12458_v52  ;;  %v9481_v38 = vld [vmem:[#allocation7 + $0x19c] sm:$0xf0]  ;;  %v9767_v18 = vld [vmem:[#allocation7 + $0x3b8] sm:$0xf] }
 0x15f   : > { %2131 = vmatmul.bf16.vlgmr.msra.gmra.mxu1 %v12454_v46  ;;  %v9484_v55 = vor.u32 %v11203_v48, %v9481_v38  ;;  %v9768_v23 = vor.u32 %v11279_v27, %v9767_v18 }
 0x160   : > { %2180 = vmatmul.bf16.vlgmr.msra.gmra.mxu2 %v12456_v51  ;;  %v3005_v12 = vpack.c.bf16 %v1937_v28, %v12580_v14 }
 0x161   : > { %2229 = vmatmul.bf16.vlgmr.msra.gmra.mxu3 %v12458_v52  ;;  %v11207_v52 = vld [vmem:[#allocation7 + $0x198] sm:$0xf0]  ;;  %2321 = vmatpush.bf16.msrb.mxu1 %v9768_v23 }
 0x162   : > { %3085 = vst [vmem:[#allocation2] sm:$0xff] %v3005_v12  ;;  %2419 = vmatpush.bf16.msrb.mxu3 %v9484_v55 }
 0x163   : > { %v1985_v22 = vpop.f32.mrf.mxu2  ;;  %v1889_v47 = vpop.f32.mrf.mxu0 }
 0x164   : > { %v2034_v15 = vpop.f32.mrf.mxu3  ;;  %v1890_v61 = vadd.f32 %v1889_v47, %v12586_v33  ;;  %v1938_v63 = vpop.f32.mrf.mxu1  ;;  %v9480_v47 = vor.u32 %v11207_v52, %v9479_v35 }
 0x165   : > { %v12678_v60 = vadd.f32 %v2034_v15, %v1985_v22 }
 0x166   : > { %v1939_v14 = vadd.f32 %v1938_v63, %v1890_v61  ;;  %2272 = vmatpush.bf16.msrb.mxu0 %v9480_v47 }
 0x168   : > { %v3010_v3 = vpack.c.bf16 %v1939_v14, %v12584_v32  ;;  %v10019_v14 = vld [vmem:[#allocation7 + $0x5b0] sm:$0xf] }
 0x169   : > { %v10459_v48 = vld [vmem:[#allocation2 + $0x4] sm:$0xf]  ;;  %v10251_v61 = vld [vmem:[#allocation2] sm:$0xf] }
 0x16a   : > { %3090 = vst [vmem:[#allocation2 + $0x24] sm:$0xff] %v3010_v3  ;;  %v11342_v3 = vld [vmem:[#allocation7 + $0x5d0] sm:$0xf0] }
 0x16b   : > { %v1987_v4 = vpop.f32.mrf.mxu2  ;;  %v1892_v12 = vpop.f32.mrf.mxu0  ;;  %v10020_v27 = vor.u32 %v11342_v3, %v10019_v14 }
 0x16c   : > { %v2036_v28 = vpop.f32.mrf.mxu3  ;;  %v1893_v33 = vadd.f32 %v1892_v12, %v12594_v57  ;;  %v1941_v15 = vpop.f32.mrf.mxu1  ;;  %v9445_v12 = vld [vmem:[#allocation7 + $0x154] sm:$0xf0] }
 0x16d   : > { %v12682_v22 = vadd.f32 %v2036_v28, %v1987_v4  ;;  %v11194_v28 = vld [vmem:[#allocation7 + $0x134] sm:$0xf]  ;;  %2371 = vmatpush.bf16.msrb.mxu2 %v10020_v27 }
 0x16e   : > { %v1942_v29 = vadd.f32 %v1941_v15, %v1893_v33  ;;  %2087 = vmatmul.bf16.gmra.mxu0 %v12474_v21  ;;  %v9448_v33 = vor.u32 %v11194_v28, %v9445_v12 }
 0x16f   : > { %2136 = vmatmul.bf16.gmra.mxu1 %v12470_v19 }
 0x170   : > { %2185 = vmatmul.bf16.gmra.mxu2 %v12472_v20  ;;  %v3015_v32 = vpack.c.bf16 %v1942_v29, %v12592_v56  ;;  %2420 = vmatpush.bf16.msrb.mxu3 %v9448_v33  ;;  %v9983_v33 = vld [vmem:[#allocation7 + $0x568] sm:$0xf] }
 0x171   : > { %2234 = vmatmul.bf16.gmra.mxu3 %v12474_v21  ;;  %v11444_v38 = vld [vmem:[#allocation2 + $0x24] sm:$0xf0]  ;;  %v11396_v63 = vld [vmem:[#allocation2 + $0x20] sm:$0xf0] }
 0x172   : > { %3095 = vst [vmem:[#allocation2 + $0x48] sm:$0xff] %v3015_v32  ;;  %v10460_v52 = vor.u32 %v11444_v38, %v10459_v48  ;;  %v10252_v55 = vor.u32 %v11396_v63, %v10251_v61  ;;  %v9731_v32 = vld [vmem:[#allocation7 + $0x370] sm:$0xf]  ;;  %v11270_v48 = vld [vmem:[#allocation7 + $0x390] sm:$0xf0] }
 0x173   : > { %v1990_v57 = vpop.f32.mrf.mxu2  ;;  %v1894_v18 = vpop.f32.mrf.mxu0  ;;  %v9732_v63 = vor.u32 %v11270_v48, %v9731_v32  ;;  %v11185_v48 = vld [vmem:[#allocation7 + $0xec] sm:$0xf] }
 0x174   : > { %v2039_v4 = vpop.f32.mrf.mxu3  ;;  %v1895_v56 = vadd.f32 %v1894_v18, %v12598_v8  ;;  %v1943_v35 = vpop.f32.mrf.mxu1  ;;  %5641 = vrot.lane.b32.xlu0 %v10460_v52, %s12291_s21  ;;  %4036 = vrot.lane.b32.xlu2 %v10252_v55, %s12291_s21  ;;  %v9443_v8 = vld [vmem:[#allocation7 + $0x130] sm:$0xf] }
 0x175   : > { %v12690_v23 = vadd.f32 %v2039_v4, %v1990_v57  ;;  %v11198_v57 = vld [vmem:[#allocation7 + $0x150] sm:$0xf0]  ;;  %2322 = vmatpush.bf16.msrb.mxu1 %v9732_v63 }
 0x176   : > { %v1944_v15 = vadd.f32 %v1943_v35, %v1895_v56  ;;  %v9444_v3 = vor.u32 %v11198_v57, %v9443_v8 }
 0x178   : > { %v3020_v47 = vpack.c.bf16 %v1944_v15, %v12596_v7  ;;  %2273 = vmatpush.bf16.msrb.mxu0 %v9444_v3  ;;  %v11333_v15 = vld [vmem:[#allocation7 + $0x588] sm:$0xf0]  ;;  %v9695_v3 = vld [vmem:[#allocation7 + $0x328] sm:$0xf] }
 0x179   : > { %v10463_v18 = vld [vmem:[#allocation2 + $0x4c] sm:$0xf]  ;;  %v10255_v28 = vld [vmem:[#allocation2 + $0x48] sm:$0xf]  ;;  %v9984_v32 = vor.u32 %v11333_v15, %v9983_v33 }
 0x17a   : > { %3100 = vst [vmem:[#allocation2 + $0x6c] sm:$0xff] %v3020_v47 }
 0x17b   : > { %v1992_v29 = vpop.f32.mrf.mxu2  ;;  %v1897_v61 = vpop.f32.mrf.mxu0  ;;  %2372 = vmatpush.bf16.msrb.mxu2 %v9984_v32 }
 0x17c   : > { %v2041_v38 = vpop.f32.mrf.mxu3  ;;  %v1898_v52 = vadd.f32 %v1897_v61, %v12606_v31  ;;  %v1946_v55 = vpop.f32.mrf.mxu1 }
 0x17d   : > { %v12696_v14 = vadd.f32 %v2041_v38, %v1992_v29  ;;  %v9409_v38 = vld [vmem:[#allocation7 + $0x10c] sm:$0xf0] }
 0x17e   : > { %v1947_v4 = vadd.f32 %v1946_v55, %v1898_v52  ;;  %2092 = vmatmul.bf16.gmra.mxu0 %v12490_v42  ;;  %v9412_v8 = vor.u32 %v11185_v48, %v9409_v38 }
 0x17f   : > { %2141 = vmatmul.bf16.gmra.mxu1 %v12486_v40 }
 0x180   : > { %2190 = vmatmul.bf16.gmra.mxu2 %v12488_v41  ;;  %v3025_v7 = vpack.c.bf16 %v1947_v4, %v12604_v30  ;;  %2421 = vmatpush.bf16.msrb.mxu3 %v9412_v8  ;;  %v11261_v4 = vld [vmem:[#allocation7 + $0x348] sm:$0xf0] }
 0x181   : > { %2239 = vmatmul.bf16.gmra.mxu3 %v12490_v42  ;;  %v11445_v27 = vld [vmem:[#allocation2 + $0x6c] sm:$0xf0]  ;;  %v11397_v12 = vld [vmem:[#allocation2 + $0x68] sm:$0xf0] }
 0x182   : > { %3105 = vst [vmem:[#allocation2 + $0x90] sm:$0xff] %v3025_v7  ;;  %v10464_v56 = vor.u32 %v11445_v27, %v10463_v18  ;;  %v10256_v35 = vor.u32 %v11397_v12, %v10255_v28  ;;  %v9696_v27 = vor.u32 %v11261_v4, %v9695_v3  ;;  %v9407_v28 = vld [vmem:[#allocation7 + $0xe8] sm:$0xf] }
 0x183   : > { %v1995_v31 = vpop.f32.mrf.mxu2  ;;  %v1899_v29 = vpop.f32.mrf.mxu0  ;;  %v9373_v3 = vld [vmem:[#allocation7 + $0xc4] sm:$0xf0] }
 0x184   : > { %v2044_v47 = vpop.f32.mrf.mxu3  ;;  %v1900_v30 = vadd.f32 %v1899_v29, %v12610_v59  ;;  %v1948_v63 = vpop.f32.mrf.mxu1  ;;  %5643 = vrot.lane.b32.xlu1 %v10464_v56, %s12291_s21  ;;  %4038 = vrot.lane.b32.xlu0 %v10256_v35, %s12291_s21  ;;  %v11189_v59 = vld [vmem:[#allocation7 + $0x108] sm:$0xf0] }
 0x185   : > { %v12704_v61 = vadd.f32 %v2044_v47, %v1995_v31  ;;  %v9408_v35 = vor.u32 %v11189_v59, %v9407_v28  ;;  %2323 = vmatpush.bf16.msrb.mxu1 %v9696_v27 }
 0x186   : > { %v1949_v57 = vadd.f32 %v1948_v63, %v1900_v30  ;;  %v9947_v30 = vld [vmem:[#allocation7 + $0x520] sm:$0xf]  ;;  %v11324_v63 = vld [vmem:[#allocation7 + $0x540] sm:$0xf0] }
 0x187   : > { %2274 = vmatpush.bf16.msrb.mxu0 %v9408_v35 }
 0x188   : > { %v3030_v52 = vpack.c.bf16 %v1949_v57, %v12608_v58 }
 0x189   : > { %v10259_v15 = vld [vmem:[#allocation2 + $0x90] sm:$0xf]  ;;  %v10467_v29 = vld [vmem:[#allocation2 + $0x94] sm:$0xf] }
 0x18a   : > { %3110 = vst [vmem:[#allocation2 + $0xb4] sm:$0xff] %v3030_v52  ;;  %v9948_v52 = vor.u32 %v11324_v63, %v9947_v30 }
 0x18b   : > { %v1997_v55 = vpop.f32.mrf.mxu2  ;;  %v1902_v18 = vpop.f32.mrf.mxu0 }
 0x18c   : > { %v2046_v7 = vpop.f32.mrf.mxu3  ;;  %v1903_v31 = vadd.f32 %v1902_v18, %v12618_v17  ;;  %v1951_v56 = vpop.f32.mrf.mxu1  ;;  %2373 = vmatpush.bf16.msrb.mxu2 %v9948_v52 }
 0x18d   : > { %v12710_v12 = vadd.f32 %v2046_v7, %v1997_v55  ;;  %v11176_v55 = vld [vmem:[#allocation7 + $0xa4] sm:$0xf] }
 0x18e   : > { %v1952_v33 = vadd.f32 %v1951_v56, %v1903_v31  ;;  %2097 = vmatmul.bf16.gmra.mxu0 %v12506_v2  ;;  %v9376_v18 = vor.u32 %v11176_v55, %v9373_v3  ;;  %v9659_v31 = vld [vmem:[#allocation7 + $0x2e0] sm:$0xf]  ;;  %v11252_v56 = vld [vmem:[#allocation7 + $0x300] sm:$0xf0] }
 0x18f   : > { %2146 = vmatmul.bf16.gmra.mxu1 %v12502_v0 }
 0x190   : > { %2195 = vmatmul.bf16.gmra.mxu2 %v12504_v1  ;;  %v3035_v58 = vpack.c.bf16 %v1952_v33, %v12616_v16  ;;  %2422 = vmatpush.bf16.msrb.mxu3 %v9376_v18 }
 0x191   : > { %2244 = vmatmul.bf16.gmra.mxu3 %v12506_v2  ;;  %v11398_v47 = vld [vmem:[#allocation2 + $0xb0] sm:$0xf0]  ;;  %v11446_v32 = vld [vmem:[#allocation2 + $0xb4] sm:$0xf0] }
 0x192   : > { %3115 = vst [vmem:[#allocation2 + $0xd8] sm:$0xff] %v3035_v58  ;;  %v10260_v48 = vor.u32 %v11398_v47, %v10259_v15  ;;  %v10468_v38 = vor.u32 %v11446_v32, %v10467_v29  ;;  %v9660_v58 = vor.u32 %v11252_v56, %v9659_v31  ;;  %v9371_v15 = vld [vmem:[#allocation7 + $0xa0] sm:$0xf] }
 0x193   : > { %v2000_v17 = vpop.f32.mrf.mxu2  ;;  %v1904_v57 = vpop.f32.mrf.mxu0 }
 0x194   : > { %v2049_v8 = vpop.f32.mrf.mxu3  ;;  %v1905_v16 = vadd.f32 %v1904_v57, %v12622_v45  ;;  %v1953_v7 = vpop.f32.mrf.mxu1  ;;  %4040 = vrot.lane.b32.xlu1 %v10260_v48, %s12291_s21  ;;  %5645 = vrot.lane.b32.xlu2 %v10468_v38, %s12291_s21  ;;  %v11180_v45 = vld [vmem:[#allocation7 + $0xc0] sm:$0xf0]  ;;  %v11315_v57 = vld [vmem:[#allocation7 + $0x4f8] sm:$0xf0] }
 0x195   : > { %v12718_v4 = vadd.f32 %v2049_v8, %v2000_v17  ;;  %v9372_v17 = vor.u32 %v11180_v45, %v9371_v15  ;;  %2324 = vmatpush.bf16.msrb.mxu1 %v9660_v58  ;;  %v9911_v8 = vld [vmem:[#allocation7 + $0x4d8] sm:$0xf]  ;;  %v11243_v45 = vld [vmem:[#allocation7 + $0x2b8] sm:$0xf0] }
 0x196   : > { %v1954_v27 = vadd.f32 %v1953_v7, %v1905_v16  ;;  %v9912_v3 = vor.u32 %v11315_v57, %v9911_v8  ;;  %v11167_v16 = vld [vmem:[#allocation7 + $0x5c] sm:$0xf]  ;;  %v9337_v7 = vld [vmem:[#allocation7 + $0x7c] sm:$0xf0]  ;;  %v9623_v15 = vld [vmem:[#allocation7 + $0x298] sm:$0xf] }
 0x197   : > { %2275 = vmatpush.bf16.msrb.mxu0 %v9372_v17  ;;  %v9624_v17 = vor.u32 %v11243_v45, %v9623_v15  ;;  %v17396_v45 = vld [vmem:[#allocation24_spill] sm:$0xff] }
 0x198   : > { %v3040_v28 = vpack.c.bf16 %v1954_v27, %v12620_v44  ;;  %2374 = vmatpush.bf16.msrb.mxu2 %v9912_v3 }
 0x199   : > { %v10263_v38 = vld [vmem:[#allocation2 + $0xd8] sm:$0xf]  ;;  %2325 = vmatpush.bf16.msrb.mxu1 %v9624_v17  ;;  %v9587_v17 = vld [vmem:[#allocation7 + $0x250] sm:$0xf] }
 0x19a   : > { %3120 = vst [vmem:[#allocation2 + $0xfc] sm:$0xff] %v3040_v28  ;;  %v9340_v28 = vor.u32 %v11167_v16, %v9337_v7  ;;  %v9875_v7 = vld [vmem:[#allocation7 + $0x490] sm:$0xf] }
 0x19b   : > { %v2002_v59 = vpop.f32.mrf.mxu2  ;;  %v1907_v33 = vpop.f32.mrf.mxu0 }
 0x19c   : > { %v2051_v35 = vpop.f32.mrf.mxu3  ;;  %v1908_v29 = vadd.f32 %v1907_v33, %v12630_v6  ;;  %v1956_v32 = vpop.f32.mrf.mxu1  ;;  %2423 = vmatpush.bf16.msrb.mxu3 %v9340_v28 }
 0x19d   : > { %v12724_v47 = vadd.f32 %v2051_v35, %v2002_v59  ;;  %v10471_v35 = vld [vmem:[#allocation2 + $0xdc] sm:$0xf] }
 0x19e   : > { %v1957_v48 = vadd.f32 %v1956_v32, %v1908_v29  ;;  %2102 = vmatmul.bf16.gmra.mxu0 %v12522_v26 }
 0x19f   : > { %2151 = vmatmul.bf16.gmra.mxu1 %v12518_v24 }
 0x1a0   : > { %2200 = vmatmul.bf16.gmra.mxu2 %v12520_v25  ;;  %v3045_v44 = vpack.c.bf16 %v1957_v48, %v12628_v5  ;;  %v11171_v48 = vld [vmem:[#allocation7 + $0x78] sm:$0xf0] }
 0x1a1   : > { %2249 = vmatmul.bf16.gmra.mxu3 %v12522_v26  ;;  %v11399_v30 = vld [vmem:[#allocation2 + $0xf8] sm:$0xf0]  ;;  %v11447_v31 = vld [vmem:[#allocation2 + $0xfc] sm:$0xf0] }
 0x1a2   : > { %3125 = vst [vmem:[#allocation2 + $0x120] sm:$0xff] %v3045_v44  ;;  %v10264_v6 = vor.u32 %v11399_v30, %v10263_v38  ;;  %v10472_v58 = vor.u32 %v11447_v31, %v10471_v35  ;;  %v11158_v31 = vld [vmem:[#allocation7 + $0x14] sm:$0xf] }
 0x1a3   : > { %v2005_v63 = vpop.f32.mrf.mxu2  ;;  %v1909_v55 = vpop.f32.mrf.mxu0 }
 0x1a4   : > { %v2054_v52 = vpop.f32.mrf.mxu3  ;;  %v1910_v27 = vadd.f32 %v1909_v55, %v12634_v37  ;;  %v1958_v5 = vpop.f32.mrf.mxu1  ;;  %4042 = vrot.lane.b32.xlu2 %v10264_v6, %s12291_s21  ;;  %v9335_v37 = vld [vmem:[#allocation7 + $0x58] sm:$0xf] }
 0x1a5   : > { %v12732_v18 = vadd.f32 %v2054_v52, %v2005_v63  ;;  %v9336_v63 = vor.u32 %v11171_v48, %v9335_v37  ;;  %v11234_v37 = vld [vmem:[#allocation7 + $0x270] sm:$0xf0] }
 0x1a6   : > { %v1959_v59 = vadd.f32 %v1958_v5, %v1910_v27  ;;  %v11306_v27 = vld [vmem:[#allocation7 + $0x4b0] sm:$0xf0] }
 0x1a7   : > { %2276 = vmatpush.bf16.msrb.mxu0 %v9336_v63  ;;  %v9299_v63 = vld [vmem:[#allocation7 + $0x10] sm:$0xf] }
 0x1a8   : > { %v3050_v56 = vpack.c.bf16 %v1959_v59, %v12632_v36  ;;  %v9876_v59 = vor.u32 %v11306_v27, %v9875_v7 }
 0x1a9   : > { %v10475_v8 = vld [vmem:[#allocation2 + $0x124] sm:$0xf] }
 0x1aa   : > { %3130 = vst [vmem:[#allocation2 + $0x144] sm:$0xff] %v3050_v56  ;;  %v9301_v56 = vld [vmem:[#allocation7 + $0x34] sm:$0xf0]  ;;  %2375 = vmatpush.bf16.msrb.mxu2 %v9876_v59  ;;  %v9559_v59 = vld [vmem:[#allocation7 + $0x210] sm:$0xf] }
 0x1ab   : > { %v2007_v33 = vpop.f32.mrf.mxu2  ;;  %v1912_v32 = vpop.f32.mrf.mxu0 }
 0x1ac   : > { %v2056_v29 = vpop.f32.mrf.mxu3  ;;  %v1913_v38 = vadd.f32 %v1912_v32, %v12642_v10  ;;  %v1961_v30 = vpop.f32.mrf.mxu1  ;;  %5647 = vrot.lane.b32.xlu2 %v10472_v58, %s12291_s21  ;;  %v10267_v10 = vld [vmem:[#allocation2 + $0x120] sm:$0xf]  ;;  %v9304_v58 = vor.u32 %v11158_v31, %v9301_v56  ;;  %v11226_v31 = vld [vmem:[#allocation7 + $0x230] sm:$0xf0]  ;;  %v9847_v56 = vld [vmem:[#allocation7 + $0x450] sm:$0xf] }
 0x1ad   : > { %v12737_v44 = vadd.f32 %v2056_v29, %v2007_v33 }
 0x1ae   : > { %v1962_v36 = vadd.f32 %v1961_v30, %v1913_v38  ;;  %2107 = vmatmul.bf16.gmra.mxu0 %v12538_v53  ;;  %2424 = vmatpush.bf16.msrb.mxu3 %v9304_v58  ;;  %v9588_v30 = vor.u32 %v11234_v37, %v9587_v17  ;;  %v9560_v58 = vor.u32 %v11226_v31, %v9559_v59 }
 0x1af   : > { %2156 = vmatmul.bf16.gmra.mxu1 %v12534_v49 }
 0x1b0   : > { %2205 = vmatmul.bf16.gmra.mxu2 %v12536_v50  ;;  %v3055_v6 = vpack.c.bf16 %v1962_v36, %v12640_v9  ;;  %2326 = vmatpush.bf16.msrb.mxu1 %v9588_v30 }
 0x1b1   : > { %2254 = vmatmul.bf16.gmra.mxu3 %v12538_v53  ;;  %v11448_v57 = vld [vmem:[#allocation2 + $0x144] sm:$0xf0]  ;;  %v11400_v52 = vld [vmem:[#allocation2 + $0x140] sm:$0xf0]  ;;  %2564 = vmatpush.bf16.msra.mxu2 %v9560_v58  ;;  %v17404_v58 = vld [vmem:[#allocation27_spill] sm:$0xff] }
 0x1b2   : > { %3135 = vst [vmem:[#allocation2 + $0x168] sm:$0xff] %v3055_v6  ;;  %v10476_v3 = vor.u32 %v11448_v57, %v10475_v8  ;;  %v10268_v16 = vor.u32 %v11400_v52, %v10267_v10  ;;  %v17397_v6 = vld [vmem:[#allocation26_spill] sm:$0xff] }
 0x1b3   : > { %v2010_v55 = vpop.f32.mrf.mxu2  ;;  %v1914_v28 = vpop.f32.mrf.mxu0 }
 0x1b4   : > { %v2059_v5 = vpop.f32.mrf.mxu3  ;;  %v1915_v9 = vadd.f32 %v1914_v28, %v12646_v54  ;;  %v1963_v33 = vpop.f32.mrf.mxu1  ;;  %5649 = vrot.lane.b32.xlu1 %v10476_v3, %s12291_s21  ;;  %4044 = vrot.lane.b32.xlu0 %v10268_v16, %s12291_s21  ;;  %v11162_v54 = vld [vmem:[#allocation7 + $0x30] sm:$0xf0]  ;;  %v17399_v3 = vld [vmem:[#allocation18_spill] sm:$0xff] }
 0x1b5   : > { %v12746_v35 = vadd.f32 %v2059_v5, %v2010_v55  ;;  %v9300_v10 = vor.u32 %v11162_v54, %v9299_v63  ;;  %v17398_v55 = vld [vmem:[#allocation20_spill] sm:$0xff]  ;;  %v17400_v16 = vld [vmem:[#allocation19_spill] sm:$0xff]  ;;  %v17401_v5 = vld [vmem:[#allocation25_spill] sm:$0xff] }
 0x1b6   : > { %v1964_v15 = vadd.f32 %v1963_v33, %v1915_v9 }
 0x1b7   : > { %2277 = vmatpush.bf16.msrb.mxu0 %v9300_v10  ;;  %v10129_v10 = vld [vmem:[#allocation7 + $0x6ac] sm:$0xf0] }
 0x1b8   : > { %v3060_v29 = vpack.c.bf16 %v1964_v15, %v17396_v45  ;;  %v11298_v15 = vld [vmem:[#allocation7 + $0x470] sm:$0xf0] }
 0x1b9   : > { %v10271_v7 = vld [vmem:[#allocation2 + $0x168] sm:$0xf]  ;;  %v10479_v27 = vld [vmem:[#allocation2 + $0x16c] sm:$0xf]  ;;  %v9848_v17 = vor.u32 %v11298_v15, %v9847_v56 }
 0x1ba   : > { %3140 = vst [vmem:[#allocation2 + $0x18c] sm:$0xff] %v3060_v29 }
 0x1bb   : > { %v2012_v32 = vpop.f32.mrf.mxu2  ;;  %v1917_v38 = vpop.f32.mrf.mxu0  ;;  %2613 = vmatpush.bf16.msra.mxu3 %v9848_v17 }
 0x1bc   : > { %v2061_v48 = vpop.f32.mrf.mxu3  ;;  %v1918_v8 = vadd.f32 %v1917_v38, %v17397_v6  ;;  %v1966_v57 = vpop.f32.mrf.mxu1 }
 0x1bd   : > { %v12752_v36 = vadd.f32 %v2061_v48, %v2012_v32 }
 0x1be   : > { %v1967_v52 = vadd.f32 %v1966_v57, %v1918_v8  ;;  %2112 = vmatmul.bf16.gmra.mxu0 %v17398_v55  ;;  %v11365_v8 = vld [vmem:[#allocation7 + $0x68c] sm:$0xf] }
 0x1bf   : > { %2161 = vmatmul.bf16.gmra.mxu1 %v17399_v3 }
 0x1c0   : > { %2210 = vmatmul.bf16.gmra.mxu2 %v17400_v16  ;;  %v3065_v28 = vpack.c.bf16 %v1967_v52, %v17401_v5  ;;  %v11293_v52 = vld [vmem:[#allocation7 + $0x44c] sm:$0xf]  ;;  %v10132_v5 = vor.u32 %v11365_v8, %v10129_v10 }
 0x1c1   : > { %2259 = vmatmul.bf16.gmra.mxu3 %v17398_v55  ;;  %v11401_v9 = vld [vmem:[#allocation2 + $0x188] sm:$0xf0]  ;;  %v11449_v33 = vld [vmem:[#allocation2 + $0x18c] sm:$0xf0] }
 0x1c2   : > { %3145 = vst [vmem:[#allocation2 + $0x1b0] sm:$0xff] %v3065_v28  ;;  %v10272_v29 = vor.u32 %v11401_v9, %v10271_v7  ;;  %v10480_v32 = vor.u32 %v11449_v33, %v10479_v27  ;;  %v9841_v28 = vld [vmem:[#allocation7 + $0x46c] sm:$0xf0]  ;;  %2515 = vmatpush.bf16.msra.mxu1 %v10132_v5 }
 0x1c3   : > { %v2015_v45 = vpop.f32.mrf.mxu2  ;;  %v1919_v48 = vpop.f32.mrf.mxu0  ;;  %v9844_v56 = vor.u32 %v11293_v52, %v9841_v28  ;;  %v17403_v33 = vld [vmem:[#allocation22_spill] sm:$0xff] }
 0x1c4   : > { %v2064_v37 = vpop.f32.mrf.mxu3  ;;  %v1920_v30 = vadd.f32 %v1919_v48, %v12658_v13  ;;  %v1968_v63 = vpop.f32.mrf.mxu1  ;;  %4046 = vrot.lane.b32.xlu0 %v10272_v29, %s12291_s21  ;;  %5651 = vrot.lane.b32.xlu2 %v10480_v32, %s12291_s21  ;;  %v9523_v32 = vld [vmem:[#allocation7 + $0x1c8] sm:$0xf] }
 0x1c5   : > { %v12760_v38 = vadd.f32 %v2064_v37, %v2015_v45  ;;  %2466 = vmatpush.bf16.msra.mxu0 %v9844_v56  ;;  %v11217_v37 = vld [vmem:[#allocation7 + $0x1e8] sm:$0xf0]  ;;  %v9811_v48 = vld [vmem:[#allocation7 + $0x408] sm:$0xf] }
 0x1c6   : > { %v1969_v54 = vadd.f32 %v1968_v63, %v1920_v30 }
 0x1c8   : > { %v3070_v6 = vpack.c.bf16 %v1969_v54, %v12656_v11  ;;  %v17402_v11 = vld [vmem:[#allocation21_spill] sm:$0xff]  ;;  %v9524_v54 = vor.u32 %v11217_v37, %v9523_v32 }
 0x1c9   : > { %v10275_v45 = vld [vmem:[#allocation2 + $0x1b0] sm:$0xf]  ;;  %v10483_v28 = vld [vmem:[#allocation2 + $0x1b4] sm:$0xf] }
 0x1ca   : > { %3150 = vst [vmem:[#allocation2 + $0x1d4] sm:$0xff] %v3070_v6  ;;  %v11289_v6 = vld [vmem:[#allocation7 + $0x428] sm:$0xf0]  ;;  %2565 = vmatpush.bf16.msra.mxu2 %v9524_v54  ;;  %v9487_v54 = vld [vmem:[#allocation7 + $0x180] sm:$0xf] }
 0x1cb   : > { %v2017_v57 = vpop.f32.mrf.mxu2  ;;  %v1922_v27 = vpop.f32.mrf.mxu0  ;;  %v9812_v52 = vor.u32 %v11289_v6, %v9811_v48 }
 0x1cc   : > { %v2066_v7 = vpop.f32.mrf.mxu3  ;;  %v1923_v13 = vadd.f32 %v1922_v27, %v12666_v34  ;;  %v1971_v31 = vpop.f32.mrf.mxu1 }
 0x1cd   : > { %v12766_v59 = vadd.f32 %v2066_v7, %v2017_v57  ;;  %2614 = vmatpush.bf16.msra.mxu3 %v9812_v52  ;;  %v11208_v52 = vld [vmem:[#allocation7 + $0x1a0] sm:$0xf0] }
 0x1ce   : > { %v1972_v9 = vadd.f32 %v1971_v31, %v1923_v13  ;;  %2117 = vmatmul.bf16.gmra.mxu0 %v12570_v43  ;;  %v11356_v13 = vld [vmem:[#allocation7 + $0x644] sm:$0xf] }
 0x1cf   : > { %2166 = vmatmul.bf16.gmra.mxu1 %v17402_v11 }
 0x1d0   : > { %2215 = vmatmul.bf16.gmra.mxu2 %v17403_v33  ;;  %v3075_v15 = vpack.c.bf16 %v1972_v9, %v17404_v58  ;;  %v10093_v9 = vld [vmem:[#allocation7 + $0x664] sm:$0xf0]  ;;  %v11284_v58 = vld [vmem:[#allocation7 + $0x404] sm:$0xf] }
 0x1d1   : > { %2264 = vmatmul.bf16.gmra.mxu3 %v12570_v43  ;;  %v11402_v29 = vld [vmem:[#allocation2 + $0x1d0] sm:$0xf0]  ;;  %v11450_v27 = vld [vmem:[#allocation2 + $0x1d4] sm:$0xf0] }
 0x1d2   : > { %3155 = vst [vmem:[#allocation2 + $0x1f8] sm:$0xff] %v3075_v15  ;;  %v10276_v17 = vor.u32 %v11402_v29, %v10275_v45  ;;  %v10484_v56 = vor.u32 %v11450_v27, %v10483_v28  ;;  %v9805_v29 = vld [vmem:[#allocation7 + $0x424] sm:$0xf0]  ;;  %v11280_v27 = vld [vmem:[#allocation7 + $0x3e0] sm:$0xf0] }
 0x1d3   : > { %v2020_v34 = vpop.f32.mrf.mxu2  ;;  %v1924_v63 = vpop.f32.mrf.mxu0 }
 0x1d4   : > { %v2069_v30 = vpop.f32.mrf.mxu3  ;;  %v1925_v57 = vadd.f32 %v1924_v63, %v12670_v39  ;;  %v1973_v10 = vpop.f32.mrf.mxu1  ;;  %4048 = vrot.lane.b32.xlu0 %v10276_v17, %s12291_s21  ;;  %v10096_v39 = vor.u32 %v11356_v13, %v10093_v9  ;;  %v9808_v17 = vor.u32 %v11284_v58, %v9805_v29  ;;  %v11347_v29 = vld [vmem:[#allocation7 + $0x5fc] sm:$0xf] }
 0x1d5   : > { %v12774_v8 = vadd.f32 %v2069_v30, %v2020_v34 }
 0x1d6   : > { %v1974_v7 = vadd.f32 %v1973_v10, %v1925_v57  ;;  %2516 = vmatpush.bf16.msra.mxu1 %v10096_v39  ;;  %2467 = vmatpush.bf16.msra.mxu0 %v9808_v17  ;;  %v10057_v17 = vld [vmem:[#allocation7 + $0x61c] sm:$0xf0] }
 0x1d8   : > { %v3080_v5 = vpack.c.bf16 %v1974_v7, %v12668_v62  ;;  %v17405_v62 = vld [vmem:[#allocation17_spill] sm:$0xff]  ;;  %v9775_v7 = vld [vmem:[#allocation7 + $0x3c0] sm:$0xf] }
 0x1d9   : > { %v10487_v37 = vld [vmem:[#allocation2 + $0x1fc] sm:$0xf]  ;;  %v10279_v48 = vld [vmem:[#allocation2 + $0x1f8] sm:$0xf] }
 0x1da   : > { %3160 = vst [vmem:[#allocation2 + $0x21c] sm:$0xff] %v3080_v5 }
 0x1db   : > { %v2022_v31 = vpop.f32.mrf.mxu2  ;;  %v2083_v45 = vpop.f32.mrf.mxu0 }
 0x1dc   : > { %v2071_v15 = vpop.f32.mrf.mxu3  ;;  %v2132_v34 = vpop.f32.mrf.mxu1  ;;  %5653 = vrot.lane.b32.xlu0 %v10484_v56, %s12291_s21  ;;  %v9776_v56 = vor.u32 %v11280_v27, %v9775_v7  ;;  %v2084_v58 = vadd.f32 %v2083_v45, %v12678_v60  ;;  %v9451_v7 = vld [vmem:[#allocation7 + $0x138] sm:$0xf]  ;;  %v11199_v27 = vld [vmem:[#allocation7 + $0x158] sm:$0xf0] }
 0x1dd   : > { %v12779_v32 = vadd.f32 %v2071_v15, %v2022_v31  ;;  %v9488_v31 = vor.u32 %v11208_v52, %v9487_v54 }
 0x1de   : > { %2278 = vmatmul.bf16.vlgmr.msrb.gmra.mxu0 %v12454_v46  ;;  %2615 = vmatpush.bf16.msra.mxu3 %v9776_v56  ;;  %v11271_v56 = vld [vmem:[#allocation7 + $0x398] sm:$0xf0] }
 0x1df   : > { %2327 = vmatmul.bf16.vlgmr.msrb.gmra.mxu1 %v12456_v51  ;;  %2566 = vmatpush.bf16.msra.mxu2 %v9488_v31  ;;  %v9739_v31 = vld [vmem:[#allocation7 + $0x378] sm:$0xf] }
 0x1e0   : > { %2376 = vmatmul.bf16.vlgmr.msrb.gmra.mxu2 %v17405_v62 }
 0x1e1   : > { %2425 = vmatmul.bf16.vlgmr.msrb.gmra.mxu3 %v12454_v46  ;;  %v11451_v30 = vld [vmem:[#allocation2 + $0x21c] sm:$0xf0]  ;;  %v11403_v63 = vld [vmem:[#allocation2 + $0x218] sm:$0xf0] }
 0x1e2   : > { %v10488_v57 = vor.u32 %v11451_v30, %v10487_v37  ;;  %v10280_v10 = vor.u32 %v11403_v63, %v10279_v48  ;;  %v11275_v48 = vld [vmem:[#allocation7 + $0x3bc] sm:$0xf]  ;;  %v9769_v30 = vld [vmem:[#allocation7 + $0x3dc] sm:$0xf0] }
 0x1e3   : > { %v2181_v6 = vpop.f32.mrf.mxu2  ;;  %v2085_v13 = vpop.f32.mrf.mxu0  ;;  %v9772_v52 = vor.u32 %v11275_v48, %v9769_v30 }
 0x1e4   : > { %v2182_v5 = vadd.f32 %v2181_v6, %v2132_v34  ;;  %v2230_v28 = vpop.f32.mrf.mxu3  ;;  %v2134_v9 = vpop.f32.mrf.mxu1  ;;  %5655 = vrot.lane.b32.xlu2 %v10488_v57, %s12291_s21  ;;  %4050 = vrot.lane.b32.xlu0 %v10280_v10, %s12291_s21  ;;  %v10060_v34 = vor.u32 %v11347_v29, %v10057_v17  ;;  %v2086_v10 = vadd.f32 %v2085_v13, %v12682_v22 }
 0x1e5   : > { %2468 = vmatpush.bf16.msra.mxu0 %v9772_v52  ;;  %v11338_v52 = vld [vmem:[#allocation7 + $0x5b4] sm:$0xf] }
 0x1e6   : > { %v2231_v15 = vadd.f32 %v2230_v28, %v2182_v5  ;;  %2517 = vmatpush.bf16.msra.mxu1 %v10060_v34  ;;  %v9452_v28 = vor.u32 %v11199_v27, %v9451_v7  ;;  %v9733_v7 = vld [vmem:[#allocation7 + $0x394] sm:$0xf0] }
 0x1e8   : > { %v3006_v39 = vpack.c.bf16 %v2231_v15, %v2084_v58  ;;  %v9740_v58 = vor.u32 %v11271_v56, %v9739_v31  ;;  %2567 = vmatpush.bf16.msra.mxu2 %v9452_v28 }
 0x1ea   : > { %3086 = vst [vmem:[#allocation2 + $0x8] sm:$0xff] %v3006_v39  ;;  %2616 = vmatpush.bf16.msra.mxu3 %v9740_v58  ;;  %v11190_v58 = vld [vmem:[#allocation7 + $0x110] sm:$0xf0] }
 0x1eb   : > { %v2183_v37 = vpop.f32.mrf.mxu2  ;;  %v2088_v6 = vpop.f32.mrf.mxu0 }
 0x1ec   : > { %v2184_v63 = vadd.f32 %v2183_v37, %v2134_v9  ;;  %v2232_v54 = vpop.f32.mrf.mxu3  ;;  %v2137_v57 = vpop.f32.mrf.mxu1  ;;  %v2089_v39 = vadd.f32 %v2088_v6, %v12690_v23 }
 0x1ee   : > { %v2233_v60 = vadd.f32 %v2232_v54, %v2184_v63  ;;  %2283 = vmatmul.bf16.gmra.mxu0 %v12470_v19 }
 0x1ef   : > { %2332 = vmatmul.bf16.gmra.mxu1 %v12472_v20 }
 0x1f0   : > { %v3011_v45 = vpack.c.bf16 %v2233_v60, %v2086_v10  ;;  %2381 = vmatmul.bf16.gmra.mxu2 %v12474_v21  ;;  %v10021_v10 = vld [vmem:[#allocation7 + $0x5d4] sm:$0xf0] }
 0x1f1   : > { %2430 = vmatmul.bf16.gmra.mxu3 %v12470_v19  ;;  %v10283_v37 = vld [vmem:[#allocation2 + $0xc] sm:$0xf]  ;;  %v10667_v48 = vld [vmem:[#allocation2 + $0x8] sm:$0xf]  ;;  %v10024_v60 = vor.u32 %v11338_v52, %v10021_v10 }
 0x1f2   : > { %3091 = vst [vmem:[#allocation2 + $0x2c] sm:$0xff] %v3011_v45  ;;  %v11266_v45 = vld [vmem:[#allocation7 + $0x374] sm:$0xf] }
 0x1f3   : > { %v2186_v5 = vpop.f32.mrf.mxu2  ;;  %v2090_v13 = vpop.f32.mrf.mxu0  ;;  %v9736_v6 = vor.u32 %v11266_v45, %v9733_v7  ;;  %2518 = vmatpush.bf16.msra.mxu1 %v10024_v60 }
 0x1f4   : > { %v2187_v9 = vadd.f32 %v2186_v5, %v2137_v57  ;;  %v2235_v22 = vpop.f32.mrf.mxu3  ;;  %v2139_v15 = vpop.f32.mrf.mxu1  ;;  %v2091_v31 = vadd.f32 %v2090_v13, %v12696_v14 }
 0x1f5   : > { %2469 = vmatpush.bf16.msra.mxu0 %v9736_v6 }
 0x1f6   : > { %v2236_v29 = vadd.f32 %v2235_v22, %v2187_v9  ;;  %v9415_v22 = vld [vmem:[#allocation7 + $0xf0] sm:$0xf] }
 0x1f8   : > { %v3016_v17 = vpack.c.bf16 %v2236_v29, %v2089_v39  ;;  %v9416_v39 = vor.u32 %v11190_v58, %v9415_v22  ;;  %v9703_v29 = vld [vmem:[#allocation7 + $0x330] sm:$0xf] }
 0x1f9   : > { %v11404_v34 = vld [vmem:[#allocation2 + $0x2c] sm:$0xf0]  ;;  %v11492_v30 = vld [vmem:[#allocation2 + $0x28] sm:$0xf0] }
 0x1fa   : > { %3096 = vst [vmem:[#allocation2 + $0x50] sm:$0xff] %v3016_v17  ;;  %v10284_v63 = vor.u32 %v11404_v34, %v10283_v37  ;;  %v10668_v54 = vor.u32 %v11492_v30, %v10667_v48  ;;  %v11262_v17 = vld [vmem:[#allocation7 + $0x350] sm:$0xf0]  ;;  %2568 = vmatpush.bf16.msra.mxu2 %v9416_v39 }
 0x1fb   : > { %v2188_v57 = vpop.f32.mrf.mxu2  ;;  %v2093_v23 = vpop.f32.mrf.mxu0  ;;  %v9704_v34 = vor.u32 %v11262_v17, %v9703_v29  ;;  %v9379_v17 = vld [vmem:[#allocation7 + $0xa8] sm:$0xf] }
 0x1fc   : > { %v2189_v27 = vadd.f32 %v2188_v57, %v2139_v15  ;;  %v2237_v5 = vpop.f32.mrf.mxu3  ;;  %4092 = vrot.lane.b32.xlu1 %v10284_v63, %s12291_s21  ;;  %7245 = vrot.lane.b32.xlu2 %v10668_v54, %s12291_s21  ;;  %v2142_v28 = vpop.f32.mrf.mxu1  ;;  %v2094_v30 = vadd.f32 %v2093_v23, %v12704_v61 }
 0x1fd   : > { %2617 = vmatpush.bf16.msra.mxu3 %v9704_v34 }
 0x1fe   : > { %v2238_v56 = vadd.f32 %v2237_v5, %v2189_v27  ;;  %2288 = vmatmul.bf16.gmra.mxu0 %v12486_v40  ;;  %v11329_v27 = vld [vmem:[#allocation7 + $0x56c] sm:$0xf]  ;;  %v9985_v5 = vld [vmem:[#allocation7 + $0x58c] sm:$0xf0] }
 0x1ff   : > { %2337 = vmatmul.bf16.gmra.mxu1 %v12488_v41 }
 0x200   : > { %v3021_v9 = vpack.c.bf16 %v2238_v56, %v2091_v31  ;;  %2386 = vmatmul.bf16.gmra.mxu2 %v12490_v42  ;;  %v11257_v31 = vld [vmem:[#allocation7 + $0x32c] sm:$0xf]  ;;  %v9697_v56 = vld [vmem:[#allocation7 + $0x34c] sm:$0xf0] }
 0x201   : > { %2435 = vmatmul.bf16.gmra.mxu3 %v12486_v40  ;;  %v10671_v52 = vld [vmem:[#allocation2 + $0x50] sm:$0xf]  ;;  %v10287_v57 = vld [vmem:[#allocation2 + $0x54] sm:$0xf]  ;;  %v9700_v23 = vor.u32 %v11257_v31, %v9697_v56  ;;  %v11248_v56 = vld [vmem:[#allocation7 + $0x2e4] sm:$0xf] }
 0x202   : > { %3101 = vst [vmem:[#allocation2 + $0x74] sm:$0xff] %v3021_v9 }
 0x203   : > { %v2191_v15 = vpop.f32.mrf.mxu2  ;;  %v2095_v13 = vpop.f32.mrf.mxu0  ;;  %2470 = vmatpush.bf16.msra.mxu0 %v9700_v23 }
 0x204   : > { %v2192_v37 = vadd.f32 %v2191_v15, %v2142_v28  ;;  %v2240_v14 = vpop.f32.mrf.mxu3  ;;  %v2144_v48 = vpop.f32.mrf.mxu1  ;;  %v9988_v28 = vor.u32 %v11329_v27, %v9985_v5  ;;  %v2096_v15 = vadd.f32 %v2095_v13, %v12710_v12  ;;  %v11320_v5 = vld [vmem:[#allocation7 + $0x524] sm:$0xf] }
 0x206   : > { %v2241_v63 = vadd.f32 %v2240_v14, %v2192_v37  ;;  %2519 = vmatpush.bf16.msra.mxu1 %v9988_v28  ;;  %v11181_v37 = vld [vmem:[#allocation7 + $0xc8] sm:$0xf0] }
 0x207   : > { %v9380_v34 = vor.u32 %v11181_v37, %v9379_v17 }
 0x208   : > { %v3026_v54 = vpack.c.bf16 %v2241_v63, %v2094_v30  ;;  %v11253_v30 = vld [vmem:[#allocation7 + $0x308] sm:$0xf0] }
 0x209   : > { %v11493_v10 = vld [vmem:[#allocation2 + $0x70] sm:$0xf0]  ;;  %v11405_v60 = vld [vmem:[#allocation2 + $0x74] sm:$0xf0]  ;;  %2569 = vmatpush.bf16.msra.mxu2 %v9380_v34  ;;  %v9343_v34 = vld [vmem:[#allocation7 + $0x60] sm:$0xf] }
 0x20a   : > { %3106 = vst [vmem:[#allocation2 + $0x98] sm:$0xff] %v3026_v54  ;;  %v10672_v45 = vor.u32 %v11493_v10, %v10671_v52  ;;  %v10288_v7 = vor.u32 %v11405_v60, %v10287_v57 }
 0x20b   : > { %v2193_v6 = vpop.f32.mrf.mxu2  ;;  %v2098_v61 = vpop.f32.mrf.mxu0 }
 0x20c   : > { %v2194_v9 = vadd.f32 %v2193_v6, %v2144_v48  ;;  %v2242_v22 = vpop.f32.mrf.mxu3  ;;  %7247 = vrot.lane.b32.xlu1 %v10672_v45, %s12291_s21  ;;  %4094 = vrot.lane.b32.xlu0 %v10288_v7, %s12291_s21  ;;  %v2147_v58 = vpop.f32.mrf.mxu1  ;;  %v9667_v48 = vld [vmem:[#allocation7 + $0x2e8] sm:$0xf]  ;;  %v2099_v10 = vadd.f32 %v2098_v61, %v12718_v4 }
 0x20d   : > { %v9668_v54 = vor.u32 %v11253_v30, %v9667_v48  ;;  %v9949_v6 = vld [vmem:[#allocation7 + $0x544] sm:$0xf0]  ;;  %v11172_v48 = vld [vmem:[#allocation7 + $0x80] sm:$0xf0] }
 0x20e   : > { %v2243_v39 = vadd.f32 %v2242_v22, %v2194_v9  ;;  %2293 = vmatmul.bf16.gmra.mxu0 %v12502_v0  ;;  %v9952_v31 = vor.u32 %v11320_v5, %v9949_v6  ;;  %v9661_v9 = vld [vmem:[#allocation7 + $0x304] sm:$0xf0] }
 0x20f   : > { %2342 = vmatmul.bf16.gmra.mxu1 %v12504_v1  ;;  %2618 = vmatpush.bf16.msra.mxu3 %v9668_v54 }
 0x210   : > { %v3031_v29 = vpack.c.bf16 %v2243_v39, %v2096_v15  ;;  %2391 = vmatmul.bf16.gmra.mxu2 %v12506_v2  ;;  %v9664_v15 = vor.u32 %v11248_v56, %v9661_v9  ;;  %2520 = vmatpush.bf16.msra.mxu1 %v9952_v31  ;;  %v11311_v9 = vld [vmem:[#allocation7 + $0x4dc] sm:$0xf] }
 0x211   : > { %2440 = vmatmul.bf16.gmra.mxu3 %v12502_v0  ;;  %v10291_v45 = vld [vmem:[#allocation2 + $0x9c] sm:$0xf]  ;;  %v10675_v37 = vld [vmem:[#allocation2 + $0x98] sm:$0xf] }
 0x212   : > { %3111 = vst [vmem:[#allocation2 + $0xbc] sm:$0xff] %v3031_v29  ;;  %2471 = vmatpush.bf16.msra.mxu0 %v9664_v15 }
 0x213   : > { %v2196_v14 = vpop.f32.mrf.mxu2  ;;  %v2100_v13 = vpop.f32.mrf.mxu0 }
 0x214   : > { %v2197_v63 = vadd.f32 %v2196_v14, %v2147_v58  ;;  %v2245_v12 = vpop.f32.mrf.mxu3  ;;  %v2149_v52 = vpop.f32.mrf.mxu1  ;;  %v2101_v61 = vadd.f32 %v2100_v13, %v12724_v47  ;;  %v9631_v47 = vld [vmem:[#allocation7 + $0x2a0] sm:$0xf] }
 0x216   : > { %v2246_v57 = vadd.f32 %v2245_v12, %v2197_v63  ;;  %v9344_v63 = vor.u32 %v11172_v48, %v9343_v34  ;;  %v11244_v12 = vld [vmem:[#allocation7 + $0x2c0] sm:$0xf0] }
 0x218   : > { %v3036_v60 = vpack.c.bf16 %v2246_v57, %v2099_v10  ;;  %v9632_v10 = vor.u32 %v11244_v12, %v9631_v47  ;;  %2570 = vmatpush.bf16.msra.mxu2 %v9344_v63  ;;  %v11366_v63 = vld [vmem:[#allocation7 + $0x694] sm:$0xf]  ;;  %v10137_v47 = vld [vmem:[#allocation7 + $0x6b4] sm:$0xf0] }
 0x219   : > { %v11406_v7 = vld [vmem:[#allocation2 + $0xbc] sm:$0xf0]  ;;  %v11494_v29 = vld [vmem:[#allocation2 + $0xb8] sm:$0xf0]  ;;  %v10140_v12 = vor.u32 %v11366_v63, %v10137_v47 }
 0x21a   : > { %3116 = vst [vmem:[#allocation2 + $0xe0] sm:$0xff] %v3036_v60  ;;  %v10292_v27 = vor.u32 %v11406_v7, %v10291_v45  ;;  %v10676_v14 = vor.u32 %v11494_v29, %v10675_v37  ;;  %2619 = vmatpush.bf16.msra.mxu3 %v9632_v10  ;;  %v9595_v37 = vld [vmem:[#allocation7 + $0x258] sm:$0xf]  ;;  %v11163_v10 = vld [vmem:[#allocation7 + $0x38] sm:$0xf0] }
 0x21b   : > { %v2198_v28 = vpop.f32.mrf.mxu2  ;;  %v2103_v58 = vpop.f32.mrf.mxu0 }
 0x21c   : > { %v2199_v22 = vadd.f32 %v2198_v28, %v2149_v52  ;;  %v2247_v23 = vpop.f32.mrf.mxu3  ;;  %4096 = vrot.lane.b32.xlu2 %v10292_v27, %s12291_s21  ;;  %v2152_v4 = vpop.f32.mrf.mxu1  ;;  %v2104_v60 = vadd.f32 %v2103_v58, %v12732_v18 }
 0x21e   : > { %v2248_v39 = vadd.f32 %v2247_v23, %v2199_v22  ;;  %2298 = vmatmul.bf16.gmra.mxu0 %v12518_v24  ;;  %v9913_v22 = vld [vmem:[#allocation7 + $0x4fc] sm:$0xf0] }
 0x21f   : > { %2347 = vmatmul.bf16.gmra.mxu1 %v12520_v25  ;;  %v9916_v15 = vor.u32 %v11311_v9, %v9913_v22  ;;  %v10065_v9 = vld [vmem:[#allocation7 + $0x624] sm:$0xf0] }
 0x220   : > { %v3041_v17 = vpack.c.bf16 %v2248_v39, %v2101_v61  ;;  %2396 = vmatmul.bf16.gmra.mxu2 %v12522_v26  ;;  %v9625_v61 = vld [vmem:[#allocation7 + $0x2bc] sm:$0xf0] }
 0x221   : > { %2445 = vmatmul.bf16.gmra.mxu3 %v12518_v24  ;;  %v10679_v27 = vld [vmem:[#allocation2 + $0xe0] sm:$0xf]  ;;  %v10295_v6 = vld [vmem:[#allocation2 + $0xe4] sm:$0xf]  ;;  %2521 = vmatpush.bf16.msra.mxu1 %v9916_v15 }
 0x222   : > { %3121 = vst [vmem:[#allocation2 + $0x104] sm:$0xff] %v3041_v17 }
 0x223   : > { %v2201_v30 = vpop.f32.mrf.mxu2  ;;  %v2105_v52 = vpop.f32.mrf.mxu0 }
 0x224   : > { %v2202_v13 = vadd.f32 %v2201_v30, %v2152_v4  ;;  %v2250_v54 = vpop.f32.mrf.mxu3  ;;  %7249 = vrot.lane.b32.xlu2 %v10676_v14, %s12291_s21  ;;  %v2154_v57 = vpop.f32.mrf.mxu1  ;;  %v11239_v4 = vld [vmem:[#allocation7 + $0x29c] sm:$0xf]  ;;  %v2106_v34 = vadd.f32 %v2105_v52, %v12737_v44 }
 0x225   : > { %v9628_v58 = vor.u32 %v11239_v4, %v9625_v61  ;;  %v11235_v14 = vld [vmem:[#allocation7 + $0x278] sm:$0xf0] }
 0x226   : > { %v2251_v45 = vadd.f32 %v2250_v54, %v2202_v13  ;;  %v9596_v30 = vor.u32 %v11235_v14, %v9595_v37  ;;  %v9307_v54 = vld [vmem:[#allocation7 + $0x18] sm:$0xf] }
 0x227   : > { %2472 = vmatpush.bf16.msra.mxu0 %v9628_v58  ;;  %v9308_v52 = vor.u32 %v11163_v10, %v9307_v54  ;;  %v9877_v37 = vld [vmem:[#allocation7 + $0x4b4] sm:$0xf0] }
 0x228   : > { %v3046_v7 = vpack.c.bf16 %v2251_v45, %v2104_v60  ;;  %2620 = vmatpush.bf16.msra.mxu3 %v9596_v30  ;;  %v10101_v60 = vld [vmem:[#allocation7 + $0x66c] sm:$0xf0]  ;;  %v9589_v30 = vld [vmem:[#allocation7 + $0x274] sm:$0xf0] }
 0x229   : > { %v11495_v5 = vld [vmem:[#allocation2 + $0x100] sm:$0xf0]  ;;  %v11407_v28 = vld [vmem:[#allocation2 + $0x104] sm:$0xf0]  ;;  %2571 = vmatpush.bf16.msra.mxu2 %v9308_v52 }
 0x22a   : > { %3126 = vst [vmem:[#allocation2 + $0x128] sm:$0xff] %v3046_v7  ;;  %v10680_v31 = vor.u32 %v11495_v5, %v10679_v27  ;;  %v10296_v56 = vor.u32 %v11407_v28, %v10295_v6 }
 0x22b   : > { %v2203_v23 = vpop.f32.mrf.mxu2  ;;  %v2108_v18 = vpop.f32.mrf.mxu0 }
 0x22c   : > { %v2204_v39 = vadd.f32 %v2203_v23, %v2154_v57  ;;  %v2252_v29 = vpop.f32.mrf.mxu3  ;;  %7251 = vrot.lane.b32.xlu1 %v10680_v31, %s12291_s21  ;;  %4098 = vrot.lane.b32.xlu2 %v10296_v56, %s12291_s21  ;;  %v2157_v17 = vpop.f32.mrf.mxu1  ;;  %v11357_v57 = vld [vmem:[#allocation7 + $0x64c] sm:$0xf]  ;;  %v2109_v28 = vadd.f32 %v2108_v18, %v12746_v35  ;;  %v11348_v56 = vld [vmem:[#allocation7 + $0x604] sm:$0xf]  ;;  %v11339_v35 = vld [vmem:[#allocation7 + $0x5bc] sm:$0xf] }
 0x22d   : > { %2809 = vmatpush.bf16.msrb.mxu3 %v10140_v12  ;;  %v10104_v5 = vor.u32 %v11357_v57, %v10101_v60  ;;  %v10068_v22 = vor.u32 %v11348_v56, %v10065_v9  ;;  %v11330_v57 = vld [vmem:[#allocation7 + $0x574] sm:$0xf]  ;;  %v9993_v60 = vld [vmem:[#allocation7 + $0x594] sm:$0xf0] }
 0x22e   : > { %v2253_v48 = vadd.f32 %v2252_v29, %v2204_v39  ;;  %2303 = vmatmul.bf16.gmra.mxu0 %v12534_v49 }
 0x22f   : > { %2352 = vmatmul.bf16.gmra.mxu1 %v12536_v50 }
 0x230   : > { %v3051_v13 = vpack.c.bf16 %v2253_v48, %v2106_v34  ;;  %2401 = vmatmul.bf16.gmra.mxu2 %v12538_v53  ;;  %v11230_v48 = vld [vmem:[#allocation7 + $0x254] sm:$0xf] }
 0x231   : > { %2450 = vmatmul.bf16.gmra.mxu3 %v12534_v49  ;;  %v10299_v15 = vld [vmem:[#allocation2 + $0x12c] sm:$0xf]  ;;  %v10683_v61 = vld [vmem:[#allocation2 + $0x128] sm:$0xf]  ;;  %v9592_v12 = vor.u32 %v11230_v48, %v9589_v30 }
 0x232   : > { %3131 = vst [vmem:[#allocation2 + $0x14c] sm:$0xff] %v3051_v13  ;;  %2810 = vmatpush.bf16.msrb.mxu3 %v10104_v5  ;;  %v10029_v13 = vld [vmem:[#allocation7 + $0x5dc] sm:$0xf0]  ;;  %v11294_v5 = vld [vmem:[#allocation7 + $0x454] sm:$0xf] }
 0x233   : > { %v2206_v44 = vpop.f32.mrf.mxu2  ;;  %v2110_v27 = vpop.f32.mrf.mxu0  ;;  %v10032_v10 = vor.u32 %v11339_v35, %v10029_v13  ;;  %2473 = vmatpush.bf16.msra.mxu0 %v9592_v12  ;;  %v11303_v13 = vld [vmem:[#allocation7 + $0x49c] sm:$0xf] }
 0x234   : > { %v2207_v45 = vadd.f32 %v2206_v44, %v2157_v17  ;;  %v2255_v7 = vpop.f32.mrf.mxu3  ;;  %v2159_v6 = vpop.f32.mrf.mxu1  ;;  %v11302_v17 = vld [vmem:[#allocation7 + $0x494] sm:$0xf]  ;;  %v2111_v44 = vadd.f32 %v2110_v27, %v12752_v36  ;;  %v11321_v27 = vld [vmem:[#allocation7 + $0x52c] sm:$0xf] }
 0x235   : > { %v9880_v34 = vor.u32 %v11302_v17, %v9877_v37  ;;  %v11370_v37 = vld [vmem:[#allocation7 + $0x6b0] sm:$0xf0] }
 0x236   : > { %v2256_v31 = vadd.f32 %v2255_v7, %v2207_v45  ;;  %2811 = vmatpush.bf16.msrb.mxu3 %v10068_v22  ;;  %v9996_v45 = vor.u32 %v11330_v57, %v9993_v60 }
 0x237   : > { %2522 = vmatpush.bf16.msra.mxu1 %v9880_v34  ;;  %v9921_v34 = vld [vmem:[#allocation7 + $0x504] sm:$0xf0] }
 0x238   : > { %v3056_v23 = vpack.c.bf16 %v2256_v31, %v2109_v28  ;;  %v9957_v31 = vld [vmem:[#allocation7 + $0x54c] sm:$0xf0] }
 0x239   : > { %v11408_v4 = vld [vmem:[#allocation2 + $0x14c] sm:$0xf0]  ;;  %v11496_v39 = vld [vmem:[#allocation2 + $0x148] sm:$0xf0] }
 0x23a   : > { %3136 = vst [vmem:[#allocation2 + $0x170] sm:$0xff] %v3056_v23  ;;  %v10300_v29 = vor.u32 %v11408_v4, %v10299_v15  ;;  %v10684_v58 = vor.u32 %v11496_v39, %v10683_v61  ;;  %2812 = vmatpush.bf16.msrb.mxu3 %v10032_v10  ;;  %v9960_v23 = vor.u32 %v11321_v27, %v9957_v31  ;;  %v11222_v39 = vld [vmem:[#allocation7 + $0x214] sm:$0xf]  ;;  %v9813_v27 = vld [vmem:[#allocation7 + $0x42c] sm:$0xf0] }
 0x23b   : > { %v2208_v14 = vpop.f32.mrf.mxu2  ;;  %v2113_v47 = vpop.f32.mrf.mxu0 }
 0x23c   : > { %v2209_v18 = vadd.f32 %v2208_v14, %v2159_v6  ;;  %v2257_v63 = vpop.f32.mrf.mxu3  ;;  %4100 = vrot.lane.b32.xlu1 %v10300_v29, %s12291_s21  ;;  %7253 = vrot.lane.b32.xlu2 %v10684_v58, %s12291_s21  ;;  %v2162_v54 = vpop.f32.mrf.mxu1  ;;  %v9849_v6 = vld [vmem:[#allocation7 + $0x474] sm:$0xf0]  ;;  %v2114_v4 = vadd.f32 %v2113_v47, %v12760_v38  ;;  %v10135_v58 = vld [vmem:[#allocation7 + $0x690] sm:$0xf]  ;;  %v11312_v14 = vld [vmem:[#allocation7 + $0x4e4] sm:$0xf] }
 0x23d   : > { %v9852_v36 = vor.u32 %v11294_v5, %v9849_v6  ;;  %v9561_v29 = vld [vmem:[#allocation7 + $0x234] sm:$0xf0]  ;;  %v10136_v30 = vor.u32 %v11370_v37, %v10135_v58  ;;  %v9924_v35 = vor.u32 %v11312_v14, %v9921_v34  ;;  %v9885_v38 = vld [vmem:[#allocation7 + $0x4bc] sm:$0xf0] }
 0x23e   : > { %v2258_v52 = vadd.f32 %v2257_v63, %v2209_v18  ;;  %2308 = vmatmul.bf16.gmra.mxu0 %v17399_v3  ;;  %2813 = vmatpush.bf16.msrb.mxu3 %v9996_v45  ;;  %v9564_v17 = vor.u32 %v11222_v39, %v9561_v29  ;;  %v9525_v39 = vld [vmem:[#allocation7 + $0x1ec] sm:$0xf0]  ;;  %v10099_v29 = vld [vmem:[#allocation7 + $0x648] sm:$0xf] }
 0x23f   : > { %2357 = vmatmul.bf16.gmra.mxu1 %v17400_v16  ;;  %2760 = vmatpush.bf16.msrb.mxu2 %v9852_v36 }
 0x240   : > { %v3061_v7 = vpack.c.bf16 %v2258_v52, %v2111_v44  ;;  %2406 = vmatmul.bf16.gmra.mxu2 %v17398_v55  ;;  %2711 = vmatpush.bf16.msrb.mxu1 %v9564_v17  ;;  %v11361_v17 = vld [vmem:[#allocation7 + $0x668] sm:$0xf0] }
 0x241   : > { %2455 = vmatmul.bf16.gmra.mxu3 %v17399_v3  ;;  %v10303_v18 = vld [vmem:[#allocation2 + $0x174] sm:$0xf]  ;;  %2662 = vmatpush.bf16.msrb.mxu0 %v10136_v30  ;;  %v10687_v6 = vld [vmem:[#allocation2 + $0x170] sm:$0xf]  ;;  %v10100_v14 = vor.u32 %v11361_v17, %v10099_v29 }
 0x242   : > { %3141 = vst [vmem:[#allocation2 + $0x194] sm:$0xff] %v3061_v7  ;;  %2814 = vmatpush.bf16.msrb.mxu3 %v9960_v23 }
 0x243   : > { %v2211_v28 = vpop.f32.mrf.mxu2  ;;  %v2115_v22 = vpop.f32.mrf.mxu0 }
 0x244   : > { %v2212_v56 = vadd.f32 %v2211_v28, %v2162_v54  ;;  %v2260_v9 = vpop.f32.mrf.mxu3  ;;  %v2164_v15 = vpop.f32.mrf.mxu1  ;;  %v9888_v54 = vor.u32 %v11303_v13, %v9885_v38  ;;  %v2116_v60 = vadd.f32 %v2115_v22, %v12766_v59  ;;  %v11285_v28 = vld [vmem:[#allocation7 + $0x40c] sm:$0xf] }
 0x245   : > { %2663 = vmatpush.bf16.msrb.mxu0 %v10100_v14 }
 0x246   : > { %v2261_v61 = vadd.f32 %v2260_v9, %v2212_v56  ;;  %2815 = vmatpush.bf16.msrb.mxu3 %v9924_v35  ;;  %v9816_v56 = vor.u32 %v11285_v28, %v9813_v27  ;;  %v11204_v27 = vld [vmem:[#allocation7 + $0x184] sm:$0xf] }
 0x248   : > { %v3066_v48 = vpack.c.bf16 %v2261_v61, %v2114_v4  ;;  %2761 = vmatpush.bf16.msrb.mxu2 %v9816_v56  ;;  %v11213_v61 = vld [vmem:[#allocation7 + $0x1cc] sm:$0xf]  ;;  %v10063_v56 = vld [vmem:[#allocation7 + $0x600] sm:$0xf] }
 0x249   : > { %v11409_v63 = vld [vmem:[#allocation2 + $0x194] sm:$0xf0]  ;;  %v11497_v7 = vld [vmem:[#allocation2 + $0x190] sm:$0xf0]  ;;  %v9528_v58 = vor.u32 %v11213_v61, %v9525_v39 }
 0x24a   : > { %3146 = vst [vmem:[#allocation2 + $0x1b8] sm:$0xff] %v3066_v48  ;;  %v10304_v12 = vor.u32 %v11409_v63, %v10303_v18  ;;  %2816 = vmatpush.bf16.msrb.mxu3 %v9888_v54  ;;  %v10688_v36 = vor.u32 %v11497_v7, %v10687_v6 }
 0x24b   : > { %v2213_v47 = vpop.f32.mrf.mxu2  ;;  %v2118_v52 = vpop.f32.mrf.mxu0  ;;  %2712 = vmatpush.bf16.msrb.mxu1 %v9528_v58 }
 0x24c   : > { %v2214_v10 = vadd.f32 %v2213_v47, %v2164_v15  ;;  %v2262_v44 = vpop.f32.mrf.mxu3  ;;  %4102 = vrot.lane.b32.xlu1 %v10304_v12, %s12291_s21  ;;  %v2167_v57 = vpop.f32.mrf.mxu1  ;;  %v2119_v15 = vadd.f32 %v2118_v52, %v12774_v8 }
 0x24e   : > { %v2263_v45 = vadd.f32 %v2262_v44, %v2214_v10  ;;  %2313 = vmatmul.bf16.gmra.mxu0 %v17402_v11 }
 0x24f   : > { %2362 = vmatmul.bf16.gmra.mxu1 %v17403_v33 }
 0x250   : > { %v3071_v5 = vpack.c.bf16 %v2263_v45, %v2116_v60  ;;  %2411 = vmatmul.bf16.gmra.mxu2 %v12570_v43  ;;  %v9777_v60 = vld [vmem:[#allocation7 + $0x3e4] sm:$0xf0] }
 0x251   : > { %2460 = vmatmul.bf16.gmra.mxu3 %v17402_v11  ;;  %v10307_v34 = vld [vmem:[#allocation2 + $0x1bc] sm:$0xf]  ;;  %v10691_v44 = vld [vmem:[#allocation2 + $0x1b8] sm:$0xf] }
 0x252   : > { %3151 = vst [vmem:[#allocation2 + $0x1dc] sm:$0xff] %v3071_v5 }
 0x253   : > { %v2216_v31 = vpop.f32.mrf.mxu2  ;;  %v2120_v22 = vpop.f32.mrf.mxu0 }
 0x254   : > { %v2217_v59 = vadd.f32 %v2216_v31, %v2167_v57  ;;  %v2265_v9 = vpop.f32.mrf.mxu3  ;;  %7255 = vrot.lane.b32.xlu1 %v10688_v36, %s12291_s21  ;;  %v2169_v23 = vpop.f32.mrf.mxu1  ;;  %v2121_v13 = vadd.f32 %v2120_v22, %v12779_v32  ;;  %v11276_v57 = vld [vmem:[#allocation7 + $0x3c4] sm:$0xf]  ;;  %v9489_v31 = vld [vmem:[#allocation7 + $0x1a4] sm:$0xf0] }
 0x255   : > { %v9780_v7 = vor.u32 %v11276_v57, %v9777_v60 }
 0x256   : > { %v2266_v4 = vadd.f32 %v2265_v9, %v2217_v59  ;;  %v9492_v59 = vor.u32 %v11204_v27, %v9489_v31  ;;  %v11352_v9 = vld [vmem:[#allocation7 + $0x620] sm:$0xf0]  ;;  %v10027_v27 = vld [vmem:[#allocation7 + $0x5b8] sm:$0xf]  ;;  %v10199_v31 = vld [vmem:[#allocation2 + $0x174] sm:$0xf] }
 0x257   : > { %2762 = vmatpush.bf16.msrb.mxu2 %v9780_v7  ;;  %v11385_v7 = vld [vmem:[#allocation2 + $0x194] sm:$0xf0] }
 0x258   : > { %v3076_v37 = vpack.c.bf16 %v2266_v4, %v2119_v15  ;;  %v10064_v4 = vor.u32 %v11352_v9, %v10063_v56  ;;  %2713 = vmatpush.bf16.msrb.mxu1 %v9492_v59  ;;  %v11343_v59 = vld [vmem:[#allocation7 + $0x5d8] sm:$0xf0]  ;;  %v10200_v9 = vor.u32 %v11385_v7, %v10199_v31  ;;  %v10191_v7 = vld [vmem:[#allocation2 + $0xe4] sm:$0xf]  ;;  %v12884_v31 = vpop.permute.xlu0 %5641 }
 0x259   : > { %v11410_v48 = vld [vmem:[#allocation2 + $0x1dc] sm:$0xf0]  ;;  %v11498_v54 = vld [vmem:[#allocation2 + $0x1d8] sm:$0xf0]  ;;  %17406 = vst [vmem:[#allocation24_spill] sm:$0xff] %v12884_v31 }
 0x25a   : > { %3156 = vst [vmem:[#allocation2 + $0x200] sm:$0xff] %v3076_v37  ;;  %v10308_v30 = vor.u32 %v11410_v48, %v10307_v34  ;;  %v10692_v52 = vor.u32 %v11498_v54, %v10691_v44  ;;  %2664 = vmatpush.bf16.msrb.mxu0 %v10064_v4 }
 0x25b   : > { %v2218_v35 = vpop.f32.mrf.mxu2  ;;  %v2279_v8 = vpop.f32.mrf.mxu0 }
 0x25c   : > { %v2219_v18 = vadd.f32 %v2218_v35, %v2169_v23  ;;  %v2267_v63 = vpop.f32.mrf.mxu3  ;;  %4104 = vrot.lane.b32.xlu0 %v10308_v30, %s12291_s21  ;;  %v2328_v12 = vpop.f32.mrf.mxu1 }
 0x25d   : > { %v2329_v47 = vadd.f32 %v2328_v12, %v2279_v8  ;;  %v10203_v12 = vld [vmem:[#allocation2 + $0x1bc] sm:$0xf] }
 0x25e   : > { %v2268_v38 = vadd.f32 %v2267_v63, %v2219_v18  ;;  %2474 = vmatmul.bf16.vlgmr.msra.gmra.mxu0 %v12456_v51  ;;  %v11386_v63 = vld [vmem:[#allocation2 + $0x1dc] sm:$0xf0] }
 0x25f   : > { %2523 = vmatmul.bf16.vlgmr.msra.gmra.mxu1 %v17405_v62 }
 0x260   : > { %v3081_v10 = vpack.c.bf16 %v2268_v38, %v2121_v13  ;;  %2572 = vmatmul.bf16.vlgmr.msra.gmra.mxu2 %v12454_v46  ;;  %v10204_v13 = vor.u32 %v11386_v63, %v10203_v12  ;;  %v11267_v38 = vld [vmem:[#allocation7 + $0x37c] sm:$0xf] }
 0x261   : > { %2621 = vmatmul.bf16.vlgmr.msra.gmra.mxu3 %v12456_v51  ;;  %v10695_v22 = vld [vmem:[#allocation2 + $0x200] sm:$0xf]  ;;  %v10311_v23 = vld [vmem:[#allocation2 + $0x204] sm:$0xf] }
 0x262   : > { %3161 = vst [vmem:[#allocation2 + $0x224] sm:$0xff] %v3081_v10  ;;  %v10207_v15 = vld [vmem:[#allocation2 + $0x204] sm:$0xf]  ;;  %v3372_v60 = vsel %vm17250_vm0, %v10204_v13, 0 }
 0x263   : > { %v2377_v45 = vpop.f32.mrf.mxu2  ;;  %v2281_v6 = vpop.f32.mrf.mxu0 }
 0x264   : > { %v12849_v32 = vadd.f32 %v2377_v45, %v2329_v47  ;;  %v12851_v5 = vpop.f32.mrf.mxu3  ;;  %7257 = vrot.lane.b32.xlu0 %v10692_v52, %s12291_s21  ;;  %v2330_v28 = vpop.f32.mrf.mxu1  ;;  %v9741_v47 = vld [vmem:[#allocation7 + $0x39c] sm:$0xf0] }
 0x265   : > { %v2331_v36 = vadd.f32 %v2330_v28, %v2281_v6  ;;  %v9744_v54 = vor.u32 %v11267_v38, %v9741_v47  ;;  %v11195_v28 = vld [vmem:[#allocation7 + $0x13c] sm:$0xf] }
 0x267   : > { %2763 = vmatpush.bf16.msrb.mxu2 %v9744_v54  ;;  %v11383_v54 = vld [vmem:[#allocation2 + $0x104] sm:$0xf0] }
 0x269   : > { %v11499_v61 = vld [vmem:[#allocation2 + $0x220] sm:$0xf0]  ;;  %v11411_v39 = vld [vmem:[#allocation2 + $0x224] sm:$0xf0] }
 0x26a   : > { %v11387_v29 = vld [vmem:[#allocation2 + $0x224] sm:$0xf0]  ;;  %v10696_v58 = vor.u32 %v11499_v61, %v10695_v22  ;;  %v10312_v17 = vor.u32 %v11411_v39, %v10311_v23  ;;  %v10028_v22 = vor.u32 %v11343_v59, %v10027_v27  ;;  %v3369_v39 = vsel %vm17250_vm0, %v10200_v9, 0 }
 0x26b   : > { %v10208_v37 = vor.u32 %v11387_v29, %v10207_v15  ;;  %v2379_v14 = vpop.f32.mrf.mxu2  ;;  %v2284_v30 = vpop.f32.mrf.mxu0 }
 0x26c   : > { %v12854_v34 = vadd.f32 %v2379_v14, %v2331_v36  ;;  %v12856_v48 = vpop.f32.mrf.mxu3  ;;  %7259 = vrot.lane.b32.xlu1 %v10696_v58, %s12291_s21  ;;  %4106 = vrot.lane.b32.xlu0 %v10312_v17, %s12291_s21  ;;  %v2333_v18 = vpop.f32.mrf.mxu1  ;;  %v9453_v36 = vld [vmem:[#allocation7 + $0x15c] sm:$0xf0]  ;;  %v11384_v58 = vld [vmem:[#allocation2 + $0x14c] sm:$0xf0] }
 0x26d   : > { %v3375_v35 = vsel %vm17250_vm0, %v10208_v37, 0  ;;  %v2334_v8 = vadd.f32 %v2333_v18, %v2284_v30  ;;  %v9456_v56 = vor.u32 %v11195_v28, %v9453_v36  ;;  %2665 = vmatpush.bf16.msrb.mxu0 %v10028_v22  ;;  %v10195_v37 = vld [vmem:[#allocation2 + $0x12c] sm:$0xf]  ;;  %v11258_v30 = vld [vmem:[#allocation7 + $0x334] sm:$0xf]  ;;  %v10192_v36 = vor.u32 %v11383_v54, %v10191_v7 }
 0x26e   : > { %3377 = vmatpush.bf16.xpose.msra.mxu3 %v3375_v35  ;;  %2479 = vmatmul.bf16.gmra.mxu0 %v12472_v20  ;;  %v10196_v14 = vor.u32 %v11384_v58, %v10195_v37  ;;  %v9705_v35 = vld [vmem:[#allocation7 + $0x354] sm:$0xf0]  ;;  %v11334_v28 = vld [vmem:[#allocation7 + $0x590] sm:$0xf0]  ;;  %v10187_v58 = vld [vmem:[#allocation2 + $0x9c] sm:$0xf]  ;;  %v12894_v37 = vpop.permute.xlu0 %4038 }
 0x26f   : > { %2528 = vmatmul.bf16.gmra.mxu1 %v12474_v21  ;;  %v9708_v18 = vor.u32 %v11258_v30, %v9705_v35  ;;  %17407 = vst [vmem:[#allocation26_spill] sm:$0xff] %v12894_v37  ;;  %v9669_v30 = vld [vmem:[#allocation7 + $0x30c] sm:$0xf0]  ;;  %v9955_v7 = vld [vmem:[#allocation7 + $0x528] sm:$0xf] }
 0x270   : > { %2577 = vmatmul.bf16.gmra.mxu2 %v12470_v19  ;;  %2714 = vmatpush.bf16.msrb.mxu1 %v9456_v56  ;;  %v3366_v38 = vsel %vm17250_vm0, %v10196_v14, 0  ;;  %v11249_v14 = vld [vmem:[#allocation7 + $0x2ec] sm:$0xf] }
 0x271   : > { %2626 = vmatmul.bf16.gmra.mxu3 %v12472_v20  ;;  %2764 = vmatpush.bf16.msrb.mxu2 %v9708_v18  ;;  %v9672_v35 = vor.u32 %v11249_v14, %v9669_v30  ;;  %v9345_v14 = vld [vmem:[#allocation7 + $0x84] sm:$0xf0] }
 0x273   : > { %v2382_v10 = vpop.f32.mrf.mxu2  ;;  %v2286_v57 = vpop.f32.mrf.mxu0 }
 0x274   : > { %v12865_v44 = vadd.f32 %v2382_v10, %v2334_v8  ;;  %v12867_v52 = vpop.f32.mrf.mxu3  ;;  %v2335_v45 = vpop.f32.mrf.mxu1 }
 0x275   : > { %v2336_v6 = vadd.f32 %v2335_v45, %v2286_v57  ;;  %v11186_v57 = vld [vmem:[#allocation7 + $0xf4] sm:$0xf]  ;;  %v9991_v45 = vld [vmem:[#allocation7 + $0x570] sm:$0xf]  ;;  %2765 = vmatpush.bf16.msrb.mxu2 %v9672_v35 }
 0x276   : > { %3378 = vmatpush.bf16.xpose.msra.mxu3 %v3372_v60  ;;  %v9417_v60 = vld [vmem:[#allocation7 + $0x114] sm:$0xf0]  ;;  %v9992_v27 = vor.u32 %v11334_v28, %v9991_v45  ;;  %v9381_v45 = vld [vmem:[#allocation7 + $0xcc] sm:$0xf0] }
 0x277   : > { %v11380_v35 = vld [vmem:[#allocation2 + $0x2c] sm:$0xf0] }
 0x278   : > { %2666 = vmatpush.bf16.msrb.mxu0 %v9992_v27 }
 0x27b   : > { %v2384_v23 = vpop.f32.mrf.mxu2  ;;  %v2289_v61 = vpop.f32.mrf.mxu0 }
 0x27c   : > { %v12870_v15 = vadd.f32 %v2384_v23, %v2336_v6  ;;  %v12872_v4 = vpop.f32.mrf.mxu3  ;;  %v2338_v29 = vpop.f32.mrf.mxu1  ;;  %v9420_v6 = vor.u32 %v11186_v57, %v9417_v60  ;;  %v3363_v23 = vsel %vm17250_vm0, %v10192_v36, 0  ;;  %v11177_v60 = vld [vmem:[#allocation7 + $0xac] sm:$0xf] }
 0x27d   : > { %v2339_v17 = vadd.f32 %v2338_v29, %v2289_v61  ;;  %v9384_v28 = vor.u32 %v11177_v60, %v9381_v45  ;;  %v11325_v36 = vld [vmem:[#allocation7 + $0x548] sm:$0xf0]  ;;  %v11240_v45 = vld [vmem:[#allocation7 + $0x2a4] sm:$0xf] }
 0x27e   : > { %3379 = vmatpush.bf16.xpose.msra.mxu3 %v3369_v39  ;;  %2484 = vmatmul.bf16.gmra.mxu0 %v12488_v41  ;;  %v11382_v39 = vld [vmem:[#allocation2 + $0xbc] sm:$0xf0] }
 0x27f   : > { %2533 = vmatmul.bf16.gmra.mxu1 %v12490_v42 }
 0x280   : > { %2582 = vmatmul.bf16.gmra.mxu2 %v12486_v40  ;;  %2715 = vmatpush.bf16.msrb.mxu1 %v9420_v6  ;;  %v10183_v6 = vld [vmem:[#allocation2 + $0x54] sm:$0xf] }
 0x281   : > { %2631 = vmatmul.bf16.gmra.mxu3 %v12488_v41 }
 0x283   : > { %v2387_v63 = vpop.f32.mrf.mxu2  ;;  %v2291_v13 = vpop.f32.mrf.mxu0 }
 0x284   : > { %v12879_v8 = vadd.f32 %v2387_v63, %v2339_v17  ;;  %v12881_v12 = vpop.f32.mrf.mxu3  ;;  %v2340_v47 = vpop.f32.mrf.mxu1  ;;  %v10188_v17 = vor.u32 %v11382_v39, %v10187_v58  ;;  %2716 = vmatpush.bf16.msrb.mxu1 %v9384_v28  ;;  %v9855_v28 = vld [vmem:[#allocation7 + $0x458] sm:$0xf] }
 0x285   : > { %v2341_v10 = vadd.f32 %v2340_v47, %v2291_v13 }
 0x286   : > { %3380 = vmatpush.bf16.xpose.msra.mxu3 %v3366_v38  ;;  %v3360_v47 = vsel %vm17250_vm0, %v10188_v17, 0  ;;  %v11168_v17 = vld [vmem:[#allocation7 + $0x64] sm:$0xf] }
 0x28b   : > { %v2389_v56 = vpop.f32.mrf.mxu2  ;;  %v2294_v22 = vpop.f32.mrf.mxu0 }
 0x28c   : > { %v12886_v59 = vadd.f32 %v2389_v56, %v2341_v10  ;;  %v12888_v9 = vpop.f32.mrf.mxu3  ;;  %v2343_v61 = vpop.f32.mrf.mxu1  ;;  %v11381_v10 = vld [vmem:[#allocation2 + $0x74] sm:$0xf0]  ;;  %v9956_v56 = vor.u32 %v11325_v36, %v9955_v7  ;;  %v9633_v7 = vld [vmem:[#allocation7 + $0x2c4] sm:$0xf0] }
 0x28d   : > { %v2344_v29 = vadd.f32 %v2343_v61, %v2294_v22  ;;  %v10184_v27 = vor.u32 %v11381_v10, %v10183_v6  ;;  %v12902_v22 = vpop.permute.xlu0 %4044  ;;  %v11159_v10 = vld [vmem:[#allocation7 + $0x1c] sm:$0xf]  ;;  %v9636_v36 = vor.u32 %v11240_v45, %v9633_v7  ;;  %v11316_v45 = vld [vmem:[#allocation7 + $0x500] sm:$0xf0] }
 0x28e   : > { %3381 = vmatpush.bf16.xpose.msra.mxu3 %v3363_v23  ;;  %2489 = vmatmul.bf16.gmra.mxu0 %v12504_v1  ;;  %17408 = vst [vmem:[#allocation20_spill] sm:$0xff] %v12902_v22 }
 0x28f   : > { %2538 = vmatmul.bf16.gmra.mxu1 %v12506_v2  ;;  %2667 = vmatpush.bf16.msrb.mxu0 %v9956_v56  ;;  %v3357_v58 = vsel %vm17250_vm0, %v10184_v27, 0  ;;  %v11299_v27 = vld [vmem:[#allocation7 + $0x478] sm:$0xf0] }
 0x290   : > { %2587 = vmatmul.bf16.gmra.mxu2 %v12502_v0 }
 0x291   : > { %2636 = vmatmul.bf16.gmra.mxu3 %v12504_v1  ;;  %2766 = vmatpush.bf16.msrb.mxu2 %v9636_v36 }
 0x293   : > { %v2392_v18 = vpop.f32.mrf.mxu2  ;;  %v2296_v38 = vpop.f32.mrf.mxu0 }
 0x294   : > { %v12897_v63 = vadd.f32 %v2392_v18, %v2344_v29  ;;  %v12899_v13 = vpop.f32.mrf.mxu3  ;;  %v2345_v54 = vpop.f32.mrf.mxu1  ;;  %v9348_v18 = vor.u32 %v11168_v17, %v9345_v14 }
 0x295   : > { %v2346_v57 = vadd.f32 %v2345_v54, %v2296_v38  ;;  %v12912_v60 = vpop.permute.xlu0 %4046 }
 0x296   : > { %3382 = vmatpush.bf16.xpose.msra.mxu3 %v3360_v47  ;;  %v10179_v47 = vld [vmem:[#allocation2 + $0xc] sm:$0xf]  ;;  %2717 = vmatpush.bf16.msrb.mxu1 %v9348_v18  ;;  %17409 = vst [vmem:[#allocation25_spill] sm:$0xff] %v12912_v60  ;;  %v11290_v18 = vld [vmem:[#allocation7 + $0x430] sm:$0xf0] }
 0x297   : > { %v10180_v54 = vor.u32 %v11380_v35, %v10179_v47  ;;  %v9819_v35 = vld [vmem:[#allocation7 + $0x410] sm:$0xf] }
 0x299   : > { %v3354_v14 = vsel %vm17250_vm0, %v10180_v54, 0 }
 0x29b   : > { %v2394_v23 = vpop.f32.mrf.mxu2  ;;  %v2299_v29 = vpop.f32.mrf.mxu0 }
 0x29c   : > { %v12904_v61 = vadd.f32 %v2394_v23, %v2346_v57  ;;  %v12906_v39 = vpop.f32.mrf.mxu3  ;;  %v2348_v30 = vpop.f32.mrf.mxu1  ;;  %v9309_v57 = vld [vmem:[#allocation7 + $0x3c] sm:$0xf0]  ;;  %v9856_v23 = vor.u32 %v11299_v27, %v9855_v28  ;;  %v11281_v28 = vld [vmem:[#allocation7 + $0x3e8] sm:$0xf0] }
 0x29d   : > { %v2349_v38 = vadd.f32 %v2348_v30, %v2299_v29  ;;  %v9312_v6 = vor.u32 %v11159_v10, %v9309_v57  ;;  %v9820_v10 = vor.u32 %v11290_v18, %v9819_v35  ;;  %v9919_v57 = vld [vmem:[#allocation7 + $0x4e0] sm:$0xf] }
 0x29e   : > { %3383 = vmatpush.bf16.xpose.msra.mxu3 %v3357_v58  ;;  %2494 = vmatmul.bf16.gmra.mxu0 %v12520_v25  ;;  %v9920_v7 = vor.u32 %v11316_v45, %v9919_v57  ;;  %v12926_v57 = vpop.permute.xlu2 %4036  ;;  %v9711_v45 = vld [vmem:[#allocation7 + $0x338] sm:$0xf] }
 0x29f   : > { %2543 = vmatmul.bf16.gmra.mxu1 %v12522_v26  ;;  %17411 = vst [vmem:[#allocation17_spill] sm:$0xff] %v12926_v57 }
 0x2a0   : > { %2592 = vmatmul.bf16.gmra.mxu2 %v12518_v24  ;;  %2718 = vmatpush.bf16.msrb.mxu1 %v9312_v6  ;;  %v12920_v6 = vpop.permute.xlu0 %4048 }
 0x2a1   : > { %2641 = vmatmul.bf16.gmra.mxu3 %v12520_v25  ;;  %17410 = vst [vmem:[#allocation27_spill] sm:$0xff] %v12920_v6  ;;  %2668 = vmatpush.bf16.msrb.mxu0 %v9920_v7  ;;  %v11254_v6 = vld [vmem:[#allocation7 + $0x310] sm:$0xf0] }
 0x2a3   : > { %v2397_v56 = vpop.f32.mrf.mxu2  ;;  %v2301_v17 = vpop.f32.mrf.mxu0 }
 0x2a4   : > { %v12915_v29 = vadd.f32 %v2397_v56, %v2349_v38  ;;  %v12917_v58 = vpop.f32.mrf.mxu3  ;;  %v2350_v30 = vpop.f32.mrf.mxu1  ;;  %2907 = vmatpush.bf16.msra.mxu1 %v9856_v23  ;;  %v9783_v38 = vld [vmem:[#allocation7 + $0x3c8] sm:$0xf] }
 0x2a5   : > { %v2351_v47 = vadd.f32 %v2350_v30, %v2301_v17  ;;  %v9784_v27 = vor.u32 %v11281_v28, %v9783_v38  ;;  %v9747_v17 = vld [vmem:[#allocation7 + $0x380] sm:$0xf]  ;;  %v11272_v30 = vld [vmem:[#allocation7 + $0x3a0] sm:$0xf0]  ;;  %v11263_v38 = vld [vmem:[#allocation7 + $0x358] sm:$0xf0] }
 0x2a6   : > { %3384 = vmatpush.bf16.xpose.msra.mxu3 %v3354_v14  ;;  %v9748_v18 = vor.u32 %v11272_v30, %v9747_v17  ;;  %v12938_v30 = vpop.permute.xlu1 %5643  ;;  %v12940_v37 = vpop.permute.xlu2 %5645 }
 0x2a7   : > { %17413 = vst [vmem:[#allocation29_spill] sm:$0xff] %v12938_v30 }
 0x2a8   : > { %2908 = vmatpush.bf16.msra.mxu1 %v9820_v10  ;;  %v9597_v10 = vld [vmem:[#allocation7 + $0x27c] sm:$0xf0]  ;;  %v12932_v28 = vpop.permute.xlu0 %5653  ;;  %17414 = vst [vmem:[#allocation30_spill] sm:$0xff] %v12940_v37 }
 0x2a9   : > { %17412 = vst [vmem:[#allocation28_spill] sm:$0xff] %v12932_v28 }
 0x2ab   : > { %v2399_v56 = vpop.f32.mrf.mxu2  ;;  %v2304_v23 = vpop.f32.mrf.mxu0 }
 0x2ac   : > { %v12922_v54 = vadd.f32 %v2399_v56, %v2351_v47  ;;  %v12924_v36 = vpop.f32.mrf.mxu3  ;;  %v2353_v14 = vpop.f32.mrf.mxu1  ;;  %2909 = vmatpush.bf16.msra.mxu1 %v9784_v27  ;;  %v11231_v47 = vld [vmem:[#allocation7 + $0x25c] sm:$0xf]  ;;  %v9712_v56 = vor.u32 %v11263_v38, %v9711_v45  ;;  %v11245_v45 = vld [vmem:[#allocation7 + $0x2c8] sm:$0xf0] }
 0x2ad   : > { %v2354_v35 = vadd.f32 %v2353_v14, %v2304_v23  ;;  %v9600_v7 = vor.u32 %v11231_v47, %v9597_v10  ;;  %v9883_v47 = vld [vmem:[#allocation7 + $0x498] sm:$0xf]  ;;  %v11307_v10 = vld [vmem:[#allocation7 + $0x4b8] sm:$0xf0] }
 0x2ae   : > { %2499 = vmatmul.bf16.gmra.mxu0 %v12536_v50  ;;  %v9884_v28 = vor.u32 %v11307_v10, %v9883_v47  ;;  %v12946_v57 = vpop.permute.xlu1 %4040 }
 0x2af   : > { %2548 = vmatmul.bf16.gmra.mxu1 %v12538_v53  ;;  %2767 = vmatpush.bf16.msrb.mxu2 %v9600_v7  ;;  %17415 = vst [vmem:[#allocation31_spill] sm:$0xff] %v12946_v57 }
 0x2b0   : > { %2597 = vmatmul.bf16.gmra.mxu2 %v12534_v49  ;;  %2910 = vmatpush.bf16.msra.mxu1 %v9748_v18  ;;  %v9675_v18 = vld [vmem:[#allocation7 + $0x2f0] sm:$0xf] }
 0x2b1   : > { %2646 = vmatmul.bf16.gmra.mxu3 %v12536_v50  ;;  %v9676_v22 = vor.u32 %v11254_v6, %v9675_v18  ;;  %2669 = vmatpush.bf16.msrb.mxu0 %v9884_v28  ;;  %v9603_v6 = vld [vmem:[#allocation7 + $0x260] sm:$0xf]  ;;  %v12948_v18 = vpop.permute.xlu0 %4050  ;;  %v12950_v28 = vpop.permute.xlu2 %4042 }
 0x2b2   : > { %17416 = vst [vmem:[#allocation32_spill] sm:$0xff] %v12948_v18 }
 0x2b3   : > { %v2402_v27 = vpop.f32.mrf.mxu2  ;;  %v2306_v17 = vpop.f32.mrf.mxu0  ;;  %17417 = vst [vmem:[#allocation33_spill] sm:$0xff] %v12950_v28 }
 0x2b4   : > { %v12934_v23 = vadd.f32 %v2402_v27, %v2354_v35  ;;  %v12936_v14 = vpop.f32.mrf.mxu3  ;;  %v2355_v31 = vpop.f32.mrf.mxu1  ;;  %2911 = vmatpush.bf16.msra.mxu1 %v9712_v56  ;;  %v9639_v35 = vld [vmem:[#allocation7 + $0x2a8] sm:$0xf] }
 0x2b5   : > { %v2356_v60 = vadd.f32 %v2355_v31, %v2306_v17  ;;  %v9640_v38 = vor.u32 %v11245_v45, %v9639_v35  ;;  %v11236_v17 = vld [vmem:[#allocation7 + $0x280] sm:$0xf0] }
 0x2b8   : > { %2912 = vmatpush.bf16.msra.mxu1 %v9676_v22  ;;  %v9604_v22 = vor.u32 %v11236_v17, %v9603_v6 }
 0x2b9   : > { %v12964_v6 = vpop.permute.xlu2 %5647 }
 0x2ba   : > { %17420 = vst [vmem:[#allocation36_spill] sm:$0xff] %v12964_v6 }
 0x2bb   : > { %v2404_v27 = vpop.f32.mrf.mxu2  ;;  %v2309_v56 = vpop.f32.mrf.mxu0 }
 0x2bc   : > { %v12942_v7 = vadd.f32 %v2404_v27, %v2356_v60  ;;  %v12944_v30 = vpop.f32.mrf.mxu3  ;;  %v2358_v31 = vpop.f32.mrf.mxu1  ;;  %2913 = vmatpush.bf16.msra.mxu1 %v9640_v38 }
 0x2bd   : > { %v2359_v47 = vadd.f32 %v2358_v31, %v2309_v56  ;;  %v12960_v38 = vpop.permute.xlu1 %5649  ;;  %v12962_v56 = vpop.permute.xlu0 %4094 }
 0x2be   : > { %2504 = vmatmul.bf16.gmra.mxu0 %v17400_v16  ;;  %17419 = vst [vmem:[#allocation35_spill] sm:$0xff] %v12960_v38 }
 0x2bf   : > { %2553 = vmatmul.bf16.gmra.mxu1 %v17398_v55 }
 0x2c0   : > { %2602 = vmatmul.bf16.gmra.mxu2 %v17399_v3  ;;  %2914 = vmatpush.bf16.msra.mxu1 %v9604_v22 }
 0x2c1   : > { %2651 = vmatmul.bf16.gmra.mxu3 %v17400_v16 }
 0x2c3   : > { %v2407_v60 = vpop.f32.mrf.mxu2  ;;  %v2311_v45 = vpop.f32.mrf.mxu0 }
 0x2c4   : > { %v12956_v10 = vadd.f32 %v2407_v60, %v2359_v47  ;;  %v12958_v35 = vpop.f32.mrf.mxu3  ;;  %v2360_v27 = vpop.f32.mrf.mxu1 }
 0x2c5   : > { %v2361_v31 = vadd.f32 %v2360_v27, %v2311_v45  ;;  %v12970_v28 = vpop.permute.xlu1 %4092  ;;  %v12975_v45 = vpop.permute.xlu2 %5651 }
 0x2c6   : > { %17418 = vst [vmem:[#allocation34_spill] sm:$0xff] %v12956_v10  ;;  %v9567_v10 = vld [vmem:[#allocation7 + $0x218] sm:$0xf] }
 0x2c7   : > { %17423 = vst [vmem:[#allocation39_spill] sm:$0xff] %v12975_v45 }
 0x2cb   : > { %v2409_v17 = vpop.f32.mrf.mxu2  ;;  %v2314_v22 = vpop.f32.mrf.mxu0 }
 0x2cc   : > { %v12966_v37 = vadd.f32 %v2409_v17, %v2361_v31  ;;  %v12968_v18 = vpop.f32.mrf.mxu3  ;;  %v2363_v47 = vpop.f32.mrf.mxu1  ;;  %v10143_v31 = vld [vmem:[#allocation7 + $0x698] sm:$0xf]  ;;  %v11371_v17 = vld [vmem:[#allocation7 + $0x6b8] sm:$0xf0] }
 0x2cd   : > { %17422 = vst [vmem:[#allocation38_spill] sm:$0xff] %v12968_v18  ;;  %v2364_v60 = vadd.f32 %v2363_v47, %v2314_v22  ;;  %v10144_v22 = vor.u32 %v11371_v17, %v10143_v31  ;;  %v12982_v47 = vpop.permute.xlu1 %7247 }
 0x2ce   : > { %17421 = vst [vmem:[#allocation37_spill] sm:$0xff] %v12966_v37  ;;  %v4105_v57 = vpop.permute.xlu0 %4104  ;;  %2509 = vmatmul.bf16.gmra.mxu0 %v17403_v33 }
 0x2cf   : > { %2558 = vmatmul.bf16.gmra.mxu1 %v12570_v43  ;;  %17426 = vst [vmem:[#allocation42_spill] sm:$0xff] %v12982_v47  ;;  %v11227_v43 = vld [vmem:[#allocation7 + $0x238] sm:$0xf0]  ;;  %2956 = vmatpush.bf16.msra.mxu2 %v10144_v22 }
 0x2d0   : > { %2607 = vmatmul.bf16.gmra.mxu2 %v17402_v11  ;;  %v9568_v45 = vor.u32 %v11227_v43, %v9567_v10  ;;  %v11362_v10 = vld [vmem:[#allocation7 + $0x670] sm:$0xf0] }
 0x2d1   : > { %2656 = vmatmul.bf16.gmra.mxu3 %v17403_v33  ;;  %v12986_v33 = vpop.permute.xlu2 %5655 }
 0x2d2   : > { %2858 = vmatpush.bf16.msra.mxu0 %v9568_v45  ;;  %17428 = vst [vmem:[#allocation44_spill] sm:$0xff] %v12986_v33 }
 0x2d3   : > { %v2412_v27 = vpop.f32.mrf.mxu2  ;;  %v2316_v37 = vpop.f32.mrf.mxu0 }
 0x2d4   : > { %v12978_v38 = vadd.f32 %v2412_v27, %v2364_v60  ;;  %v12980_v6 = vpop.f32.mrf.mxu3  ;;  %v2365_v18 = vpop.f32.mrf.mxu1 }
 0x2d5   : > { %17425 = vst [vmem:[#allocation41_spill] sm:$0xff] %v12980_v6  ;;  %v2366_v16 = vadd.f32 %v2365_v18, %v2316_v37  ;;  %v12992_v31 = vpop.permute.xlu1 %7251 }
 0x2d6   : > { %17424 = vst [vmem:[#allocation40_spill] sm:$0xff] %v12978_v38  ;;  %v12984_v11 = vpop.permute.xlu0 %7257 }
 0x2d7   : > { %17427 = vst [vmem:[#allocation43_spill] sm:$0xff] %v12984_v11 }
 0x2d8   : > { %17429 = vst [vmem:[#allocation45_spill] sm:$0xff] %v12992_v31  ;;  %v9531_v31 = vld [vmem:[#allocation7 + $0x1d0] sm:$0xf] }
 0x2d9   : > { %v12999_v43 = vpop.permute.xlu2 %7245 }
 0x2da   : > { %17430 = vst [vmem:[#allocation46_spill] sm:$0xff] %v12999_v43  ;;  %v11218_v43 = vld [vmem:[#allocation7 + $0x1f0] sm:$0xf0] }
 0x2db   : > { %v2414_v3 = vpop.f32.mrf.mxu2  ;;  %v2475_v38 = vpop.f32.mrf.mxu0 }
 0x2dc   : > { %v12988_v60 = vadd.f32 %v2414_v3, %v2366_v16  ;;  %v12990_v27 = vpop.f32.mrf.mxu3  ;;  %v2476_v17 = vadd.f32 %v2475_v38, %v12851_v5  ;;  %v2524_v47 = vpop.f32.mrf.mxu1  ;;  %v10107_v5 = vld [vmem:[#allocation7 + $0x650] sm:$0xf] }
 0x2dd   : > { %v4101_v22 = vpop.permute.xlu1 %4100 }
 0x2de   : > { %v4107_v6 = vpop.permute.xlu0 %4106  ;;  %v2525_v37 = vadd.f32 %v2524_v47, %v2476_v17  ;;  %2670 = vmatmul.bf16.vlgmr.msrb.gmra.mxu0 %v17405_v62 }
 0x2df   : > { %v4154_v18 = vsel %vm17250_vm0, %v4107_v6, 0  ;;  %2719 = vmatmul.bf16.vlgmr.msrb.gmra.mxu1 %v12454_v46  ;;  %v10108_v6 = vor.u32 %v11362_v10, %v10107_v5 }
 0x2e0   : > { %2768 = vmatmul.bf16.vlgmr.msrb.gmra.mxu2 %v12456_v51  ;;  %v3007_v3 = vpack.c.bf16 %v2525_v37, %v12849_v32  ;;  %4156 = vmatpush.bf16.xpose.msrb.mxu1 %v4154_v18  ;;  %v9532_v32 = vor.u32 %v11218_v43, %v9531_v31  ;;  %v4151_v18 = vsel %vm17250_vm0, %v4105_v57, 0 }
 0x2e1   : > { %2817 = vmatmul.bf16.vlgmr.msrb.gmra.mxu3 %v17405_v62  ;;  %2957 = vmatpush.bf16.msra.mxu2 %v10108_v6 }
 0x2e2   : > { %3087 = vst [vmem:[#allocation2 + $0x10] sm:$0xff] %v3007_v3  ;;  %2859 = vmatpush.bf16.msra.mxu0 %v9532_v32  ;;  %v13007_v3 = vpop.permute.xlu2 %4096 }
 0x2e3   : > { %v2573_v16 = vpop.f32.mrf.mxu2  ;;  %v2477_v45 = vpop.f32.mrf.mxu0 }
 0x2e4   : > { %v2622_v38 = vpop.f32.mrf.mxu3  ;;  %v2478_v17 = vadd.f32 %v2477_v45, %v12856_v48  ;;  %v2526_v11 = vpop.f32.mrf.mxu1 }
 0x2e5   : > { %v13003_v47 = vadd.f32 %v2622_v38, %v2573_v16  ;;  %v4103_v38 = vpop.permute.xlu1 %4102 }
 0x2e6   : > { %v2527_v37 = vadd.f32 %v2526_v11, %v2478_v17  ;;  %v4148_v11 = vsel %vm17250_vm0, %v4103_v38, 0 }
 0x2e8   : > { %v3012_v33 = vpack.c.bf16 %v2527_v37, %v12854_v34  ;;  %4157 = vmatpush.bf16.xpose.msrb.mxu1 %v4151_v18 }
 0x2e9   : > { %v10491_v34 = vld [vmem:[#allocation2 + $0x10] sm:$0xf]  ;;  %v10699_v43 = vld [vmem:[#allocation2 + $0x14] sm:$0xf] }
 0x2ea   : > { %3092 = vst [vmem:[#allocation2 + $0x34] sm:$0xff] %v3012_v33 }
 0x2eb   : > { %v2575_v5 = vpop.f32.mrf.mxu2  ;;  %v2480_v10 = vpop.f32.mrf.mxu0 }
 0x2ec   : > { %v2624_v16 = vpop.f32.mrf.mxu3  ;;  %v2481_v45 = vadd.f32 %v2480_v10, %v12867_v52  ;;  %v2529_v6 = vpop.f32.mrf.mxu1 }
 0x2ed   : > { %v13010_v48 = vadd.f32 %v2624_v16, %v2575_v5  ;;  %v13019_v52 = vpop.permute.xlu2 %7249  ;;  %v10071_v5 = vld [vmem:[#allocation7 + $0x608] sm:$0xf]  ;;  %v11353_v16 = vld [vmem:[#allocation7 + $0x628] sm:$0xf0] }
 0x2ee   : > { %v2530_v31 = vadd.f32 %v2529_v6, %v2481_v45  ;;  %2675 = vmatmul.bf16.gmra.mxu0 %v12474_v21  ;;  %17431 = vst [vmem:[#allocation47_spill] sm:$0xff] %v13019_v52  ;;  %v10072_v38 = vor.u32 %v11353_v16, %v10071_v5  ;;  %v11209_v52 = vld [vmem:[#allocation7 + $0x1a8] sm:$0xf0] }
 0x2ef   : > { %2724 = vmatmul.bf16.gmra.mxu1 %v12470_v19 }
 0x2f0   : > { %2773 = vmatmul.bf16.gmra.mxu2 %v12472_v20  ;;  %v3017_v33 = vpack.c.bf16 %v2530_v31, %v12865_v44  ;;  %4158 = vmatpush.bf16.xpose.msrb.mxu1 %v4148_v11  ;;  %v9495_v11 = vld [vmem:[#allocation7 + $0x188] sm:$0xf] }
 0x2f1   : > { %2822 = vmatmul.bf16.gmra.mxu3 %v12474_v21  ;;  %v11452_v57 = vld [vmem:[#allocation2 + $0x30] sm:$0xf0]  ;;  %v11500_v17 = vld [vmem:[#allocation2 + $0x34] sm:$0xf0]  ;;  %2958 = vmatpush.bf16.msra.mxu2 %v10072_v38 }
 0x2f2   : > { %3097 = vst [vmem:[#allocation2 + $0x58] sm:$0xff] %v3017_v33  ;;  %v10492_v37 = vor.u32 %v11452_v57, %v10491_v34  ;;  %v10700_v18 = vor.u32 %v11500_v17, %v10699_v43  ;;  %v9496_v33 = vor.u32 %v11209_v52, %v9495_v11  ;;  %v4145_v57 = vsel %vm17250_vm0, %v4101_v22, 0 }
 0x2f3   : > { %v2578_v32 = vpop.f32.mrf.mxu2  ;;  %v2482_v45 = vpop.f32.mrf.mxu0 }
 0x2f4   : > { %v2627_v10 = vpop.f32.mrf.mxu3  ;;  %v2483_v44 = vadd.f32 %v2482_v45, %v12872_v4  ;;  %v2531_v31 = vpop.f32.mrf.mxu1  ;;  %5697 = vrot.lane.b32.xlu2 %v10492_v37, %s12291_s21  ;;  %7301 = vrot.lane.b32.xlu0 %v10700_v18, %s12291_s21 }
 0x2f5   : > { %v13021_v6 = vadd.f32 %v2627_v10, %v2578_v32  ;;  %2860 = vmatpush.bf16.msra.mxu0 %v9496_v33  ;;  %v4099_v5 = vpop.permute.xlu2 %4098 }
 0x2f6   : > { %v2532_v34 = vadd.f32 %v2531_v31, %v2483_v44  ;;  %v10035_v44 = vld [vmem:[#allocation7 + $0x5c0] sm:$0xf]  ;;  %v11344_v31 = vld [vmem:[#allocation7 + $0x5e0] sm:$0xf0] }
 0x2f8   : > { %v3022_v43 = vpack.c.bf16 %v2532_v34, %v12870_v15  ;;  %4159 = vmatpush.bf16.xpose.msrb.mxu1 %v4145_v57  ;;  %v4142_v15 = vsel %vm17250_vm0, %v4099_v5, 0  ;;  %v10036_v34 = vor.u32 %v11344_v31, %v10035_v44 }
 0x2f9   : > { %v10495_v52 = vld [vmem:[#allocation2 + $0x58] sm:$0xf] }
 0x2fa   : > { %3102 = vst [vmem:[#allocation2 + $0x7c] sm:$0xff] %v3022_v43  ;;  %2959 = vmatpush.bf16.msra.mxu2 %v10036_v34 }
 0x2fb   : > { %v2580_v17 = vpop.f32.mrf.mxu2  ;;  %v2485_v4 = vpop.f32.mrf.mxu0 }
 0x2fc   : > { %v2629_v32 = vpop.f32.mrf.mxu3  ;;  %v2486_v37 = vadd.f32 %v2485_v4, %v12881_v12  ;;  %v2534_v18 = vpop.f32.mrf.mxu1 }
 0x2fd   : > { %v13028_v16 = vadd.f32 %v2629_v32, %v2580_v17  ;;  %v11200_v32 = vld [vmem:[#allocation7 + $0x160] sm:$0xf0] }
 0x2fe   : > { %v2535_v10 = vadd.f32 %v2534_v18, %v2486_v37  ;;  %2680 = vmatmul.bf16.gmra.mxu0 %v12490_v42  ;;  %v4139_v37 = vsel %vm17250_vm0, %v13007_v3, 0 }
 0x2ff   : > { %2729 = vmatmul.bf16.gmra.mxu1 %v12486_v40 }
 0x300   : > { %2778 = vmatmul.bf16.gmra.mxu2 %v12488_v41  ;;  %v3027_v22 = vpack.c.bf16 %v2535_v10, %v12879_v8  ;;  %4160 = vmatpush.bf16.xpose.msrb.mxu1 %v4142_v15  ;;  %v9459_v8 = vld [vmem:[#allocation7 + $0x140] sm:$0xf]  ;;  %v10703_v15 = vld [vmem:[#allocation2 + $0x5c] sm:$0xf] }
 0x301   : > { %2827 = vmatmul.bf16.gmra.mxu3 %v12490_v42  ;;  %v11453_v45 = vld [vmem:[#allocation2 + $0x78] sm:$0xf0]  ;;  %v9460_v4 = vor.u32 %v11200_v32, %v9459_v8  ;;  %v11501_v18 = vld [vmem:[#allocation2 + $0x7c] sm:$0xf0]  ;;  %v9999_v32 = vld [vmem:[#allocation7 + $0x578] sm:$0xf] }
 0x302   : > { %3107 = vst [vmem:[#allocation2 + $0xa0] sm:$0xff] %v3027_v22  ;;  %v10496_v12 = vor.u32 %v11453_v45, %v10495_v52 }
 0x303   : > { %v2583_v38 = vpop.f32.mrf.mxu2  ;;  %v2487_v33 = vpop.f32.mrf.mxu0  ;;  %2861 = vmatpush.bf16.msra.mxu0 %v9460_v4  ;;  %v11335_v4 = vld [vmem:[#allocation7 + $0x598] sm:$0xf0] }
 0x304   : > { %v2632_v11 = vpop.f32.mrf.mxu3  ;;  %v2488_v43 = vadd.f32 %v2487_v33, %v12888_v9  ;;  %v2536_v17 = vpop.f32.mrf.mxu1  ;;  %5699 = vrot.lane.b32.xlu1 %v10496_v12, %s12291_s21  ;;  %v10704_v9 = vor.u32 %v11501_v18, %v10703_v15  ;;  %v10000_v18 = vor.u32 %v11335_v4, %v9999_v32  ;;  %v9423_v15 = vld [vmem:[#allocation7 + $0xf8] sm:$0xf] }
 0x305   : > { %v13037_v57 = vadd.f32 %v2632_v11, %v2583_v38 }
 0x306   : > { %v2537_v5 = vadd.f32 %v2536_v17, %v2488_v43  ;;  %2960 = vmatpush.bf16.msra.mxu2 %v10000_v18 }
 0x308   : > { %v3032_v10 = vpack.c.bf16 %v2537_v5, %v12886_v59  ;;  %4161 = vmatpush.bf16.xpose.msrb.mxu1 %v4139_v37  ;;  %v4136_v59 = vsel %vm17250_vm0, %v12962_v56, 0 }
 0x309   : > { %v10707_v11 = vld [vmem:[#allocation2 + $0xa4] sm:$0xf]  ;;  %v10499_v33 = vld [vmem:[#allocation2 + $0xa0] sm:$0xf] }
 0x30a   : > { %3112 = vst [vmem:[#allocation2 + $0xc4] sm:$0xff] %v3032_v10 }
 0x30b   : > { %v2585_v22 = vpop.f32.mrf.mxu2  ;;  %v2490_v45 = vpop.f32.mrf.mxu0 }
 0x30c   : > { %v2634_v52 = vpop.f32.mrf.mxu3  ;;  %v2491_v12 = vadd.f32 %v2490_v45, %v12899_v13  ;;  %v2539_v44 = vpop.f32.mrf.mxu1  ;;  %7303 = vrot.lane.b32.xlu1 %v10704_v9, %s12291_s21  ;;  %v4133_v45 = vsel %vm17250_vm0, %v12970_v28, 0 }
 0x30d   : > { %v13044_v38 = vadd.f32 %v2634_v52, %v2585_v22  ;;  %v11191_v22 = vld [vmem:[#allocation7 + $0x118] sm:$0xf0] }
 0x30e   : > { %v2540_v31 = vadd.f32 %v2539_v44, %v2491_v12  ;;  %2685 = vmatmul.bf16.gmra.mxu0 %v12506_v2  ;;  %v9424_v9 = vor.u32 %v11191_v22, %v9423_v15 }
 0x30f   : > { %2734 = vmatmul.bf16.gmra.mxu1 %v12502_v0 }
 0x310   : > { %2783 = vmatmul.bf16.gmra.mxu2 %v12504_v1  ;;  %v3037_v3 = vpack.c.bf16 %v2540_v31, %v12897_v63  ;;  %4162 = vmatpush.bf16.xpose.msrb.mxu1 %v4136_v59 }
 0x311   : > { %2832 = vmatmul.bf16.gmra.mxu3 %v12506_v2  ;;  %v11502_v13 = vld [vmem:[#allocation2 + $0xc4] sm:$0xf0]  ;;  %v11454_v34 = vld [vmem:[#allocation2 + $0xc0] sm:$0xf0]  ;;  %2862 = vmatpush.bf16.msra.mxu0 %v9424_v9 }
 0x312   : > { %3117 = vst [vmem:[#allocation2 + $0xe8] sm:$0xff] %v3037_v3  ;;  %v10708_v17 = vor.u32 %v11502_v13, %v10707_v11  ;;  %v10500_v8 = vor.u32 %v11454_v34, %v10499_v33 }
 0x313   : > { %v2588_v43 = vpop.f32.mrf.mxu2  ;;  %v2492_v37 = vpop.f32.mrf.mxu0 }
 0x314   : > { %v2637_v5 = vpop.f32.mrf.mxu3  ;;  %v2493_v63 = vadd.f32 %v2492_v37, %v12906_v39  ;;  %v2541_v56 = vpop.f32.mrf.mxu1  ;;  %7305 = vrot.lane.b32.xlu1 %v10708_v17, %s12291_s21  ;;  %5701 = vrot.lane.b32.xlu2 %v10500_v8, %s12291_s21  ;;  %v9963_v17 = vld [vmem:[#allocation7 + $0x530] sm:$0xf]  ;;  %v11326_v8 = vld [vmem:[#allocation7 + $0x550] sm:$0xf0] }
 0x315   : > { %v13055_v10 = vadd.f32 %v2637_v5, %v2588_v43  ;;  %v9964_v4 = vor.u32 %v11326_v8, %v9963_v17 }
 0x316   : > { %v2542_v52 = vadd.f32 %v2541_v56, %v2493_v63  ;;  %v11182_v63 = vld [vmem:[#allocation7 + $0xd0] sm:$0xf0] }
 0x317   : > { %2961 = vmatpush.bf16.msra.mxu2 %v9964_v4 }
 0x318   : > { %v3042_v12 = vpack.c.bf16 %v2542_v52, %v12904_v61  ;;  %4163 = vmatpush.bf16.xpose.msrb.mxu1 %v4133_v45 }
 0x319   : > { %v10503_v61 = vld [vmem:[#allocation2 + $0xe8] sm:$0xf]  ;;  %v10711_v52 = vld [vmem:[#allocation2 + $0xec] sm:$0xf] }
 0x31a   : > { %3122 = vst [vmem:[#allocation2 + $0x10c] sm:$0xff] %v3042_v12 }
 0x31b   : > { %v2590_v44 = vpop.f32.mrf.mxu2  ;;  %v2495_v31 = vpop.f32.mrf.mxu0 }
 0x31c   : > { %v2639_v39 = vpop.f32.mrf.mxu3  ;;  %v2496_v3 = vadd.f32 %v2495_v31, %v12917_v58  ;;  %v2544_v11 = vpop.f32.mrf.mxu1 }
 0x31d   : > { %v13063_v59 = vadd.f32 %v2639_v39, %v2590_v44 }
 0x31e   : > { %v2545_v13 = vadd.f32 %v2544_v11, %v2496_v3  ;;  %2690 = vmatmul.bf16.gmra.mxu0 %v12522_v26 }
 0x31f   : > { %2739 = vmatmul.bf16.gmra.mxu1 %v12518_v24 }
 0x320   : > { %2788 = vmatmul.bf16.gmra.mxu2 %v12520_v25  ;;  %v3047_v28 = vpack.c.bf16 %v2545_v13, %v12915_v29  ;;  %v9387_v29 = vld [vmem:[#allocation7 + $0xb0] sm:$0xf] }
 0x321   : > { %2837 = vmatmul.bf16.gmra.mxu3 %v12522_v26  ;;  %v11455_v33 = vld [vmem:[#allocation2 + $0x108] sm:$0xf0]  ;;  %v9388_v56 = vor.u32 %v11182_v63, %v9387_v29  ;;  %v11503_v22 = vld [vmem:[#allocation2 + $0x10c] sm:$0xf0] }
 0x322   : > { %3127 = vst [vmem:[#allocation2 + $0x130] sm:$0xff] %v3047_v28  ;;  %v10504_v43 = vor.u32 %v11455_v33, %v10503_v61  ;;  %v10712_v12 = vor.u32 %v11503_v22, %v10711_v52  ;;  %v9891_v52 = vld [vmem:[#allocation7 + $0x4a0] sm:$0xf] }
 0x323   : > { %v2593_v34 = vpop.f32.mrf.mxu2  ;;  %v2497_v32 = vpop.f32.mrf.mxu0  ;;  %2863 = vmatpush.bf16.msra.mxu0 %v9388_v56 }
 0x324   : > { %v2642_v58 = vpop.f32.mrf.mxu3  ;;  %v2498_v37 = vadd.f32 %v2497_v32, %v12924_v36  ;;  %v2546_v18 = vpop.f32.mrf.mxu1  ;;  %5703 = vrot.lane.b32.xlu1 %v10504_v43, %s12291_s21 }
 0x325   : > { %v13071_v5 = vadd.f32 %v2642_v58, %v2593_v34  ;;  %v11317_v34 = vld [vmem:[#allocation7 + $0x508] sm:$0xf0] }
 0x326   : > { %v2547_v15 = vadd.f32 %v2546_v18, %v2498_v37  ;;  %v11173_v37 = vld [vmem:[#allocation7 + $0x88] sm:$0xf0] }
 0x328   : > { %v3052_v9 = vpack.c.bf16 %v2547_v15, %v12922_v54 }
 0x329   : > { %v10507_v13 = vld [vmem:[#allocation2 + $0x130] sm:$0xf]  ;;  %v10715_v15 = vld [vmem:[#allocation2 + $0x134] sm:$0xf] }
 0x32a   : > { %3132 = vst [vmem:[#allocation2 + $0x154] sm:$0xff] %v3052_v9 }
 0x32b   : > { %v2595_v45 = vpop.f32.mrf.mxu2  ;;  %v2500_v39 = vpop.f32.mrf.mxu0 }
 0x32c   : > { %v2644_v44 = vpop.f32.mrf.mxu3  ;;  %v2501_v36 = vadd.f32 %v2500_v39, %v12936_v14  ;;  %v2549_v3 = vpop.f32.mrf.mxu1  ;;  %7307 = vrot.lane.b32.xlu1 %v10712_v12, %s12291_s21  ;;  %v9927_v14 = vld [vmem:[#allocation7 + $0x4e8] sm:$0xf] }
 0x32d   : > { %v13076_v31 = vadd.f32 %v2644_v44, %v2595_v45  ;;  %v9928_v8 = vor.u32 %v11317_v34, %v9927_v14  ;;  %v11308_v45 = vld [vmem:[#allocation7 + $0x4c0] sm:$0xf0] }
 0x32e   : > { %v2550_v11 = vadd.f32 %v2549_v3, %v2501_v36  ;;  %2695 = vmatmul.bf16.gmra.mxu0 %v12538_v53  ;;  %v9892_v44 = vor.u32 %v11308_v45, %v9891_v52 }
 0x32f   : > { %2744 = vmatmul.bf16.gmra.mxu1 %v12534_v49  ;;  %2962 = vmatpush.bf16.msra.mxu2 %v9928_v8 }
 0x330   : > { %2793 = vmatmul.bf16.gmra.mxu2 %v12536_v50  ;;  %v3057_v54 = vpack.c.bf16 %v2550_v11, %v12934_v23  ;;  %v9351_v23 = vld [vmem:[#allocation7 + $0x68] sm:$0xf] }
 0x331   : > { %2842 = vmatmul.bf16.gmra.mxu3 %v12538_v53  ;;  %v11456_v28 = vld [vmem:[#allocation2 + $0x150] sm:$0xf0]  ;;  %v9352_v18 = vor.u32 %v11173_v37, %v9351_v23  ;;  %v11504_v63 = vld [vmem:[#allocation2 + $0x154] sm:$0xf0] }
 0x332   : > { %3137 = vst [vmem:[#allocation2 + $0x178] sm:$0xff] %v3057_v54  ;;  %v10508_v33 = vor.u32 %v11456_v28, %v10507_v13  ;;  %v10716_v9 = vor.u32 %v11504_v63, %v10715_v15  ;;  %v11164_v54 = vld [vmem:[#allocation7 + $0x40] sm:$0xf0]  ;;  %v17432_v13 = vld [vmem:[#allocation18_spill] sm:$0xff]  ;;  %v17433_v28 = vld [vmem:[#allocation19_spill] sm:$0xff] }
 0x333   : > { %v2598_v61 = vpop.f32.mrf.mxu2  ;;  %v2502_v17 = vpop.f32.mrf.mxu0  ;;  %2864 = vmatpush.bf16.msra.mxu0 %v9352_v18  ;;  %2963 = vmatpush.bf16.msra.mxu2 %v9892_v44  ;;  %v17437_v44 = vld [vmem:[#allocation41_spill] sm:$0xff] }
 0x334   : > { %v2647_v43 = vpop.f32.mrf.mxu3  ;;  %v2503_v32 = vadd.f32 %v2502_v17, %v12944_v30  ;;  %v2551_v4 = vpop.f32.mrf.mxu1  ;;  %5705 = vrot.lane.b32.xlu2 %v10508_v33, %s12291_s21  ;;  %v17434_v33 = vld [vmem:[#allocation34_spill] sm:$0xff] }
 0x335   : > { %v13085_v58 = vadd.f32 %v2647_v43, %v2598_v61 }
 0x336   : > { %v2552_v29 = vadd.f32 %v2551_v4, %v2503_v32 }
 0x338   : > { %v3062_v56 = vpack.c.bf16 %v2552_v29, %v12942_v7  ;;  %v9315_v7 = vld [vmem:[#allocation7 + $0x20] sm:$0xf]  ;;  %v17435_v29 = vld [vmem:[#allocation38_spill] sm:$0xff] }
 0x339   : > { %v9316_v61 = vor.u32 %v11164_v54, %v9315_v7  ;;  %v10511_v34 = vld [vmem:[#allocation2 + $0x178] sm:$0xf]  ;;  %v10719_v43 = vld [vmem:[#allocation2 + $0x17c] sm:$0xf]  ;;  %v17439_v54 = vld [vmem:[#allocation21_spill] sm:$0xff] }
 0x33a   : > { %3142 = vst [vmem:[#allocation2 + $0x19c] sm:$0xff] %v3062_v56  ;;  %v17438_v7 = vld [vmem:[#allocation23_spill] sm:$0xff] }
 0x33b   : > { %v2600_v22 = vpop.f32.mrf.mxu2  ;;  %v2505_v30 = vpop.f32.mrf.mxu0  ;;  %2865 = vmatpush.bf16.msra.mxu0 %v9316_v61  ;;  %v17440_v61 = vld [vmem:[#allocation22_spill] sm:$0xff] }
 0x33c   : > { %v2649_v12 = vpop.f32.mrf.mxu3  ;;  %v2506_v36 = vadd.f32 %v2505_v30, %v12958_v35  ;;  %v2554_v3 = vpop.f32.mrf.mxu1  ;;  %7309 = vrot.lane.b32.xlu2 %v10716_v9, %s12291_s21 }
 0x33d   : > { %v13090_v39 = vadd.f32 %v2649_v12, %v2600_v22  ;;  %v17436_v22 = vld [vmem:[#allocation37_spill] sm:$0xff] }
 0x33e   : > { %v2555_v11 = vadd.f32 %v2554_v3, %v2506_v36  ;;  %2700 = vmatmul.bf16.gmra.mxu0 %v17398_v55 }
 0x33f   : > { %2749 = vmatmul.bf16.gmra.mxu1 %v17432_v13 }
 0x340   : > { %2798 = vmatmul.bf16.gmra.mxu2 %v17433_v28  ;;  %v3067_v14 = vpack.c.bf16 %v2555_v11, %v17434_v33  ;;  %v17441_v33 = vld [vmem:[#allocation40_spill] sm:$0xff] }
 0x341   : > { %2847 = vmatmul.bf16.gmra.mxu3 %v17398_v55  ;;  %v11457_v35 = vld [vmem:[#allocation2 + $0x198] sm:$0xf0]  ;;  %v11505_v17 = vld [vmem:[#allocation2 + $0x19c] sm:$0xf0] }
 0x342   : > { %3147 = vst [vmem:[#allocation2 + $0x1c0] sm:$0xff] %v3067_v14  ;;  %v10512_v32 = vor.u32 %v11457_v35, %v10511_v34  ;;  %v10720_v4 = vor.u32 %v11505_v17, %v10719_v43 }
 0x343   : > { %v2603_v8 = vpop.f32.mrf.mxu2  ;;  %v2507_v37 = vpop.f32.mrf.mxu0 }
 0x344   : > { %v2652_v23 = vpop.f32.mrf.mxu3  ;;  %v2508_v63 = vadd.f32 %v2507_v37, %v17435_v29  ;;  %v2556_v56 = vpop.f32.mrf.mxu1  ;;  %5707 = vrot.lane.b32.xlu1 %v10512_v32, %s12291_s21  ;;  %7311 = vrot.lane.b32.xlu2 %v10720_v4, %s12291_s21 }
 0x345   : > { %v13099_v18 = vadd.f32 %v2652_v23, %v2603_v8 }
 0x346   : > { %v2557_v15 = vadd.f32 %v2556_v56, %v2508_v63 }
 0x348   : > { %v3072_v9 = vpack.c.bf16 %v2557_v15, %v17436_v22 }
 0x349   : > { %v10515_v34 = vld [vmem:[#allocation2 + $0x1c0] sm:$0xf]  ;;  %v10723_v43 = vld [vmem:[#allocation2 + $0x1c4] sm:$0xf] }
 0x34a   : > { %3152 = vst [vmem:[#allocation2 + $0x1e4] sm:$0xff] %v3072_v9 }
 0x34b   : > { %v2605_v52 = vpop.f32.mrf.mxu2  ;;  %v2510_v12 = vpop.f32.mrf.mxu0 }
 0x34c   : > { %v2654_v45 = vpop.f32.mrf.mxu3  ;;  %v2511_v36 = vadd.f32 %v2510_v12, %v17437_v44  ;;  %v2559_v3 = vpop.f32.mrf.mxu1  ;;  %v11372_v12 = vld [vmem:[#allocation2 + $0x20] sm:$0xf0] }
 0x34d   : > { %v13105_v30 = vadd.f32 %v2654_v45, %v2605_v52 }
 0x34e   : > { %v2560_v11 = vadd.f32 %v2559_v3, %v2511_v36  ;;  %2705 = vmatmul.bf16.gmra.mxu0 %v17438_v7  ;;  %v10147_v3 = vld [vmem:[#allocation2] sm:$0xf] }
 0x34f   : > { %2754 = vmatmul.bf16.gmra.mxu1 %v17439_v54 }
 0x350   : > { %2803 = vmatmul.bf16.gmra.mxu2 %v17440_v61  ;;  %v3077_v14 = vpack.c.bf16 %v2560_v11, %v17441_v33  ;;  %v10148_v11 = vor.u32 %v11372_v12, %v10147_v3 }
 0x351   : > { %2852 = vmatmul.bf16.gmra.mxu3 %v17438_v7  ;;  %v11458_v35 = vld [vmem:[#allocation2 + $0x1e0] sm:$0xf0]  ;;  %v11506_v17 = vld [vmem:[#allocation2 + $0x1e4] sm:$0xf0] }
 0x352   : > { %3157 = vst [vmem:[#allocation2 + $0x208] sm:$0xff] %v3077_v14  ;;  %v10516_v32 = vor.u32 %v11458_v35, %v10515_v34  ;;  %v10724_v4 = vor.u32 %v11506_v17, %v10723_v43 }
 0x353   : > { %v2608_v8 = vpop.f32.mrf.mxu2  ;;  %v2512_v37 = vpop.f32.mrf.mxu0 }
 0x354   : > { %v2657_v23 = vpop.f32.mrf.mxu3  ;;  %v2513_v63 = vadd.f32 %v2512_v37, %v12990_v27  ;;  %v2561_v56 = vpop.f32.mrf.mxu1  ;;  %5709 = vrot.lane.b32.xlu2 %v10516_v32, %s12291_s21  ;;  %7313 = vrot.lane.b32.xlu0 %v10724_v4, %s12291_s21 }
 0x355   : > { %v13113_v29 = vadd.f32 %v2657_v23, %v2608_v8 }
 0x356   : > { %v2562_v15 = vadd.f32 %v2561_v56, %v2513_v63  ;;  %v11434_v56 = vld [vmem:[#allocation2 + $0x1e0] sm:$0xf0] }
 0x358   : > { %v3082_v22 = vpack.c.bf16 %v2562_v15, %v12988_v60 }
 0x359   : > { %v10519_v27 = vld [vmem:[#allocation2 + $0x208] sm:$0xf]  ;;  %v10727_v60 = vld [vmem:[#allocation2 + $0x20c] sm:$0xf] }
 0x35a   : > { %3162 = vst [vmem:[#allocation2 + $0x22c] sm:$0xff] %v3082_v22  ;;  %v10415_v33 = vld [vmem:[#allocation2 + $0x208] sm:$0xf]  ;;  %v10411_v22 = vld [vmem:[#allocation2 + $0x1c0] sm:$0xf] }
 0x35b   : > { %v2610_v9 = vpop.f32.mrf.mxu2  ;;  %v2671_v45 = vpop.f32.mrf.mxu0 }
 0x35c   : > { %v2659_v52 = vpop.f32.mrf.mxu3  ;;  %v2720_v36 = vpop.f32.mrf.mxu1 }
 0x35d   : > { %v13119_v44 = vadd.f32 %v2659_v52, %v2610_v9  ;;  %v10412_v9 = vor.u32 %v11434_v56, %v10411_v22 }
 0x35e   : > { %2866 = vmatmul.bf16.vlgmr.msra.gmra.mxu0 %v12454_v46 }
 0x35f   : > { %2915 = vmatmul.bf16.vlgmr.msra.gmra.mxu1 %v12456_v51 }
 0x360   : > { %2964 = vmatmul.bf16.vlgmr.msra.gmra.mxu2 %v17405_v62  ;;  %v2672_v62 = vadd.f32 %v2671_v45, %v13003_v47  ;;  %v10151_v47 = vld [vmem:[#allocation2 + $0x48] sm:$0xf]  ;;  %v11433_v45 = vld [vmem:[#allocation2 + $0x198] sm:$0xf0] }
 0x361   : > { %10209 = vmatmul.msk.bf16.vlgmr.msra.gmra.mxu3 %vm17250_vm0, %v10148_v11  ;;  %v11459_v14 = vld [vmem:[#allocation2 + $0x228] sm:$0xf0]  ;;  %v11507_v34 = vld [vmem:[#allocation2 + $0x22c] sm:$0xf0] }
 0x362   : > { %v11435_v35 = vld [vmem:[#allocation2 + $0x228] sm:$0xf0]  ;;  %v10520_v17 = vor.u32 %v11459_v14, %v10519_v27  ;;  %v10728_v8 = vor.u32 %v11507_v34, %v10727_v60  ;;  %v4978_v60 = vsel %vm17250_vm0, %v10412_v9, 0 }
 0x363   : > { %v2769_v43 = vpop.f32.mrf.mxu2  ;;  %v10416_v32 = vor.u32 %v11435_v35, %v10415_v33  ;;  %v2673_v37 = vpop.f32.mrf.mxu0  ;;  %v11373_v11 = vld [vmem:[#allocation2 + $0x68] sm:$0xf0] }
 0x364   : > { %v2770_v4 = vadd.f32 %v2769_v43, %v2720_v36  ;;  %v2818_v23 = vpop.f32.mrf.mxu3  ;;  %v2722_v46 = vpop.f32.mrf.mxu1  ;;  %5711 = vrot.lane.b32.xlu1 %v10520_v17, %s12291_s21  ;;  %7315 = vrot.lane.b32.xlu2 %v10728_v8, %s12291_s21  ;;  %v2674_v33 = vadd.f32 %v2673_v37, %v13010_v48  ;;  %v10152_v34 = vor.u32 %v11373_v11, %v10151_v47  ;;  %v10407_v43 = vld [vmem:[#allocation2 + $0x178] sm:$0xf] }
 0x365   : > { %v4981_v51 = vsel %vm17250_vm0, %v10416_v32, 0  ;;  %v10408_v17 = vor.u32 %v11433_v45, %v10407_v43 }
 0x366   : > { %v2819_v63 = vadd.f32 %v2818_v23, %v2770_v4  ;;  %4983 = vmatpush.bf16.xpose.msrb.mxu3 %v4981_v51  ;;  %v11432_v51 = vld [vmem:[#allocation2 + $0x150] sm:$0xf0] }
 0x367   : > { %v4975_v37 = vsel %vm17250_vm0, %v10408_v17, 0 }
 0x368   : > { %v3008_v15 = vpack.c.bf16 %v2819_v63, %v2672_v62  ;;  %v10403_v62 = vld [vmem:[#allocation2 + $0x130] sm:$0xf] }
 0x369   : > { %v10404_v56 = vor.u32 %v11432_v51, %v10403_v62 }
 0x36a   : > { %3088 = vst [vmem:[#allocation2 + $0x18] sm:$0xff] %v3008_v15 }
 0x36b   : > { %v2771_v52 = vpop.f32.mrf.mxu2  ;;  %v2676_v3 = vpop.f32.mrf.mxu0 }
 0x36c   : > { %v2772_v12 = vadd.f32 %v2771_v52, %v2722_v46  ;;  %v2820_v36 = vpop.f32.mrf.mxu3  ;;  %v2725_v27 = vpop.f32.mrf.mxu1  ;;  %v2677_v46 = vadd.f32 %v2676_v3, %v13021_v6  ;;  %v4972_v6 = vsel %vm17250_vm0, %v10404_v56, 0 }
 0x36e   : > { %v2821_v14 = vadd.f32 %v2820_v36, %v2772_v12  ;;  %4984 = vmatpush.bf16.xpose.msrb.mxu3 %v4978_v60  ;;  %2871 = vmatmul.bf16.gmra.mxu0 %v12470_v19  ;;  %v11374_v36 = vld [vmem:[#allocation2 + $0xb0] sm:$0xf0]  ;;  %v10155_v60 = vld [vmem:[#allocation2 + $0x90] sm:$0xf] }
 0x36f   : > { %2920 = vmatmul.bf16.gmra.mxu1 %v12472_v20 }
 0x370   : > { %v3013_v35 = vpack.c.bf16 %v2821_v14, %v2674_v33  ;;  %2969 = vmatmul.bf16.gmra.mxu2 %v12474_v21  ;;  %v11431_v33 = vld [vmem:[#allocation2 + $0x108] sm:$0xf0]  ;;  %v10156_v14 = vor.u32 %v11374_v36, %v10155_v60  ;;  %v10159_v36 = vld [vmem:[#allocation2 + $0xd8] sm:$0xf] }
 0x371   : > { %10210 = vmatmul.msk.bf16.gmra.mxu3 %vm17250_vm0, %v10152_v34  ;;  %v10323_v63 = vld [vmem:[#allocation2 + $0x18] sm:$0xf]  ;;  %v10399_v34 = vld [vmem:[#allocation2 + $0xe8] sm:$0xf] }
 0x372   : > { %3093 = vst [vmem:[#allocation2 + $0x3c] sm:$0xff] %v3013_v35  ;;  %v10531_v35 = vld [vmem:[#allocation2 + $0x1c] sm:$0xf]  ;;  %v10400_v43 = vor.u32 %v11431_v33, %v10399_v34  ;;  %v10391_v60 = vld [vmem:[#allocation2 + $0x58] sm:$0xf]  ;;  %v13153_v33 = vpop.permute.xlu1 %7255 }
 0x373   : > { %v2774_v8 = vpop.f32.mrf.mxu2  ;;  %v2678_v4 = vpop.f32.mrf.mxu0 }
 0x374   : > { %v2775_v32 = vadd.f32 %v2774_v8, %v2725_v27  ;;  %v2823_v48 = vpop.f32.mrf.mxu3  ;;  %v2727_v23 = vpop.f32.mrf.mxu1  ;;  %v2679_v3 = vadd.f32 %v2678_v4, %v13028_v16 }
 0x376   : > { %v2824_v19 = vadd.f32 %v2823_v48, %v2775_v32  ;;  %4985 = vmatpush.bf16.xpose.msrb.mxu3 %v4975_v37 }
 0x378   : > { %v3018_v20 = vpack.c.bf16 %v2824_v19, %v2677_v46  ;;  %v10395_v46 = vld [vmem:[#allocation2 + $0xa0] sm:$0xf] }
 0x379   : > { %v11412_v21 = vld [vmem:[#allocation2 + $0x38] sm:$0xf0]  ;;  %v11460_v47 = vld [vmem:[#allocation2 + $0x3c] sm:$0xf0] }
 0x37a   : > { %3098 = vst [vmem:[#allocation2 + $0x60] sm:$0xff] %v3018_v20  ;;  %v10324_v15 = vor.u32 %v11412_v21, %v10323_v63  ;;  %v10532_v16 = vor.u32 %v11460_v47, %v10531_v35 }
 0x37b   : > { %v2776_v22 = vpop.f32.mrf.mxu2  ;;  %v2681_v12 = vpop.f32.mrf.mxu0 }
 0x37c   : > { %v2777_v9 = vadd.f32 %v2776_v22, %v2727_v23  ;;  %v2825_v52 = vpop.f32.mrf.mxu3  ;;  %4637 = vrot.lane.b32.xlu0 %v10324_v15, %s12291_s21  ;;  %v2730_v11 = vpop.f32.mrf.mxu1  ;;  %v11375_v22 = vld [vmem:[#allocation2 + $0xf8] sm:$0xf0] }
 0x37e   : > { %v2826_v27 = vadd.f32 %v2825_v52, %v2777_v9  ;;  %4986 = vmatpush.bf16.xpose.msrb.mxu3 %v4972_v6  ;;  %2876 = vmatmul.bf16.gmra.mxu0 %v12486_v40  ;;  %v4969_v40 = vsel %vm17250_vm0, %v10400_v43, 0  ;;  %v10160_v6 = vor.u32 %v11375_v22, %v10159_v36  ;;  %v10163_v22 = vld [vmem:[#allocation2 + $0x120] sm:$0xf] }
 0x37f   : > { %2925 = vmatmul.bf16.gmra.mxu1 %v12488_v41  ;;  %v2682_v41 = vadd.f32 %v2681_v12, %v13037_v57 }
 0x380   : > { %v3023_v45 = vpack.c.bf16 %v2826_v27, %v2679_v3  ;;  %2974 = vmatmul.bf16.gmra.mxu2 %v12490_v42  ;;  %v11430_v42 = vld [vmem:[#allocation2 + $0xc0] sm:$0xf0] }
 0x381   : > { %10211 = vmatmul.msk.bf16.gmra.mxu3 %vm17250_vm0, %v10156_v14  ;;  %v10327_v19 = vld [vmem:[#allocation2 + $0x60] sm:$0xf]  ;;  %v10396_v20 = vor.u32 %v11430_v42, %v10395_v46  ;;  %v10535_v14 = vld [vmem:[#allocation2 + $0x64] sm:$0xf]  ;;  %v10623_v42 = vld [vmem:[#allocation2 + $0x20c] sm:$0xf] }
 0x382   : > { %3103 = vst [vmem:[#allocation2 + $0x84] sm:$0xff] %v3023_v45 }
 0x383   : > { %v2779_v17 = vpop.f32.mrf.mxu2  ;;  %v2683_v48 = vpop.f32.mrf.mxu0  ;;  %v4966_v57 = vsel %vm17250_vm0, %v10396_v20, 0 }
 0x384   : > { %v2780_v8 = vadd.f32 %v2779_v17, %v2730_v11  ;;  %v2828_v32 = vpop.f32.mrf.mxu3  ;;  %6242 = vrot.lane.b32.xlu0 %v10532_v16, %s12291_s21  ;;  %v2732_v4 = vpop.f32.mrf.mxu1  ;;  %v2684_v52 = vadd.f32 %v2683_v48, %v13044_v38  ;;  %v11429_v11 = vld [vmem:[#allocation2 + $0x78] sm:$0xf0]  ;;  %v11428_v17 = vld [vmem:[#allocation2 + $0x30] sm:$0xf0]  ;;  %v10387_v48 = vld [vmem:[#allocation2 + $0x10] sm:$0xf] }
 0x385   : > { %v10392_v38 = vor.u32 %v11429_v11, %v10391_v60 }
 0x386   : > { %v2829_v23 = vadd.f32 %v2828_v32, %v2780_v8  ;;  %4987 = vmatpush.bf16.xpose.msrb.mxu3 %v4969_v40  ;;  %v11483_v8 = vld [vmem:[#allocation2 + $0x22c] sm:$0xf0] }
 0x387   : > { %v10624_v46 = vor.u32 %v11483_v8, %v10623_v42 }
 0x388   : > { %v3028_v37 = vpack.c.bf16 %v2829_v23, %v2682_v41  ;;  %v10388_v23 = vor.u32 %v11428_v17, %v10387_v48 }
 0x389   : > { %v11413_v51 = vld [vmem:[#allocation2 + $0x80] sm:$0xf0]  ;;  %v11461_v3 = vld [vmem:[#allocation2 + $0x84] sm:$0xf0] }
 0x38a   : > { %3108 = vst [vmem:[#allocation2 + $0xa8] sm:$0xff] %v3028_v37  ;;  %v10328_v62 = vor.u32 %v11413_v51, %v10327_v19  ;;  %v10536_v47 = vor.u32 %v11461_v3, %v10535_v14 }
 0x38b   : > { %v2781_v63 = vpop.f32.mrf.mxu2  ;;  %v2686_v15 = vpop.f32.mrf.mxu0 }
 0x38c   : > { %v2782_v21 = vadd.f32 %v2781_v63, %v2732_v4  ;;  %v2830_v56 = vpop.f32.mrf.mxu3  ;;  %4639 = vrot.lane.b32.xlu2 %v10328_v62, %s12291_s21  ;;  %v2735_v9 = vpop.f32.mrf.mxu1  ;;  %v2687_v16 = vadd.f32 %v2686_v15, %v13055_v10  ;;  %v11376_v62 = vld [vmem:[#allocation2 + $0x140] sm:$0xf0] }
 0x38d   : > { %v13159_v4 = vpop.permute.xlu1 %7259 }
 0x38e   : > { %v2831_v12 = vadd.f32 %v2830_v56, %v2782_v21  ;;  %4988 = vmatpush.bf16.xpose.msrb.mxu3 %v4966_v57  ;;  %2881 = vmatmul.bf16.gmra.mxu0 %v12502_v0  ;;  %17442 = vst [vmem:[#allocation18_spill] sm:$0xff] %v13159_v4  ;;  %v4960_v21 = vsel %vm17250_vm0, %v10388_v23, 0  ;;  %v10164_v57 = vor.u32 %v11376_v62, %v10163_v22 }
 0x38f   : > { %2930 = vmatmul.bf16.gmra.mxu1 %v12504_v1  ;;  %v4963_v1 = vsel %vm17250_vm0, %v10392_v38, 0 }
 0x390   : > { %v3033_v27 = vpack.c.bf16 %v2831_v12, %v2684_v52  ;;  %2979 = vmatmul.bf16.gmra.mxu2 %v12506_v2  ;;  %v11482_v12 = vld [vmem:[#allocation2 + $0x1e4] sm:$0xf0] }
 0x391   : > { %10212 = vmatmul.msk.bf16.gmra.mxu3 %vm17250_vm0, %v10160_v6  ;;  %v10331_v40 = vld [vmem:[#allocation2 + $0xa8] sm:$0xf]  ;;  %v10619_v6 = vld [vmem:[#allocation2 + $0x1c4] sm:$0xf] }
 0x392   : > { %3113 = vst [vmem:[#allocation2 + $0xcc] sm:$0xff] %v3033_v27  ;;  %v10620_v27 = vor.u32 %v11482_v12, %v10619_v6 }
 0x393   : > { %v2784_v45 = vpop.f32.mrf.mxu2  ;;  %v2688_v0 = vpop.f32.mrf.mxu0 }
 0x394   : > { %v2785_v34 = vadd.f32 %v2784_v45, %v2735_v9  ;;  %v2833_v35 = vpop.f32.mrf.mxu3  ;;  %6244 = vrot.lane.b32.xlu2 %v10536_v47, %s12291_s21  ;;  %v2737_v43 = vpop.f32.mrf.mxu1  ;;  %v2689_v56 = vadd.f32 %v2688_v0, %v13063_v59  ;;  %v6585_v9 = vsel %vm17250_vm0, %v10624_v46, 0  ;;  %v10539_v59 = vld [vmem:[#allocation2 + $0xac] sm:$0xf]  ;;  %v10167_v46 = vld [vmem:[#allocation2 + $0x168] sm:$0xf] }
 0x395   : > { %v13168_v11 = vpop.permute.xlu1 %5699  ;;  %v13174_v0 = vpop.permute.xlu2 %7253 }
 0x396   : > { %v2834_v2 = vadd.f32 %v2833_v35, %v2785_v34  ;;  %4989 = vmatpush.bf16.xpose.msrb.mxu3 %v4963_v1  ;;  %v11481_v34 = vld [vmem:[#allocation2 + $0x19c] sm:$0xf0] }
 0x398   : > { %v3038_v32 = vpack.c.bf16 %v2834_v2, %v2687_v16  ;;  %v10615_v16 = vld [vmem:[#allocation2 + $0x17c] sm:$0xf] }
 0x399   : > { %v11414_v41 = vld [vmem:[#allocation2 + $0xc8] sm:$0xf0]  ;;  %v11462_v52 = vld [vmem:[#allocation2 + $0xcc] sm:$0xf0]  ;;  %v10616_v17 = vor.u32 %v11481_v34, %v10615_v16 }
 0x39a   : > { %3118 = vst [vmem:[#allocation2 + $0xf0] sm:$0xff] %v3038_v32  ;;  %v10332_v37 = vor.u32 %v11414_v41, %v10331_v40  ;;  %v10540_v3 = vor.u32 %v11462_v52, %v10539_v59  ;;  %v11377_v41 = vld [vmem:[#allocation2 + $0x188] sm:$0xf0]  ;;  %v11479_v59 = vld [vmem:[#allocation2 + $0x10c] sm:$0xf0] }
 0x39b   : > { %v2786_v19 = vpop.f32.mrf.mxu2  ;;  %v2691_v10 = vpop.f32.mrf.mxu0  ;;  %v10171_v16 = vld [vmem:[#allocation2 + $0x1b0] sm:$0xf] }
 0x39c   : > { %v2787_v51 = vadd.f32 %v2786_v19, %v2737_v43  ;;  %v2835_v20 = vpop.f32.mrf.mxu3  ;;  %4641 = vrot.lane.b32.xlu0 %v10332_v37, %s12291_s21  ;;  %v2740_v63 = vpop.f32.mrf.mxu1  ;;  %v6579_v19 = vsel %vm17250_vm0, %v10616_v17, 0 }
 0x39d   : > { %v13176_v8 = vpop.permute.xlu1 %7303 }
 0x39e   : > { %v2836_v15 = vadd.f32 %v2835_v20, %v2787_v51  ;;  %4990 = vmatpush.bf16.xpose.msrb.mxu3 %v4960_v21  ;;  %2886 = vmatmul.bf16.gmra.mxu0 %v12518_v24  ;;  %v10168_v51 = vor.u32 %v11377_v41, %v10167_v46  ;;  %v10611_v21 = vld [vmem:[#allocation2 + $0x134] sm:$0xf]  ;;  %v10603_v41 = vld [vmem:[#allocation2 + $0xa4] sm:$0xf] }
 0x39f   : > { %2935 = vmatmul.bf16.gmra.mxu1 %v12520_v25  ;;  %v2692_v25 = vadd.f32 %v2691_v10, %v13071_v5  ;;  %v11480_v10 = vld [vmem:[#allocation2 + $0x154] sm:$0xf0] }
 0x3a0   : > { %v3043_v36 = vpack.c.bf16 %v2836_v15, %v2689_v56  ;;  %2984 = vmatmul.bf16.gmra.mxu2 %v12522_v26  ;;  %v6582_v26 = vsel %vm17250_vm0, %v10620_v27, 0  ;;  %v10612_v15 = vor.u32 %v11480_v10, %v10611_v21 }
 0x3a1   : > { %10213 = vmatmul.msk.bf16.gmra.mxu3 %vm17250_vm0, %v10164_v57  ;;  %v10335_v43 = vld [vmem:[#allocation2 + $0xf0] sm:$0xf] }
 0x3a2   : > { %3123 = vst [vmem:[#allocation2 + $0x114] sm:$0xff] %v3043_v36  ;;  %v6576_v36 = vsel %vm17250_vm0, %v10612_v15, 0 }
 0x3a3   : > { %v2789_v60 = vpop.f32.mrf.mxu2  ;;  %v2693_v24 = vpop.f32.mrf.mxu0 }
 0x3a4   : > { %v2790_v14 = vadd.f32 %v2789_v60, %v2740_v63  ;;  %v2838_v38 = vpop.f32.mrf.mxu3  ;;  %6246 = vrot.lane.b32.xlu0 %v10540_v3, %s12291_s21  ;;  %v2742_v47 = vpop.f32.mrf.mxu1  ;;  %v2694_v42 = vadd.f32 %v2693_v24, %v13076_v31  ;;  %v10543_v31 = vld [vmem:[#allocation2 + $0xf4] sm:$0xf] }
 0x3a5   : > { %v13184_v63 = vpop.permute.xlu2 %5697  ;;  %v13188_v52 = vpop.permute.xlu1 %7305 }
 0x3a6   : > { %6587 = vmatpush.bf16.xpose.msra.mxu3 %v6585_v9  ;;  %v2839_v45 = vadd.f32 %v2838_v38, %v2790_v14  ;;  %v10607_v14 = vld [vmem:[#allocation2 + $0xec] sm:$0xf] }
 0x3a7   : > { %v10608_v24 = vor.u32 %v11479_v59, %v10607_v14 }
 0x3a8   : > { %v3048_v35 = vpack.c.bf16 %v2839_v45, %v2692_v25 }
 0x3a9   : > { %v11415_v1 = vld [vmem:[#allocation2 + $0x110] sm:$0xf0]  ;;  %v11463_v20 = vld [vmem:[#allocation2 + $0x114] sm:$0xf0] }
 0x3aa   : > { %3128 = vst [vmem:[#allocation2 + $0x138] sm:$0xff] %v3048_v35  ;;  %v10336_v2 = vor.u32 %v11415_v1, %v10335_v43  ;;  %v10544_v56 = vor.u32 %v11463_v20, %v10543_v31 }
 0x3ab   : > { %v2791_v32 = vpop.f32.mrf.mxu2  ;;  %v2696_v5 = vpop.f32.mrf.mxu0 }
 0x3ac   : > { %v2792_v48 = vadd.f32 %v2791_v32, %v2742_v47  ;;  %v2840_v40 = vpop.f32.mrf.mxu3  ;;  %4643 = vrot.lane.b32.xlu1 %v10336_v2, %s12291_s21  ;;  %v2745_v23 = vpop.f32.mrf.mxu1  ;;  %v6573_v2 = vsel %vm17250_vm0, %v10608_v24, 0 }
 0x3ad   : > { %v13192_v3 = vpop.permute.xlu2 %5701  ;;  %v13195_v34 = vpop.permute.xlu1 %5703 }
 0x3ae   : > { %6588 = vmatpush.bf16.xpose.msra.mxu3 %v6582_v26  ;;  %v2841_v37 = vadd.f32 %v2840_v40, %v2792_v48  ;;  %2891 = vmatmul.bf16.gmra.mxu0 %v12534_v49  ;;  %v11378_v26 = vld [vmem:[#allocation2 + $0x1d0] sm:$0xf0]  ;;  %v11478_v48 = vld [vmem:[#allocation2 + $0xc4] sm:$0xf0] }
 0x3af   : > { %2940 = vmatmul.bf16.gmra.mxu1 %v12536_v50  ;;  %v10172_v17 = vor.u32 %v11378_v26, %v10171_v16  ;;  %v10595_v26 = vld [vmem:[#allocation2 + $0x14] sm:$0xf] }
 0x3b0   : > { %v3053_v62 = vpack.c.bf16 %v2841_v37, %v2694_v42  ;;  %2989 = vmatmul.bf16.gmra.mxu2 %v12538_v53  ;;  %v2697_v53 = vadd.f32 %v2696_v5, %v13085_v58  ;;  %v10604_v42 = vor.u32 %v11478_v48, %v10603_v41 }
 0x3b1   : > { %10214 = vmatmul.msk.bf16.gmra.mxu3 %vm17250_vm0, %v10168_v51  ;;  %v10339_v27 = vld [vmem:[#allocation2 + $0x138] sm:$0xf] }
 0x3b2   : > { %3133 = vst [vmem:[#allocation2 + $0x15c] sm:$0xff] %v3053_v62  ;;  %v11477_v62 = vld [vmem:[#allocation2 + $0x7c] sm:$0xf0] }
 0x3b3   : > { %v2794_v22 = vpop.f32.mrf.mxu2  ;;  %v2698_v49 = vpop.f32.mrf.mxu0 }
 0x3b4   : > { %v2795_v9 = vadd.f32 %v2794_v22, %v2745_v23  ;;  %v2843_v57 = vpop.f32.mrf.mxu3  ;;  %6248 = vrot.lane.b32.xlu1 %v10544_v56, %s12291_s21  ;;  %v2747_v50 = vpop.f32.mrf.mxu1  ;;  %v2699_v43 = vadd.f32 %v2698_v49, %v13090_v39  ;;  %v10547_v39 = vld [vmem:[#allocation2 + $0x13c] sm:$0xf] }
 0x3b5   : > { %v13202_v5 = vpop.permute.xlu2 %5705  ;;  %v13208_v10 = vpop.permute.xlu1 %7307  ;;  %v10599_v56 = vld [vmem:[#allocation2 + $0x5c] sm:$0xf] }
 0x3b6   : > { %6589 = vmatpush.bf16.xpose.msra.mxu3 %v6579_v19  ;;  %v2844_v12 = vadd.f32 %v2843_v57, %v2795_v9 }
 0x3b8   : > { %v3058_v6 = vpack.c.bf16 %v2844_v12, %v2697_v53 }
 0x3b9   : > { %v11416_v60 = vld [vmem:[#allocation2 + $0x158] sm:$0xf0]  ;;  %v11464_v32 = vld [vmem:[#allocation2 + $0x15c] sm:$0xf0] }
 0x3ba   : > { %3138 = vst [vmem:[#allocation2 + $0x180] sm:$0xff] %v3058_v6  ;;  %v10340_v38 = vor.u32 %v11416_v60, %v10339_v27  ;;  %v10548_v23 = vor.u32 %v11464_v32, %v10547_v39  ;;  %v11379_v6 = vld [vmem:[#allocation2 + $0x218] sm:$0xf0] }
 0x3bb   : > { %v2796_v47 = vpop.f32.mrf.mxu2  ;;  %v2701_v58 = vpop.f32.mrf.mxu0 }
 0x3bc   : > { %v2797_v25 = vadd.f32 %v2796_v47, %v2747_v50  ;;  %v2845_v45 = vpop.f32.mrf.mxu3  ;;  %4645 = vrot.lane.b32.xlu2 %v10340_v38, %s12291_s21  ;;  %v2750_v35 = vpop.f32.mrf.mxu1  ;;  %v10600_v50 = vor.u32 %v11477_v62, %v10599_v56  ;;  %v10175_v38 = vld [vmem:[#allocation2 + $0x1f8] sm:$0xf] }
 0x3bd   : > { %v13210_v53 = vpop.permute.xlu2 %7309  ;;  %v5708_v47 = vpop.permute.xlu1 %5707 }
 0x3be   : > { %6590 = vmatpush.bf16.xpose.msra.mxu3 %v6576_v36  ;;  %v2846_v1 = vadd.f32 %v2845_v45, %v2797_v25  ;;  %2896 = vmatmul.bf16.gmra.mxu0 %v17432_v13  ;;  %v6567_v24 = vsel %vm17250_vm0, %v10600_v50, 0  ;;  %v10176_v25 = vor.u32 %v11379_v6, %v10175_v38  ;;  %v11476_v45 = vld [vmem:[#allocation2 + $0x34] sm:$0xf0]  ;;  %v5753_v6 = vsel %vm17250_vm0, %v5708_v47, 0 }
 0x3bf   : > { %2945 = vmatmul.bf16.gmra.mxu1 %v17433_v28  ;;  %v2702_v28 = vadd.f32 %v2701_v58, %v13099_v18 }
 0x3c0   : > { %v3063_v40 = vpack.c.bf16 %v2846_v1, %v2699_v43  ;;  %2994 = vmatmul.bf16.gmra.mxu2 %v17398_v55  ;;  %v6570_v55 = vsel %vm17250_vm0, %v10604_v42, 0 }
 0x3c1   : > { %10215 = vmatmul.msk.bf16.gmra.mxu3 %vm17250_vm0, %v10172_v17  ;;  %v10551_v21 = vld [vmem:[#allocation2 + $0x184] sm:$0xf]  ;;  %v10343_v22 = vld [vmem:[#allocation2 + $0x180] sm:$0xf] }
 0x3c2   : > { %3143 = vst [vmem:[#allocation2 + $0x1a4] sm:$0xff] %v3063_v40 }
 0x3c3   : > { %v2799_v37 = vpop.f32.mrf.mxu2  ;;  %v2703_v13 = vpop.f32.mrf.mxu0 }
 0x3c4   : > { %v2800_v46 = vadd.f32 %v2799_v37, %v2750_v35  ;;  %v2848_v19 = vpop.f32.mrf.mxu3  ;;  %6250 = vrot.lane.b32.xlu2 %v10548_v23, %s12291_s21  ;;  %v2752_v51 = vpop.f32.mrf.mxu1  ;;  %v2704_v60 = vadd.f32 %v2703_v13, %v13105_v30  ;;  %v10596_v30 = vor.u32 %v11476_v45, %v10595_v26 }
 0x3c6   : > { %6591 = vmatpush.bf16.xpose.msra.mxu3 %v6573_v2  ;;  %v2849_v20 = vadd.f32 %v2848_v19, %v2800_v46  ;;  %v13220_v2 = vpop.permute.xlu2 %7311  ;;  %v6564_v48 = vsel %vm17250_vm0, %v10596_v30, 0 }
 0x3c8   : > { %v3068_v31 = vpack.c.bf16 %v2849_v20, %v2702_v28 }
 0x3c9   : > { %v11465_v15 = vld [vmem:[#allocation2 + $0x1a4] sm:$0xf0]  ;;  %v11417_v9 = vld [vmem:[#allocation2 + $0x1a0] sm:$0xf0] }
 0x3ca   : > { %3148 = vst [vmem:[#allocation2 + $0x1c8] sm:$0xff] %v3068_v31  ;;  %v10552_v57 = vor.u32 %v11465_v15, %v10551_v21  ;;  %v10344_v49 = vor.u32 %v11417_v9, %v10343_v22  ;;  %v10355_v21 = vld [vmem:[#allocation2 + $0x4] sm:$0xf] }
 0x3cb   : > { %v2801_v18 = vpop.f32.mrf.mxu2  ;;  %v2706_v59 = vpop.f32.mrf.mxu0  ;;  %v17443_v22 = vld [vmem:[#allocation17_spill] sm:$0xff] }
 0x3cc   : > { %v2802_v12 = vadd.f32 %v2801_v18, %v2752_v51  ;;  %v2850_v36 = vpop.f32.mrf.mxu3  ;;  %6252 = vrot.lane.b32.xlu1 %v10552_v57, %s12291_s21  ;;  %4647 = vrot.lane.b32.xlu0 %v10344_v49, %s12291_s21  ;;  %v2755_v27 = vpop.f32.mrf.mxu1  ;;  %v2707_v32 = vadd.f32 %v2706_v59, %v13113_v29  ;;  %v11420_v29 = vld [vmem:[#allocation2 + $0x24] sm:$0xf0] }
 0x3cd   : > { %v10356_v56 = vor.u32 %v11420_v29, %v10355_v21 }
 0x3ce   : > { %6592 = vmatpush.bf16.xpose.msra.mxu3 %v6570_v55  ;;  %v2851_v14 = vadd.f32 %v2850_v36, %v2802_v12  ;;  %2901 = vmatmul.bf16.gmra.mxu0 %v17439_v54  ;;  %v5710_v20 = vpop.permute.xlu2 %5709 }
 0x3cf   : > { %2950 = vmatmul.bf16.gmra.mxu1 %v17440_v61  ;;  %v5756_v57 = vsel %vm17250_vm0, %v5710_v20, 0 }
 0x3d0   : > { %v3073_v58 = vpack.c.bf16 %v2851_v14, %v2704_v60  ;;  %2999 = vmatmul.bf16.gmra.mxu2 %v17438_v7  ;;  %v3165_v60 = vlaneseq }
 0x3d1   : > { %10216 = vmatmul.msk.bf16.gmra.mxu3 %vm17250_vm0, %v10176_v25  ;;  %v10555_v39 = vld [vmem:[#allocation2 + $0x1cc] sm:$0xf]  ;;  %v10347_v23 = vld [vmem:[#allocation2 + $0x1c8] sm:$0xf] }
 0x3d2   : > { %3153 = vst [vmem:[#allocation2 + $0x1ec] sm:$0xff] %v3073_v58 }
 0x3d3   : > { %v2804_v35 = vpop.f32.mrf.mxu2  ;;  %v2708_v16 = vpop.f32.mrf.mxu0 }
 0x3d4   : > { %v2805_v43 = vadd.f32 %v2804_v35, %v2755_v27  ;;  %v2853_v1 = vpop.f32.mrf.mxu3  ;;  %v2757_v17 = vpop.f32.mrf.mxu1  ;;  %v2709_v62 = vadd.f32 %v2708_v16, %v13119_v44 }
 0x3d6   : > { %6593 = vmatpush.bf16.xpose.msra.mxu3 %v6567_v24  ;;  %v2854_v54 = vadd.f32 %v2853_v1, %v2805_v43  ;;  %v5712_v61 = vpop.permute.xlu1 %5711  ;;  %v11421_v43 = vld [vmem:[#allocation2 + $0x6c] sm:$0xf0]  ;;  %v13236_v1 = vshrl.u32 %v3165_v60, 7 }
 0x3d7   : > { %v5759_v40 = vsel %vm17250_vm0, %v5712_v61, 0 }
 0x3d8   : > { %v3078_v7 = vpack.c.bf16 %v2854_v54, %v2707_v32  ;;  %5761 = vmatpush.bf16.xpose.msra.mxu1 %v5759_v40  ;;  %v3167_v61 = vadd.s32 8, %v13236_v1  ;;  %v11393_v40 = vld [vmem:[#allocation2 + $0x1a0] sm:$0xf0] }
 0x3d9   : > { %v11466_v41 = vld [vmem:[#allocation2 + $0x1ec] sm:$0xf0]  ;;  %v11418_v42 = vld [vmem:[#allocation2 + $0x1e8] sm:$0xf0] }
 0x3da   : > { %3158 = vst [vmem:[#allocation2 + $0x210] sm:$0xff] %v3078_v7  ;;  %v10556_v37 = vor.u32 %v11466_v41, %v10555_v39  ;;  %v10348_v46 = vor.u32 %v11418_v42, %v10347_v23  ;;  %v11394_v26 = vld [vmem:[#allocation2 + $0x1e8] sm:$0xf0]  ;;  %v5750_v41 = vsel %vm17250_vm0, %v13202_v5, 0  ;;  %v13243_v23 = vand.u32 127, %v3165_v60 }
 0x3db   : > { %v2806_v19 = vpop.f32.mrf.mxu2  ;;  %v2867_v28 = vpop.f32.mrf.mxu0  ;;  %v17444_v39 = vld [vmem:[#allocation26_spill] sm:$0xff] }
 0x3dc   : > { %v2807_v13 = vadd.f32 %v2806_v19, %v2757_v17  ;;  %v2855_v51 = vpop.f32.mrf.mxu3  ;;  %6254 = vrot.lane.b32.xlu2 %v10556_v37, %s12291_s21  ;;  %4649 = vrot.lane.b32.xlu0 %v10348_v46, %s12291_s21  ;;  %v2916_v55 = vpop.f32.mrf.mxu1  ;;  %v10243_v17 = vld [vmem:[#allocation2 + $0x1c8] sm:$0xf]  ;;  %v10239_v46 = vld [vmem:[#allocation2 + $0x180] sm:$0xf]  ;;  %vm13247_vm1 = vcmp.le.s32.totalorder %v13243_v23, %v3167_v61  ;;  %vm13280_vm3 = vcmp.le.s32.totalorder %v13243_v23, %v13236_v1  ;;  %v17452_v61 = vmov 0 }
 0x3dd   : > { %v2917_v9 = vadd.f32 %v2916_v55, %v2867_v28  ;;  %v10244_v54 = vor.u32 %v11394_v26, %v10243_v17  ;;  %v10240_v19 = vor.u32 %v11393_v40, %v10239_v46  ;;  %v17451_v17 = vld [vmem:[#allocation31_spill] sm:$0xff]  ;;  %v17453_v61 = vsel %vm13280_vm3, 4294967295, %v17452_v61 }
 0x3de   : > { %6594 = vmatpush.bf16.xpose.msra.mxu3 %v6564_v48  ;;  %v2856_v31 = vadd.f32 %v2855_v51, %v2807_v13  ;;  %v10359_v48 = vld [vmem:[#allocation2 + $0x4c] sm:$0xf]  ;;  %v17445_v13 = vmov 0  ;;  %v11392_v51 = vld [vmem:[#allocation2 + $0x158] sm:$0xf0]  ;;  %17454 = vst [vmem:[#allocation38_spill] sm:$0xff] %v17453_v61 }
 0x3df   : > { %10313 = vmatmul.msk.bf16.vlgmr.msrb.gmra.mxu1 %vm17250_vm0, %v17443_v22  ;;  %v10360_v7 = vor.u32 %v11421_v43, %v10359_v48  ;;  %v17446_v13 = vsel %vm13247_vm1, 4294967295, %v17445_v13  ;;  %v10223_v48 = vld [vmem:[#allocation2 + $0x60] sm:$0xf] }
 0x3e0   : > { %v3083_v15 = vpack.c.bf16 %v2856_v31, %v2709_v62  ;;  %5762 = vmatpush.bf16.xpose.msra.mxu1 %v5756_v57  ;;  %17447 = vst [vmem:[#allocation19_spill] sm:$0xff] %v17446_v13  ;;  %v10235_v31 = vld [vmem:[#allocation2 + $0x138] sm:$0xf]  ;;  %v11391_v57 = vld [vmem:[#allocation2 + $0x110] sm:$0xf0] }
 0x3e1   : > { %10417 = vmatmul.msk.bf16.vlgmr.msrb.gmra.mxu3 %vm17250_vm0, %v10356_v56  ;;  %v10247_v27 = vld [vmem:[#allocation2 + $0x210] sm:$0xf]  ;;  %v10559_v38 = vld [vmem:[#allocation2 + $0x214] sm:$0xf]  ;;  %v10236_v56 = vor.u32 %v11392_v51, %v10235_v31 }
 0x3e2   : > { %3163 = vst [vmem:[#allocation2 + $0x234] sm:$0xff] %v3083_v15  ;;  %v3168_v15 = vadd.s32 16, %v13236_v1 }
 0x3e3   : > { %v2965_v49 = vpop.f32.mrf.mxu2  ;;  %v2869_v12 = vpop.f32.mrf.mxu0 }
 0x3e4   : > { %v2966_v50 = vadd.f32 %v2965_v49, %v2917_v9  ;;  %v13232_v18 = vpop.f32.mrf.mxu3  ;;  %v2918_v44 = vpop.f32.mrf.mxu1  ;;  %vm13261_vm2 = vcmp.le.s32.totalorder %v13243_v23, %v3168_v15 }
 0x3e5   : > { %v2919_v59 = vadd.f32 %v2918_v44, %v2869_v12 }
 0x3e6   : > { %v3009_v36 = vpack.c.bf16 %v2966_v50, %v2966_v50  ;;  %v5747_v50 = vsel %vm17250_vm0, %v13195_v34, 0 }
 0x3e8   : > { %3089 = vst [vmem:[#allocation2 + $0x20] sm:$0xf] %v3009_v36  ;;  %5763 = vmatpush.bf16.xpose.msra.mxu1 %v5753_v6  ;;  %v10231_v36 = vld [vmem:[#allocation2 + $0xf0] sm:$0xf]  ;;  %v17448_v6 = vmov 0 }
 0x3e9   : > { %v11395_v14 = vld [vmem:[#allocation2 + $0x230] sm:$0xf0]  ;;  %v11467_v24 = vld [vmem:[#allocation2 + $0x234] sm:$0xf0]  ;;  %v17449_v6 = vsel %vm13261_vm2, 4294967295, %v17448_v6 }
 0x3ea   : > { %v10248_v25 = vor.u32 %v11395_v14, %v10247_v27  ;;  %v10560_v45 = vor.u32 %v11467_v24, %v10559_v38  ;;  %17450 = vst [vmem:[#allocation34_spill] sm:$0xff] %v17449_v6  ;;  %v11390_v27 = vld [vmem:[#allocation2 + $0xc8] sm:$0xf0]  ;;  %v11422_v38 = vld [vmem:[#allocation2 + $0xb4] sm:$0xf0] }
 0x3eb   : > { %v2967_v58 = vpop.f32.mrf.mxu2  ;;  %v2872_v16 = vpop.f32.mrf.mxu0 }
 0x3ec   : > { %v2968_v30 = vadd.f32 %v2967_v58, %v2919_v59  ;;  %v3388_v35 = vpop.f32.mrf.mxu3  ;;  %3866 = vmatpush.bf16.msrb.mxu0 %v10248_v25  ;;  %6256 = vrot.lane.b32.xlu0 %v10560_v45, %s12291_s21  ;;  %v2921_v47 = vpop.f32.mrf.mxu1  ;;  %v10232_v59 = vor.u32 %v11391_v57, %v10231_v36  ;;  %v10227_v58 = vld [vmem:[#allocation2 + $0xa8] sm:$0xf]  ;;  %v10447_v36 = vld [vmem:[#allocation2 + $0x184] sm:$0xf] }
 0x3ed   : > { %v2922_v42 = vadd.f32 %v2921_v47, %v2872_v16  ;;  %v3427_v37 = vmul.f32 0.125, %v3388_v35  ;;  %v10228_v26 = vor.u32 %v11390_v27, %v10227_v58  ;;  %v11389_v16 = vld [vmem:[#allocation2 + $0x80] sm:$0xf0]  ;;  %v3426_v47 = vmul.f32 0.125, %v13232_v18  ;;  %v11441_v57 = vld [vmem:[#allocation2 + $0x1a4] sm:$0xf0]  ;;  %v7316_v27 = vpop.permute.xlu2 %7315 }
 0x3ee   : > { %v3014_v32 = vpack.c.bf16 %v2968_v30, %v2968_v30  ;;  %v10363_v30 = vld [vmem:[#allocation2 + $0x94] sm:$0xf]  ;;  %v10224_v18 = vor.u32 %v11389_v16, %v10223_v48 }
 0x3ef   : > { %10314 = vmatmul.msk.bf16.gmra.mxu1 %vm17250_vm0, %v17444_v39  ;;  %v13253_v62 = vsel %vm13247_vm1, %v3427_v37, -1e+30  ;;  %v10739_v21 = vld [vmem:[#allocation2 + $0x20] sm:$0xf]  ;;  %v10364_v43 = vor.u32 %v11422_v38, %v10363_v30  ;;  %v10448_v38 = vor.u32 %v11441_v57, %v10447_v36  ;;  %v5738_v30 = vsel %vm17250_vm0, %v13184_v63, 0 }
 0x3f0   : > { %3094 = vst [vmem:[#allocation2 + $0x44] sm:$0xf] %v3014_v32  ;;  %3867 = vmatpush.bf16.msrb.mxu0 %v10244_v54  ;;  %5764 = vmatpush.bf16.xpose.msra.mxu1 %v5750_v41  ;;  %v5744_v32 = vsel %vm17250_vm0, %v13192_v3, 0  ;;  %v13288_v3 = vsel %vm13280_vm3, %v3426_v47, -1e+30 }
 0x3f1   : > { %10418 = vmatmul.msk.bf16.gmra.mxu3 %vm17250_vm0, %v10360_v7  ;;  %v11388_v7 = vld [vmem:[#allocation2 + $0x38] sm:$0xf0]  ;;  %v11443_v41 = vld [vmem:[#allocation2 + $0x234] sm:$0xf0] }
 0x3f3   : > { %v2970_v29 = vpop.f32.mrf.mxu2  ;;  %v2874_v5 = vpop.f32.mrf.mxu0 }
 0x3f4   : > { %v3391_v28 = vpop.f32.mrf.mxu3  ;;  %3868 = vmatpush.bf16.msrb.mxu0 %v10240_v19  ;;  %v2971_v20 = vadd.f32 %v2970_v29, %v2922_v42  ;;  %v2923_v55 = vpop.f32.mrf.mxu1  ;;  %v10219_v19 = vld [vmem:[#allocation2 + $0x18] sm:$0xf]  ;;  %v10455_v29 = vld [vmem:[#allocation2 + $0x214] sm:$0xf] }
 0x3f5   : > { %v2924_v12 = vadd.f32 %v2923_v55, %v2874_v5  ;;  %v3428_v44 = vmul.f32 0.125, %v3391_v28  ;;  %v10220_v51 = vor.u32 %v11388_v7, %v10219_v19  ;;  %v5741_v5 = vsel %vm17250_vm0, %v13168_v11, 0  ;;  %v11442_v55 = vld [vmem:[#allocation2 + $0x1ec] sm:$0xf0]  ;;  %v13295_v11 = vpop.permute.xlu0 %7301 }
 0x3f6   : > { %3460 = vmax.xlane.f32.xlu1 %v13253_v62  ;;  %v3019_v22 = vpack.c.bf16 %v2971_v20, %v2971_v20  ;;  %v10456_v20 = vor.u32 %v11443_v41, %v10455_v29  ;;  %v10435_v29 = vld [vmem:[#allocation2 + $0xac] sm:$0xf] }
 0x3f7   : > { %v11508_v9 = vld [vmem:[#allocation2 + $0x40] sm:$0xf0]  ;;  %v13269_v45 = vsel %vm13261_vm2, %v3428_v44, -1e+30  ;;  %v10367_v44 = vld [vmem:[#allocation2 + $0xdc] sm:$0xf] }
 0x3f8   : > { %3869 = vmatpush.bf16.msrb.mxu0 %v10236_v56  ;;  %v10740_v49 = vor.u32 %v11508_v9, %v10739_v21  ;;  %3099 = vst [vmem:[#allocation2 + $0x68] sm:$0xf] %v3019_v22  ;;  %5765 = vmatpush.bf16.xpose.msra.mxu1 %v5747_v50  ;;  %v10451_v21 = vld [vmem:[#allocation2 + $0x1cc] sm:$0xf]  ;;  %v11423_v9 = vld [vmem:[#allocation2 + $0xfc] sm:$0xf0] }
 0x3f9   : > { %v10452_v56 = vor.u32 %v11442_v55, %v10451_v21  ;;  %v11424_v21 = vld [vmem:[#allocation2 + $0x144] sm:$0xf0] }
 0x3fa   : > { %7846 = vrot.lane.b32.xlu0 %v10740_v49, %s12291_s21 }
 0x3fb   : > { %v2972_v60 = vpop.f32.mrf.mxu2  ;;  %v2877_v24 = vpop.f32.mrf.mxu0 }
 0x3fc   : > { %v13265_v14 = vpop.f32.mrf.mxu3  ;;  %3870 = vmatpush.bf16.msrb.mxu0 %v10232_v59  ;;  %v2973_v34 = vadd.f32 %v2972_v60, %v2924_v12  ;;  %v2926_v25 = vpop.f32.mrf.mxu1  ;;  %v10368_v60 = vor.u32 %v11423_v9, %v10367_v44 }
 0x3fd   : > { %v2927_v54 = vadd.f32 %v2926_v25, %v2877_v24  ;;  %v17455_v24 = vld [vmem:[#allocation33_spill] sm:$0xff] }
 0x3fe   : > { %3462 = vmax.xlane.f32.xlu1 %v13269_v45  ;;  %v3024_v35 = vpack.c.bf16 %v2973_v34, %v2973_v34  ;;  %v11440_v34 = vld [vmem:[#allocation2 + $0x15c] sm:$0xf0] }
 0x3ff   : > { %10315 = vmatmul.msk.bf16.gmra.mxu1 %vm17250_vm0, %v17451_v17  ;;  %v10743_v25 = vld [vmem:[#allocation2 + $0x68] sm:$0xf] }
 0x400   : > { %3871 = vmatpush.bf16.msrb.mxu0 %v10228_v26  ;;  %3104 = vst [vmem:[#allocation2 + $0x8c] sm:$0xf] %v3024_v35  ;;  %5766 = vmatpush.bf16.xpose.msra.mxu1 %v5744_v32  ;;  %v7363_v35 = vsel %vm17250_vm0, %v7316_v27, 0 }
 0x401   : > { %10419 = vmatmul.msk.bf16.gmra.mxu3 %vm17250_vm0, %v10364_v43  ;;  %v10443_v43 = vld [vmem:[#allocation2 + $0x13c] sm:$0xf] }
 0x402   : > { %v10444_v16 = vor.u32 %v11440_v34, %v10443_v43  ;;  %v11436_v34 = vld [vmem:[#allocation2 + $0x3c] sm:$0xf0]  ;;  %v3172_v43 = vadd.s32 48, %v13236_v1 }
 0x403   : > { %v2975_v40 = vpop.f32.mrf.mxu2  ;;  %v2879_v37 = vpop.f32.mrf.mxu0 }
 0x404   : > { %v13284_v39 = vpop.f32.mrf.mxu3  ;;  %3872 = vmatpush.bf16.msrb.mxu0 %v10224_v18  ;;  %v2976_v42 = vadd.f32 %v2975_v40, %v2927_v54  ;;  %v2928_v46 = vpop.f32.mrf.mxu1  ;;  %v11439_v54 = vld [vmem:[#allocation2 + $0x114] sm:$0xf0]  ;;  %v10439_v40 = vld [vmem:[#allocation2 + $0xf4] sm:$0xf]  ;;  %vm13327_vm5 = vcmp.le.s32.totalorder %v13243_v23, %v3172_v43  ;;  %v3169_v43 = vadd.s32 24, %v13236_v1 }
 0x405   : > { %3458 = vmax.xlane.f32.xlu2 %v13288_v3  ;;  %v2929_v31 = vadd.f32 %v2928_v46, %v2879_v37  ;;  %v10440_v63 = vor.u32 %v11439_v54, %v10439_v40  ;;  %v11438_v37 = vld [vmem:[#allocation2 + $0xcc] sm:$0xf0]  ;;  %v11419_v46 = vld [vmem:[#allocation2 + $0x230] sm:$0xf0]  ;;  %v3430_v36 = vmul.f32 0.125, %v13284_v39 }
 0x406   : > { %v3029_v28 = vpack.c.bf16 %v2976_v42, %v2976_v42  ;;  %v7314_v42 = vpop.permute.xlu0 %7313  ;;  %v10427_v39 = vld [vmem:[#allocation2 + $0x1c] sm:$0xf]  ;;  %vm13393_vm9 = vcmp.le.s32.totalorder %v13243_v23, %v3169_v43 }
 0x407   : > { %v11509_v58 = vld [vmem:[#allocation2 + $0x88] sm:$0xf0] }
 0x408   : > { %3873 = vmatpush.bf16.msrb.mxu0 %v10220_v51  ;;  %3109 = vst [vmem:[#allocation2 + $0xb0] sm:$0xf] %v3029_v28  ;;  %5767 = vmatpush.bf16.xpose.msra.mxu1 %v5741_v5  ;;  %v10744_v47 = vor.u32 %v11509_v58, %v10743_v25  ;;  %v7360_v51 = vsel %vm17250_vm0, %v7314_v42, 0  ;;  %v10351_v28 = vld [vmem:[#allocation2 + $0x210] sm:$0xf]  ;;  %v7357_v25 = vsel %vm17250_vm0, %v13220_v2, 0 }
 0x409   : > { %v10352_v5 = vor.u32 %v11419_v46, %v10351_v28  ;;  %v17459_v2 = vmov 0 }
 0x40a   : > { %v17460_v2 = vsel %vm13327_vm5, 4294967295, %v17459_v2 }
 0x40b   : > { %v2977_v15 = vpop.f32.mrf.mxu2  ;;  %v2882_v50 = vpop.f32.mrf.mxu0  ;;  %17461 = vst [vmem:[#allocation37_spill] sm:$0xff] %v17460_v2 }
 0x40c   : > { %5472 = vmatpush.bf16.msra.mxu0 %v10456_v20  ;;  %v13293_v22 = vpop.f32.mrf.mxu3  ;;  %v2978_v49 = vadd.f32 %v2977_v15, %v2929_v31  ;;  %v2931_v12 = vpop.f32.mrf.mxu1  ;;  %v10436_v20 = vor.u32 %v11438_v37, %v10435_v29  ;;  %v3170_v15 = vadd.s32 32, %v13236_v1 }
 0x40d   : > { %v2932_v26 = vadd.f32 %v2931_v12, %v2882_v50  ;;  %v10371_v50 = vld [vmem:[#allocation2 + $0x124] sm:$0xf] }
 0x40e   : > { %v3034_v59 = vpack.c.bf16 %v2978_v49, %v2978_v49  ;;  %v10431_v12 = vld [vmem:[#allocation2 + $0x64] sm:$0xf]  ;;  %vm13313_vm4 = vcmp.le.s32.totalorder %v13243_v23, %v3170_v15 }
 0x40f   : > { %10316 = vmatmul.msk.bf16.gmra.mxu1 %vm17250_vm0, %v17455_v24  ;;  %v13322_v58 = vsel %vm13313_vm4, %v3430_v36, -1e+30 }
 0x410   : > { %5473 = vmatpush.bf16.msra.mxu0 %v10452_v56  ;;  %3114 = vst [vmem:[#allocation2 + $0xd4] sm:$0xf] %v3034_v59  ;;  %5768 = vmatpush.bf16.xpose.msra.mxu1 %v5738_v30  ;;  %v11437_v56 = vld [vmem:[#allocation2 + $0x84] sm:$0xf0]  ;;  %v10372_v59 = vor.u32 %v11424_v21, %v10371_v50  ;;  %v7351_v21 = vsel %vm17250_vm0, %v13208_v10, 0 }
 0x411   : > { %10420 = vmatmul.msk.bf16.gmra.mxu3 %vm17250_vm0, %v10368_v60  ;;  %v10432_v27 = vor.u32 %v11437_v56, %v10431_v12  ;;  %v17456_v60 = vld [vmem:[#allocation20_spill] sm:$0xff] }
 0x413   : > { %v2980_v17 = vpop.f32.mrf.mxu2  ;;  %v2884_v18 = vpop.f32.mrf.mxu0 }
 0x414   : > { %5474 = vmatpush.bf16.msra.mxu0 %v10448_v38  ;;  %v3401_v32 = vpop.f32.mrf.mxu3  ;;  %v2981_v48 = vadd.f32 %v2980_v17, %v2932_v26  ;;  %v2933_v7 = vpop.f32.mrf.mxu1  ;;  %v10428_v26 = vor.u32 %v11436_v34, %v10427_v39 }
 0x415   : > { %v2934_v19 = vadd.f32 %v2933_v7, %v2884_v18  ;;  %v7354_v7 = vsel %vm17250_vm0, %v13210_v53, 0 }
 0x416   : > { %v3039_v41 = vpack.c.bf16 %v2981_v48, %v2981_v48  ;;  %v3432_v48 = vmul.f32 0.125, %v3401_v32  ;;  %v11425_v32 = vld [vmem:[#allocation2 + $0x18c] sm:$0xf0] }
 0x417   : > { %7848 = vrot.lane.b32.xlu1 %v10744_v47, %s12291_s21 }
 0x418   : > { %7365 = vmatpush.bf16.xpose.msrb.mxu1 %v7363_v35  ;;  %5475 = vmatpush.bf16.msra.mxu0 %v10444_v16  ;;  %3119 = vst [vmem:[#allocation2 + $0xf8] sm:$0xf] %v3039_v41  ;;  %v13335_v40 = vsel %vm13327_vm5, %v3432_v48, -1e+30  ;;  %v3429_v48 = vmul.f32 0.125, %v13265_v14  ;;  %v17475_v14 = vmov 0 }
 0x41b   : > { %v2982_v55 = vpop.f32.mrf.mxu2  ;;  %v2887_v57 = vpop.f32.mrf.mxu0 }
 0x41c   : > { %5476 = vmatpush.bf16.msra.mxu0 %v10440_v63  ;;  %v13305_v31 = vpop.f32.mrf.mxu3  ;;  %v2983_v9 = vadd.f32 %v2982_v55, %v2934_v19  ;;  %v2936_v49 = vpop.f32.mrf.mxu1  ;;  %v3174_v63 = vadd.s32 64, %v13236_v1 }
 0x41d   : > { %4651 = vrot.lane.b32.xlu2 %v10352_v5, %s12291_s21  ;;  %v2937_v24 = vadd.f32 %v2936_v49, %v2887_v57  ;;  %v17463_v5 = vmov 0  ;;  %v3176_v57 = vadd.s32 80, %v13236_v1 }
 0x41e   : > { %v3044_v44 = vpack.c.bf16 %v2983_v9, %v2983_v9  ;;  %vm13344_vm6 = vcmp.le.s32.totalorder %v13243_v23, %v3174_v63  ;;  %v3433_v63 = vmul.f32 0.125, %v13305_v31 }
 0x41f   : > { %10317 = vmatmul.msk.bf16.gmra.mxu1 %vm17250_vm0, %v17456_v60  ;;  %v17464_v5 = vsel %vm13344_vm6, 4294967295, %v17463_v5  ;;  %vm13358_vm7 = vcmp.le.s32.totalorder %v13243_v23, %v3176_v57  ;;  %v7348_v60 = vsel %vm17250_vm0, %v13188_v52, 0  ;;  %v10379_v52 = vld [vmem:[#allocation2 + $0x1b4] sm:$0xf] }
 0x420   : > { %7366 = vmatpush.bf16.xpose.msrb.mxu1 %v7360_v51  ;;  %5477 = vmatpush.bf16.msra.mxu0 %v10436_v20  ;;  %3124 = vst [vmem:[#allocation2 + $0x11c] sm:$0xf] %v3044_v44  ;;  %v10375_v51 = vld [vmem:[#allocation2 + $0x16c] sm:$0xf]  ;;  %v17462_v20 = vld [vmem:[#allocation25_spill] sm:$0xff] }
 0x421   : > { %10421 = vmatmul.msk.bf16.gmra.mxu3 %vm17250_vm0, %v10372_v59  ;;  %v10376_v53 = vor.u32 %v11425_v32, %v10375_v51  ;;  %17465 = vst [vmem:[#allocation41_spill] sm:$0xff] %v17464_v5  ;;  %v17466_v59 = vmov 0  ;;  %v17472_v32 = vmov 0 }
 0x422   : > { %v17467_v59 = vsel %vm13358_vm7, 4294967295, %v17466_v59  ;;  %v17473_v32 = vsel %vm13393_vm9, 4294967295, %v17472_v32 }
 0x423   : > { %v2985_v30 = vpop.f32.mrf.mxu2  ;;  %v2889_v47 = vpop.f32.mrf.mxu0  ;;  %17468 = vst [vmem:[#allocation23_spill] sm:$0xff] %v17467_v59 }
 0x424   : > { %5478 = vmatpush.bf16.msra.mxu0 %v10432_v27  ;;  %v3406_v35 = vpop.f32.mrf.mxu3  ;;  %3466 = vmax.xlane.f32.xlu0 %v13322_v58  ;;  %v2986_v16 = vadd.f32 %v2985_v30, %v2937_v24  ;;  %v2938_v17 = vpop.f32.mrf.mxu1  ;;  %v3171_v27 = vadd.s32 40, %v13236_v1  ;;  %17474 = vst [vmem:[#allocation21_spill] sm:$0xff] %v17473_v32 }
 0x425   : > { %v2939_v18 = vadd.f32 %v2938_v17, %v2889_v47  ;;  %v3434_v28 = vmul.f32 0.125, %v3406_v35  ;;  %v17471_v17 = vld [vmem:[#allocation27_spill] sm:$0xff] }
 0x426   : > { %v3049_v54 = vpack.c.bf16 %v2986_v16, %v2986_v16  ;;  %vm13374_vm8 = vcmp.le.s32.totalorder %v13243_v23, %v3171_v27  ;;  %v10747_v27 = vld [vmem:[#allocation2 + $0xb0] sm:$0xf] }
 0x427   : > { %v13353_v56 = vsel %vm13344_vm6, %v3434_v28, -1e+30  ;;  %v7342_v28 = vsel %vm17250_vm0, %v13295_v11, 0 }
 0x428   : > { %7367 = vmatpush.bf16.xpose.msrb.mxu1 %v7357_v25  ;;  %5479 = vmatpush.bf16.msra.mxu0 %v10428_v26  ;;  %3129 = vst [vmem:[#allocation2 + $0x140] sm:$0xf] %v3049_v54  ;;  %v3431_v25 = vmul.f32 0.125, %v13293_v22  ;;  %v11426_v26 = vld [vmem:[#allocation2 + $0x1d4] sm:$0xf0]  ;;  %v3178_v54 = vadd.s32 96, %v13236_v1 }
 0x429   : > { %v10380_v47 = vor.u32 %v11426_v26, %v10379_v52 }
 0x42a   : > { %v13383_v22 = vsel %vm13374_vm8, %v3431_v25, -1e+30  ;;  %vm13399_vm10 = vcmp.le.s32.totalorder %v13243_v23, %v3178_v54  ;;  %v11468_v25 = vld [vmem:[#allocation2 + $0x28] sm:$0xf0]  ;;  %v10751_v54 = vld [vmem:[#allocation2 + $0xf8] sm:$0xf] }
 0x42b   : > { %v2987_v41 = vpop.f32.mrf.mxu2  ;;  %v2892_v46 = vpop.f32.mrf.mxu0  ;;  %v17476_v14 = vsel %vm13399_vm10, 4294967295, %v17475_v14 }
 0x42c   : > { %v13337_v42 = vpop.f32.mrf.mxu3  ;;  %3470 = vmax.xlane.f32.xlu0 %v13335_v40  ;;  %v2988_v37 = vadd.f32 %v2987_v41, %v2939_v18  ;;  %v2941_v19 = vpop.f32.mrf.mxu1  ;;  %v3173_v18 = vadd.s32 56, %v13236_v1  ;;  %v7345_v41 = vsel %vm17250_vm0, %v13176_v8, 0  ;;  %17477 = vst [vmem:[#allocation22_spill] sm:$0xff] %v17476_v14 }
 0x42d   : > { %v2942_v55 = vadd.f32 %v2941_v19, %v2892_v46  ;;  %v13405_v19 = vsel %vm13393_vm9, %v3429_v48, -1e+30  ;;  %v11511_v48 = vld [vmem:[#allocation2 + $0x118] sm:$0xf0] }
 0x42e   : > { %v3054_v29 = vpack.c.bf16 %v2988_v37, %v2988_v37  ;;  %vm13408_vm11 = vcmp.le.s32.totalorder %v13243_v23, %v3173_v18 }
 0x42f   : > { %10318 = vmatmul.msk.bf16.gmra.mxu1 %vm17250_vm0, %v17462_v20  ;;  %v13420_v51 = vsel %vm13408_vm11, %v3433_v63, -1e+30  ;;  %v3435_v20 = vmul.f32 0.125, %v13337_v42 }
 0x430   : > { %7368 = vmatpush.bf16.xpose.msrb.mxu1 %v7354_v7  ;;  %3134 = vst [vmem:[#allocation2 + $0x164] sm:$0xf] %v3054_v29  ;;  %v3175_v29 = vadd.s32 72, %v13236_v1 }
 0x431   : > { %10422 = vmatmul.msk.bf16.gmra.mxu3 %vm17250_vm0, %v10376_v53  ;;  %v13426_v53 = vpop.permute.xlu2 %4639 }
 0x432   : > { %vm13430_vm12 = vcmp.le.s32.totalorder %v13243_v23, %v3175_v29 }
 0x433   : > { %v2990_v15 = vpop.f32.mrf.mxu2  ;;  %v2894_v50 = vpop.f32.mrf.mxu0  ;;  %v13438_v11 = vsel %vm13430_vm12, %v3435_v20, -1e+30 }
 0x434   : > { %v3411_v9 = vpop.f32.mrf.mxu3  ;;  %3474 = vmax.xlane.f32.xlu0 %v13353_v56  ;;  %v2991_v49 = vadd.f32 %v2990_v15, %v2942_v55  ;;  %v2943_v36 = vpop.f32.mrf.mxu1  ;;  %v17480_v15 = vmov 0 }
 0x435   : > { %v3436_v44 = vmul.f32 0.125, %v3411_v9  ;;  %v2944_v10 = vadd.f32 %v2943_v36, %v2894_v50  ;;  %v17481_v15 = vsel %vm13430_vm12, 4294967295, %v17480_v15  ;;  %v10383_v9 = vld [vmem:[#allocation2 + $0x1fc] sm:$0xf]  ;;  %v13446_v36 = vpop.permute.xlu0 %4637 }
 0x436   : > { %v3059_v12 = vpack.c.bf16 %v2991_v49, %v2991_v49  ;;  %17482 = vst [vmem:[#allocation40_spill] sm:$0xff] %v17481_v15  ;;  %v17483_v49 = vld [vmem:[#allocation32_spill] sm:$0xff] }
 0x437   : > { %v13367_v34 = vsel %vm13358_vm7, %v3436_v44, -1e+30  ;;  %v11512_v20 = vld [vmem:[#allocation2 + $0x160] sm:$0xf0] }
 0x438   : > { %7369 = vmatpush.bf16.xpose.msrb.mxu1 %v7351_v21  ;;  %3139 = vst [vmem:[#allocation2 + $0x188] sm:$0xf] %v3059_v12  ;;  %v11427_v21 = vld [vmem:[#allocation2 + $0x21c] sm:$0xf0] }
 0x439   : > { %v10384_v57 = vor.u32 %v11427_v21, %v10383_v9  ;;  %v13442_v12 = vpop.permute.xlu2 %6244 }
 0x43b   : > { %v2992_v24 = vpop.f32.mrf.mxu2  ;;  %v2897_v52 = vpop.f32.mrf.mxu0 }
 0x43c   : > { %v13370_v39 = vpop.f32.mrf.mxu3  ;;  %3478 = vmax.xlane.f32.xlu0 %v13367_v34  ;;  %v2993_v30 = vadd.f32 %v2992_v24, %v2944_v10  ;;  %v2946_v7 = vpop.f32.mrf.mxu1 }
 0x43e   : > { %v3064_v16 = vpack.c.bf16 %v2993_v30, %v2993_v30  ;;  %v10563_v30 = vld [vmem:[#allocation2 + $0x8] sm:$0xf] }
 0x43f   : > { %10319 = vmatmul.msk.bf16.gmra.mxu1 %vm17250_vm0, %v17471_v17  ;;  %v10759_v42 = vld [vmem:[#allocation2 + $0x188] sm:$0xf]  ;;  %v10564_v43 = vor.u32 %v11468_v25, %v10563_v30  ;;  %v17484_v17 = vld [vmem:[#allocation24_spill] sm:$0xff]  ;;  %v10567_v25 = vld [vmem:[#allocation2 + $0x50] sm:$0xf] }
 0x440   : > { %7370 = vmatpush.bf16.xpose.msrb.mxu1 %v7348_v60  ;;  %3144 = vst [vmem:[#allocation2 + $0x1ac] sm:$0xf] %v3064_v16  ;;  %v11510_v60 = vld [vmem:[#allocation2 + $0xd0] sm:$0xf0]  ;;  %v2947_v16 = vadd.f32 %v2946_v7, %v2897_v52 }
 0x441   : > { %10423 = vmatmul.msk.bf16.gmra.mxu3 %vm17250_vm0, %v10380_v47  ;;  %3468 = vmax.xlane.f32.xlu1 %v13383_v22  ;;  %v10748_v24 = vor.u32 %v11510_v60, %v10747_v27  ;;  %v13449_v26 = vpop.permute.xlu2 %4645  ;;  %v11469_v27 = vld [vmem:[#allocation2 + $0x70] sm:$0xf0] }
 0x442   : > { %v10568_v30 = vor.u32 %v11469_v27, %v10567_v25 }
 0x443   : > { %v2995_v18 = vpop.f32.mrf.mxu2  ;;  %v2899_v7 = vpop.f32.mrf.mxu0 }
 0x444   : > { %v3416_v37 = vpop.f32.mrf.mxu3  ;;  %v2948_v55 = vpop.f32.mrf.mxu1  ;;  %v2996_v63 = vadd.f32 %v2995_v18, %v2947_v16  ;;  %v11470_v18 = vld [vmem:[#allocation2 + $0xb8] sm:$0xf0] }
 0x445   : > { %v3438_v46 = vmul.f32 0.125, %v3416_v37  ;;  %v2949_v21 = vadd.f32 %v2948_v55, %v2899_v7  ;;  %v17485_v55 = vld [vmem:[#allocation29_spill] sm:$0xff]  ;;  %v17486_v7 = vld [vmem:[#allocation30_spill] sm:$0xff] }
 0x446   : > { %3464 = vmax.xlane.f32.xlu2 %v13405_v19  ;;  %v3069_v29 = vpack.c.bf16 %v2996_v63, %v2996_v63 }
 0x447   : > { %v13415_v31 = vsel %vm13399_vm10, %v3438_v46, -1e+30  ;;  %v11513_v50 = vld [vmem:[#allocation2 + $0x1a8] sm:$0xf0]  ;;  %v10752_v46 = vor.u32 %v11511_v48, %v10751_v54 }
 0x448   : > { %7371 = vmatpush.bf16.xpose.msrb.mxu1 %v7345_v41  ;;  %3482 = vmax.xlane.f32.xlu0 %v13415_v31  ;;  %v10760_v10 = vor.u32 %v11513_v50, %v10759_v42  ;;  %v13457_v41 = vpop.permute.xlu0 %6242  ;;  %3149 = vst [vmem:[#allocation2 + $0x1d0] sm:$0xf] %v3069_v29  ;;  %v3180_v29 = vadd.s32 112, %v13236_v1 }
 0x449   : > { %3472 = vmax.xlane.f32.xlu1 %v13420_v51  ;;  %v13462_v9 = vpop.permute.xlu2 %6250 }
 0x44a   : > { %vm13489_vm13 = vcmp.le.s32.totalorder %v13243_v23, %v3180_v29 }
 0x44c   : > { %v13444_v44 = vpop.f32.mrf.mxu1  ;;  %v13459_v37 = vpop.f32.mrf.mxu3 }
 0x44f   : > { %10320 = vmatmul.msk.bf16.gmra.mxu1 %vm17250_vm0, %v17483_v49  ;;  %v2997_v49 = vpop.f32.mrf.mxu2 }
 0x450   : > { %7372 = vmatpush.bf16.xpose.msrb.mxu1 %v7342_v28  ;;  %v10755_v28 = vld [vmem:[#allocation2 + $0x140] sm:$0xf]  ;;  %v13464_v42 = vpop.permute.xlu0 %4641 }
 0x451   : > { %10424 = vmatmul.msk.bf16.gmra.mxu3 %vm17250_vm0, %v10384_v57  ;;  %3476 = vmax.xlane.f32.xlu1 %v13438_v11  ;;  %v10756_v57 = vor.u32 %v11512_v20, %v10755_v28  ;;  %v13469_v52 = vpop.permute.xlu2 %6254 }
 0x454   : > { %v13452_v47 = vpop.f32.mrf.mxu1 }
 0x457   : > { %v3000_v25 = vpop.f32.mrf.mxu2 }
 0x45c   : > { %7856 = vrot.lane.b32.xlu0 %v10760_v10, %s12291_s21  ;;  %v13466_v50 = vpop.f32.mrf.mxu1  ;;  %v2998_v10 = vadd.f32 %v2997_v49, %v2949_v21  ;;  %v17487_v49 = vmov 0 }
 0x45d   : > { %v17488_v49 = vsel %vm13489_vm13, 4294967295, %v17487_v49 }
 0x45e   : > { %7850 = vrot.lane.b32.xlu2 %v10748_v24, %s12291_s21  ;;  %v3074_v60 = vpack.c.bf16 %v2998_v10, %v2998_v10  ;;  %v3421_v24 = vpop.f32.mrf.mxu3  ;;  %17489 = vst [vmem:[#allocation17_spill] sm:$0xff] %v17488_v49 }
 0x45f   : > { %10521 = vmatmul.msk.bf16.vlgmr.msra.gmra.mxu1 %vm17250_vm0, %v17484_v17  ;;  %v3440_v21 = vmul.f32 0.125, %v3421_v24 }
 0x460   : > { %3154 = vst [vmem:[#allocation2 + $0x1f4] sm:$0xf] %v3074_v60  ;;  %v2902_v60 = vpop.f32.mrf.mxu0 }
 0x461   : > { %10625 = vmatmul.msk.bf16.vlgmr.msra.gmra.mxu3 %vm17250_vm0, %v10564_v43  ;;  %v13474_v43 = vpop.permute.xlu0 %6246  ;;  %v13495_v27 = vsel %vm13489_vm13, %v3440_v21, -1e+30  ;;  %v2952_v24 = vadd.f32 %v13444_v44, %v2902_v60 }
 0x464   : > { %v4167_v16 = vpop.f32.mrf.mxu1 }
 0x465   : > { %v4206_v60 = vmul.f32 0.125, %v4167_v16 }
 0x466   : > { %7852 = vrot.lane.b32.xlu2 %v10752_v46, %s12291_s21  ;;  %v13476_v17 = vpop.f32.mrf.mxu3  ;;  %v10571_v46 = vld [vmem:[#allocation2 + $0x98] sm:$0xf] }
 0x467   : > { %v10572_v28 = vor.u32 %v11470_v18, %v10571_v46  ;;  %v3001_v18 = vadd.f32 %v3000_v25, %v2952_v24  ;;  %v3437_v46 = vmul.f32 0.125, %v13370_v39  ;;  %v3002_v39 = vpop.f32.mrf.mxu2  ;;  %v3179_v25 = vadd.s32 104, %v13236_v1 }
 0x468   : > { %v2904_v44 = vpop.f32.mrf.mxu0  ;;  %v13522_v16 = vsel %vm13247_vm1, %v4206_v60, -1e+30 }
 0x469   : > { %v4648_v48 = vpop.permute.xlu0 %4647  ;;  %v3079_v29 = vpack.c.bf16 %v3001_v18, %v3001_v18  ;;  %v17493_v18 = vld [vmem:[#allocation36_spill] sm:$0xff]  ;;  %vm13525_vm15 = vcmp.le.s32.totalorder %v13243_v23, %v3179_v25 }
 0x46a   : > { %7854 = vrot.lane.b32.xlu1 %v10756_v57, %s12291_s21 }
 0x46b   : > { %3159 = vst [vmem:[#allocation2 + $0x218] sm:$0xf] %v3079_v29 }
 0x46c   : > { %v13480_v63 = vpop.f32.mrf.mxu1 }
 0x46e   : > { %v13486_v57 = vpop.f32.mrf.mxu3 }
 0x46f   : > { %10522 = vmatmul.msk.bf16.gmra.mxu1 %vm17250_vm0, %v17485_v55 }
 0x471   : > { %10626 = vmatmul.msk.bf16.gmra.mxu3 %vm17250_vm0, %v10568_v30  ;;  %v4650_v10 = vpop.permute.xlu0 %4649  ;;  %v3177_v30 = vadd.s32 88, %v13236_v1 }
 0x473   : > { %vm13504_vm14 = vcmp.le.s32.totalorder %v13243_v23, %v3177_v30  ;;  %v4644_v30 = vpop.permute.xlu1 %4643 }
 0x474   : > { %v13500_v55 = vpop.f32.mrf.mxu1  ;;  %v13511_v21 = vsel %vm13504_vm14, %v3437_v46, -1e+30  ;;  %v3439_v46 = vmul.f32 0.125, %v13459_v37 }
 0x478   : > { %v13478_v54 = vpop.xlane.xlu2 %3458 }
 0x479   : > { %v6257_v29 = vpop.permute.xlu0 %6256  ;;  %v3490_v25 = vsub.f32 %v13288_v3, %v13478_v54  ;;  %v11472_v3 = vld [vmem:[#allocation2 + $0x148] sm:$0xf0]  ;;  %v10579_v54 = vld [vmem:[#allocation2 + $0x128] sm:$0xf] }
 0x47c   : > { %v4175_v4 = vpop.f32.mrf.mxu1 }
 0x47f   : > { %10523 = vmatmul.msk.bf16.gmra.mxu1 %vm17250_vm0, %v17486_v7  ;;  %v11471_v7 = vld [vmem:[#allocation2 + $0x100] sm:$0xf0] }
 0x480   : > { %v4652_v20 = vpop.permute.xlu2 %4651 }
 0x481   : > { %10627 = vmatmul.msk.bf16.gmra.mxu3 %vm17250_vm0, %v10572_v28  ;;  %4661 = vmatpush.bf16.msrb.mxu2 %v4652_v20  ;;  %v17490_v28 = vmov 0  ;;  %v4994_v20 = vpop.f32.mrf.mxu3 }
 0x482   : > { %v17491_v28 = vsel %vm13504_vm14, 4294967295, %v17490_v28  ;;  %v5033_v60 = vmul.f32 0.125, %v4994_v20  ;;  %v17498_v20 = vmov 0 }
 0x483   : > { %17492 = vst [vmem:[#allocation26_spill] sm:$0xff] %v17491_v28 }
 0x485   : > { %4662 = vmatpush.bf16.msrb.mxu2 %v4650_v10  ;;  %v10575_v10 = vld [vmem:[#allocation2 + $0xe0] sm:$0xf] }
 0x486   : > { %3486 = vmax.xlane.f32.xlu0 %v13495_v27  ;;  %v10576_v24 = vor.u32 %v11471_v7, %v10575_v10  ;;  %v17494_v7 = vmov 0  ;;  %v11514_v10 = vld [vmem:[#allocation2 + $0x1f0] sm:$0xf0] }
 0x487   : > { %v17495_v7 = vsel %vm13525_vm15, 4294967295, %v17494_v7 }
 0x488   : > { %17496 = vst [vmem:[#allocation31_spill] sm:$0xff] %v17495_v7 }
 0x489   : > { %4663 = vmatpush.bf16.msrb.mxu2 %v4648_v48  ;;  %v2954_v48 = vadd.f32 %v13452_v47, %v2904_v44  ;;  %v10763_v44 = vld [vmem:[#allocation2 + $0x1d0] sm:$0xf]  ;;  %v4997_v37 = vpop.f32.mrf.mxu3 }
 0x48d   : > { %4664 = vmatpush.bf16.msrb.mxu2 %v13449_v26  ;;  %v3003_v26 = vadd.f32 %v3002_v39, %v2954_v48  ;;  %v13533_v48 = vsel %vm13525_vm15, %v3439_v46, -1e+30  ;;  %v10764_v39 = vor.u32 %v11514_v10, %v10763_v44  ;;  %v5034_v46 = vmul.f32 0.125, %v4997_v37  ;;  %v17501_v44 = vld [vmem:[#allocation35_spill] sm:$0xff] }
 0x48f   : > { %3480 = vmax.xlane.f32.xlu2 %v13511_v21  ;;  %10524 = vmatmul.msk.bf16.gmra.mxu1 %vm17250_vm0, %v17493_v18  ;;  %v3084_v47 = vpack.c.bf16 %v3003_v26, %v3003_v26  ;;  %v13541_v18 = vpop.permute.xlu0 %7846  ;;  %v13553_v26 = vpop.f32.mrf.mxu1 }
 0x490   : > { %17497 = vst [vmem:[#allocation33_spill] sm:$0xff] %v13541_v18 }
 0x491   : > { %10628 = vmatmul.msk.bf16.gmra.mxu3 %vm17250_vm0, %v10576_v24  ;;  %4665 = vmatpush.bf16.msrb.mxu2 %v4644_v30  ;;  %3164 = vst [vmem:[#allocation2 + $0x23c] sm:$0xf] %v3084_v47  ;;  %v3181_v24 = vadd.s32 120, %v13236_v1  ;;  %v3441_v30 = vmul.f32 0.125, %v13476_v17  ;;  %v3506_v1 = vmul.f32 1.442695, %v3490_v25  ;;  %v13562_v47 = vpop.f32.mrf.mxu3 }
 0x493   : > { %vm13549_vm0 = vcmp.le.s32.totalorder %v13243_v23, %v3181_v24  ;;  %v10580_v23 = vor.u32 %v11472_v3, %v10579_v54  ;;  %11702 = vpow2.f32 %v3506_v1  ;;  %v4209_v24 = vmul.f32 0.125, %v4175_v4  ;;  %v10583_v3 = vld [vmem:[#allocation2 + $0x170] sm:$0xf] }
 0x494   : > { %4239 = vmax.xlane.f32.xlu1 %v13522_v16  ;;  %v17499_v20 = vsel %vm13549_vm0, 4294967295, %v17498_v20  ;;  %v13559_v17 = vsel %vm13549_vm0, %v3441_v30, -1e+30  ;;  %v5032_v30 = vmul.f32 0.125, %v13486_v57 }
 0x495   : > { %4666 = vmatpush.bf16.msrb.mxu2 %v13464_v42  ;;  %v13546_v42 = vsel %vm13247_vm1, %v5033_v60, -1e+30  ;;  %17500 = vst [vmem:[#allocation20_spill] sm:$0xff] %v17499_v20  ;;  %vm17502_vm1 = vcmask 523264   ;;  %v13583_v1 = vsel %vm13313_vm4, %v4209_v24, -1e+30 }
 0x496   : > { %vm17503_vm13 = vmmov %vm17502_vm1  ;;  %v13588_v4 = vsel %vm13280_vm3, %v5032_v30, -1e+30  ;;  %v11474_v24 = vld [vmem:[#allocation2 + $0x1d8] sm:$0xf0]  ;;  %v10587_v30 = vld [vmem:[#allocation2 + $0x1b8] sm:$0xf] }
 0x497   : > { %3484 = vmax.xlane.f32.xlu2 %v13533_v48  ;;  %v3467_v10 = vpop.xlane.xlu0 %3466  ;;  %v4180_v60 = vpop.f32.mrf.mxu1 }
 0x498   : > { %v3494_v37 = vsub.f32 %v13322_v58, %v3467_v10  ;;  %v11473_v58 = vld [vmem:[#allocation2 + $0x190] sm:$0xf0] }
 0x499   : > { %4667 = vmatpush.bf16.msrb.mxu2 %v13426_v53  ;;  %v6249_v53 = vpop.permute.xlu1 %6248  ;;  %v10584_v57 = vor.u32 %v11473_v58, %v10583_v3  ;;  %v4211_v58 = vmul.f32 0.125, %v4180_v60  ;;  %v10588_v3 = vor.u32 %v11474_v24, %v10587_v30  ;;  %v11475_v30 = vld [vmem:[#allocation2 + $0x220] sm:$0xf0] }
 0x49a   : > { %7858 = vrot.lane.b32.xlu0 %v10764_v39, %s12291_s21  ;;  %v13574_v39 = vpop.eup %11702  ;;  %v3514_v25 = vmul.f32 1.442695, %v3494_v37 }
 0x49c   : > { %5066 = vmax.xlane.f32.xlu1 %v13546_v42  ;;  %11704 = vpow2.f32 %v3514_v25 }
 0x49d   : > { %4668 = vmatpush.bf16.msrb.mxu2 %v13446_v36  ;;  %v13570_v36 = vsel %vm13261_vm2, %v5034_v46, -1e+30  ;;  %v17504_v46 = vld [vmem:[#allocation39_spill] sm:$0xff] }
 0x49f   : > { %3488 = vmax.xlane.f32.xlu2 %v13559_v17  ;;  %10525 = vmatmul.msk.bf16.gmra.mxu1 %vm17502_vm1, %v17501_v44  ;;  %v4182_v54 = vpop.f32.mrf.mxu1 }
 0x4a1   : > { %6266 = vmatpush.bf16.msra.mxu2 %v6257_v29  ;;  %10629 = vmatmul.msk.bf16.gmra.mxu3 %vm17503_vm13, %v10580_v23  ;;  %v6253_v29 = vpop.permute.xlu1 %6252  ;;  %vm17505_vm13 = vmmov %vm17502_vm1 }
 0x4a4   : > { %5068 = vmax.xlane.f32.xlu1 %v13570_v36 }
 0x4a5   : > { %6267 = vmatpush.bf16.msra.mxu2 %v13469_v52  ;;  %v13578_v52 = vpop.f32.mrf.mxu3 }
 0x4a7   : > { %3538 = vadd.xlane.f32.xlu2 %v13574_v39  ;;  %v13599_v10 = vpop.f32.mrf.mxu1 }
 0x4a9   : > { %6268 = vmatpush.bf16.msra.mxu2 %v6253_v29  ;;  %v3461_v44 = vpop.xlane.xlu1 %3460  ;;  %v3471_v29 = vpop.xlane.xlu0 %3470 }
 0x4aa   : > { %v3496_v25 = vsub.f32 %v13335_v40, %v3471_v29  ;;  %v13619_v40 = vsel %vm13327_vm5, %v4211_v58, -1e+30 }
 0x4ac   : > { %4245 = vmax.xlane.f32.xlu1 %v13583_v1 }
 0x4ad   : > { %6269 = vmatpush.bf16.msra.mxu2 %v13462_v9  ;;  %v13595_v9 = vpop.eup %11704  ;;  %v5004_v23 = vpop.f32.mrf.mxu3 }
 0x4af   : > { %5064 = vmax.xlane.f32.xlu2 %v13588_v4  ;;  %10526 = vmatmul.msk.bf16.gmra.mxu1 %vm17502_vm1, %v17504_v46 }
 0x4b1   : > { %6270 = vmatpush.bf16.msra.mxu2 %v6249_v53  ;;  %10630 = vmatmul.msk.bf16.gmra.mxu3 %vm17505_vm13, %v10584_v57  ;;  %v5037_v53 = vmul.f32 0.125, %v5004_v23  ;;  %v17506_v23 = vld [vmem:[#allocation28_spill] sm:$0xff]  ;;  %vm17507_vm13 = vmmov %vm17502_vm1  ;;  %v3475_v18 = vpop.xlane.xlu0 %3474 }
 0x4b3   : > { %v13604_v37 = vsel %vm13374_vm8, %v5037_v53, -1e+30  ;;  %v10767_v53 = vld [vmem:[#allocation2 + $0x218] sm:$0xf] }
 0x4b4   : > { %3546 = vadd.xlane.f32.xlu1 %v13595_v9 }
 0x4b5   : > { %6271 = vmatpush.bf16.msra.mxu2 %v13474_v43  ;;  %v3491_v43 = vsub.f32 %v13253_v62, %v3461_v44  ;;  %v5007_v46 = vpop.f32.mrf.mxu3  ;;  %v11515_v62 = vld [vmem:[#allocation2 + $0x238] sm:$0xf0] }
 0x4b6   : > { %v10768_v60 = vor.u32 %v11515_v62, %v10767_v53  ;;  %v3463_v53 = vpop.xlane.xlu1 %3462  ;;  %v17509_v62 = vld [vmem:[#allocation44_spill] sm:$0xff] }
 0x4b7   : > { %v3508_v57 = vmul.f32 1.442695, %v3491_v43 }
 0x4b9   : > { %6272 = vmatpush.bf16.msra.mxu2 %v13442_v12  ;;  %v4205_v12 = vmul.f32 0.125, %v13466_v50  ;;  %11706 = vpow2.f32 %v3508_v57  ;;  %v4187_v50 = vpop.f32.mrf.mxu1  ;;  %v3465_v24 = vpop.xlane.xlu2 %3464  ;;  %v4208_v57 = vmul.f32 0.125, %v13500_v55  ;;  %v3498_v55 = vsub.f32 %v13353_v56, %v3475_v18 }
 0x4ba   : > { %v5036_v56 = vmul.f32 0.125, %v13578_v52  ;;  %v4214_v52 = vmul.f32 0.125, %v4187_v50 }
 0x4bb   : > { %v13615_v44 = vsel %vm13280_vm3, %v4205_v12, -1e+30  ;;  %v3493_v12 = vsub.f32 %v13405_v19, %v3465_v24 }
 0x4bc   : > { %5074 = vmax.xlane.f32.xlu1 %v13604_v37 }
 0x4bd   : > { %6273 = vmatpush.bf16.msra.mxu2 %v13457_v41  ;;  %v3518_v41 = vmul.f32 1.442695, %v3496_v25  ;;  %v13626_v43 = vpop.f32.mrf.mxu3 }
 0x4bf   : > { %10527 = vmatmul.msk.bf16.gmra.mxu1 %vm17502_vm1, %v17506_v23  ;;  %11708 = vpow2.f32 %v3518_v41  ;;  %v13624_v29 = vpop.eup %11706  ;;  %v5038_v23 = vmul.f32 0.125, %v5007_v46  ;;  %v4212_v46 = vmul.f32 0.125, %v4182_v54  ;;  %v17514_v54 = vld [vmem:[#allocation46_spill] sm:$0xff] }
 0x4c1   : > { %10631 = vmatmul.msk.bf16.gmra.mxu3 %vm17507_vm13, %v10588_v3  ;;  %v13633_v58 = vpop.f32.mrf.mxu1  ;;  %v10591_v3 = vld [vmem:[#allocation2 + $0x200] sm:$0xf]  ;;  %vm17510_vm13 = vmmov %vm17502_vm1  ;;  %v13645_v19 = vsel %vm13327_vm5, %v5038_v23, -1e+30  ;;  %v13658_v23 = vsel %vm13408_vm11, %v4212_v46, -1e+30 }
 0x4c2   : > { %v10592_v41 = vor.u32 %v11475_v30, %v10591_v3  ;;  %17511 = vst [vmem:[#allocation27_spill] sm:$0xff] %v13645_v19  ;;  %v13652_v30 = vpop.permute.xlu1 %7848  ;;  %v3522_v3 = vmul.f32 1.442695, %v3498_v55  ;;  %v13669_v55 = vsel %vm13313_vm4, %v5036_v56, -1e+30 }
 0x4c3   : > { %17512 = vst [vmem:[#allocation32_spill] sm:$0xff] %v13652_v30 }
 0x4c4   : > { %4237 = vmax.xlane.f32.xlu0 %v13615_v44  ;;  %4249 = vmax.xlane.f32.xlu1 %v13619_v40  ;;  %17513 = vst [vmem:[#allocation24_spill] sm:$0xff] %v13658_v23 }
 0x4c5   : > { %v13628_v25 = vpop.eup %11708  ;;  %v13647_v24 = vpop.f32.mrf.mxu3 }
 0x4c6   : > { %17508 = vst [vmem:[#allocation25_spill] sm:$0xff] %v13628_v25 }
 0x4c7   : > { %7860 = vrot.lane.b32.xlu2 %v10768_v60, %s12291_s21  ;;  %v3512_v60 = vmul.f32 1.442695, %v3493_v12 }
 0x4c9   : > { %11710 = vpow2.f32 %v3512_v60  ;;  %v4192_v12 = vpop.f32.mrf.mxu1 }
 0x4ca   : > { %11712 = vpow2.f32 %v3522_v3  ;;  %v3469_v18 = vpop.xlane.xlu1 %3468  ;;  %v4210_v3 = vmul.f32 0.125, %v13553_v26 }
 0x4cb   : > { %v3495_v46 = vsub.f32 %v13383_v22, %v3469_v18  ;;  %v17518_v18 = vld [vmem:[#allocation42_spill] sm:$0xff] }
 0x4cc   : > { %3540 = vadd.xlane.f32.xlu0 %v13624_v29  ;;  %3550 = vadd.xlane.f32.xlu1 %v13628_v25  ;;  %v13641_v25 = vsel %vm13393_vm9, %v4208_v57, -1e+30  ;;  %v13681_v56 = vsel %vm13374_vm8, %v4210_v3, -1e+30  ;;  %v3479_v3 = vpop.xlane.xlu0 %3478 }
 0x4cd   : > { %v3516_v2 = vmul.f32 1.442695, %v3495_v46 }
 0x4cf   : > { %10528 = vmatmul.msk.bf16.gmra.mxu1 %vm17502_vm1, %v17509_v62  ;;  %v13654_v57 = vpop.eup %11710  ;;  %11714 = vpow2.f32 %v3516_v2 }
 0x4d0   : > { %v13665_v60 = vpop.eup %11712 }
 0x4d1   : > { %10632 = vmatmul.msk.bf16.gmra.mxu3 %vm17510_vm13, %v10592_v41  ;;  %v5014_v41 = vpop.f32.mrf.mxu3  ;;  %v4195_v62 = vpop.f32.mrf.mxu1  ;;  %17515 = vst [vmem:[#allocation29_spill] sm:$0xff] %v13665_v60  ;;  %vm17519_vm13 = vmmov %vm17502_vm1 }
 0x4d2   : > { %v5041_v50 = vmul.f32 0.125, %v5014_v41  ;;  %v4216_v41 = vmul.f32 0.125, %v4192_v12 }
 0x4d4   : > { %4243 = vmax.xlane.f32.xlu0 %v13641_v25  ;;  %5076 = vmax.xlane.f32.xlu1 %v13645_v19  ;;  %v4207_v19 = vmul.f32 0.125, %v13480_v63 }
 0x4d5   : > { %v13703_v2 = vpop.eup %11714 }
 0x4d6   : > { %v13694_v63 = vsel %vm13261_vm2, %v4207_v19, -1e+30 }
 0x4d9   : > { %v13675_v30 = vpop.f32.mrf.mxu3  ;;  %v13687_v22 = vpop.f32.mrf.mxu1 }
 0x4dc   : > { %3544 = vadd.xlane.f32.xlu0 %v13654_v57  ;;  %4251 = vmax.xlane.f32.xlu1 %v13658_v23  ;;  %v3473_v23 = vpop.xlane.xlu1 %3472 }
 0x4df   : > { %10729 = vmatmul.msk.bf16.vlgmr.msrb.gmra.mxu1 %vm17502_vm1, %v17514_v54  ;;  %v3492_v54 = vsub.f32 %v13269_v45, %v3463_v53  ;;  %v3497_v45 = vsub.f32 %v13420_v51, %v3473_v23  ;;  %v13696_v53 = vpop.permute.xlu2 %7850  ;;  %v13707_v51 = vsel %vm13430_vm12, %v5041_v50, -1e+30  ;;  %v5035_v50 = vmul.f32 0.125, %v13562_v47 }
 0x4e0   : > { %17517 = vst [vmem:[#allocation36_spill] sm:$0xff] %v13696_v53  ;;  %v13723_v53 = vsel %vm13504_vm14, %v4216_v41, -1e+30  ;;  %v17525_v41 = vld [vmem:[#allocation47_spill] sm:$0xff] }
 0x4e1   : > { %v3510_v26 = vmul.f32 1.442695, %v3492_v54  ;;  %v3520_v46 = vmul.f32 1.442695, %v3497_v45  ;;  %17520 = vst [vmem:[#allocation35_spill] sm:$0xff] %v13707_v51  ;;  %v13711_v19 = vpop.f32.mrf.mxu1 }
 0x4e2   : > { %17523 = vst [vmem:[#allocation44_spill] sm:$0xff] %v13723_v53 }
 0x4e3   : > { %11716 = vpow2.f32 %v3510_v26  ;;  %v3483_v26 = vpop.xlane.xlu0 %3482 }
 0x4e4   : > { %5072 = vmax.xlane.f32.xlu0 %v13669_v55  ;;  %3554 = vadd.xlane.f32.xlu1 %v13665_v60  ;;  %v13685_v60 = vsel %vm13430_vm12, %v4214_v52, -1e+30  ;;  %v13701_v52 = vpop.f32.mrf.mxu3  ;;  %11718 = vpow2.f32 %v3520_v46  ;;  %v3477_v54 = vpop.xlane.xlu1 %3476  ;;  %v3502_v12 = vsub.f32 %v13415_v31, %v3483_v26  ;;  %v5039_v31 = vmul.f32 0.125, %v13626_v43 }
 0x4e5   : > { %17516 = vst [vmem:[#allocation30_spill] sm:$0xff] %v13685_v60  ;;  %v3499_v26 = vsub.f32 %v13438_v11, %v3477_v54 }
 0x4e6   : > { %v13757_v43 = vsel %vm13408_vm11, %v5039_v31, -1e+30 }
 0x4e7   : > { %v13716_v45 = vpop.permute.xlu2 %7852  ;;  %17528 = vst [vmem:[#allocation48_spill] sm:$0xff] %v13757_v43 }
 0x4e8   : > { %17521 = vst [vmem:[#allocation39_spill] sm:$0xff] %v13716_v45  ;;  %v13733_v45 = vsel %vm13393_vm9, %v5035_v50, -1e+30 }
 0x4e9   : > { %v13713_v23 = vpop.eup %11716  ;;  %v13735_v47 = vpop.f32.mrf.mxu1 }
 0x4ec   : > { %4247 = vmax.xlane.f32.xlu0 %v13681_v56  ;;  %4255 = vmax.xlane.f32.xlu1 %v13685_v60  ;;  %v5022_v46 = vpop.f32.mrf.mxu3  ;;  %v4217_v60 = vmul.f32 0.125, %v4195_v62  ;;  %v13729_v15 = vpop.permute.xlu1 %7854 }
 0x4ed   : > { %17524 = vst [vmem:[#allocation46_spill] sm:$0xff] %v13729_v15  ;;  %v5044_v54 = vmul.f32 0.125, %v5022_v46 }
 0x4ee   : > { %v13747_v62 = vsel %vm13399_vm10, %v4217_v60, -1e+30  ;;  %v3524_v60 = vmul.f32 1.442695, %v3499_v26 }
 0x4ef   : > { %10730 = vmatmul.msk.bf16.gmra.mxu1 %vm17519_vm13, %v17518_v18  ;;  %v13718_v18 = vpop.eup %11718  ;;  %17527 = vst [vmem:[#allocation47_spill] sm:$0xff] %v13747_v62  ;;  %vm17531_vm13 = vmmov %vm17502_vm1  ;;  %v13786_v46 = vsel %vm13399_vm10, %v5044_v54, -1e+30  ;;  %v13804_v54 = vpop.permute.xlu0 %7856 }
 0x4f0   : > { %4241 = vmax.xlane.f32.xlu2 %v13694_v63  ;;  %17522 = vst [vmem:[#allocation28_spill] sm:$0xff] %v13718_v18 }
 0x4f1   : > { %17536 = vst [vmem:[#allocation53_spill] sm:$0xff] %v13804_v54 }
 0x4f4   : > { %3548 = vadd.xlane.f32.xlu0 %v13703_v2  ;;  %5082 = vmax.xlane.f32.xlu1 %v13707_v51  ;;  %v4213_v51 = vmul.f32 0.125, %v13599_v10  ;;  %v5024_v50 = vpop.f32.mrf.mxu3 }
 0x4f6   : > { %v13743_v10 = vsel %vm13344_vm6, %v4213_v51, -1e+30  ;;  %v5770_v51 = vpop.f32.mrf.mxu1 }
 0x4f7   : > { %17526 = vst [vmem:[#allocation42_spill] sm:$0xff] %v13743_v10 }
 0x4f8   : > { %3542 = vadd.xlane.f32.xlu2 %v13713_v23 }
 0x4fc   : > { %3552 = vadd.xlane.f32.xlu0 %v13718_v18  ;;  %4259 = vmax.xlane.f32.xlu1 %v13723_v53  ;;  %v3530_v18 = vmul.f32 1.442695, %v3502_v12  ;;  %v5040_v12 = vmul.f32 0.125, %v13647_v24  ;;  %v3500_v24 = vsub.f32 %v13367_v34, %v3479_v3  ;;  %v13774_v26 = vpop.f32.mrf.mxu3  ;;  %v5042_v34 = vmul.f32 0.125, %v13675_v30 }
 0x4fe   : > { %11720 = vpow2.f32 %v3530_v18  ;;  %v4215_v18 = vmul.f32 0.125, %v13633_v58  ;;  %v13765_v11 = vsel %vm13344_vm6, %v5040_v12, -1e+30  ;;  %v17530_v58 = vld [vmem:[#allocation45_spill] sm:$0xff]  ;;  %v3526_v12 = vmul.f32 1.442695, %v3500_v24 }
 0x4ff   : > { %10731 = vmatmul.msk.bf16.gmra.mxu1 %vm17502_vm1, %v17525_v41  ;;  %11722 = vpow2.f32 %v3524_v60  ;;  %17532 = vst [vmem:[#allocation45_spill] sm:$0xff] %v13786_v46  ;;  %v13788_v60 = vpop.f32.mrf.mxu1 }
 0x500   : > { %5070 = vmax.xlane.f32.xlu2 %v13733_v45  ;;  %v13772_v31 = vsel %vm13358_vm7, %v4215_v18, -1e+30  ;;  %11724 = vpow2.f32 %v3526_v12  ;;  %v5043_v12 = vmul.f32 0.125, %v13701_v52 }
 0x502   : > { %v3481_v53 = vpop.xlane.xlu2 %3480 }
 0x503   : > { %v3501_v5 = vsub.f32 %v13511_v21, %v3481_v53  ;;  %v13794_v53 = vsel %vm13358_vm7, %v5042_v34, -1e+30 }
 0x504   : > { %4253 = vmax.xlane.f32.xlu0 %v13743_v10  ;;  %4261 = vmax.xlane.f32.xlu1 %v13747_v62  ;;  %v13760_v10 = vpop.eup %11720  ;;  %17533 = vst [vmem:[#allocation50_spill] sm:$0xff] %v13794_v53 }
 0x505   : > { %17529 = vst [vmem:[#allocation49_spill] sm:$0xff] %v13760_v10  ;;  %v3528_v18 = vmul.f32 1.442695, %v3501_v5 }
 0x507   : > { %v13753_v41 = vpop.xlane.xlu1 %4239  ;;  %v13806_v5 = vpop.f32.mrf.mxu1 }
 0x508   : > { %5078 = vmax.xlane.f32.xlu2 %v13757_v43  ;;  %v13780_v43 = vpop.eup %11722 }
 0x50a   : > { %v3485_v15 = vpop.xlane.xlu2 %3484 }
 0x50c   : > { %5080 = vmax.xlane.f32.xlu0 %v13765_v11  ;;  %3562 = vadd.xlane.f32.xlu1 %v13760_v10 }
 0x50f   : > { %v5067_v62 = vpop.xlane.xlu1 %5066  ;;  %10732 = vmatmul.msk.bf16.gmra.mxu1 %vm17531_vm13, %v17530_v58  ;;  %vm17542_vm13 = vnez %v17488_v49 }
 0x510   : > { %4257 = vmax.xlane.f32.xlu2 %v13772_v31 }
 0x512   : > { %v3489_v10 = vpop.xlane.xlu2 %3488 }
 0x513   : > { %v3505_v3 = vsub.f32 %v13559_v17, %v3489_v10  ;;  %v5029_v17 = vpop.f32.mrf.mxu3  ;;  %v13799_v10 = vpop.eup %11724 }
 0x514   : > { %3556 = vadd.xlane.f32.xlu0 %v13780_v43  ;;  %5088 = vmax.xlane.f32.xlu1 %v13786_v46  ;;  %17534 = vst [vmem:[#allocation51_spill] sm:$0xff] %v13799_v10  ;;  %v5047_v34 = vmul.f32 0.125, %v5029_v17  ;;  %v5097_v17 = vsub.f32 %v13546_v42, %v5067_v62  ;;  %v13836_v46 = vpop.f32.mrf.mxu1 }
 0x515   : > { %v3536_v21 = vmul.f32 1.442695, %v3505_v3  ;;  %v5045_v3 = vmul.f32 0.125, %v5024_v50  ;;  %v4218_v50 = vmul.f32 0.125, %v13687_v22 }
 0x516   : > { %v13827_v52 = vsel %vm13549_vm0, %v5047_v34, -1e+30 }
 0x517   : > { %11726 = vpow2.f32 %v3536_v21  ;;  %v13797_v30 = vpop.xlane.xlu1 %5068  ;;  %17538 = vst [vmem:[#allocation55_spill] sm:$0xff] %v13827_v52  ;;  %v13843_v22 = vsel %vm13525_vm15, %v4218_v50, -1e+30 }
 0x518   : > { %5084 = vmax.xlane.f32.xlu2 %v13794_v53  ;;  %11728 = vpow2.f32 %v3528_v18  ;;  %v13817_v18 = vsel %vm13504_vm14, %v5043_v12, -1e+30  ;;  %v13834_v12 = vsel %vm13525_vm15, %v5045_v3, -1e+30  ;;  %v5114_v53 = vmul.f32 1.442695, %v5097_v17 }
 0x519   : > { %17537 = vst [vmem:[#allocation54_spill] sm:$0xff] %v13817_v18  ;;  %v5046_v17 = vmul.f32 0.125, %v13774_v26  ;;  %vm17559_vm14 = vcmask 523264  }
 0x51a   : > { %17539 = vst [vmem:[#allocation56_spill] sm:$0xff] %v13843_v22 }
 0x51b   : > { %v13819_v21 = vpop.f32.mrf.mxu3  ;;  %v13888_v26 = vsel %vm17542_vm13, %v5046_v17, -1e+30  ;;  %v17550_v17 = vld [vmem:[#allocation43_spill] sm:$0xff] }
 0x51c   : > { %3558 = vadd.xlane.f32.xlu0 %v13799_v10  ;;  %17547 = vst [vmem:[#allocation63_spill] sm:$0xff] %v13888_v26  ;;  %v4270_v10 = vsub.f32 %v13522_v16, %v13753_v41 }
 0x51d   : > { %v13802_v24 = vpop.eup %11726 }
 0x51e   : > { %17535 = vst [vmem:[#allocation52_spill] sm:$0xff] %v13802_v24  ;;  %3568 = vadd.xlane.f32.xlu1 %v13802_v24  ;;  %v13809_v58 = vpop.eup %11728  ;;  %v3503_v24 = vsub.f32 %v13533_v48, %v3485_v15  ;;  %v5810_v15 = vmul.f32 0.125, %v5770_v51  ;;  %v4287_v16 = vmul.f32 1.442695, %v4270_v10  ;;  %v11490_v10 = vld [vmem:[#allocation2 + $0x1f0] sm:$0xf0] }
 0x51f   : > { %10733 = vmatmul.msk.bf16.gmra.mxu1 %vm17502_vm1, %v13174_v0  ;;  %v13821_v54 = vpop.xlane.xlu1 %4245  ;;  %v3487_v0 = vpop.xlane.xlu0 %3486 }
 0x520   : > { %3560 = vadd.xlane.f32.xlu2 %v13809_v58  ;;  %v3504_v48 = vsub.f32 %v13495_v27, %v3487_v0  ;;  %v3532_v34 = vmul.f32 1.442695, %v3503_v24  ;;  %v13848_v62 = vsel %vm13280_vm3, %v5810_v15, -1e+30  ;;  %v13864_v0 = vpop.f32.mrf.mxu1 }
 0x521   : > { %17540 = vst [vmem:[#allocation57_spill] sm:$0xff] %v13848_v62 }
 0x522   : > { %v3534_v42 = vmul.f32 1.442695, %v3504_v48  ;;  %11730 = vpow2.f32 %v3532_v34 }
 0x523   : > { %v6598_v3 = vpop.f32.mrf.mxu3  ;;  %11732 = vpow2.f32 %v5114_v53 }
 0x524   : > { %5086 = vmax.xlane.f32.xlu0 %v13817_v18  ;;  %v4219_v18 = vmul.f32 0.125, %v13711_v19  ;;  %v13855_v19 = vpop.xlane.xlu2 %3538  ;;  %11734 = vpow2.f32 %v3534_v42  ;;  %v6637_v42 = vmul.f32 0.125, %v6598_v3 }
 0x525   : > { %11736 = vrcp.f32 %v13855_v19  ;;  %vm3575_vm15 = vweird.f32 %v13855_v19 }
 0x526   : > { %5094 = vmax.xlane.f32.xlu1 %v13827_v52  ;;  %v13859_v24 = vsel %vm17542_vm13, %v4219_v18, -1e+30  ;;  %vm17551_vm13 = vcmask 523264  }
 0x527   : > { %v13850_v51 = vpop.xlane.xlu1 %3546  ;;  %v13853_v27 = vpop.permute.xlu0 %7858  ;;  %17543 = vst [vmem:[#allocation59_spill] sm:$0xff] %v13859_v24 }
 0x528   : > { %5090 = vmax.xlane.f32.xlu2 %v13834_v12  ;;  %17541 = vst [vmem:[#allocation58_spill] sm:$0xff] %v13853_v27  ;;  %v13867_v50 = vpop.eup %11730 }
 0x529   : > { %17544 = vst [vmem:[#allocation60_spill] sm:$0xff] %v13867_v50  ;;  %v13870_v53 = vpop.eup %11732 }
 0x52a   : > { %17545 = vst [vmem:[#allocation61_spill] sm:$0xff] %v13870_v53  ;;  %v13873_v18 = vpop.eup %11734 }
 0x52b   : > { %17546 = vst [vmem:[#allocation62_spill] sm:$0xff] %v13873_v18  ;;  %v13876_v15 = vpop.eup %11736  ;;  %v13882_v52 = vpop.f32.mrf.mxu3 }
 0x52c   : > { %4263 = vmax.xlane.f32.xlu0 %v13843_v22  ;;  %v5065_v27 = vpop.xlane.xlu2 %5064 }
 0x52e   : > { %5842 = vmax.xlane.f32.xlu1 %v13848_v62 }
 0x52f   : > { %10734 = vmatmul.msk.bf16.gmra.mxu1 %vm17502_vm1, %v13153_v33  ;;  %v13878_v48 = vpop.xlane.xlu1 %5074  ;;  %vm17548_vm1 = vnez %v17446_v13 }
 0x530   : > { %4265 = vmax.xlane.f32.xlu2 %v13859_v24  ;;  %v13890_v24 = vpop.f32.mrf.mxu1  ;;  %v13896_v3 = vsel %vm17548_vm1, %v6637_v42, -1e+30 }
 0x531   : > { %17549 = vst [vmem:[#allocation64_spill] sm:$0xff] %v13896_v3 }
 0x534   : > { %3564 = vadd.xlane.f32.xlu0 %v13867_v50 }
 0x536   : > { %5146 = vadd.xlane.f32.xlu1 %v13870_v53  ;;  %v3571_v53 = vmul.f32 %v13876_v15, %v13855_v19 }
 0x537   : > { %v4238_v33 = vpop.xlane.xlu0 %4237  ;;  %v13904_v62 = vpop.xlane.xlu1 %4249 }
 0x538   : > { %v4269_v34 = vsub.f32 %v13615_v44, %v4238_v33  ;;  %3566 = vadd.xlane.f32.xlu2 %v13873_v18  ;;  %v5096_v44 = vsub.f32 %v13588_v4, %v5065_v27  ;;  %v4220_v33 = vmul.f32 0.125, %v13735_v47  ;;  %v13906_v4 = vpop.f32.mrf.mxu3 }
 0x53a   : > { %v4285_v7 = vmul.f32 1.442695, %v4269_v34  ;;  %v3572_v34 = vsub.f32 1.0, %v3571_v53  ;;  %v5112_v49 = vmul.f32 1.442695, %v5096_v44  ;;  %v5098_v53 = vsub.f32 %v13570_v36, %v13797_v30 }
 0x53b   : > { %v13912_v47 = vsel %vm13549_vm0, %v4220_v33, -1e+30  ;;  %v5812_v44 = vmul.f32 0.125, %v13806_v5  ;;  %v3581_v33 = vand.u32 2147483648, %v13855_v19  ;;  %v3579_v36 = vand.u32 2147483647, %v13855_v19 }
 0x53c   : > { %11738 = vpow2.f32 %v4285_v7  ;;  %5092 = vmax.xlane.f32.xlu0 %v13888_v26  ;;  %v3573_v27 = vmul.f32 %v13876_v15, %v3572_v34  ;;  %17553 = vst [vmem:[#allocation65_spill] sm:$0xff] %v13912_v47  ;;  %v5116_v22 = vmul.f32 1.442695, %v5098_v53 }
 0x53d   : > { %v3582_v19 = vor.u32 1.1754944e-38, %v3581_v33 }
 0x53e   : > { %6670 = vmax.xlane.f32.xlu1 %v13896_v3  ;;  %v3574_v3 = vadd.f32 %v13876_v15, %v3573_v27  ;;  %v13931_v27 = vsel %vm13261_vm2, %v5812_v44, -1e+30 }
 0x53f   : > { %v3541_v18 = vpop.xlane.xlu0 %3540  ;;  %10735 = vmatmul.msk.bf16.gmra.mxu1 %vm17551_vm13, %v17550_v17  ;;  %v13918_v17 = vpop.f32.mrf.mxu1  ;;  %vm3576_vm13 = vweird.f32 %v13876_v15  ;;  %17556 = vst [vmem:[#allocation66_spill] sm:$0xff] %v13931_v27 }
 0x540   : > { %11740 = vrcp.f32 %v3541_v18  ;;  %vm13925_vm0 = vmor %vm3575_vm15, %vm3576_vm13  ;;  %v3596_v5 = vand.u32 2147483648, %v3541_v18  ;;  %v3594_v50 = vand.u32 2147483647, %v3541_v18  ;;  %v6606_v44 = vpop.f32.mrf.mxu3  ;;  %vm3580_vm15 = vcmp.eq.f32.partialorder %v3579_v36, 8.507059e+37  ;;  %v11491_v36 = vld [vmem:[#allocation2 + $0x238] sm:$0xf0] }
 0x541   : > { %11742 = vpow2.f32 %v5112_v49  ;;  %v3578_v53 = vsel %vm13925_vm0, %v13876_v15, %v3574_v3  ;;  %vm3590_vm0 = vweird.f32 %v3541_v18 }
 0x542   : > { %v13902_v7 = vpop.eup %11738  ;;  %11744 = vpow2.f32 %v5116_v22  ;;  %v3583_v15 = vsel %vm3580_vm15, %v3582_v19, %v3578_v53  ;;  %v3597_v3 = vor.u32 1.1754944e-38, %v3596_v5  ;;  %vm3595_vm10 = vcmp.eq.f32.partialorder %v3594_v50, 8.507059e+37  ;;  %v10655_v19 = vld [vmem:[#allocation2 + $0x188] sm:$0xf] }
 0x543   : > { %17552 = vst [vmem:[#allocation43_spill] sm:$0xff] %v13902_v7  ;;  %4317 = vadd.xlane.f32.xlu2 %v13902_v7 }
 0x544   : > { %4267 = vmax.xlane.f32.xlu0 %v13912_v47 }
 0x546   : > { %v11741_v42 = vpop.eup %11740 }
 0x547   : > { %v3586_v34 = vmul.f32 %v11741_v42, %v3541_v18  ;;  %v4244_v7 = vpop.xlane.xlu0 %4243  ;;  %v13933_v47 = vpop.eup %11742  ;;  %vm3591_vm6 = vweird.f32 %v11741_v42  ;;  %v10663_v18 = vld [vmem:[#allocation2 + $0x218] sm:$0xf] }
 0x548   : > { %17557 = vst [vmem:[#allocation67_spill] sm:$0xff] %v13933_v47  ;;  %v4272_v26 = vsub.f32 %v13641_v25, %v4244_v7  ;;  %vm3592_vm13 = vmor %vm3590_vm0, %vm3591_vm6  ;;  %v13954_v5 = vpop.eup %11744 }
 0x549   : > { %v3587_v30 = vsub.f32 1.0, %v3586_v34  ;;  %v13939_v34 = vpop.xlane.xlu1 %3550 }
 0x54a   : > { %v4291_v7 = vmul.f32 1.442695, %v4272_v26  ;;  %v10664_v26 = vor.u32 %v11491_v36, %v10663_v18 }
 0x54b   : > { %v3588_v20 = vmul.f32 %v11741_v42, %v3587_v30  ;;  %5846 = vmax.xlane.f32.xlu2 %v13931_v27  ;;  %v6636_v30 = vmul.f32 0.125, %v13819_v21  ;;  %v13948_v27 = vpop.f32.mrf.mxu1 }
 0x54c   : > { %5144 = vadd.xlane.f32.xlu0 %v13933_v47  ;;  %v17558_v47 = vld [vmem:[#allocation18_spill] sm:$0xff]  ;;  %11746 = vpow2.f32 %v4291_v7  ;;  %v10651_v7 = vld [vmem:[#allocation2 + $0x140] sm:$0xf] }
 0x54d   : > { %v3589_v49 = vadd.f32 %v11741_v42, %v3588_v20  ;;  %v3584_v20 = vmul.f32 %v13574_v39, %v3583_v15  ;;  %17560 = vst [vmem:[#allocation18_spill] sm:$0xff] %v13954_v5  ;;  %v13959_v21 = vsel %vm13280_vm3, %v6636_v30, -1e+30  ;;  %11748 = vpow2.f32 %v4287_v16  ;;  %v10659_v39 = vld [vmem:[#allocation2 + $0x1d0] sm:$0xf]  ;;  %v13972_v30 = vpop.permute.xlu2 %7860 }
 0x54e   : > { %17561 = vst [vmem:[#allocation68_spill] sm:$0xff] %v13959_v21  ;;  %v10660_v53 = vor.u32 %v11490_v10, %v10659_v39  ;;  %v11488_v16 = vld [vmem:[#allocation2 + $0x160] sm:$0xf0] }
 0x54f   : > { %v3593_v22 = vsel %vm3592_vm13, %v11741_v42, %v3589_v49  ;;  %v13946_v33 = vpop.xlane.xlu0 %3544  ;;  %10736 = vmatmul.msk.bf16.gmra.mxu1 %vm17559_vm14, %v17558_v47  ;;  %v13964_v47 = vpop.f32.mrf.mxu3  ;;  %v11489_v49 = vld [vmem:[#allocation2 + $0x1a8] sm:$0xf0]  ;;  %17564 = vst [vmem:[#allocation71_spill] sm:$0xff] %v13972_v30 }
 0x550   : > { %v3598_v25 = vsel %vm3595_vm10, %v3597_v3, %v3593_v22  ;;  %v5101_v22 = vsub.f32 %v13604_v37, %v13878_v48  ;;  %11750 = vrcp.f32 %v13946_v33  ;;  %v10647_v37 = vld [vmem:[#allocation2 + $0xf8] sm:$0xf]  ;;  %v11487_v48 = vld [vmem:[#allocation2 + $0x118] sm:$0xf0]  ;;  %vm3620_vm10 = vweird.f32 %v13946_v33 }
 0x551   : > { %v3599_v41 = vmul.f32 %v13624_v29, %v3598_v25  ;;  %v13962_v29 = vpop.xlane.xlu1 %5076  ;;  %v10656_v25 = vor.u32 %v11489_v49, %v10655_v19  ;;  %v10648_v19 = vor.u32 %v11487_v48, %v10647_v37  ;;  %v10643_v49 = vld [vmem:[#allocation2 + $0xb0] sm:$0xf] }
 0x552   : > { %v13968_v15 = vpop.eup %11746  ;;  %v5122_v36 = vmul.f32 1.442695, %v5101_v22  ;;  %v11486_v22 = vld [vmem:[#allocation2 + $0xd0] sm:$0xf0] }
 0x553   : > { %5148 = vadd.xlane.f32.xlu2 %v13954_v5  ;;  %v3810_v50 = vpack.c.bf16 %v3599_v41, %v3584_v20  ;;  %17562 = vst [vmem:[#allocation69_spill] sm:$0xff] %v13968_v15  ;;  %v13970_v3 = vpop.eup %11748  ;;  %v6640_v20 = vmul.f32 0.125, %v6606_v44  ;;  %v5811_v41 = vmul.f32 0.125, %v13788_v60  ;;  %v14060_v6 = vpop.f32.mrf.mxu1 }
 0x554   : > { %6668 = vmax.xlane.f32.xlu0 %v13959_v21  ;;  %17563 = vst [vmem:[#allocation70_spill] sm:$0xff] %v13970_v3  ;;  %11752 = vpow2.f32 %v5122_v36 }
 0x555   : > { %3874 = vmatmul.bf16.vlgmr.msrb.gmra.mxu0 %v3810_v50  ;;  %v13988_v10 = vsel %vm13313_vm4, %v6640_v20, -1e+30  ;;  %v13993_v60 = vsel %vm17548_vm1, %v5811_v41, -1e+30  ;;  %v10644_v41 = vor.u32 %v11486_v22, %v10643_v49  ;;  %v11484_v49 = vld [vmem:[#allocation2 + $0x40] sm:$0xf0] }
 0x556   : > { %7076 = vmatpush.bf16.msrb.mxu0 %v10664_v26  ;;  %v10652_v26 = vor.u32 %v11488_v16, %v10651_v7  ;;  %17565 = vst [vmem:[#allocation72_spill] sm:$0xff] %v13988_v10  ;;  %v5813_v16 = vmul.f32 0.125, %v13836_v46 }
 0x557   : > { %v13966_v42 = vpop.xlane.xlu0 %5072  ;;  %v13984_v39 = vpop.f32.mrf.mxu3  ;;  %17566 = vst [vmem:[#allocation73_spill] sm:$0xff] %v13993_v60 }
 0x558   : > { %v14011_v46 = vsel %vm13393_vm9, %v5813_v16, -1e+30  ;;  %v6638_v16 = vmul.f32 0.125, %v13882_v52 }
 0x559   : > { %v13982_v50 = vpop.xlane.xlu1 %4251  ;;  %17568 = vst [vmem:[#allocation75_spill] sm:$0xff] %v14011_v46 }
 0x55a   : > { %7077 = vmatpush.bf16.msrb.mxu0 %v10660_v53  ;;  %v14037_v52 = vsel %vm13261_vm2, %v6638_v16, -1e+30  ;;  %v3624_v16 = vand.u32 2147483647, %v13946_v33 }
 0x55b   : > { %4323 = vadd.xlane.f32.xlu2 %v13968_v15  ;;  %17571 = vst [vmem:[#allocation78_spill] sm:$0xff] %v14037_v52 }
 0x55c   : > { %4319 = vadd.xlane.f32.xlu0 %v13970_v3  ;;  %vm3625_vm3 = vcmp.eq.f32.partialorder %v3624_v16, 8.507059e+37 }
 0x55e   : > { %7078 = vmatpush.bf16.msrb.mxu0 %v10656_v25  ;;  %v13997_v25 = vpop.eup %11750 }
 0x55f   : > { %v13979_v18 = vpop.xlane.xlu0 %4247  ;;  %v3616_v36 = vmul.f32 %v13997_v25, %v13946_v33  ;;  %v14004_v61 = vpop.eup %11752  ;;  %vm3621_vm6 = vweird.f32 %v13997_v25 }
 0x560   : > { %17567 = vst [vmem:[#allocation74_spill] sm:$0xff] %v14004_v61  ;;  %v6613_v37 = vpop.f32.mrf.mxu3  ;;  %vm3622_vm15 = vmor %vm3620_vm10, %vm3621_vm6 }
 0x562   : > { %7079 = vmatpush.bf16.msrb.mxu0 %v10652_v26  ;;  %v10639_v26 = vld [vmem:[#allocation2 + $0x68] sm:$0xf] }
 0x563   : > { %6676 = vmax.xlane.f32.xlu2 %v13988_v10  ;;  %v4242_v44 = vpop.xlane.xlu2 %4241  ;;  %v11485_v10 = vld [vmem:[#allocation2 + $0x88] sm:$0xf0] }
 0x564   : > { %5844 = vmax.xlane.f32.xlu0 %v13993_v60  ;;  %v4271_v53 = vsub.f32 %v13694_v63, %v4242_v44  ;;  %v14006_v63 = vpop.xlane.xlu1 %3554  ;;  %v10640_v44 = vor.u32 %v11485_v10, %v10639_v26 }
 0x566   : > { %v4289_v7 = vmul.f32 1.442695, %v4271_v53  ;;  %7080 = vmatpush.bf16.msrb.mxu0 %v10648_v19  ;;  %v3617_v53 = vsub.f32 1.0, %v3616_v36  ;;  %v10635_v19 = vld [vmem:[#allocation2 + $0x20] sm:$0xf] }
 0x567   : > { %v14000_v20 = vpop.xlane.xlu0 %3548  ;;  %v10636_v10 = vor.u32 %v11484_v49, %v10635_v19 }
 0x568   : > { %11754 = vpow2.f32 %v4289_v7  ;;  %v6643_v7 = vmul.f32 0.125, %v6613_v37  ;;  %v3618_v36 = vmul.f32 %v13997_v25, %v3617_v53  ;;  %vm3650_vm6 = vweird.f32 %v14000_v20 }
 0x56a   : > { %7081 = vmatpush.bf16.msrb.mxu0 %v10644_v41  ;;  %v4273_v41 = vsub.f32 %v13583_v1, %v13821_v54  ;;  %v14027_v37 = vsel %vm13408_vm11, %v6643_v7, -1e+30  ;;  %v3619_v53 = vadd.f32 %v13997_v25, %v3618_v36  ;;  %v3626_v7 = vand.u32 2147483648, %v13946_v33 }
 0x56b   : > { %5154 = vadd.xlane.f32.xlu2 %v14004_v61  ;;  %v3543_v48 = vpop.xlane.xlu2 %3542  ;;  %17570 = vst [vmem:[#allocation77_spill] sm:$0xff] %v14027_v37 }
 0x56c   : > { %5848 = vmax.xlane.f32.xlu0 %v14011_v46  ;;  %11756 = vrcp.f32 %v3543_v48  ;;  %v4293_v26 = vmul.f32 1.442695, %v4273_v41  ;;  %v14032_v13 = vpop.xlane.xlu1 %4255  ;;  %vm3605_vm0 = vweird.f32 %v3543_v48  ;;  %v3627_v21 = vor.u32 1.1754944e-38, %v3626_v7 }
 0x56d   : > { %11758 = vrcp.f32 %v14000_v20 }
 0x56e   : > { %v14014_v22 = vpop.eup %11754  ;;  %7082 = vmatpush.bf16.msrb.mxu0 %v10640_v44  ;;  %11760 = vrcp.f32 %v13850_v51 }
 0x56f   : > { %17569 = vst [vmem:[#allocation76_spill] sm:$0xff] %v14014_v22  ;;  %v14019_v61 = vpop.xlane.xlu0 %3552  ;;  %4321 = vadd.xlane.f32.xlu1 %v14014_v22  ;;  %11762 = vpow2.f32 %v4293_v26  ;;  %v3609_v26 = vand.u32 2147483647, %v3543_v48 }
 0x571   : > { %vm3610_vm1 = vcmp.eq.f32.partialorder %v3609_v26, 8.507059e+37 }
 0x572   : > { %7083 = vmatpush.bf16.msrb.mxu0 %v10636_v10  ;;  %v11757_v1 = vpop.eup %11756 }
 0x573   : > { %6682 = vmax.xlane.f32.xlu2 %v14027_v37  ;;  %v5071_v54 = vpop.xlane.xlu2 %5070  ;;  %v14030_v44 = vpop.eup %11758  ;;  %v3601_v60 = vmul.f32 %v11757_v1, %v3543_v48  ;;  %vm3606_vm14 = vweird.f32 %v11757_v1 }
 0x574   : > { %v5099_v19 = vsub.f32 %v13733_v45, %v5071_v54  ;;  %v14041_v49 = vpop.eup %11760  ;;  %v3646_v45 = vmul.f32 %v14030_v44, %v14000_v20  ;;  %v3611_v54 = vand.u32 2147483648, %v3543_v48  ;;  %vm3607_vm13 = vmor %vm3605_vm0, %vm3606_vm14  ;;  %vm3635_vm14 = vweird.f32 %v13850_v51 }
 0x575   : > { %v3602_v41 = vsub.f32 1.0, %v3601_v60  ;;  %v3631_v60 = vmul.f32 %v14041_v49, %v13850_v51 }
 0x576   : > { %v5118_v10 = vmul.f32 1.442695, %v5099_v19  ;;  %v3623_v19 = vsel %vm3622_vm15, %v13997_v25, %v3619_v53  ;;  %v3647_v15 = vsub.f32 1.0, %v3646_v45  ;;  %v3612_v33 = vor.u32 1.1754944e-38, %v3611_v54  ;;  %v14064_v25 = vpop.xlane.xlu1 %5082 }
 0x577   : > { %v14047_v37 = vpop.xlane.xlu0 %4253  ;;  %6672 = vmax.xlane.f32.xlu1 %v14037_v52  ;;  %v3603_v36 = vmul.f32 %v11757_v1, %v3602_v41  ;;  %v14058_v41 = vpop.eup %11762  ;;  %v3628_v52 = vsel %vm3625_vm3, %v3627_v21, %v3623_v19  ;;  %v3632_v46 = vsub.f32 1.0, %v3631_v60  ;;  %v5100_v21 = vsub.f32 %v13669_v55, %v13966_v42 }
 0x578   : > { %11764 = vpow2.f32 %v5118_v10  ;;  %v3648_v53 = vmul.f32 %v14030_v44, %v3647_v15  ;;  %v5814_v15 = vmul.f32 0.125, %v13864_v0  ;;  %vm3651_vm3 = vweird.f32 %v14030_v44 }
 0x579   : > { %v3604_v5 = vadd.f32 %v11757_v1, %v3603_v36  ;;  %11766 = vrcp.f32 %v14019_v61  ;;  %v3633_v45 = vmul.f32 %v14041_v49, %v3632_v46  ;;  %v5120_v55 = vmul.f32 1.442695, %v5100_v21  ;;  %vm14103_vm10 = vmor %vm3650_vm6, %vm3651_vm3  ;;  %v14128_v21 = vpop.f32.mrf.mxu3 }
 0x57a   : > { %11768 = vrcp.f32 %v13939_v34  ;;  %v3654_v42 = vand.u32 2147483647, %v14000_v20  ;;  %v3641_v36 = vand.u32 2147483648, %v13850_v51  ;;  %v14097_v26 = vsel %vm13313_vm4, %v5814_v15, -1e+30 }
 0x57b   : > { %v14056_v22 = vpop.xlane.xlu2 %5078  ;;  %v3608_v10 = vsel %vm3607_vm13, %v11757_v1, %v3604_v5  ;;  %v3629_v5 = vmul.f32 %v13654_v57, %v3628_v52  ;;  %v3649_v57 = vadd.f32 %v14030_v44, %v3648_v53  ;;  %v3634_v0 = vadd.f32 %v14041_v49, %v3633_v45 }
 0x57c   : > { %v3613_v30 = vsel %vm3610_vm1, %v3612_v33, %v3608_v10  ;;  %vm3636_vm1 = vweird.f32 %v14041_v49  ;;  %v3639_v33 = vand.u32 2147483647, %v13850_v51  ;;  %vm3655_vm0 = vcmp.eq.f32.partialorder %v3654_v42, 8.507059e+37 }
 0x57d   : > { %v3614_v48 = vmul.f32 %v13713_v23, %v3613_v30  ;;  %v6639_v23 = vmul.f32 0.125, %v13906_v4  ;;  %v4275_v4 = vsub.f32 %v13619_v40, %v13904_v62  ;;  %v5792_v62 = vpop.f32.mrf.mxu1  ;;  %v3653_v10 = vsel %vm14103_vm10, %v14030_v44, %v3649_v57  ;;  %vm14124_vm15 = vmor %vm3635_vm14, %vm3636_vm1 }
 0x57e   : > { %v14062_v3 = vpop.eup %11764  ;;  %v14120_v53 = vpop.xlane.xlu1 %4259  ;;  %v3638_v44 = vsel %vm14124_vm15, %v14041_v49, %v3634_v0  ;;  %v3642_v45 = vor.u32 1.1754944e-38, %v3641_v36  ;;  %vm3640_vm13 = vcmp.eq.f32.partialorder %v3639_v33, 8.507059e+37  ;;  %v17578_v36 = vld [vmem:[#allocation27_spill] sm:$0xff]  ;;  %vm3680_vm1 = vweird.f32 %v14019_v61 }
 0x57f   : > { %v5081_v7 = vpop.xlane.xlu0 %5080  ;;  %4325 = vadd.xlane.f32.xlu1 %v14058_v41  ;;  %5150 = vadd.xlane.f32.xlu0 %v14062_v3  ;;  %v3811_v54 = vpack.c.bf16 %v3629_v5, %v3614_v48  ;;  %v14083_v52 = vpop.eup %11766  ;;  %v14101_v60 = vsel %vm13393_vm9, %v6639_v23, -1e+30  ;;  %v4274_v48 = vsub.f32 %v13681_v56, %v13979_v18  ;;  %v4297_v51 = vmul.f32 1.442695, %v4275_v4 }
 0x580   : > { %v5104_v1 = vsub.f32 %v13765_v11, %v5081_v7  ;;  %v3656_v11 = vand.u32 2147483648, %v14000_v20  ;;  %v14092_v46 = vpop.eup %11768  ;;  %v3676_v20 = vmul.f32 %v14083_v52, %v14019_v61  ;;  %v5815_v18 = vmul.f32 0.125, %v13890_v24 }
 0x581   : > { %3879 = vmatmul.bf16.gmra.mxu0 %v3811_v54  ;;  %v3643_v57 = vsel %vm3640_vm13, %v3642_v45, %v3638_v44  ;;  %v5819_v4 = vmul.f32 0.125, %v5792_v62  ;;  %v5102_v40 = vsub.f32 %v17578_v36, %v13962_v29  ;;  %vm3681_vm3 = vweird.f32 %v14083_v52 }
 0x582   : > { %v5128_v30 = vmul.f32 1.442695, %v5104_v1  ;;  %v3657_v5 = vor.u32 1.1754944e-38, %v3656_v11  ;;  %v3661_v1 = vmul.f32 %v14092_v46, %v13939_v34  ;;  %v3677_v23 = vsub.f32 1.0, %v3676_v20  ;;  %vm14185_vm14 = vmor %vm3680_vm1, %vm3681_vm3 }
 0x583   : > { %v14079_v16 = vpop.xlane.xlu2 %4257  ;;  %v14147_v24 = vsel %vm13374_vm8, %v5815_v18, -1e+30  ;;  %v14163_v7 = vsel %vm13430_vm12, %v5819_v4, -1e+30  ;;  %v5124_v44 = vmul.f32 1.442695, %v5102_v40  ;;  %vm3666_vm6 = vweird.f32 %v14092_v46 }
 0x584   : > { %11770 = vpow2.f32 %v5128_v30  ;;  %v3658_v54 = vsel %vm3655_vm0, %v3657_v5, %v3653_v10  ;;  %v4295_v30 = vmul.f32 1.442695, %v4274_v48  ;;  %17577 = vst [vmem:[#allocation80_spill] sm:$0xff] %v14147_v24  ;;  %v3678_v0 = vmul.f32 %v14083_v52, %v3677_v23  ;;  %v17584_v4 = vld [vmem:[#allocation24_spill] sm:$0xff] }
 0x585   : > { %11772 = vpow2.f32 %v5120_v55  ;;  %v3662_v55 = vsub.f32 1.0, %v3661_v1  ;;  %v3659_v11 = vmul.f32 %v13703_v2, %v3658_v54  ;;  %v3644_v2 = vmul.f32 %v13595_v9, %v3643_v57  ;;  %v5795_v62 = vpop.f32.mrf.mxu1  ;;  %17580 = vst [vmem:[#allocation27_spill] sm:$0xff] %v14163_v7 }
 0x586   : > { %11774 = vpow2.f32 %v4297_v51  ;;  %v14159_v10 = vpop.xlane.xlu1 %4261  ;;  %v6618_v51 = vpop.f32.mrf.mxu3  ;;  %v3679_v29 = vadd.f32 %v14083_v52, %v3678_v0  ;;  %v3686_v18 = vand.u32 2147483648, %v14019_v61  ;;  %v3684_v23 = vand.u32 2147483647, %v14019_v61 }
 0x587   : > { %v14110_v19 = vpop.xlane.xlu0 %3556  ;;  %5850 = vmax.xlane.f32.xlu1 %v14097_v26  ;;  %6674 = vmax.xlane.f32.xlu0 %v14101_v60  ;;  %v3663_v20 = vmul.f32 %v14092_v46, %v3662_v55  ;;  %v3812_v33 = vpack.c.bf16 %v3659_v11, %v3644_v2  ;;  %v6645_v57 = vmul.f32 0.125, %v6618_v51  ;;  %vm3665_vm10 = vweird.f32 %v13939_v34 }
 0x588   : > { %11776 = vrcp.f32 %v14110_v19  ;;  %v3671_v55 = vand.u32 2147483648, %v13939_v34  ;;  %v4276_v0 = vsub.f32 %v17584_v4, %v13982_v50  ;;  %v3669_v61 = vand.u32 2147483647, %v13939_v34  ;;  %vm14203_vm15 = vmor %vm3665_vm10, %vm3666_vm6 }
 0x589   : > { %11778 = vrcp.f32 %v14006_v63  ;;  %v3664_v54 = vadd.f32 %v14092_v46, %v3663_v20  ;;  %v3683_v40 = vsel %vm14185_vm14, %v14083_v52, %v3679_v29  ;;  %v3687_v20 = vor.u32 1.1754944e-38, %v3686_v18 }
 0x58a   : > { %v14135_v56 = vpop.eup %11770  ;;  %11780 = vpow2.f32 %v4295_v30  ;;  %vm3685_vm0 = vcmp.eq.f32.partialorder %v3684_v23, 8.507059e+37  ;;  %v6641_v34 = vmul.f32 0.125, %v13964_v47  ;;  %v14215_v52 = vsel %vm13430_vm12, %v6645_v57, -1e+30  ;;  %v17588_v47 = vld [vmem:[#allocation28_spill] sm:$0xff] }
 0x58b   : > { %17576 = vst [vmem:[#allocation79_spill] sm:$0xff] %v14135_v56  ;;  %5160 = vadd.xlane.f32.xlu2 %v14135_v56  ;;  %v14139_v15 = vpop.xlane.xlu2 %5084  ;;  %v14142_v49 = vpop.eup %11772  ;;  %11782 = vpow2.f32 %v5124_v44  ;;  %v3668_v51 = vsel %vm14203_vm15, %v14092_v46, %v3664_v54  ;;  %v3672_v29 = vor.u32 1.1754944e-38, %v3671_v55  ;;  %v3688_v44 = vsel %vm3685_vm0, %v3687_v20, %v3683_v40  ;;  %v17591_v20 = vld [vmem:[#allocation42_spill] sm:$0xff] }
 0x58c   : > { %v14165_v5 = vpop.eup %11774  ;;  %17587 = vst [vmem:[#allocation24_spill] sm:$0xff] %v14215_v52  ;;  %v4299_v4 = vmul.f32 1.442695, %v4276_v0  ;;  %vm3670_vm13 = vcmp.eq.f32.partialorder %v3669_v61, 8.507059e+37  ;;  %v3689_v23 = vmul.f32 %v17588_v47, %v3688_v44  ;;  %v5820_v57 = vmul.f32 0.125, %v5795_v62  ;;  %v17590_v61 = vld [vmem:[#allocation25_spill] sm:$0xff] }
 0x58d   : > { %17581 = vst [vmem:[#allocation81_spill] sm:$0xff] %v14165_v5  ;;  %v14217_v11 = vpop.f32.mrf.mxu1  ;;  %v3673_v46 = vsel %vm3670_vm13, %v3672_v29, %v3668_v51  ;;  %v14230_v55 = vsel %vm13374_vm8, %v6641_v34, -1e+30  ;;  %v4277_v62 = vsub.f32 %v17591_v20, %v14047_v37  ;;  %v5816_v29 = vmul.f32 0.125, %v13918_v17 }
 0x58e   : > { %v14172_v1 = vpop.eup %11776  ;;  %v14222_v50 = vpop.xlane.xlu1 %3562  ;;  %v3674_v40 = vmul.f32 %v17590_v61, %v3673_v46  ;;  %v14245_v44 = vsel %vm13358_vm7, %v5820_v57, -1e+30  ;;  %v3716_v46 = vand.u32 2147483648, %v14110_v19  ;;  %vm3710_vm1 = vweird.f32 %v14110_v19 }
 0x58f   : > { %v14151_v42 = vpop.xlane.xlu0 %3558  ;;  %5152 = vadd.xlane.f32.xlu1 %v14142_v49  ;;  %5852 = vmax.xlane.f32.xlu0 %v14147_v24  ;;  %v14175_v45 = vpop.eup %11778  ;;  %v3706_v2 = vmul.f32 %v14172_v1, %v14110_v19  ;;  %17592 = vst [vmem:[#allocation25_spill] sm:$0xff] %v14245_v44  ;;  %vm3711_vm3 = vweird.f32 %v14172_v1  ;;  %v3714_v57 = vand.u32 2147483647, %v14110_v19  ;;  %vm3695_vm10 = vweird.f32 %v14006_v63  ;;  %v17597_v19 = vld [vmem:[#allocation30_spill] sm:$0xff] }
 0x590   : > { %v14181_v30 = vpop.eup %11780  ;;  %v3813_v34 = vpack.c.bf16 %v3689_v23, %v3674_v40  ;;  %vm3696_vm6 = vweird.f32 %v14175_v45  ;;  %v3701_v40 = vand.u32 2147483648, %v14006_v63  ;;  %vm14275_vm14 = vmor %vm3710_vm1, %vm3711_vm3  ;;  %v6642_v24 = vmul.f32 0.125, %v13984_v39  ;;  %v17599_v39 = vld [vmem:[#allocation35_spill] sm:$0xff] }
 0x591   : > { %3884 = vmatmul.bf16.gmra.mxu0 %v3812_v33  ;;  %v3691_v33 = vmul.f32 %v14175_v45, %v14006_v63  ;;  %v3707_v18 = vsub.f32 1.0, %v3706_v2  ;;  %v14225_v48 = vpop.eup %11782  ;;  %vm3697_vm15 = vmor %vm3695_vm10, %vm3696_vm6  ;;  %vm3715_vm0 = vcmp.eq.f32.partialorder %v3714_v57, 8.507059e+37  ;;  %v5105_v57 = vsub.f32 %v17599_v39, %v14064_v25  ;;  %v17600_v25 = vld [vmem:[#allocation29_spill] sm:$0xff] }
 0x592   : > { %17589 = vst [vmem:[#allocation28_spill] sm:$0xff] %v14225_v48  ;;  %vm17602_vm3 = vnez %v17491_v28 }
 0x593   : > { %5860 = vmax.xlane.f32.xlu2 %v14163_v7  ;;  %v14168_v9 = vpop.xlane.xlu2 %3560  ;;  %v3692_v54 = vsub.f32 1.0, %v3691_v33  ;;  %v3708_v0 = vmul.f32 %v14172_v1, %v3707_v18  ;;  %v6621_v33 = vpop.f32.mrf.mxu3  ;;  %v4301_v18 = vmul.f32 1.442695, %v4277_v62 }
 0x594   : > { %11784 = vrcp.f32 %v14168_v9  ;;  %v6646_v61 = vmul.f32 0.125, %v6621_v33  ;;  %vm3740_vm6 = vweird.f32 %v14168_v9 }
 0x595   : > { %11786 = vpow2.f32 %v4299_v4  ;;  %v3693_v51 = vmul.f32 %v14175_v45, %v3692_v54  ;;  %v3709_v4 = vadd.f32 %v14172_v1, %v3708_v0  ;;  %v14257_v17 = vpop.f32.mrf.mxu1 }
 0x596   : > { %11788 = vrcp.f32 %v14151_v42  ;;  %v14267_v20 = vpop.xlane.xlu1 %5088  ;;  %v5822_v39 = vmul.f32 0.125, %v14257_v17 }
 0x597   : > { %v14193_v36 = vpop.xlane.xlu0 %5086  ;;  %4327 = vadd.xlane.f32.xlu1 %v14181_v30  ;;  %4329 = vadd.xlane.f32.xlu0 %v14165_v5  ;;  %v3694_v23 = vadd.f32 %v14175_v45, %v3693_v51  ;;  %11790 = vpow2.f32 %v4301_v18 }
 0x599   : > { %v3698_v7 = vsel %vm3697_vm15, %v14175_v45, %v3694_v23  ;;  %vm3725_vm15 = vweird.f32 %v14151_v42 }
 0x59a   : > { %v14250_v37 = vpop.eup %11784 }
 0x59b   : > { %6686 = vmax.xlane.f32.xlu2 %v14215_v52  ;;  %v14220_v56 = vpop.xlane.xlu2 %5090  ;;  %v14255_v47 = vpop.eup %11786  ;;  %v4278_v52 = vsub.f32 %v17597_v19, %v14032_v13  ;;  %v3736_v33 = vmul.f32 %v14250_v37, %v14168_v9  ;;  %v3717_v13 = vor.u32 1.1754944e-38, %v3716_v46  ;;  %vm3741_vm1 = vweird.f32 %v14250_v37 }
 0x59c   : > { %17593 = vst [vmem:[#allocation42_spill] sm:$0xff] %v14255_v47  ;;  %v14263_v0 = vpop.eup %11788 }
 0x59d   : > { %v3721_v19 = vmul.f32 %v14263_v0, %v14151_v42  ;;  %v3737_v18 = vsub.f32 1.0, %v3736_v33  ;;  %v14303_v45 = vpop.eup %11790  ;;  %v17601_v33 = vld [vmem:[#allocation48_spill] sm:$0xff]  ;;  %vm3726_vm10 = vweird.f32 %v14263_v0 }
 0x59f   : > { %v14233_v2 = vpop.xlane.xlu0 %4263  ;;  %6678 = vmax.xlane.f32.xlu1 %v14230_v55  ;;  %5156 = vadd.xlane.f32.xlu0 %v14225_v48  ;;  %v3722_v5 = vsub.f32 1.0, %v3721_v19  ;;  %v5817_v19 = vmul.f32 0.125, %v13948_v27 }
 0x5a1   : > { %3889 = vmatmul.bf16.gmra.mxu0 %v3813_v34  ;;  %v14271_v34 = vsel %vm13327_vm5, %v5816_v29, -1e+30  ;;  %v3699_v29 = vand.u32 2147483647, %v14006_v63  ;;  %v14299_v63 = vsel %vm13358_vm7, %v6646_v61, -1e+30  ;;  %v14307_v61 = vpop.xlane.xlu1 %3568 }
 0x5a2   : > { %17598 = vst [vmem:[#allocation37_spill] sm:$0xff] %v14299_v63 }
 0x5a3   : > { %5862 = vmax.xlane.f32.xlu2 %v14245_v44  ;;  %v14253_v54 = vpop.xlane.xlu2 %4265  ;;  %v3713_v44 = vsel %vm14275_vm14, %v14172_v1, %v3709_v4  ;;  %v6623_v1 = vpop.f32.mrf.mxu3  ;;  %v4303_v4 = vmul.f32 1.442695, %v4278_v52  ;;  %vm3700_vm13 = vcmp.eq.f32.partialorder %v3699_v29, 8.507059e+37  ;;  %v14314_v52 = vsel %vm13327_vm5, %v6642_v24, -1e+30  ;;  %vm14357_vm14 = vmor %vm3740_vm6, %vm3741_vm1 }
 0x5a4   : > { %v3718_v51 = vsel %vm3715_vm0, %v3717_v13, %v3713_v44  ;;  %v6647_v23 = vmul.f32 0.125, %v6623_v1  ;;  %v5103_v29 = vsub.f32 %v17601_v33, %v14056_v22  ;;  %v3723_v24 = vmul.f32 %v14263_v0, %v3722_v5  ;;  %vm14378_vm0 = vmor %vm3725_vm15, %vm3726_vm10 }
 0x5a5   : > { %v3719_v32 = vmul.f32 %v13780_v43, %v3718_v51  ;;  %v3738_v43 = vmul.f32 %v14250_v37, %v3737_v18  ;;  %v5130_v51 = vmul.f32 1.442695, %v5105_v57  ;;  %v3746_v5 = vand.u32 2147483648, %v14168_v9 }
 0x5a6   : > { %v14331_v1 = vsel %vm17602_vm3, %v6647_v23, -1e+30  ;;  %v5126_v18 = vmul.f32 1.442695, %v5103_v29  ;;  %v3724_v27 = vadd.f32 %v14263_v0, %v3723_v24  ;;  %v3731_v57 = vand.u32 2147483648, %v14151_v42 }
 0x5a7   : > { %v14283_v48 = vpop.xlane.xlu0 %3564  ;;  %5854 = vmax.xlane.f32.xlu1 %v14271_v34  ;;  %4331 = vadd.xlane.f32.xlu0 %v14255_v47  ;;  %v3702_v47 = vor.u32 1.1754944e-38, %v3701_v40  ;;  %17603 = vst [vmem:[#allocation30_spill] sm:$0xff] %v14331_v1  ;;  %v3729_v33 = vand.u32 2147483647, %v14151_v42  ;;  %v4279_v24 = vsub.f32 %v13772_v31, %v14079_v16  ;;  %vm17609_vm1 = vnez %v17476_v14 }
 0x5a8   : > { %11792 = vrcp.f32 %v14283_v48  ;;  %v14391_v31 = vsel %vm17609_vm1, %v5822_v39, -1e+30  ;;  %v3732_v16 = vor.u32 1.1754944e-38, %v3731_v57  ;;  %vm3770_vm15 = vweird.f32 %v14283_v48 }
 0x5a9   : > { %v3703_v46 = vsel %vm3700_vm13, %v3702_v47, %v3698_v7  ;;  %v14316_v7 = vpop.f32.mrf.mxu1  ;;  %11794 = vpow2.f32 %v4303_v4  ;;  %v3739_v4 = vadd.f32 %v14250_v37, %v3738_v43  ;;  %vm3730_vm6 = vcmp.eq.f32.partialorder %v3729_v33, 8.507059e+37 }
 0x5aa   : > { %v3704_v40 = vmul.f32 %v17600_v25, %v3703_v46  ;;  %11796 = vrcp.f32 %v14222_v50  ;;  %v3744_v46 = vand.u32 2147483647, %v14168_v9  ;;  %v14353_v25 = vsel %vm13408_vm11, %v5817_v19, -1e+30 }
 0x5ab   : > { %6688 = vmax.xlane.f32.xlu2 %v14299_v63  ;;  %v14310_v44 = vpop.xlane.xlu2 %3566  ;;  %11798 = vpow2.f32 %v5130_v51  ;;  %v3743_v29 = vsel %vm14357_vm14, %v14250_v37, %v3739_v4  ;;  %v3747_v51 = vor.u32 1.1754944e-38, %v3746_v5  ;;  %v3728_v37 = vsel %vm14378_vm0, %v14263_v0, %v3724_v27 }
 0x5ac   : > { %v3814_v13 = vpack.c.bf16 %v3719_v32, %v3704_v40  ;;  %11800 = vpow2.f32 %v5126_v18  ;;  %vm3745_vm13 = vcmp.eq.f32.partialorder %v3744_v46, 8.507059e+37  ;;  %v6626_v18 = vpop.f32.mrf.mxu3  ;;  %v5109_v0 = vsub.f32 %v13834_v12, %v14220_v56  ;;  %v17613_v12 = vld [vmem:[#allocation51_spill] sm:$0xff] }
 0x5ad   : > { %v3748_v4 = vsel %vm3745_vm13, %v3747_v51, %v3743_v29  ;;  %11802 = vrcp.f32 %v14307_v61  ;;  %v3733_v27 = vsel %vm3730_vm6, %v3732_v16, %v3728_v37  ;;  %v6648_v57 = vmul.f32 0.125, %v6626_v18 }
 0x5ae   : > { %v14336_v22 = vpop.eup %11792  ;;  %v3749_v39 = vmul.f32 %v13809_v58, %v3748_v4  ;;  %11804 = vrcp.f32 %v14310_v44  ;;  %v3734_v58 = vmul.f32 %v17613_v12, %v3733_v27  ;;  %v5138_v56 = vmul.f32 1.442695, %v5109_v0  ;;  %v17614_v4 = vld [vmem:[#allocation47_spill] sm:$0xff] }
 0x5af   : > { %v14319_v47 = vpop.xlane.xlu0 %5092  ;;  %6680 = vmax.xlane.f32.xlu1 %v14314_v52  ;;  %4333 = vadd.xlane.f32.xlu0 %v14303_v45  ;;  %v14339_v32 = vpop.eup %11794  ;;  %v3766_v9 = vmul.f32 %v14336_v22, %v14283_v48  ;;  %v5818_v16 = vmul.f32 0.125, %v14060_v6  ;;  %v4281_v18 = vsub.f32 %v17614_v4, %v14159_v10  ;;  %vm3771_vm10 = vweird.f32 %v14336_v22  ;;  %v17616_v10 = vld [vmem:[#allocation63_spill] sm:$0xff] }
 0x5b0   : > { %17604 = vst [vmem:[#allocation35_spill] sm:$0xff] %v14339_v32  ;;  %v14345_v23 = vpop.eup %11796  ;;  %v3815_v37 = vpack.c.bf16 %v3749_v39, %v3734_v58  ;;  %v3776_v6 = vand.u32 2147483648, %v14283_v48  ;;  %v5110_v39 = vsub.f32 %v17616_v10, %v14319_v47  ;;  %v17619_v47 = vld [vmem:[#allocation41_spill] sm:$0xff]  ;;  %vm14451_vm13 = vmor %vm3770_vm15, %vm3771_vm10  ;;  %vm3755_vm6 = vweird.f32 %v14222_v50 }
 0x5b1   : > { %3894 = vmatmul.bf16.gmra.mxu0 %v3814_v13  ;;  %v14374_v13 = vpop.xlane.xlu1 %5094  ;;  %v14382_v59 = vpop.f32.mrf.mxu1  ;;  %v3751_v42 = vmul.f32 %v14345_v23, %v14222_v50  ;;  %v3767_v40 = vsub.f32 1.0, %v3766_v9  ;;  %v17612_v9 = vld [vmem:[#allocation44_spill] sm:$0xff]  ;;  %vm3756_vm14 = vweird.f32 %v14345_v23  ;;  %v4309_v58 = vmul.f32 1.442695, %v4281_v18 }
 0x5b2   : > { %v14394_v5 = vpop.eup %11798  ;;  %v4280_v33 = vsub.f32 %v17612_v9, %v14120_v53  ;;  %v14424_v9 = vsel %vm17609_vm1, %v6648_v57, -1e+30  ;;  %vm17620_vm0 = vnez %v17619_v47  ;;  %v5140_v14 = vmul.f32 1.442695, %v5110_v39  ;;  %vm14471_vm10 = vmor %vm3755_vm6, %vm3756_vm14 }
 0x5b3   : > { %6690 = vmax.xlane.f32.xlu2 %v14331_v1  ;;  %17610 = vst [vmem:[#allocation29_spill] sm:$0xff] %v14394_v5  ;;  %v4305_v1 = vmul.f32 1.442695, %v4279_v24  ;;  %v3752_v46 = vsub.f32 1.0, %v3751_v42  ;;  %v14400_v19 = vpop.eup %11800  ;;  %v3768_v29 = vmul.f32 %v14336_v22, %v3767_v40  ;;  %v14447_v10 = vsel %vm17620_vm0, %v5818_v16, -1e+30 }
 0x5b4   : > { %17611 = vst [vmem:[#allocation48_spill] sm:$0xff] %v14400_v19  ;;  %v14415_v53 = vpop.eup %11802  ;;  %v4307_v0 = vmul.f32 1.442695, %v4280_v33 }
 0x5b5   : > { %11806 = vpow2.f32 %v4305_v1  ;;  %v3753_v42 = vmul.f32 %v14345_v23, %v3752_v46  ;;  %17615 = vst [vmem:[#allocation44_spill] sm:$0xff] %v14424_v9  ;;  %v3769_v27 = vadd.f32 %v14336_v22, %v3768_v29  ;;  %v14429_v46 = vpop.eup %11804  ;;  %v3796_v57 = vmul.f32 %v14415_v53, %v14307_v61 }
 0x5b6   : > { %v14349_v43 = vpop.xlane.xlu2 %4317  ;;  %v3774_v29 = vand.u32 2147483647, %v14283_v48  ;;  %17621 = vst [vmem:[#allocation47_spill] sm:$0xff] %v14447_v10  ;;  %v3781_v48 = vmul.f32 %v14429_v46, %v14310_v44  ;;  %vm3801_vm6 = vweird.f32 %v14415_v53 }
 0x5b7   : > { %v14364_v17 = vpop.xlane.xlu0 %4267  ;;  %5856 = vmax.xlane.f32.xlu1 %v14353_v25  ;;  %4335 = vadd.xlane.f32.xlu0 %v14339_v32  ;;  %11808 = vrcp.f32 %v14349_v43  ;;  %v3754_v33 = vadd.f32 %v14345_v23, %v3753_v42  ;;  %v3773_v16 = vsel %vm14451_vm13, %v14336_v22, %v3769_v27 }
 0x5b8   : > { %11810 = vpow2.f32 %v5138_v56  ;;  %v3761_v56 = vand.u32 2147483648, %v14222_v50  ;;  %vm3775_vm15 = vcmp.eq.f32.partialorder %v3774_v29, 8.507059e+37 }
 0x5b9   : > { %v14420_v40 = vpop.xlane.xlu1 %5842  ;;  %v5807_v1 = vpop.f32.mrf.mxu1  ;;  %11812 = vpow2.f32 %v4307_v0 }
 0x5ba   : > { %v3762_v0 = vor.u32 1.1754944e-38, %v3761_v56  ;;  %v5825_v39 = vmul.f32 0.125, %v5807_v1  ;;  %11814 = vpow2.f32 %v4309_v58 }
 0x5bb   : > { %5866 = vmax.xlane.f32.xlu2 %v14391_v31  ;;  %v14440_v12 = vpop.eup %11806  ;;  %11816 = vpow2.f32 %v5140_v14 }
 0x5bc   : > { %17617 = vst [vmem:[#allocation51_spill] sm:$0xff] %v14440_v12 }
 0x5bd   : > { %v14455_v42 = vpop.eup %11808 }
 0x5be   : > { %v14406_v24 = vpop.xlane.xlu2 %5846 }
 0x5bf   : > { %v14408_v51 = vpop.xlane.xlu0 %5144  ;;  %5162 = vadd.xlane.f32.xlu0 %v14394_v5  ;;  %5158 = vadd.xlane.f32.xlu1 %v14400_v19  ;;  %v3777_v5 = vor.u32 1.1754944e-38, %v3776_v6  ;;  %v5821_v19 = vmul.f32 0.125, %v14217_v11  ;;  %v3782_v6 = vsub.f32 1.0, %v3781_v48  ;;  %v17627_v11 = vld [vmem:[#allocation45_spill] sm:$0xff] }
 0x5c0   : > { %11818 = vrcp.f32 %v14408_v51  ;;  %v17631_v48 = vld [vmem:[#allocation49_spill] sm:$0xff] }
 0x5c1   : > { %3899 = vmatmul.bf16.gmra.mxu0 %v3815_v37  ;;  %v17618_v37 = vld [vmem:[#allocation50_spill] sm:$0xff]  ;;  %v3778_v27 = vsel %vm3775_vm15, %v3777_v5, %v3773_v16  ;;  %v14488_v63 = vpop.xlane.xlu1 %5146  ;;  %v17628_v5 = vld [vmem:[#allocation60_spill] sm:$0xff]  ;;  %v14503_v14 = vsel %vm17602_vm3, %v5821_v19, -1e+30  ;;  %v3806_v19 = vand.u32 2147483648, %v14307_v61  ;;  %vm17644_vm3 = vcmask 519168  }
 0x5c2   : > { %v5106_v4 = vsub.f32 %v17618_v37, %v14139_v15  ;;  %v3759_v15 = vand.u32 2147483647, %v14222_v50  ;;  %v6644_v37 = vmul.f32 0.125, %v14128_v21  ;;  %v3758_v50 = vsel %vm14471_vm10, %v14345_v23, %v3754_v33  ;;  %v14481_v21 = vpop.eup %11810  ;;  %v14490_v33 = vpop.f32.mrf.mxu1  ;;  %v17632_v16 = vld [vmem:[#allocation20_spill] sm:$0xff] }
 0x5c3   : > { %6692 = vmax.xlane.f32.xlu2 %v14424_v9  ;;  %17626 = vst [vmem:[#allocation63_spill] sm:$0xff] %v14481_v21  ;;  %v4350_v9 = vmul.f32 %v14455_v42, %v14349_v43  ;;  %v3779_v1 = vmul.f32 %v17628_v5, %v3778_v27  ;;  %v14495_v58 = vpop.eup %11812  ;;  %vm17633_vm13 = vnez %v17632_v16  ;;  %vm3800_vm10 = vweird.f32 %v14307_v61 }
 0x5c4   : > { %v5132_v22 = vmul.f32 1.442695, %v5106_v4  ;;  %vm3760_vm14 = vcmp.eq.f32.partialorder %v3759_v15, 8.507059e+37  ;;  %17629 = vst [vmem:[#allocation50_spill] sm:$0xff] %v14495_v58  ;;  %v14499_v4 = vsel %vm17620_vm0, %v6644_v37, -1e+30  ;;  %vm14547_vm15 = vmor %vm3800_vm10, %vm3801_vm6  ;;  %vm4355_vm6 = vweird.f32 %v14455_v42 }
 0x5c5   : > { %v3763_v23 = vsel %vm3760_vm14, %v3762_v0, %v3758_v50  ;;  %v4351_v56 = vsub.f32 1.0, %v4350_v9  ;;  %17630 = vst [vmem:[#allocation45_spill] sm:$0xff] %v14499_v4  ;;  %v14514_v37 = vsel %vm17633_vm13, %v5825_v39, -1e+30  ;;  %v14519_v9 = vpop.eup %11814  ;;  %v17635_v0 = vld [vmem:[#allocation54_spill] sm:$0xff]  ;;  %v17637_v39 = vld [vmem:[#allocation56_spill] sm:$0xff]  ;;  %vm3785_vm14 = vweird.f32 %v14310_v44 }
 0x5c6   : > { %v14476_v32 = vpop.xlane.xlu2 %5148  ;;  %11820 = vpow2.f32 %v5132_v22  ;;  %v3764_v15 = vmul.f32 %v17631_v48, %v3763_v23  ;;  %v3804_v22 = vand.u32 2147483647, %v14307_v61  ;;  %17634 = vst [vmem:[#allocation60_spill] sm:$0xff] %v14519_v9  ;;  %v5107_v27 = vsub.f32 %v17635_v0, %v14193_v36  ;;  %v14525_v23 = vpop.eup %11816  ;;  %v17638_v36 = vld [vmem:[#allocation57_spill] sm:$0xff] }
 0x5c7   : > { %v14460_v18 = vpop.xlane.xlu0 %6668  ;;  %5858 = vmax.xlane.f32.xlu1 %v14447_v10  ;;  %4337 = vadd.xlane.f32.xlu0 %v14440_v12  ;;  %v3797_v12 = vsub.f32 1.0, %v3796_v57  ;;  %v5108_v57 = vsub.f32 %v17627_v11, %v14267_v20  ;;  %11822 = vrcp.f32 %v14488_v63  ;;  %v3783_v20 = vmul.f32 %v14429_v46, %v3782_v6  ;;  %17636 = vst [vmem:[#allocation49_spill] sm:$0xff] %v14525_v23 }
 0x5c8   : > { %v3816_v6 = vpack.c.bf16 %v3779_v1, %v3764_v15  ;;  %v4352_v5 = vmul.f32 %v14455_v42, %v4351_v56  ;;  %v5874_v1 = vsub.f32 %v17638_v36, %v14420_v40  ;;  %v3791_v56 = vand.u32 2147483648, %v14310_v44 }
 0x5c9   : > { %v3798_v29 = vmul.f32 %v14415_v53, %v3797_v12  ;;  %v5136_v50 = vmul.f32 1.442695, %v5108_v57  ;;  %v4282_v57 = vsub.f32 %v17637_v39, %v14233_v2  ;;  %v3784_v0 = vadd.f32 %v14429_v46, %v3783_v20 }
 0x5ca   : > { %vm14551_vm1 = vcmp.eq.f32.partialorder %v3804_v22, 8.507059e+37  ;;  %v3807_v20 = vor.u32 1.1754944e-38, %v3806_v19  ;;  %v4353_v22 = vadd.f32 %v14455_v42, %v4352_v5  ;;  %vm17645_vm10 = vweird.f32 %v14429_v46 }
 0x5cb   : > { %5170 = vadd.xlane.f32.xlu2 %v14481_v21  ;;  %v3799_v11 = vadd.f32 %v14415_v53, %v3798_v29  ;;  %v14531_v21 = vpop.eup %11818  ;;  %vm14570_vm12 = vmor %vm3785_vm14, %vm17645_vm10  ;;  %v3792_v28 = vor.u32 1.1754944e-38, %v3791_v56  ;;  %vm17651_vm10 = vcmask 519168  }
 0x5cc   : > { %v14540_v2 = vpop.eup %11820  ;;  %v5177_v19 = vmul.f32 %v14531_v21, %v14408_v51  ;;  %v3788_v5 = vsel %vm14570_vm12, %v14429_v46, %v3784_v0 }
 0x5cd   : > { %17639 = vst [vmem:[#allocation20_spill] sm:$0xff] %v14540_v2  ;;  %v14555_v39 = vpop.eup %11822  ;;  %v3803_v61 = vsel %vm14547_vm15, %v14415_v53, %v3799_v11  ;;  %v5890_v53 = vmul.f32 1.442695, %v5874_v1 }
 0x5ce   : > { %v14535_v15 = vpop.xlane.xlu2 %4323  ;;  %v5192_v40 = vmul.f32 %v14555_v39, %v14488_v63  ;;  %v3808_v46 = vsel %vm14551_vm1, %v3807_v20, %v3803_v61 }
 0x5cf   : > { %v14507_v12 = vpop.xlane.xlu0 %4319  ;;  %6684 = vmax.xlane.f32.xlu1 %v14499_v4  ;;  %4339 = vadd.xlane.f32.xlu0 %v14495_v58 }
 0x5d0   : > { %11824 = vrcp.f32 %v14507_v12  ;;  %v4375_v58 = vand.u32 2147483648, %v14507_v12  ;;  %v5193_v20 = vsub.f32 1.0, %v5192_v40 }
 0x5d1   : > { %3904 = vmatmul.bf16.gmra.mxu0 %v3816_v6  ;;  %11826 = vpow2.f32 %v5136_v50  ;;  %v3789_v50 = vand.u32 2147483647, %v14310_v44  ;;  %v14574_v44 = vpop.f32.mrf.mxu1 }
 0x5d2   : > { %v3875_v48 = vpop.f32.mrf.mxu0  ;;  %11828 = vrcp.f32 %v14535_v15 }
 0x5d3   : > { %v3915_v29 = vpack.c.bf16 %v3875_v48, %v3875_v48  ;;  %5172 = vadd.xlane.f32.xlu2 %v14525_v23  ;;  %v5134_v48 = vmul.f32 1.442695, %v5107_v27  ;;  %v4360_v23 = vand.u32 2147483648, %v14349_v43  ;;  %vm3790_vm14 = vcmp.eq.f32.partialorder %v3789_v50, 8.507059e+37  ;;  %v17650_v50 = vld [vmem:[#allocation64_spill] sm:$0xff] }
 0x5d4   : > { %v5178_v27 = vsub.f32 1.0, %v5177_v19  ;;  %v3793_v4 = vsel %vm3790_vm14, %v3792_v28, %v3788_v5  ;;  %11830 = vpow2.f32 %v5890_v53  ;;  %v17652_v28 = vld [vmem:[#allocation62_spill] sm:$0xff]  ;;  %v17653_v53 = vld [vmem:[#allocation52_spill] sm:$0xff]  ;;  %vm5182_vm14 = vweird.f32 %v14531_v21 }
 0x5d5   : > { %3932 = vst.msk [vmem:[#allocation3] sm:$0xf] %vm17644_vm3, %v3915_v29  ;;  %v4311_v29 = vmul.f32 1.442695, %v4282_v57  ;;  %vm4354_vm3 = vweird.f32 %v14349_v43  ;;  %v6671_v57 = vpop.xlane.xlu1 %6670  ;;  %v4361_v1 = vor.u32 1.1754944e-38, %v4360_v23  ;;  %11832 = vpow2.f32 %v5134_v48 }
 0x5d6   : > { %v11825_v36 = vpop.eup %11824  ;;  %vm14588_vm15 = vmor %vm4354_vm3, %vm4355_vm6  ;;  %v6701_v61 = vsub.f32 %v17650_v50, %v6671_v57  ;;  %vm4369_vm6 = vweird.f32 %v14507_v12  ;;  %v3809_v5 = vmul.f32 %v17653_v53, %v3808_v46  ;;  %v5179_v40 = vmul.f32 %v14531_v21, %v5178_v27  ;;  %v17654_v57 = vld [vmem:[#allocation43_spill] sm:$0xff] }
 0x5d7   : > { %v4365_v11 = vmul.f32 %v11825_v36, %v14507_v12  ;;  %4341 = vadd.xlane.f32.xlu0 %v14519_v9  ;;  %5164 = vadd.xlane.f32.xlu1 %v14540_v2  ;;  %v4358_v2 = vand.u32 2147483647, %v14349_v43  ;;  %v14595_v0 = vpop.eup %11826  ;;  %v4357_v56 = vsel %vm14588_vm15, %v14455_v42, %v4353_v22  ;;  %vm4370_vm12 = vweird.f32 %v11825_v36  ;;  %v14610_v19 = vpop.xlane.xlu0 %5844  ;;  %v17657_v53 = vld [vmem:[#allocation59_spill] sm:$0xff] }
 0x5d8   : > { %v4373_v43 = vand.u32 2147483647, %v14507_v12  ;;  %v14603_v6 = vpop.eup %11828  ;;  %vm4371_vm3 = vmor %vm4369_vm6, %vm4370_vm12  ;;  %11834 = vpow2.f32 %v4311_v29  ;;  %v6628_v29 = vpop.f32.mrf.mxu3  ;;  %v5180_v50 = vadd.f32 %v14531_v21, %v5179_v40  ;;  %vm5197_vm12 = vweird.f32 %v14555_v39 }
 0x5d9   : > { %v4366_v9 = vsub.f32 1.0, %v4365_v11  ;;  %vm4359_vm1 = vcmp.eq.f32.partialorder %v4358_v2, 8.507059e+37  ;;  %v14618_v2 = vpop.f32.mrf.mxu1  ;;  %vm5196_vm6 = vweird.f32 %v14488_v63 }
 0x5da   : > { %v3877_v47 = vpop.f32.mrf.mxu0  ;;  %v4362_v22 = vsel %vm4359_vm1, %v4361_v1, %v4357_v56  ;;  %vm4374_vm15 = vcmp.eq.f32.partialorder %v4373_v43, 8.507059e+37  ;;  %v17655_v56 = vld [vmem:[#allocation70_spill] sm:$0xff]  ;;  %vm5181_vm1 = vweird.f32 %v14408_v51 }
 0x5db   : > { %v4367_v10 = vmul.f32 %v11825_v36, %v4366_v9  ;;  %v3916_v11 = vpack.c.bf16 %v3877_v47, %v3877_v47  ;;  %5872 = vmax.xlane.f32.xlu2 %v14514_v37  ;;  %v3794_v9 = vmul.f32 %v17652_v28, %v3793_v4  ;;  %v4376_v47 = vor.u32 1.1754944e-38, %v4375_v58 }
 0x5dc   : > { %v6718_v4 = vmul.f32 1.442695, %v6701_v61  ;;  %v5194_v58 = vmul.f32 %v14555_v39, %v5193_v20  ;;  %v4363_v46 = vmul.f32 %v17654_v57, %v4362_v22  ;;  %v5187_v28 = vand.u32 2147483648, %v14408_v51  ;;  %v17663_v57 = vld [vmem:[#allocation31_spill] sm:$0xff] }
 0x5dd   : > { %v4368_v42 = vadd.f32 %v11825_v36, %v4367_v10  ;;  %3933 = vst.msk [vmem:[#allocation3 + $0xc] sm:$0xf] %vm17651_vm10, %v3916_v11  ;;  %v4395_v10 = vmul.f32 %v14603_v6, %v14535_v15  ;;  %v3817_v48 = vpack.c.bf16 %v3809_v5, %v3794_v9  ;;  %v14623_v11 = vpop.eup %11830  ;;  %v5185_v22 = vand.u32 2147483647, %v14408_v51  ;;  %vm14649_vm10 = vmor %vm5181_vm1, %vm5182_vm14 }
 0x5de   : > { %17656 = vst [vmem:[#allocation54_spill] sm:$0xff] %v14623_v11  ;;  %v14633_v1 = vpop.eup %11832  ;;  %v5195_v9 = vadd.f32 %v14555_v39, %v5194_v58  ;;  %v4283_v5 = vsub.f32 %v17657_v53, %v14253_v54  ;;  %v5200_v51 = vand.u32 2147483647, %v14488_v63  ;;  %vm17664_vm14 = vnez %v17663_v57 }
 0x5df   : > { %v4372_v23 = vsel %vm4371_vm3, %v11825_v36, %v4368_v42  ;;  %5168 = vadd.xlane.f32.xlu0 %v14595_v0  ;;  %5864 = vmax.xlane.f32.xlu1 %v14503_v14  ;;  %v14626_v36 = vpop.xlane.xlu2 %6676  ;;  %v4396_v61 = vsub.f32 1.0, %v4395_v10  ;;  %v5823_v42 = vmul.f32 0.125, %v14316_v7  ;;  %v5202_v7 = vand.u32 2147483648, %v14488_v63  ;;  %v17660_v10 = vld [vmem:[#allocation71_spill] sm:$0xff]  ;;  %vm14664_vm3 = vmor %vm5196_vm6, %vm5197_vm12  ;;  %v5849_v58 = vpop.xlane.xlu0 %5848 }
 0x5e0   : > { %v4377_v12 = vsel %vm4374_vm15, %v4376_v47, %v4372_v23  ;;  %v14641_v47 = vpop.eup %11834  ;;  %v5184_v23 = vsel %vm14649_vm10, %v14531_v21, %v5180_v50  ;;  %v5188_v63 = vor.u32 1.1754944e-38, %v5187_v28  ;;  %v5199_v21 = vsel %vm14664_vm3, %v14555_v39, %v5195_v9  ;;  %v17667_v39 = vld [vmem:[#allocation75_spill] sm:$0xff] }
 0x5e1   : > { %v4378_v27 = vmul.f32 %v17655_v56, %v4377_v12  ;;  %3909 = vmatmul.bf16.gmra.mxu0 %v3817_v48  ;;  %v4397_v54 = vmul.f32 %v14603_v6, %v4396_v61  ;;  %vm5186_vm15 = vcmp.eq.f32.partialorder %v5185_v22, 8.507059e+37  ;;  %v14684_v53 = vpop.f32.mrf.mxu1  ;;  %vm5201_vm12 = vcmp.eq.f32.partialorder %v5200_v51, 8.507059e+37  ;;  %v6631_v51 = vpop.f32.mrf.mxu3 }
 0x5e2   : > { %v14628_v43 = vpop.xlane.xlu1 %4321  ;;  %v5189_v50 = vsel %vm5186_vm15, %v5188_v63, %v5184_v23  ;;  %v5877_v9 = vsub.f32 %v17667_v39, %v5849_v58  ;;  %vm4400_vm1 = vweird.f32 %v14603_v6  ;;  %v7416_v12 = vmul.f32 0.125, %v14618_v2 }
 0x5e3   : > { %11836 = vrcp.f32 %v14628_v43  ;;  %5922 = vadd.xlane.f32.xlu2 %v14623_v11  ;;  %v4589_v20 = vpack.c.bf16 %v4378_v27, %v4363_v46  ;;  %v14675_v46 = vsel %vm17664_vm14, %v5823_v42, -1e+30  ;;  %v4313_v27 = vmul.f32 1.442695, %v4283_v5 }
 0x5e4   : > { %11838 = vpow2.f32 %v6718_v4  ;;  %v6649_v4 = vmul.f32 0.125, %v6628_v29  ;;  %v5203_v29 = vor.u32 1.1754944e-38, %v5202_v7  ;;  %v4398_v42 = vadd.f32 %v14603_v6, %v4397_v54  ;;  %v17669_v54 = vld [vmem:[#allocation67_spill] sm:$0xff] }
 0x5e5   : > { %4669 = vmatmul.bf16.vlgmr.msrb.gmra.mxu2 %v4589_v20  ;;  %11840 = vrcp.f32 %v14476_v32  ;;  %v17666_v20 = vld [vmem:[#allocation58_spill] sm:$0xff]  ;;  %v4405_v5 = vand.u32 2147483648, %v14535_v15  ;;  %vm4399_vm6 = vweird.f32 %v14535_v15  ;;  %v5190_v63 = vmul.f32 %v17669_v54, %v5189_v50 }
 0x5e6   : > { %7870 = vmatpush.bf16.msrb.mxu2 %v17660_v10  ;;  %v5204_v22 = vsel %vm5201_vm12, %v5203_v29, %v5199_v21  ;;  %v14695_v10 = vsel %vm17664_vm14, %v6649_v4, -1e+30  ;;  %v4403_v58 = vand.u32 2147483647, %v14535_v15  ;;  %11842 = vpow2.f32 %v4313_v27  ;;  %vm14709_vm3 = vmor %vm4399_vm6, %vm4400_vm1  ;;  %v17673_v15 = vld [vmem:[#allocation61_spill] sm:$0xff]  ;;  %v17680_v4 = vld [vmem:[#allocation76_spill] sm:$0xff] }
 0x5e7   : > { %4343 = vadd.xlane.f32.xlu0 %v14641_v47  ;;  %5166 = vadd.xlane.f32.xlu1 %v14633_v1  ;;  %v14691_v7 = vpop.xlane.xlu2 %5154  ;;  %17668 = vst [vmem:[#allocation57_spill] sm:$0xff] %v14695_v10  ;;  %v4390_v29 = vand.u32 2147483648, %v14628_v43  ;;  %v5896_v2 = vmul.f32 1.442695, %v5877_v9  ;;  %v5205_v27 = vmul.f32 %v17673_v15, %v5204_v22  ;;  %v4388_v50 = vand.u32 2147483647, %v14628_v43 }
 0x5e8   : > { %vm4384_vm15 = vweird.f32 %v14628_v43  ;;  %v4406_v9 = vor.u32 1.1754944e-38, %v4405_v5  ;;  %v5824_v54 = vmul.f32 0.125, %v14382_v59  ;;  %v14727_v22 = vsel %vm13261_vm2, %v7416_v12, -1e+30 }
 0x5e9   : > { %v14668_v48 = vpop.eup %11836  ;;  %vm4404_vm1 = vcmp.eq.f32.partialorder %v4403_v58, 8.507059e+37  ;;  %11844 = vrcp.f32 %v14691_v7  ;;  %v4391_v5 = vor.u32 1.1754944e-38, %v4390_v29  ;;  %vm4389_vm2 = vcmp.eq.f32.partialorder %v4388_v50, 8.507059e+37  ;;  %v17681_v29 = vld [vmem:[#allocation69_spill] sm:$0xff] }
 0x5ea   : > { %v14677_v56 = vpop.eup %11838  ;;  %v4380_v61 = vmul.f32 %v14668_v48, %v14628_v43  ;;  %7871 = vmatpush.bf16.msrb.mxu2 %v17666_v20  ;;  %v14682_v28 = vpop.xlane.xlu1 %6672  ;;  %vm4385_vm10 = vweird.f32 %v14668_v48  ;;  %v4402_v20 = vsel %vm14709_vm3, %v14603_v6, %v4398_v42  ;;  %v17677_v6 = vld [vmem:[#allocation46_spill] sm:$0xff]  ;;  %11846 = vpow2.f32 %v5896_v2  ;;  %v17683_v50 = vld [vmem:[#allocation17_spill] sm:$0xff] }
 0x5eb   : > { %17665 = vst [vmem:[#allocation56_spill] sm:$0xff] %v14677_v56  ;;  %6750 = vadd.xlane.f32.xlu2 %v14677_v56  ;;  %v14697_v23 = vpop.eup %11840  ;;  %vm14731_vm12 = vmor %vm4384_vm15, %vm4385_vm10  ;;  %vm17684_vm6 = vnez %v17683_v50  ;;  %vm5211_vm3 = vweird.f32 %v14476_v32  ;;  %v17694_v56 = vld [vmem:[#allocation33_spill] sm:$0xff] }
 0x5ec   : > { %v4381_v40 = vsub.f32 1.0, %v4380_v61  ;;  %v17670_v61 = vld [vmem:[#allocation53_spill] sm:$0xff]  ;;  %v5207_v39 = vmul.f32 %v14697_v23, %v14476_v32  ;;  %v14745_v12 = vpop.eup %11842  ;;  %vm5212_vm10 = vweird.f32 %v14697_v23 }
 0x5ed   : > { %17678 = vst [vmem:[#allocation64_spill] sm:$0xff] %v14745_v12  ;;  %vm14802_vm15 = vmor %vm5211_vm3, %vm5212_vm10  ;;  %vm17695_vm10 = vcmask 519168  }
 0x5ee   : > { %v4382_v21 = vmul.f32 %v14668_v48, %v4381_v40  ;;  %7872 = vmatpush.bf16.msrb.mxu2 %v17670_v61  ;;  %v5416_v61 = vpack.c.bf16 %v5205_v27, %v5190_v63  ;;  %v17679_v63 = vld [vmem:[#allocation65_spill] sm:$0xff]  ;;  %v14750_v27 = vpop.f32.mrf.mxu1 }
 0x5ef   : > { %5868 = vmax.xlane.f32.xlu0 %v14675_v46  ;;  %6694 = vmax.xlane.f32.xlu1 %v14695_v10  ;;  %v4407_v10 = vsel %vm4404_vm1, %v4406_v9, %v4402_v20  ;;  %v4284_v58 = vsub.f32 %v17679_v63, %v14364_v17  ;;  %v14754_v2 = vpop.xlane.xlu2 %6682  ;;  %v14759_v9 = vsel %vm17684_vm6, %v5824_v54, -1e+30  ;;  %v6633_v17 = vpop.f32.mrf.mxu3 }
 0x5f0   : > { %v4383_v40 = vadd.f32 %v14668_v48, %v4382_v21  ;;  %v5208_v21 = vsub.f32 1.0, %v5207_v39  ;;  %v4408_v20 = vmul.f32 %v17681_v29, %v4407_v10  ;;  %v17685_v10 = vld [vmem:[#allocation68_spill] sm:$0xff] }
 0x5f1   : > { %5480 = vmatmul.bf16.vlgmr.msra.gmra.mxu0 %v5416_v61  ;;  %v6650_v61 = vmul.f32 0.125, %v6631_v51  ;;  %v6700_v63 = vsub.f32 %v17685_v10, %v14460_v18  ;;  %v17687_v51 = vld [vmem:[#allocation36_spill] sm:$0xff] }
 0x5f2   : > { %7873 = vmatpush.bf16.msrb.mxu2 %v17677_v6  ;;  %v14737_v43 = vpop.xlane.xlu1 %4325  ;;  %v14739_v42 = vpop.xlane.xlu0 %5150  ;;  %v4387_v59 = vsel %vm14731_vm12, %v14668_v48, %v4383_v40  ;;  %v17682_v40 = vld [vmem:[#allocation39_spill] sm:$0xff] }
 0x5f3   : > { %7450 = vmax.xlane.f32.xlu2 %v14727_v22  ;;  %11848 = vrcp.f32 %v14739_v42  ;;  %v4392_v15 = vsel %vm4389_vm2, %v4391_v5, %v4387_v59  ;;  %v14763_v6 = vpop.eup %11844  ;;  %v4315_v59 = vmul.f32 1.442695, %v4284_v58  ;;  %v5209_v5 = vmul.f32 %v14697_v23, %v5208_v21 }
 0x5f4   : > { %v4393_v48 = vmul.f32 %v17680_v4, %v4392_v15  ;;  %v14768_v15 = vpop.eup %11846  ;;  %v6651_v4 = vmul.f32 0.125, %v6633_v17  ;;  %v14778_v58 = vsel %vm17684_vm6, %v6650_v61, -1e+30  ;;  %v6716_v18 = vmul.f32 1.442695, %v6700_v63 }
 0x5f5   : > { %17686 = vst [vmem:[#allocation62_spill] sm:$0xff] %v14768_v15  ;;  %11850 = vpow2.f32 %v4315_v59  ;;  %v5210_v21 = vadd.f32 %v14697_v23, %v5209_v5  ;;  %v5217_v17 = vand.u32 2147483648, %v14476_v32  ;;  %v5215_v5 = vand.u32 2147483647, %v14476_v32 }
 0x5f6   : > { %7874 = vmatpush.bf16.msrb.mxu2 %v17682_v40  ;;  %v4590_v39 = vpack.c.bf16 %v4408_v20, %v4393_v48  ;;  %17688 = vst [vmem:[#allocation52_spill] sm:$0xff] %v14778_v58  ;;  %11852 = vrcp.f32 %v14737_v43  ;;  %v14792_v59 = vsel %vm17633_vm13, %v6651_v4, -1e+30  ;;  %v7386_v63 = vpop.f32.mrf.mxu1  ;;  %v5230_v4 = vand.u32 2147483647, %v14739_v42 }
 0x5f7   : > { %5870 = vmax.xlane.f32.xlu1 %v14759_v9  ;;  %4345 = vadd.xlane.f32.xlu0 %v14745_v12  ;;  %17690 = vst [vmem:[#allocation43_spill] sm:$0xff] %v14792_v59  ;;  %vm5226_vm1 = vweird.f32 %v14739_v42  ;;  %vm5216_vm2 = vcmp.eq.f32.partialorder %v5215_v5, 8.507059e+37  ;;  %v17698_v5 = vld [vmem:[#allocation66_spill] sm:$0xff] }
 0x5f8   : > { %4674 = vmatmul.bf16.gmra.mxu2 %v4590_v39  ;;  %v5252_v39 = vmul.f32 %v14763_v6, %v14691_v7 }
 0x5f9   : > { %v11849_v54 = vpop.eup %11848 }
 0x5fa   : > { %7875 = vmatpush.bf16.msrb.mxu2 %v17687_v51  ;;  %v5851_v29 = vpop.xlane.xlu1 %5850  ;;  %v14771_v40 = vpop.xlane.xlu0 %6674  ;;  %v5222_v48 = vmul.f32 %v11849_v54, %v14739_v42  ;;  %vm5227_vm12 = vweird.f32 %v11849_v54 }
 0x5fb   : > { %v5878_v20 = vsub.f32 %v14097_v26, %v5851_v29  ;;  %5928 = vadd.xlane.f32.xlu2 %v14768_v15  ;;  %v17689_v26 = vld [vmem:[#allocation32_spill] sm:$0xff]  ;;  %v17691_v29 = vld [vmem:[#allocation55_spill] sm:$0xff]  ;;  %vm5228_vm3 = vmor %vm5226_vm1, %vm5227_vm12  ;;  %vm5257_vm12 = vweird.f32 %v14763_v6  ;;  %vm5256_vm1 = vweird.f32 %v14691_v7 }
 0x5fc   : > { %v5223_v10 = vsub.f32 1.0, %v5222_v48  ;;  %v5111_v15 = vsub.f32 %v17691_v29, %v14374_v13  ;;  %v5214_v13 = vsel %vm14802_vm15, %v14697_v23, %v5210_v21  ;;  %v5218_v29 = vor.u32 1.1754944e-38, %v5217_v17 }
 0x5fd   : > { %v5898_v51 = vmul.f32 1.442695, %v5878_v20  ;;  %v5232_v20 = vand.u32 2147483648, %v14739_v42  ;;  %vm5231_vm15 = vcmp.eq.f32.partialorder %v5230_v4, 8.507059e+37 }
 0x5fe   : > { %7876 = vmatpush.bf16.msrb.mxu2 %v17689_v26  ;;  %v14788_v61 = vpop.xlane.xlu2 %5160  ;;  %v5224_v48 = vmul.f32 %v11849_v54, %v5223_v10  ;;  %v3880_v32 = vpop.f32.mrf.mxu0  ;;  %v5253_v10 = vsub.f32 1.0, %v5252_v39  ;;  %v5219_v23 = vsel %vm5216_vm2, %v5218_v29, %v5214_v13  ;;  %v5142_v39 = vmul.f32 1.442695, %v5111_v15  ;;  %vm17701_vm2 = vmmov %vm17695_vm10 }
 0x5ff   : > { %11854 = vpow2.f32 %v5898_v51  ;;  %6698 = vmax.xlane.f32.xlu1 %v14792_v59  ;;  %6696 = vmax.xlane.f32.xlu0 %v14778_v58  ;;  %v3917_v51 = vpack.c.bf16 %v3880_v32, %v3880_v32  ;;  %v14810_v58 = vpop.eup %11850  ;;  %v5233_v21 = vor.u32 1.1754944e-38, %v5232_v20  ;;  %v17699_v20 = vld [vmem:[#allocation18_spill] sm:$0xff] }
 0x600   : > { %11856 = vpow2.f32 %v6716_v18  ;;  %v5225_v59 = vadd.f32 %v11849_v54, %v5224_v48  ;;  %v14821_v17 = vpop.eup %11852  ;;  %v5220_v13 = vmul.f32 %v17699_v20, %v5219_v23  ;;  %v17700_v23 = vld [vmem:[#allocation73_spill] sm:$0xff]  ;;  %v5262_v20 = vand.u32 2147483648, %v14691_v7 }
 0x601   : > { %3934 = vst.msk [vmem:[#allocation3 + $0x18] sm:$0xf] %vm17695_vm10, %v3917_v51  ;;  %v5876_v51 = vsub.f32 %v17698_v5, %v14406_v24  ;;  %v4410_v4 = vmul.f32 %v14821_v17, %v14737_v43  ;;  %vm14860_vm10 = vmor %vm5256_vm1, %vm5257_vm12 }
 0x602   : > { %7877 = vmatpush.bf16.msrb.mxu2 %v17694_v56  ;;  %v14814_v11 = vpop.xlane.xlu1 %5152  ;;  %v14816_v18 = vpop.xlane.xlu0 %5852  ;;  %v5229_v48 = vsel %vm5228_vm3, %v11849_v54, %v5225_v59  ;;  %v5254_v56 = vmul.f32 %v14763_v6, %v5253_v10  ;;  %v7415_v54 = vmul.f32 0.125, %v14574_v44  ;;  %v7419_v59 = vmul.f32 0.125, %v7386_v63 }
 0x603   : > { %11858 = vrcp.f32 %v14814_v11  ;;  %v5234_v26 = vsel %vm5231_vm15, %v5233_v21, %v5229_v48  ;;  %v14842_v21 = vpop.f32.mrf.mxu1  ;;  %vm5241_vm12 = vweird.f32 %v14814_v11 }
 0x604   : > { %v5235_v15 = vmul.f32 %v14062_v3, %v5234_v26  ;;  %11860 = vpow2.f32 %v5142_v39  ;;  %v5875_v3 = vsub.f32 %v17700_v23, %v14610_v19  ;;  %v5255_v44 = vadd.f32 %v14763_v6, %v5254_v56  ;;  %v17705_v23 = vld [vmem:[#allocation19_spill] sm:$0xff] }
 0x605   : > { %v14823_v42 = vpop.eup %11854  ;;  %v5894_v26 = vmul.f32 1.442695, %v5876_v51  ;;  %v5260_v19 = vand.u32 2147483647, %v14691_v7  ;;  %v7414_v56 = vmul.f32 0.125, %v14490_v33  ;;  %vm17706_vm3 = vnez %v17705_v23  ;;  %v17709_v23 = vld [vmem:[#allocation38_spill] sm:$0xff] }
 0x606   : > { %17696 = vst [vmem:[#allocation70_spill] sm:$0xff] %v14823_v42  ;;  %v14826_v32 = vpop.eup %11856  ;;  %v14830_v12 = vpop.xlane.xlu2 %5860  ;;  %5930 = vadd.xlane.f32.xlu2 %v14823_v42  ;;  %v5417_v10 = vpack.c.bf16 %v5235_v15, %v5220_v13  ;;  %v4411_v13 = vsub.f32 1.0, %v4410_v4  ;;  %v5259_v33 = vsel %vm14860_vm10, %v14763_v6, %v5255_v44  ;;  %v6703_v4 = vsub.f32 %v14101_v60, %v14771_v40 }
 0x607   : > { %17697 = vst [vmem:[#allocation59_spill] sm:$0xff] %v14826_v32  ;;  %6748 = vadd.xlane.f32.xlu1 %v14826_v32  ;;  %4347 = vadd.xlane.f32.xlu0 %v14810_v58  ;;  %v3882_v24 = vpop.f32.mrf.mxu0  ;;  %v5263_v6 = vor.u32 1.1754944e-38, %v5262_v20  ;;  %vm17712_vm10 = vcmask 519168  }
 0x608   : > { %v3918_v48 = vpack.c.bf16 %v3882_v24, %v3882_v24  ;;  %5485 = vmatmul.bf16.gmra.mxu0 %v5417_v10  ;;  %v5892_v24 = vmul.f32 1.442695, %v5875_v3  ;;  %v14866_v10 = vsel %vm13374_vm8, %v7419_v59, -1e+30  ;;  %vm5261_vm8 = vcmp.eq.f32.partialorder %v5260_v19, 8.507059e+37 }
 0x609   : > { %v14840_v29 = vpop.eup %11858  ;;  %17704 = vst [vmem:[#allocation71_spill] sm:$0xff] %v14866_v10  ;;  %v4412_v60 = vmul.f32 %v14821_v17, %v4411_v13  ;;  %v5245_v59 = vand.u32 2147483647, %v14814_v11  ;;  %v6722_v20 = vmul.f32 1.442695, %v6703_v4 }
 0x60a   : > { %v5237_v63 = vmul.f32 %v14840_v29, %v14814_v11  ;;  %v14850_v39 = vpop.xlane.xlu1 %4327  ;;  %v14852_v5 = vpop.xlane.xlu0 %4329  ;;  %3935 = vst.msk [vmem:[#allocation3 + $0x24] sm:$0xf] %vm17701_vm2, %v3918_v48  ;;  %v14870_v48 = vsel %vm17706_vm3, %v7415_v54, -1e+30  ;;  %vm5242_vm15 = vweird.f32 %v14840_v29  ;;  %v5247_v54 = vand.u32 2147483648, %v14814_v11 }
 0x60b   : > { %11862 = vrcp.f32 %v14850_v39  ;;  %v14875_v7 = vpop.eup %11860  ;;  %vm14894_vm1 = vmor %vm5241_vm12, %vm5242_vm15  ;;  %vm17710_vm2 = vnez %v17709_v23  ;;  %vm5246_vm3 = vcmp.eq.f32.partialorder %v5245_v59, 8.507059e+37  ;;  %vm4415_vm15 = vweird.f32 %v14821_v17 }
 0x60c   : > { %v5238_v51 = vsub.f32 1.0, %v5237_v63  ;;  %11864 = vrcp.f32 %v14852_v5  ;;  %v4448_v62 = vand.u32 2147483647, %v14852_v5 }
 0x60d   : > { %11866 = vpow2.f32 %v5894_v26 }
 0x60e   : > { %v5239_v63 = vmul.f32 %v14840_v29, %v5238_v51  ;;  %v14882_v35 = vpop.xlane.xlu2 %6686  ;;  %7456 = vmax.xlane.f32.xlu2 %v14866_v10  ;;  %v5264_v51 = vsel %vm5261_vm8, %v5263_v6, %v5259_v33  ;;  %11868 = vpow2.f32 %v5892_v24  ;;  %v14909_v10 = vpop.f32.mrf.mxu1  ;;  %v5248_v6 = vor.u32 1.1754944e-38, %v5247_v54 }
 0x60f   : > { %7448 = vmax.xlane.f32.xlu1 %v14870_v48  ;;  %5174 = vadd.xlane.f32.xlu0 %v14875_v7  ;;  %v3885_v3 = vpop.f32.mrf.mxu0  ;;  %vm4414_vm8 = vweird.f32 %v14737_v43  ;;  %11870 = vpow2.f32 %v6722_v20 }
 0x610   : > { %v5240_v40 = vadd.f32 %v14840_v29, %v5239_v63  ;;  %v3919_v26 = vpack.c.bf16 %v3885_v3, %v3885_v3  ;;  %v14904_v63 = vsel %vm17710_vm2, %v7414_v56, -1e+30  ;;  %v17711_v3 = vld [vmem:[#allocation78_spill] sm:$0xff]  ;;  %vm14938_vm12 = vmor %vm4414_vm8, %vm4415_vm15  ;;  %vm4429_vm2 = vweird.f32 %v14850_v39 }
 0x611   : > { %v14898_v15 = vpop.eup %11862  ;;  %v6702_v33 = vsub.f32 %v17711_v3, %v14682_v28  ;;  %v17713_v56 = vld [vmem:[#allocation74_spill] sm:$0xff]  ;;  %v4420_v28 = vand.u32 2147483648, %v14737_v43  ;;  %vm17717_vm15 = vcmask 519168  }
 0x612   : > { %v6679_v19 = vpop.xlane.xlu1 %6678  ;;  %v14900_v13 = vpop.xlane.xlu0 %5156  ;;  %v5244_v11 = vsel %vm14894_vm1, %v14840_v29, %v5240_v40  ;;  %v4425_v24 = vmul.f32 %v14898_v15, %v14850_v39  ;;  %3936 = vst.msk [vmem:[#allocation3 + $0x30] sm:$0xf] %vm17712_vm10, %v3919_v26  ;;  %v5265_v42 = vmul.f32 %v17713_v56, %v5264_v51  ;;  %v4413_v29 = vadd.f32 %v14821_v17, %v4412_v60 }
 0x613   : > { %v6705_v4 = vsub.f32 %v14230_v55, %v6679_v19  ;;  %v14917_v23 = vpop.eup %11864  ;;  %v5249_v3 = vsel %vm5246_vm3, %v5248_v6, %v5244_v11  ;;  %v4418_v26 = vand.u32 2147483647, %v14737_v43  ;;  %v4435_v51 = vand.u32 2147483648, %v14850_v39 }
 0x614   : > { %v14922_v40 = vpop.eup %11866  ;;  %v4426_v54 = vsub.f32 1.0, %v4425_v24  ;;  %v5250_v59 = vmul.f32 %v14142_v49, %v5249_v3  ;;  %v4440_v19 = vmul.f32 %v14917_v23, %v14852_v5  ;;  %vm4430_vm1 = vweird.f32 %v14898_v15 }
 0x615   : > { %17714 = vst [vmem:[#allocation31_spill] sm:$0xff] %v14922_v40  ;;  %v6726_v44 = vmul.f32 1.442695, %v6705_v4  ;;  %v14942_v49 = vpop.eup %11868  ;;  %v4433_v43 = vand.u32 2147483647, %v14850_v39  ;;  %v4417_v24 = vsel %vm14938_vm12, %v14821_v17, %v4413_v29  ;;  %vm4419_vm10 = vcmp.eq.f32.partialorder %v4418_v26, 8.507059e+37  ;;  %vm4431_vm3 = vmor %vm4429_vm2, %vm4430_vm1 }
 0x616   : > { %v14926_v55 = vpop.xlane.xlu2 %5862  ;;  %v4427_v60 = vmul.f32 %v14898_v15, %v4426_v54  ;;  %v5418_v6 = vpack.c.bf16 %v5265_v42, %v5250_v59  ;;  %v4421_v54 = vor.u32 1.1754944e-38, %v4420_v28  ;;  %v4441_v32 = vsub.f32 1.0, %v4440_v19  ;;  %v14954_v59 = vpop.eup %11870  ;;  %vm17719_vm12 = vmmov %vm17717_vm15 }
 0x617   : > { %11872 = vpow2.f32 %v6726_v44  ;;  %7446 = vmax.xlane.f32.xlu0 %v14904_v63  ;;  %5926 = vadd.xlane.f32.xlu1 %v14922_v40  ;;  %v3887_v11 = vpop.f32.mrf.mxu0  ;;  %v4436_v40 = vor.u32 1.1754944e-38, %v4435_v51  ;;  %v6720_v17 = vmul.f32 1.442695, %v6702_v33  ;;  %vm4434_vm8 = vcmp.eq.f32.partialorder %v4433_v43, 8.507059e+37  ;;  %v14960_v28 = vpop.f32.mrf.mxu1 }
 0x618   : > { %v4428_v4 = vadd.f32 %v14898_v15, %v4427_v60  ;;  %v3920_v56 = vpack.c.bf16 %v3887_v11, %v3887_v11  ;;  %5490 = vmatmul.bf16.gmra.mxu0 %v5418_v6  ;;  %v4422_v42 = vsel %vm4419_vm10, %v4421_v54, %v4417_v24  ;;  %v4442_v33 = vmul.f32 %v14917_v23, %v4441_v32 }
 0x619   : > { %v4423_v51 = vmul.f32 %v14058_v41, %v4422_v42  ;;  %v7418_v24 = vmul.f32 0.125, %v14750_v27  ;;  %vm4445_vm1 = vweird.f32 %v14917_v23  ;;  %vm4444_vm2 = vweird.f32 %v14852_v5  ;;  %v17721_v42 = vld [vmem:[#allocation72_spill] sm:$0xff] }
 0x61a   : > { %v5855_v44 = vpop.xlane.xlu1 %5854  ;;  %v14951_v3 = vpop.xlane.xlu0 %4331  ;;  %3937 = vst.msk [vmem:[#allocation3 + $0x3c] sm:$0xf] %vm17717_vm15, %v3920_v56  ;;  %v4432_v29 = vsel %vm4431_vm3, %v14898_v15, %v4428_v4  ;;  %v4443_v4 = vadd.f32 %v14917_v23, %v4442_v33  ;;  %vm14998_vm10 = vmor %vm4444_vm2, %vm4445_vm1  ;;  %vm4449_vm3 = vcmp.eq.f32.partialorder %v4448_v62, 8.507059e+37 }
 0x61b   : > { %11874 = vrcp.f32 %v14951_v3  ;;  %v4437_v60 = vsel %vm4434_vm8, %v4436_v40, %v4432_v29  ;;  %v5880_v15 = vsub.f32 %v14271_v34, %v5855_v44  ;;  %v7420_v40 = vmul.f32 0.125, %v14842_v21  ;;  %vm17724_vm15 = vmmov %vm17719_vm12 }
 0x61c   : > { %v4438_v19 = vmul.f32 %v14181_v30, %v4437_v60  ;;  %11876 = vpow2.f32 %v6720_v17  ;;  %v4450_v21 = vand.u32 2147483648, %v14852_v5  ;;  %v7417_v44 = vmul.f32 0.125, %v14684_v53 }
 0x61d   : > { %v14958_v39 = vpop.eup %11872  ;;  %v5902_v34 = vmul.f32 1.442695, %v5880_v15  ;;  %v14984_v56 = vsel %vm13327_vm5, %v7420_v40, -1e+30  ;;  %v6704_v17 = vsub.f32 %v17721_v42, %v14626_v36  ;;  %v14996_v60 = vsel %vm13313_vm4, %v7418_v24, -1e+30 }
 0x61e   : > { %17718 = vst [vmem:[#allocation58_spill] sm:$0xff] %v14958_v39  ;;  %v14962_v26 = vpop.xlane.xlu2 %6688  ;;  %6758 = vadd.xlane.f32.xlu2 %v14958_v39  ;;  %v4591_v43 = vpack.c.bf16 %v4438_v19, %v4423_v51  ;;  %v4465_v36 = vand.u32 2147483648, %v14951_v3  ;;  %v4447_v38 = vsel %vm14998_vm10, %v14917_v23, %v4443_v4  ;;  %v4463_v5 = vand.u32 2147483647, %v14951_v3 }
 0x61f   : > { %5924 = vadd.xlane.f32.xlu0 %v14942_v49  ;;  %6754 = vadd.xlane.f32.xlu1 %v14954_v59  ;;  %v3890_v20 = vpop.f32.mrf.mxu0  ;;  %17720 = vst [vmem:[#allocation75_spill] sm:$0xff] %v14984_v56  ;;  %v15003_v19 = vpop.f32.mrf.mxu1  ;;  %v6724_v24 = vmul.f32 1.442695, %v6704_v17  ;;  %vm4459_vm5 = vweird.f32 %v14951_v3  ;;  %v15030_v62 = vsel %vm13393_vm9, %v7417_v44, -1e+30  ;;  %v17732_v44 = vld [vmem:[#allocation27_spill] sm:$0xff]  ;;  %vm17733_vm9 = vmmov %vm17724_vm15 }
 0x620   : > { %v3921_v11 = vpack.c.bf16 %v3890_v20, %v3890_v20  ;;  %4679 = vmatmul.bf16.gmra.mxu2 %v4591_v43  ;;  %v4451_v43 = vor.u32 1.1754944e-38, %v4450_v21  ;;  %v4466_v4 = vor.u32 1.1754944e-38, %v4465_v36  ;;  %17726 = vst [vmem:[#allocation67_spill] sm:$0xff] %v15030_v62 }
 0x621   : > { %v11875_v6 = vpop.eup %11874 }
 0x622   : > { %v6681_v41 = vpop.xlane.xlu1 %6680  ;;  %v14973_v30 = vpop.xlane.xlu0 %4333  ;;  %v4455_v32 = vmul.f32 %v11875_v6, %v14951_v3  ;;  %3938 = vst.msk [vmem:[#allocation3 + $0x48] sm:$0xf] %vm17719_vm12, %v3921_v11  ;;  %vm4460_vm4 = vweird.f32 %v11875_v6  ;;  %vm4464_vm12 = vcmp.eq.f32.partialorder %v4463_v5, 8.507059e+37  ;;  %v17730_v5 = vld [vmem:[#allocation42_spill] sm:$0xff] }
 0x623   : > { %11878 = vrcp.f32 %v14973_v30  ;;  %v14986_v54 = vpop.eup %11876  ;;  %v6706_v33 = vsub.f32 %v14314_v52, %v6681_v41  ;;  %v4452_v41 = vsel %vm4449_vm3, %v4451_v43, %v4447_v38  ;;  %vm4461_vm8 = vmor %vm4459_vm5, %vm4460_vm4  ;;  %vm4474_vm2 = vweird.f32 %v14973_v30 }
 0x624   : > { %v4456_v27 = vsub.f32 1.0, %v4455_v32  ;;  %11880 = vrcp.f32 %v14900_v13  ;;  %vm5271_vm4 = vweird.f32 %v14900_v13  ;;  %vm17741_vm3 = vmmov %vm17733_vm9 }
 0x625   : > { %11882 = vpow2.f32 %v5902_v34  ;;  %v6728_v34 = vmul.f32 1.442695, %v6706_v33  ;;  %v17729_v33 = vld [vmem:[#allocation81_spill] sm:$0xff] }
 0x626   : > { %v14991_v29 = vpop.xlane.xlu2 %6690  ;;  %7458 = vmax.xlane.f32.xlu2 %v14984_v56  ;;  %v4457_v53 = vmul.f32 %v11875_v6, %v4456_v27  ;;  %11884 = vrcp.f32 %v14788_v61 }
 0x627   : > { %6752 = vadd.xlane.f32.xlu0 %v14986_v54  ;;  %7454 = vmax.xlane.f32.xlu1 %v14996_v60  ;;  %v3892_v15 = vpop.f32.mrf.mxu0 }
 0x628   : > { %v3922_v20 = vpack.c.bf16 %v3892_v15, %v3892_v15  ;;  %v4458_v40 = vadd.f32 %v11875_v6, %v4457_v53 }
 0x629   : > { %v15015_v11 = vpop.eup %11878 }
 0x62a   : > { %v5857_v32 = vpop.xlane.xlu1 %5856  ;;  %v15018_v27 = vpop.xlane.xlu0 %4335  ;;  %v4470_v52 = vmul.f32 %v15015_v11, %v14973_v30  ;;  %3939 = vst.msk [vmem:[#allocation3 + $0x54] sm:$0xf] %vm17724_vm15, %v3922_v20  ;;  %v4462_v21 = vsel %vm4461_vm8, %v11875_v6, %v4458_v40  ;;  %v4453_v6 = vmul.f32 %v17729_v33, %v4452_v41  ;;  %v17731_v40 = vld [vmem:[#allocation80_spill] sm:$0xff]  ;;  %vm4475_vm1 = vweird.f32 %v15015_v11 }
 0x62b   : > { %v5881_v23 = vsub.f32 %v14353_v25, %v5857_v32  ;;  %11886 = vrcp.f32 %v15018_v27  ;;  %v15026_v3 = vpop.eup %11880  ;;  %v4467_v53 = vsel %vm4464_vm12, %v4466_v4, %v4462_v21  ;;  %v17728_v25 = vld [vmem:[#allocation77_spill] sm:$0xff]  ;;  %v5879_v32 = vsub.f32 %v17731_v40, %v14816_v18  ;;  %v15050_v41 = vpop.f32.mrf.mxu1 }
 0x62c   : > { %v4471_v42 = vsub.f32 1.0, %v4470_v52  ;;  %v15032_v15 = vpop.eup %11882  ;;  %11888 = vpow2.f32 %v6724_v24  ;;  %v6707_v36 = vsub.f32 %v17728_v25, %v14754_v2  ;;  %v4468_v20 = vmul.f32 %v17730_v5, %v4467_v53 }
 0x62d   : > { %v5904_v17 = vmul.f32 1.442695, %v5881_v23  ;;  %17727 = vst [vmem:[#allocation53_spill] sm:$0xff] %v15032_v15  ;;  %v15040_v43 = vpop.eup %11884  ;;  %v5883_v24 = vsub.f32 %v17732_v44, %v14830_v12  ;;  %v5267_v2 = vmul.f32 %v15026_v3, %v14900_v13  ;;  %v4480_v44 = vand.u32 2147483648, %v14973_v30 }
 0x62e   : > { %v15036_v38 = vpop.xlane.xlu2 %5866  ;;  %v4592_v23 = vpack.c.bf16 %v4468_v20, %v4453_v6  ;;  %v4472_v4 = vmul.f32 %v15015_v11, %v4471_v42  ;;  %v6730_v51 = vmul.f32 1.442695, %v6707_v36  ;;  %v5297_v53 = vmul.f32 %v15040_v43, %v14788_v61 }
 0x62f   : > { %11890 = vpow2.f32 %v5904_v17  ;;  %7452 = vmax.xlane.f32.xlu0 %v15030_v62  ;;  %5934 = vadd.xlane.f32.xlu1 %v15032_v15  ;;  %v3895_v52 = vpop.f32.mrf.mxu0  ;;  %v7421_v17 = vmul.f32 0.125, %v14909_v10  ;;  %v5908_v6 = vmul.f32 1.442695, %v5883_v24  ;;  %v5268_v5 = vsub.f32 1.0, %v5267_v2  ;;  %v17742_v62 = vld [vmem:[#allocation25_spill] sm:$0xff] }
 0x630   : > { %11892 = vpow2.f32 %v6728_v34  ;;  %v3923_v21 = vpack.c.bf16 %v3895_v52, %v3895_v52  ;;  %4684 = vmatmul.bf16.gmra.mxu2 %v4592_v23  ;;  %v5900_v34 = vmul.f32 1.442695, %v5879_v32  ;;  %v4473_v20 = vadd.f32 %v15015_v11, %v4472_v4 }
 0x631   : > { %v15053_v18 = vpop.eup %11886  ;;  %v5298_v32 = vsub.f32 1.0, %v5297_v53  ;;  %v15081_v24 = vsel %vm13408_vm11, %v7421_v17, -1e+30  ;;  %v4478_v23 = vand.u32 2147483647, %v14973_v30  ;;  %v5269_v4 = vmul.f32 %v15026_v3, %v5268_v5  ;;  %vm15092_vm11 = vmor %vm4474_vm2, %vm4475_vm1 }
 0x632   : > { %v15058_v12 = vpop.xlane.xlu0 %5162  ;;  %v15060_v25 = vpop.xlane.xlu1 %5158  ;;  %v4485_v33 = vmul.f32 %v15053_v18, %v15018_v27  ;;  %3940 = vst.msk [vmem:[#allocation3 + $0x60] sm:$0xf] %vm17733_vm9, %v3923_v21  ;;  %v4495_v21 = vand.u32 2147483648, %v15018_v27  ;;  %v4493_v17 = vand.u32 2147483647, %v15018_v27  ;;  %vm4490_vm10 = vweird.f32 %v15053_v18 }
 0x633   : > { %v15065_v42 = vpop.eup %11888  ;;  %11894 = vrcp.f32 %v15058_v12  ;;  %17738 = vst [vmem:[#allocation76_spill] sm:$0xff] %v15081_v24  ;;  %v5277_v5 = vand.u32 2147483648, %v14900_v13  ;;  %v15111_v8 = vpop.f32.mrf.mxu1  ;;  %vm4489_vm5 = vweird.f32 %v15018_v27  ;;  %vm4479_vm15 = vcmp.eq.f32.partialorder %v4478_v23, 8.507059e+37 }
 0x634   : > { %17734 = vst [vmem:[#allocation61_spill] sm:$0xff] %v15065_v42  ;;  %v4486_v36 = vsub.f32 1.0, %v4485_v33  ;;  %11896 = vrcp.f32 %v15060_v25  ;;  %vm5272_vm8 = vweird.f32 %v15026_v3  ;;  %vm4491_vm12 = vmor %vm4489_vm5, %vm4490_vm10  ;;  %v5886_v27 = vsub.f32 %v14391_v31, %v15036_v38 }
 0x635   : > { %v15068_v10 = vpop.eup %11890  ;;  %11898 = vpow2.f32 %v6730_v51  ;;  %vm4494_vm9 = vcmp.eq.f32.partialorder %v4493_v17, 8.507059e+37  ;;  %v5290_v31 = vand.u32 2147483647, %v15060_v25  ;;  %v5292_v38 = vand.u32 2147483648, %v15060_v25  ;;  %v17743_v17 = vld [vmem:[#allocation47_spill] sm:$0xff]  ;;  %vm15148_vm2 = vmor %vm5271_vm4, %vm5272_vm8 }
 0x636   : > { %17735 = vst [vmem:[#allocation34_spill] sm:$0xff] %v15068_v10  ;;  %v15073_v40 = vpop.eup %11892  ;;  %v15076_v52 = vpop.xlane.xlu2 %6692  ;;  %5936 = vadd.xlane.f32.xlu2 %v15068_v10  ;;  %11900 = vpow2.f32 %v5900_v34  ;;  %v4487_v2 = vmul.f32 %v15053_v18, %v4486_v36  ;;  %v4477_v34 = vsel %vm15092_vm11, %v15015_v11, %v4473_v20  ;;  %v5275_v11 = vand.u32 2147483647, %v14900_v13  ;;  %vm17749_vm5 = vmmov %vm17741_vm3 }
 0x637   : > { %17736 = vst [vmem:[#allocation46_spill] sm:$0xff] %v15073_v40  ;;  %6760 = vadd.xlane.f32.xlu1 %v15073_v40  ;;  %6756 = vadd.xlane.f32.xlu0 %v15065_v42  ;;  %11902 = vpow2.f32 %v5908_v6  ;;  %v3897_v51 = vpop.f32.mrf.mxu0  ;;  %v15105_v6 = vmul.f32 %v15040_v43, %v5298_v32  ;;  %v5884_v42 = vsub.f32 %v17742_v62, %v14926_v55  ;;  %v5914_v62 = vmul.f32 1.442695, %v5886_v27 }
 0x638   : > { %17737 = vst [vmem:[#allocation65_spill] sm:$0xff] %v15076_v52  ;;  %v3924_v53 = vpack.c.bf16 %v3897_v51, %v3897_v51  ;;  %v4488_v30 = vadd.f32 %v15053_v18, %v4487_v2  ;;  %v4481_v51 = vor.u32 1.1754944e-38, %v4480_v44  ;;  %v4496_v44 = vor.u32 1.1754944e-38, %v4495_v21 }
 0x639   : > { %v15102_v33 = vpop.eup %11894  ;;  %v5278_v21 = vor.u32 1.1754944e-38, %v5277_v5  ;;  %vm15155_vm11 = vcmp.eq.f32.partialorder %v5275_v11, 8.507059e+37  ;;  %vm5286_vm10 = vweird.f32 %v15060_v25  ;;  %v5293_v27 = vor.u32 1.1754944e-38, %v5292_v38  ;;  %v17750_v11 = vld [vmem:[#allocation45_spill] sm:$0xff] }
 0x63a   : > { %v5859_v36 = vpop.xlane.xlu1 %5858  ;;  %v15109_v52 = vpop.xlane.xlu0 %4337  ;;  %3941 = vst.msk [vmem:[#allocation3 + $0x6c] sm:$0xf] %vm17741_vm3, %v3924_v53  ;;  %v4482_v2 = vsel %vm4479_vm15, %v4481_v51, %v4477_v34  ;;  %v4492_v23 = vsel %vm4491_vm12, %v15053_v18, %v4488_v30  ;;  %v5270_v53 = vadd.f32 %v15026_v3, %v5269_v4  ;;  %v5312_v40 = vmul.f32 %v15102_v33, %v15058_v12 }
 0x63b   : > { %v11897_v15 = vpop.eup %11896  ;;  %11904 = vrcp.f32 %v15109_v52  ;;  %v4497_v39 = vsel %vm4494_vm9, %v4496_v44, %v4492_v23  ;;  %v4483_v18 = vmul.f32 %v14303_v45, %v4482_v2  ;;  %v5882_v30 = vsub.f32 %v17743_v17, %v5859_v36  ;;  %v17744_v44 = vld [vmem:[#allocation35_spill] sm:$0xff] }
 0x63c   : > { %v15117_v20 = vpop.eup %11898  ;;  %v5282_v32 = vmul.f32 %v11897_v15, %v15060_v25  ;;  %vm5287_vm1 = vweird.f32 %v11897_v15  ;;  %v4498_v5 = vmul.f32 %v17744_v44, %v4497_v39  ;;  %v5274_v45 = vsel %vm15148_vm2, %v15026_v3, %v5270_v53 }
 0x63d   : > { %v15123_v10 = vpop.eup %11900  ;;  %v5313_v39 = vsub.f32 1.0, %v5312_v40  ;;  %vm5288_vm4 = vmor %vm5286_vm10, %vm5287_vm1  ;;  %vm5291_vm3 = vcmp.eq.f32.partialorder %v5290_v31, 8.507059e+37  ;;  %v5906_v40 = vmul.f32 1.442695, %v5882_v30  ;;  %v5279_v25 = vsel %vm15155_vm11, %v5278_v21, %v5274_v45 }
 0x63e   : > { %v15129_v56 = vpop.eup %11902  ;;  %v5283_v34 = vsub.f32 1.0, %v5282_v32  ;;  %v15133_v51 = vpop.xlane.xlu2 %5170  ;;  %v4593_v13 = vpack.c.bf16 %v4498_v5, %v4483_v18  ;;  %v15184_v30 = vadd.f32 %v15040_v43, %v15105_v6  ;;  %vm5302_vm15 = vweird.f32 %v15040_v43  ;;  %vm17755_vm1 = vmmov %vm17749_vm5 }
 0x63f   : > { %7460 = vmax.xlane.f32.xlu1 %v15081_v24  ;;  %5932 = vadd.xlane.f32.xlu0 %v15123_v10  ;;  %v3900_v32 = vpop.f32.mrf.mxu0  ;;  %v5314_v5 = vmul.f32 %v15102_v33, %v5313_v39  ;;  %v5322_v39 = vand.u32 2147483648, %v15058_v12  ;;  %vm5301_vm8 = vweird.f32 %v14788_v61  ;;  %vm5317_vm12 = vweird.f32 %v15102_v33  ;;  %v17769_v24 = vld [vmem:[#allocation37_spill] sm:$0xff] }
 0x640   : > { %v5284_v4 = vmul.f32 %v11897_v15, %v5283_v34  ;;  %v3925_v23 = vpack.c.bf16 %v3900_v32, %v3900_v32  ;;  %4689 = vmatmul.bf16.gmra.mxu2 %v4593_v13  ;;  %vm15203_vm9 = vmor %vm5301_vm8, %vm5302_vm15  ;;  %vm5316_vm2 = vweird.f32 %v15058_v12  ;;  %vm4504_vm11 = vweird.f32 %v15109_v52 }
 0x641   : > { %v15159_v36 = vpop.eup %11904  ;;  %vm15222_vm10 = vmor %vm5316_vm2, %vm5317_vm12 }
 0x642   : > { %v5285_v34 = vadd.f32 %v11897_v15, %v5284_v4  ;;  %v6685_v17 = vpop.xlane.xlu1 %6684  ;;  %v15162_v44 = vpop.xlane.xlu0 %4339  ;;  %v4500_v3 = vmul.f32 %v15159_v36, %v15109_v52  ;;  %3942 = vst.msk [vmem:[#allocation3 + $0x78] sm:$0xf] %vm17749_vm5, %v3925_v23  ;;  %v17751_v23 = vld [vmem:[#allocation48_spill] sm:$0xff]  ;;  %vm4505_vm5 = vweird.f32 %v15159_v36 }
 0x643   : > { %v6708_v53 = vsub.f32 %v17750_v11, %v6685_v17  ;;  %11906 = vrcp.f32 %v15162_v44  ;;  %v15172_v4 = vpop.f32.mrf.mxu1  ;;  %v5307_v11 = vand.u32 2147483648, %v14788_v61  ;;  %vm4519_vm15 = vweird.f32 %v15162_v44  ;;  %vm15254_vm8 = vmor %vm4504_vm11, %vm4505_vm5 }
 0x644   : > { %v5289_v18 = vsel %vm5288_vm4, %v11897_v15, %v5285_v34  ;;  %11908 = vpow2.f32 %v5914_v62  ;;  %v4501_v31 = vsub.f32 1.0, %v4500_v3  ;;  %v17752_v15 = vld [vmem:[#allocation28_spill] sm:$0xff]  ;;  %v5910_v62 = vmul.f32 1.442695, %v5884_v42 }
 0x645   : > { %v6732_v32 = vmul.f32 1.442695, %v6708_v53  ;;  %v5294_v38 = vsel %vm5291_vm3, %v5293_v27, %v5289_v18  ;;  %v5280_v21 = vmul.f32 %v17752_v15, %v5279_v25  ;;  %v5320_v27 = vand.u32 2147483647, %v15058_v12 }
 0x646   : > { %v15175_v55 = vpop.xlane.xlu2 %5172  ;;  %v5295_v17 = vmul.f32 %v17751_v23, %v5294_v38  ;;  %v5315_v42 = vadd.f32 %v15102_v33, %v5314_v5  ;;  %v5305_v18 = vand.u32 2147483647, %v14788_v61  ;;  %v5308_v5 = vor.u32 1.1754944e-38, %v5307_v11 }
 0x647   : > { %11910 = vpow2.f32 %v6732_v32  ;;  %6762 = vadd.xlane.f32.xlu0 %v15117_v20  ;;  %5940 = vadd.xlane.f32.xlu1 %v15129_v56  ;;  %v3902_v45 = vpop.f32.mrf.mxu0  ;;  %v4502_v32 = vmul.f32 %v15159_v36, %v4501_v31  ;;  %vm15226_vm4 = vcmp.eq.f32.partialorder %v5320_v27, 8.507059e+37  ;;  %v5323_v12 = vor.u32 1.1754944e-38, %v5322_v39 }
 0x648   : > { %11912 = vpow2.f32 %v5906_v40  ;;  %v3926_v34 = vpack.c.bf16 %v3902_v45, %v3902_v45  ;;  %v5419_v13 = vpack.c.bf16 %v5295_v17, %v5280_v21  ;;  %v7422_v40 = vmul.f32 0.125, %v14960_v28 }
 0x649   : > { %v15187_v2 = vpop.eup %11906  ;;  %v5304_v28 = vsel %vm15203_vm9, %v15040_v43, %v15184_v30  ;;  %11914 = vpow2.f32 %v5910_v62  ;;  %v4510_v43 = vand.u32 2147483648, %v15109_v52  ;;  %v5319_v30 = vsel %vm15222_vm10, %v15102_v33, %v5315_v42 }
 0x64a   : > { %v4515_v3 = vmul.f32 %v15187_v2, %v15162_v44  ;;  %v15194_v6 = vpop.xlane.xlu0 %4341  ;;  %v15196_v53 = vpop.xlane.xlu1 %5164  ;;  %3943 = vst.msk [vmem:[#allocation3 + $0x84] sm:$0xf] %vm17755_vm1, %v3926_v34  ;;  %5495 = vmatmul.bf16.gmra.mxu0 %v5419_v13  ;;  %v4503_v45 = vadd.f32 %v15159_v36, %v4502_v32  ;;  %v4508_v39 = vand.u32 2147483647, %v15109_v52  ;;  %vm4520_vm3 = vweird.f32 %v15187_v2 }
 0x64b   : > { %v15210_v38 = vpop.eup %11908  ;;  %v7406_v62 = vpop.f32.mrf.mxu1  ;;  %11916 = vrcp.f32 %v15194_v6  ;;  %v4525_v34 = vand.u32 2147483648, %v15162_v44  ;;  %v4523_v25 = vand.u32 2147483647, %v15162_v44  ;;  %v5324_v32 = vsel %vm15226_vm4, %v5323_v12, %v5319_v30  ;;  %vm15267_vm9 = vmor %vm4519_vm15, %vm4520_vm3 }
 0x64c   : > { %17756 = vst [vmem:[#allocation69_spill] sm:$0xff] %v15210_v38  ;;  %v4516_v23 = vsub.f32 1.0, %v4515_v3  ;;  %11918 = vrcp.f32 %v15196_v53  ;;  %vm5306_vm12 = vcmp.eq.f32.partialorder %v5305_v18, 8.507059e+37  ;;  %v4507_v44 = vsel %vm15254_vm8, %v15159_v36, %v4503_v45 }
 0x64d   : > { %v15217_v17 = vpop.eup %11910  ;;  %v5309_v11 = vsel %vm5306_vm12, %v5308_v5, %v5304_v28  ;;  %v4526_v30 = vor.u32 1.1754944e-38, %v4525_v34  ;;  %vm4509_vm2 = vcmp.eq.f32.partialorder %v4508_v39, 8.507059e+37  ;;  %vm4524_vm11 = vcmp.eq.f32.partialorder %v4523_v25, 8.507059e+37  ;;  %v17768_v28 = vld [vmem:[#allocation79_spill] sm:$0xff]  ;;  %v17770_v39 = vld [vmem:[#allocation24_spill] sm:$0xff] }
 0x64e   : > { %17757 = vst [vmem:[#allocation39_spill] sm:$0xff] %v15217_v17  ;;  %v15230_v31 = vpop.eup %11912  ;;  %v4517_v15 = vmul.f32 %v15187_v2, %v4516_v23  ;;  %v5873_v21 = vpop.xlane.xlu2 %5872  ;;  %6764 = vadd.xlane.f32.xlu2 %v15217_v17  ;;  %v15285_v17 = vsel %vm17620_vm0, %v7422_v40, -1e+30  ;;  %v7424_v45 = vmul.f32 0.125, %v15050_v41  ;;  %v6710_v40 = vsub.f32 %v17769_v24, %v14962_v26  ;;  %v17771_v26 = vld [vmem:[#allocation51_spill] sm:$0xff]  ;;  %vm17773_vm0 = vmmov %vm17755_vm1  ;;  %v17776_v24 = vld [vmem:[#allocation40_spill] sm:$0xff] }
 0x64f   : > { %5938 = vadd.xlane.f32.xlu0 %v15230_v31  ;;  %5946 = vadd.xlane.f32.xlu1 %v15210_v38  ;;  %v5889_v13 = vsub.f32 %v14514_v37, %v5873_v21  ;;  %v3905_v33 = vpop.f32.mrf.mxu0  ;;  %v7427_v37 = vmul.f32 0.125, %v7406_v62  ;;  %v15271_v52 = vpop.eup %11914  ;;  %v4511_v21 = vor.u32 1.1754944e-38, %v4510_v43  ;;  %v17766_v62 = vld [vmem:[#allocation29_spill] sm:$0xff]  ;;  %v5310_v43 = vmul.f32 %v17768_v28, %v5309_v11  ;;  %vm17781_vm5 = vmmov %vm17773_vm0 }
 0x650   : > { %v4518_v27 = vadd.f32 %v15187_v2, %v4517_v15  ;;  %v3927_v3 = vpack.c.bf16 %v3905_v33, %v3905_v33  ;;  %v5325_v33 = vmul.f32 %v17766_v62, %v5324_v32  ;;  %11920 = vrcp.f32 %v15133_v51  ;;  %v17772_v32 = vld [vmem:[#allocation50_spill] sm:$0xff] }
 0x651   : > { %v5920_v12 = vmul.f32 1.442695, %v5889_v13  ;;  %v15281_v38 = vpop.eup %11916  ;;  %v15292_v36 = vsel %vm17664_vm14, %v7427_v37, -1e+30  ;;  %v6709_v57 = vsub.f32 %v17770_v39, %v14882_v35  ;;  %v7423_v15 = vmul.f32 0.125, %v15003_v19  ;;  %v17774_v19 = vld [vmem:[#allocation30_spill] sm:$0xff] }
 0x652   : > { %v15261_v23 = vpop.xlane.xlu0 %5168  ;;  %v15263_v61 = vpop.xlane.xlu1 %5864  ;;  %3944 = vst.msk [vmem:[#allocation3 + $0x90] sm:$0xf] %vm17755_vm1, %v3927_v3  ;;  %v4522_v18 = vsel %vm15267_vm9, %v15187_v2, %v4518_v27  ;;  %v4512_v2 = vsel %vm4509_vm2, %v4511_v21, %v4507_v44  ;;  %v4530_v34 = vmul.f32 %v15281_v38, %v15194_v6  ;;  %v5420_v27 = vpack.c.bf16 %v5325_v33, %v5310_v43  ;;  %v17778_v39 = vld [vmem:[#allocation26_spill] sm:$0xff] }
 0x653   : > { %v15287_v3 = vpop.eup %11918  ;;  %v4527_v5 = vsel %vm4524_vm11, %v4526_v30, %v4522_v18  ;;  %11922 = vpow2.f32 %v5920_v12  ;;  %v4513_v25 = vmul.f32 %v17771_v26, %v4512_v2  ;;  %v6736_v35 = vmul.f32 1.442695, %v6710_v40 }
 0x654   : > { %v5327_v41 = vmul.f32 %v15287_v3, %v15196_v53  ;;  %v4528_v37 = vmul.f32 %v17772_v32, %v4527_v5  ;;  %v7425_v12 = vmul.f32 0.125, %v15111_v8  ;;  %v6734_v21 = vmul.f32 1.442695, %v6709_v57 }
 0x655   : > { %v4531_v30 = vsub.f32 1.0, %v4530_v34  ;;  %v6711_v33 = vsub.f32 %v17774_v19, %v14991_v29  ;;  %v15324_v28 = vsel %vm13358_vm7, %v7424_v45, -1e+30  ;;  %v5885_v8 = vsub.f32 %v14503_v14, %v15263_v61 }
 0x656   : > { %5942 = vadd.xlane.f32.xlu2 %v15271_v52  ;;  %v4594_v11 = vpack.c.bf16 %v4528_v37, %v4513_v25  ;;  %v15318_v62 = vpop.eup %11920  ;;  %v5328_v2 = vsub.f32 1.0, %v5327_v41  ;;  %vm17777_vm14 = vnez %v17776_v24  ;;  %vm17779_vm7 = vnez %v17778_v39 }
 0x657   : > { %7462 = vmax.xlane.f32.xlu0 %v15285_v17  ;;  %7472 = vmax.xlane.f32.xlu1 %v15292_v36  ;;  %v3907_v13 = vpop.f32.mrf.mxu0  ;;  %v15334_v40 = vsel %vm17777_vm14, %v7423_v15, -1e+30  ;;  %v4532_v29 = vmul.f32 %v15281_v38, %v4531_v30  ;;  %v15341_v57 = vsel %vm17779_vm7, %v7425_v12, -1e+30  ;;  %v15345_v61 = vmul.f32 1.442695, %v6711_v33 }
 0x658   : > { %v3928_v42 = vpack.c.bf16 %v3907_v13, %v3907_v13  ;;  %4694 = vmatmul.bf16.gmra.mxu2 %v4594_v11  ;;  %v4540_v34 = vand.u32 2147483648, %v15194_v6  ;;  %v5329_v13 = vmul.f32 %v15287_v3, %v5328_v2  ;;  %vm4534_vm10 = vweird.f32 %v15194_v6 }
 0x659   : > { %v15326_v43 = vpop.eup %11922  ;;  %v5912_v26 = vmul.f32 1.442695, %v5885_v8  ;;  %v4538_v15 = vand.u32 2147483647, %v15194_v6  ;;  %vm5331_vm4 = vweird.f32 %v15196_v53  ;;  %vm4535_vm3 = vweird.f32 %v15281_v38 }
 0x65a   : > { %v15310_v44 = vpop.xlane.xlu0 %4343  ;;  %v15312_v18 = vpop.xlane.xlu1 %5166  ;;  %3945 = vst.msk [vmem:[#allocation3 + $0x9c] sm:$0xf] %vm17773_vm0, %v3928_v42  ;;  %5500 = vmatmul.bf16.gmra.mxu0 %v5420_v27  ;;  %v15353_v42 = vmul.f32 %v15318_v62, %v15133_v51  ;;  %v5337_v30 = vand.u32 2147483648, %v15196_v53  ;;  %v4541_v2 = vor.u32 1.1754944e-38, %v4540_v34  ;;  %v5330_v5 = vadd.f32 %v15287_v3, %v5329_v13  ;;  %vm15383_vm12 = vmor %vm4534_vm10, %vm4535_vm3 }
 0x65b   : > { %11924 = vrcp.f32 %v15310_v44  ;;  %vm5332_vm15 = vweird.f32 %v15287_v3  ;;  %v4553_v13 = vand.u32 2147483647, %v15310_v44  ;;  %vm4549_vm9 = vweird.f32 %v15310_v44  ;;  %vm17788_vm10 = vmmov %vm17781_vm5 }
 0x65c   : > { %11926 = vrcp.f32 %v15312_v18  ;;  %v5352_v6 = vand.u32 2147483648, %v15312_v18  ;;  %vm4539_vm11 = vcmp.eq.f32.partialorder %v4538_v15, 8.507059e+37  ;;  %vm15410_vm0 = vmor %vm5331_vm4, %vm5332_vm15  ;;  %vm5346_vm14 = vweird.f32 %v15312_v18  ;;  %v15422_v15 = vpop.xlane.xlu2 %5922 }
 0x65d   : > { %11928 = vrcp.f32 %v15261_v23  ;;  %vm4554_vm7 = vcmp.eq.f32.partialorder %v4553_v13, 8.507059e+37  ;;  %vm17793_vm15 = vmmov %vm17788_vm10 }
 0x65e   : > { %7466 = vmax.xlane.f32.xlu2 %v15324_v28  ;;  %11930 = vpow2.f32 %v6736_v35  ;;  %v5335_v35 = vand.u32 2147483647, %v15196_v53 }
 0x65f   : > { %7464 = vmax.xlane.f32.xlu0 %v15334_v40  ;;  %5952 = vadd.xlane.f32.xlu1 %v15326_v43  ;;  %11932 = vpow2.f32 %v6734_v21  ;;  %v3910_v45 = vpop.f32.mrf.mxu0  ;;  %v4533_v21 = vadd.f32 %v15281_v38, %v4532_v29  ;;  %v4555_v29 = vand.u32 2147483648, %v15310_v44 }
 0x660   : > { %v3929_v27 = vpack.c.bf16 %v3910_v45, %v3910_v45  ;;  %11934 = vpow2.f32 %v5912_v26  ;;  %vm5336_vm4 = vcmp.eq.f32.partialorder %v5335_v35, 8.507059e+37 }
 0x661   : > { %v15343_v14 = vpop.eup %11924  ;;  %11936 = vpow2.f32 %v15345_v61 }
 0x662   : > { %v15349_v41 = vpop.eup %11926  ;;  %v4545_v25 = vmul.f32 %v15343_v14, %v15310_v44  ;;  %v5869_v32 = vpop.xlane.xlu0 %5868  ;;  %3946 = vst.msk [vmem:[#allocation3 + $0xa8] sm:$0xf] %vm17781_vm5, %v3929_v27  ;;  %vm4550_vm8 = vweird.f32 %v15343_v14 }
 0x663   : > { %v15358_v37 = vpop.xlane.xlu1 %6694  ;;  %v5342_v11 = vmul.f32 %v15349_v41, %v15312_v18  ;;  %v15366_v12 = vpop.eup %11928  ;;  %v5887_v26 = vsub.f32 %v14675_v46, %v5869_v32  ;;  %vm15399_vm1 = vmor %vm4549_vm9, %vm4550_vm8  ;;  %vm5347_vm2 = vweird.f32 %v15349_v41  ;;  %v5350_v46 = vand.u32 2147483647, %v15312_v18 }
 0x664   : > { %17780 = vst [vmem:[#allocation17_spill] sm:$0xff] %v15358_v37  ;;  %v4546_v19 = vsub.f32 1.0, %v4545_v25  ;;  %v15371_v33 = vpop.eup %11930  ;;  %v5357_v34 = vmul.f32 %v15366_v12, %v15261_v23  ;;  %vm5348_vm5 = vmor %vm5346_vm14, %vm5347_vm2  ;;  %v5353_v37 = vor.u32 1.1754944e-38, %v5352_v6  ;;  %vm5362_vm8 = vweird.f32 %v15366_v12 }
 0x665   : > { %v5343_v8 = vsub.f32 1.0, %v5342_v11  ;;  %v15375_v24 = vpop.eup %11932  ;;  %vm5351_vm3 = vcmp.eq.f32.partialorder %v5350_v46, 8.507059e+37  ;;  %vm5361_vm9 = vweird.f32 %v15261_v23  ;;  %vm17798_vm14 = vmmov %vm17788_vm10 }
 0x666   : > { %v4547_v45 = vmul.f32 %v15343_v14, %v4546_v19  ;;  %6768 = vadd.xlane.f32.xlu2 %v15371_v33  ;;  %v4537_v19 = vsel %vm15383_vm12, %v15281_v38, %v4533_v21  ;;  %v4556_v38 = vor.u32 1.1754944e-38, %v4555_v29  ;;  %v5334_v29 = vsel %vm15410_vm0, %v15287_v3, %v5330_v5  ;;  %v15428_v18 = vpop.eup %11934  ;;  %v17789_v3 = vld [vmem:[#allocation60_spill] sm:$0xff]  ;;  %vm15471_vm2 = vmor %vm5361_vm9, %vm5362_vm8 }
 0x667   : > { %v5344_v27 = vmul.f32 %v15349_v41, %v5343_v8  ;;  %6766 = vadd.xlane.f32.xlu0 %v15375_v24  ;;  %v3912_v11 = vpop.f32.mrf.mxu0  ;;  %v4542_v53 = vsel %vm4539_vm11, %v4541_v2, %v4537_v19  ;;  %v17790_v19 = vld [vmem:[#allocation20_spill] sm:$0xff]  ;;  %vm5377_vm12 = vweird.f32 %v15318_v62  ;;  %vm17806_vm8 = vmmov %vm17798_vm14 }
 0x668   : > { %v4548_v25 = vadd.f32 %v15343_v14, %v4547_v45  ;;  %v3930_v32 = vpack.c.bf16 %v3912_v11, %v3912_v11  ;;  %v5338_v11 = vor.u32 1.1754944e-38, %v5337_v30  ;;  %v4543_v2 = vmul.f32 %v17789_v3, %v4542_v53 }
 0x669   : > { %v5345_v8 = vadd.f32 %v15349_v41, %v5344_v27  ;;  %v5916_v27 = vmul.f32 1.442695, %v5887_v26  ;;  %v5373_v30 = vsub.f32 1.0, %v15353_v42  ;;  %v7409_v42 = vpop.f32.mrf.mxu1 }
 0x66a   : > { %v15417_v45 = vpop.xlane.xlu0 %4345  ;;  %v4552_v39 = vsel %vm15399_vm1, %v15343_v14, %v4548_v25  ;;  %3947 = vst.msk [vmem:[#allocation3 + $0xb4] sm:$0xf] %vm17788_vm10, %v3930_v32  ;;  %v5358_v25 = vsub.f32 1.0, %v5357_v34  ;;  %v5339_v5 = vsel %vm5336_vm4, %v5338_v11, %v5334_v29  ;;  %v7428_v11 = vmul.f32 0.125, %v7409_v42 }
 0x66b   : > { %v15415_v21 = vpop.xlane.xlu1 %5870  ;;  %v4557_v14 = vsel %vm4554_vm7, %v4556_v38, %v4552_v39  ;;  %v5349_v26 = vsel %vm5348_vm5, %v15349_v41, %v5345_v8  ;;  %11938 = vpow2.f32 %v5916_v27  ;;  %v5340_v61 = vmul.f32 %v17790_v19, %v5339_v5  ;;  %v15449_v39 = vpop.eup %11936 }
 0x66c   : > { %v4558_v13 = vmul.f32 %v14641_v47, %v4557_v14  ;;  %v5354_v35 = vsel %vm5351_vm3, %v5353_v37, %v5349_v26  ;;  %11940 = vrcp.f32 %v15417_v45  ;;  %v5359_v47 = vmul.f32 %v15366_v12, %v5358_v25 }
 0x66d   : > { %v5355_v8 = vmul.f32 %v14633_v1, %v5354_v35  ;;  %v5374_v44 = vmul.f32 %v15318_v62, %v5373_v30  ;;  %v15455_v1 = vpop.xlane.xlu2 %6750  ;;  %v5367_v37 = vand.u32 2147483648, %v15261_v23  ;;  %v5365_v25 = vand.u32 2147483647, %v15261_v23 }
 0x66e   : > { %7468 = vmax.xlane.f32.xlu2 %v15341_v57  ;;  %v4595_v6 = vpack.c.bf16 %v4558_v13, %v4543_v2  ;;  %v5360_v53 = vadd.f32 %v15366_v12, %v5359_v47  ;;  %vm5376_vm1 = vweird.f32 %v15133_v51  ;;  %v5380_v13 = vand.u32 2147483647, %v15133_v51 }
 0x66f   : > { %5944 = vadd.xlane.f32.xlu0 %v15428_v18  ;;  %v5481_v34 = vpop.f32.mrf.mxu0  ;;  %v5421_v38 = vpack.c.bf16 %v5355_v8, %v5340_v61  ;;  %v5375_v14 = vadd.f32 %v15318_v62, %v5374_v44  ;;  %v5382_v26 = vand.u32 2147483648, %v15133_v51  ;;  %v5888_v2 = vsub.f32 %v14759_v9, %v15415_v21  ;;  %vm15486_vm11 = vmor %vm5376_vm1, %vm5377_vm12  ;;  %v17800_v8 = vld [vmem:[#allocation22_spill] sm:$0xff] }
 0x670   : > { %v5521_v41 = vpack.c.bf16 %v5481_v34, %v5481_v34  ;;  %4699 = vmatmul.bf16.gmra.mxu2 %v4595_v6  ;;  %11942 = vrcp.f32 %v15175_v55  ;;  %v5364_v51 = vsel %vm15471_vm2, %v15366_v12, %v5360_v53  ;;  %v7426_v30 = vmul.f32 0.125, %v15172_v4 }
 0x671   : > { %v15451_v27 = vpop.eup %11938  ;;  %5505 = vmatmul.bf16.gmra.mxu0 %v5421_v38  ;;  %v5368_v9 = vor.u32 1.1754944e-38, %v5367_v37  ;;  %vm5366_vm0 = vcmp.eq.f32.partialorder %v5365_v25, 8.507059e+37  ;;  %v5379_v12 = vsel %vm15486_vm11, %v15318_v62, %v5375_v14  ;;  %v5383_v47 = vor.u32 1.1754944e-38, %v5382_v26  ;;  %v7411_v62 = vpop.f32.mrf.mxu1  ;;  %v17802_v37 = vld [vmem:[#allocation63_spill] sm:$0xff] }
 0x672   : > { %v15445_v32 = vpop.xlane.xlu0 %6696  ;;  %5537 = vst.msk [vmem:[#allocation3 + $0x4] sm:$0xf] %vm17793_vm15, %v5521_v41  ;;  %v15457_v29 = vpop.eup %11940  ;;  %v5918_v4 = vmul.f32 1.442695, %v5888_v2  ;;  %vm5381_vm7 = vcmp.eq.f32.partialorder %v5380_v13, 8.507059e+37  ;;  %vm17801_vm10 = vnez %v17800_v8  ;;  %v7429_v13 = vmul.f32 0.125, %v7411_v62 }
 0x673   : > { %v15443_v46 = vpop.xlane.xlu1 %6698  ;;  %17792 = vst [vmem:[#allocation36_spill] sm:$0xff] %v15445_v32  ;;  %v4560_v23 = vmul.f32 %v15457_v29, %v15417_v45  ;;  %v5369_v41 = vsel %vm5366_vm0, %v5368_v9, %v5364_v51  ;;  %v15501_v61 = vsel %vm17684_vm6, %v7428_v11, -1e+30  ;;  %v15506_v42 = vsel %vm17801_vm10, %v7426_v30, -1e+30 }
 0x674   : > { %17791 = vst [vmem:[#allocation68_spill] sm:$0xff] %v15443_v46  ;;  %v5384_v44 = vsel %vm5381_vm7, %v5383_v47, %v5379_v12  ;;  %v5370_v50 = vmul.f32 %v14595_v0, %v5369_v41  ;;  %vm4565_vm6 = vweird.f32 %v15457_v29  ;;  %v5395_v9 = vand.u32 2147483647, %v15175_v55  ;;  %vm17812_vm7 = vmmov %vm17806_vm8 }
 0x675   : > { %v4561_v19 = vsub.f32 1.0, %v4560_v23  ;;  %17799 = vst [vmem:[#allocation32_spill] sm:$0xff] %v15501_v61  ;;  %v15511_v53 = vpop.xlane.xlu2 %7450  ;;  %v5385_v14 = vmul.f32 %v17802_v37, %v5384_v44  ;;  %v4570_v12 = vand.u32 2147483648, %v15417_v45  ;;  %v15537_v47 = vsel %vm17633_vm13, %v7429_v13, -1e+30 }
 0x676   : > { %5948 = vadd.xlane.f32.xlu2 %v15451_v27  ;;  %v15508_v38 = vpop.eup %11942  ;;  %17803 = vst [vmem:[#allocation55_spill] sm:$0xff] %v15537_v47  ;;  %vm4564_vm4 = vweird.f32 %v15417_v45  ;;  %vm5391_vm5 = vweird.f32 %v15175_v55  ;;  %vm15593_vm11 = vcmp.eq.f32.partialorder %v5395_v9, 8.507059e+37 }
 0x677   : > { %6770 = vadd.xlane.f32.xlu0 %v15449_v39  ;;  %v5483_v5 = vpop.f32.mrf.mxu0  ;;  %v4562_v11 = vmul.f32 %v15457_v29, %v4561_v19  ;;  %v5387_v26 = vmul.f32 %v15508_v38, %v15175_v55  ;;  %v5422_v23 = vpack.c.bf16 %v5385_v14, %v5370_v50  ;;  %vm15549_vm13 = vmor %vm4564_vm4, %vm4565_vm6  ;;  %vm5392_vm15 = vweird.f32 %v15508_v38 }
 0x678   : > { %v5522_v35 = vpack.c.bf16 %v5483_v5, %v5483_v5  ;;  %vm15603_vm0 = vmor %vm5391_vm5, %vm5392_vm15  ;;  %vm5959_vm5 = vweird.f32 %v15422_v15 }
 0x679   : > { %v5388_v34 = vsub.f32 1.0, %v5387_v26 }
 0x67a   : > { %v15492_v6 = vpop.xlane.xlu0 %4347  ;;  %5538 = vst.msk [vmem:[#allocation3 + $0x10] sm:$0xf] %vm17798_vm14, %v5522_v35  ;;  %v4563_v35 = vadd.f32 %v15457_v29, %v4562_v11 }
 0x67b   : > { %v15490_v21 = vpop.xlane.xlu1 %6748  ;;  %11944 = vrcp.f32 %v15492_v6  ;;  %v4583_v37 = vand.u32 2147483647, %v15492_v6  ;;  %v5389_v26 = vmul.f32 %v15508_v38, %v5388_v34  ;;  %vm4579_vm9 = vweird.f32 %v15492_v6 }
 0x67c   : > { %11946 = vrcp.f32 %v15422_v15  ;;  %v4567_v14 = vsel %vm15549_vm13, %v15457_v29, %v4563_v35 }
 0x67d   : > { %11948 = vpow2.f32 %v5918_v4  ;;  %v4568_v4 = vand.u32 2147483647, %v15417_v45  ;;  %v4585_v45 = vand.u32 2147483648, %v15492_v6  ;;  %v15555_v50 = vpop.xlane.xlu2 %5928  ;;  %vm4584_vm2 = vcmp.eq.f32.partialorder %v4583_v37, 8.507059e+37  ;;  %v17807_v37 = vld [vmem:[#allocation64_spill] sm:$0xff] }
 0x67e   : > { %7474 = vmax.xlane.f32.xlu2 %v15501_v61  ;;  %v5390_v46 = vadd.f32 %v15508_v38, %v5389_v26 }
 0x67f   : > { %7470 = vmax.xlane.f32.xlu0 %v15506_v42  ;;  %vm4569_vm12 = vcmp.eq.f32.partialorder %v4568_v4, 8.507059e+37 }
 0x681   : > { %v15517_v25 = vpop.eup %11944  ;;  %5510 = vmatmul.bf16.gmra.mxu0 %v5422_v23 }
 0x682   : > { %v15521_v2 = vpop.xlane.xlu0 %5174  ;;  %v4575_v5 = vmul.f32 %v15517_v25, %v15492_v6  ;;  %v15526_v0 = vpop.eup %11946  ;;  %vm4580_vm3 = vweird.f32 %v15517_v25 }
 0x683   : > { %v7449_v3 = vpop.xlane.xlu1 %7448  ;;  %11950 = vrcp.f32 %v15521_v2  ;;  %v15531_v30 = vpop.eup %11948  ;;  %v5955_v8 = vmul.f32 %v15526_v0, %v15422_v15  ;;  %vm4581_vm1 = vmor %vm4579_vm9, %vm4580_vm3  ;;  %v5412_v26 = vand.u32 2147483648, %v15521_v2  ;;  %vm5406_vm10 = vweird.f32 %v15521_v2 }
 0x684   : > { %11952 = vrcp.f32 %v15455_v1  ;;  %v4576_v51 = vsub.f32 1.0, %v4575_v5  ;;  %v7479_v44 = vsub.f32 %v14870_v48, %v7449_v3  ;;  %v5397_v48 = vand.u32 2147483648, %v15175_v55 }
 0x685   : > { %11954 = vrcp.f32 %v15490_v21  ;;  %v5486_v19 = vpop.f32.mrf.mxu0  ;;  %v4571_v3 = vor.u32 1.1754944e-38, %v4570_v12  ;;  %v5956_v34 = vsub.f32 1.0, %v5955_v8  ;;  %v4586_v12 = vor.u32 1.1754944e-38, %v4585_v45  ;;  %v15608_v9 = vpop.xlane.xlu2 %5930 }
 0x686   : > { %v4577_v41 = vmul.f32 %v15517_v25, %v4576_v51  ;;  %v5523_v62 = vpack.c.bf16 %v5486_v19, %v5486_v19  ;;  %v7480_v8 = vsub.f32 %v14727_v22, %v15511_v53  ;;  %v5398_v53 = vor.u32 1.1754944e-38, %v5397_v48 }
 0x687   : > { %5950 = vadd.xlane.f32.xlu0 %v15531_v30  ;;  %v4572_v19 = vsel %vm4569_vm12, %v4571_v3, %v4567_v14  ;;  %v5394_v48 = vsel %vm15603_vm0, %v15508_v38, %v5390_v46  ;;  %vm5960_vm6 = vweird.f32 %v15526_v0  ;;  %v5413_v38 = vor.u32 1.1754944e-38, %v5412_v26  ;;  %vm17820_vm12 = vmmov %vm17812_vm7 }
 0x688   : > { %v4578_v11 = vadd.f32 %v15517_v25, %v4577_v41  ;;  %5539 = vst.msk [vmem:[#allocation3 + $0x1c] sm:$0xf] %vm17806_vm8, %v5523_v62  ;;  %v7496_v41 = vmul.f32 1.442695, %v7479_v44  ;;  %v15581_v62 = vpop.f32.mrf.mxu2  ;;  %v4573_v3 = vmul.f32 %v17807_v37, %v4572_v19  ;;  %vm15657_vm15 = vmor %vm5959_vm5, %vm5960_vm6  ;;  %vm6800_vm8 = vweird.f32 %v15455_v1 }
 0x689   : > { %v15563_v13 = vpop.eup %11950  ;;  %vm17828_vm5 = vmmov %vm17820_vm12 }
 0x68a   : > { %v7447_v5 = vpop.xlane.xlu0 %7446  ;;  %v15571_v51 = vpop.eup %11952  ;;  %v5402_v29 = vmul.f32 %v15563_v13, %v15521_v2  ;;  %v4582_v6 = vsel %vm4581_vm1, %v15517_v25, %v4578_v11  ;;  %vm5407_vm14 = vweird.f32 %v15563_v13 }
 0x68b   : > { %v15569_v23 = vpop.xlane.xlu1 %5926  ;;  %v7478_v35 = vsub.f32 %v14904_v63, %v7447_v5  ;;  %v15579_v16 = vpop.eup %11954  ;;  %v6796_v63 = vmul.f32 %v15571_v51, %v15455_v1  ;;  %v4587_v45 = vsel %vm4584_vm2, %v4586_v12, %v4582_v6  ;;  %v5410_v12 = vand.u32 2147483647, %v15521_v2  ;;  %vm15633_vm4 = vmor %vm5406_vm10, %vm5407_vm14 }
 0x68c   : > { %v5403_v4 = vsub.f32 1.0, %v5402_v29  ;;  %v4588_v5 = vmul.f32 %v14810_v58, %v4587_v45  ;;  %v6781_v11 = vmul.f32 %v15579_v16, %v15490_v21  ;;  %v5957_v58 = vmul.f32 %v15526_v0, %v5956_v34 }
 0x68d   : > { %v7494_v32 = vmul.f32 1.442695, %v7478_v35  ;;  %v5488_v14 = vpop.f32.mrf.mxu0  ;;  %v5963_v34 = vand.u32 2147483647, %v15422_v15  ;;  %v6797_v19 = vsub.f32 1.0, %v6796_v63  ;;  %v5965_v6 = vand.u32 2147483648, %v15422_v15 }
 0x68e   : > { %v5404_v44 = vmul.f32 %v15563_v13, %v5403_v4  ;;  %v5524_v22 = vpack.c.bf16 %v5488_v14, %v5488_v14  ;;  %v4596_v29 = vpack.c.bf16 %v4588_v5, %v4573_v3  ;;  %v7498_v4 = vmul.f32 1.442695, %v7480_v8 }
 0x68f   : > { %11956 = vpow2.f32 %v7494_v32  ;;  %7476 = vmax.xlane.f32.xlu0 %v15537_v47  ;;  %v6782_v45 = vsub.f32 1.0, %v6781_v11  ;;  %v5958_v14 = vadd.f32 %v15526_v0, %v5957_v58  ;;  %v5399_v63 = vsel %vm15593_vm11, %v5398_v53, %v5394_v48  ;;  %v17819_v32 = vld [vmem:[#allocation49_spill] sm:$0xff] }
 0x690   : > { %11958 = vpow2.f32 %v7496_v41  ;;  %v5405_v35 = vadd.f32 %v15563_v13, %v5404_v44  ;;  %5540 = vst.msk [vmem:[#allocation3 + $0x28] sm:$0xf] %vm17812_vm7, %v5524_v22  ;;  %4704 = vmatmul.bf16.gmra.mxu2 %v4596_v29  ;;  %vm5411_vm13 = vcmp.eq.f32.partialorder %v5410_v12, 8.507059e+37  ;;  %vm15647_vm3 = vcmp.eq.f32.partialorder %v5963_v34, 8.507059e+37  ;;  %v15652_v5 = vpop.f32.mrf.mxu2 }
 0x691   : > { %v6798_v3 = vmul.f32 %v15571_v51, %v6797_v19  ;;  %v5400_v53 = vmul.f32 %v17819_v32, %v5399_v63  ;;  %v5962_v29 = vsel %vm15657_vm15, %v15526_v0, %v5958_v14  ;;  %v6804_v48 = vand.u32 2147483647, %v15455_v1  ;;  %v15690_v63 = vpop.xlane.xlu2 %7456 }
 0x692   : > { %v15615_v55 = vpop.xlane.xlu0 %5924  ;;  %v5409_v2 = vsel %vm15633_vm4, %v15563_v13, %v5405_v35  ;;  %v6783_v13 = vmul.f32 %v15579_v16, %v6782_v45  ;;  %v5966_v35 = vor.u32 1.1754944e-38, %v5965_v6  ;;  %v6806_v34 = vand.u32 2147483648, %v15455_v1 }
 0x693   : > { %v15617_v41 = vpop.xlane.xlu1 %6754  ;;  %11960 = vrcp.f32 %v15615_v55  ;;  %v5414_v15 = vsel %vm5411_vm13, %v5413_v38, %v5409_v2  ;;  %v6799_v6 = vadd.f32 %v15571_v51, %v6798_v3  ;;  %vm6801_vm9 = vweird.f32 %v15571_v51 }
 0x694   : > { %11962 = vrcp.f32 %v15569_v23  ;;  %v5415_v58 = vmul.f32 %v14875_v7, %v5414_v15  ;;  %v6789_v45 = vand.u32 2147483647, %v15490_v21  ;;  %v5967_v46 = vsel %vm15647_vm3, %v5966_v35, %v5962_v29  ;;  %vm15703_vm2 = vmor %vm6800_vm8, %vm6801_vm9 }
 0x695   : > { %v15627_v44 = vpop.eup %11956  ;;  %11964 = vrcp.f32 %v15555_v50  ;;  %v5491_v25 = vpop.f32.mrf.mxu0  ;;  %v6784_v38 = vadd.f32 %v15579_v16, %v6783_v13  ;;  %vm6786_vm1 = vweird.f32 %v15579_v16  ;;  %v5980_v11 = vand.u32 2147483648, %v15615_v55 }
 0x696   : > { %v15639_v8 = vpop.eup %11958  ;;  %7526 = vadd.xlane.f32.xlu1 %v15627_v44  ;;  %11966 = vpow2.f32 %v7498_v4  ;;  %v5525_v22 = vpack.c.bf16 %v5491_v25, %v5491_v25  ;;  %v5423_v19 = vpack.c.bf16 %v5415_v58, %v5400_v53  ;;  %v6791_v25 = vand.u32 2147483648, %v15490_v21 }
 0x697   : > { %7528 = vadd.xlane.f32.xlu0 %v15639_v8  ;;  %11968 = vrcp.f32 %v15617_v41  ;;  %vm6785_vm11 = vweird.f32 %v15490_v21  ;;  %v5978_v32 = vand.u32 2147483647, %v15615_v55  ;;  %vm15724_vm7 = vcmp.eq.f32.partialorder %v6789_v45, 8.507059e+37  ;;  %v17831_v21 = vld [vmem:[#allocation56_spill] sm:$0xff] }
 0x698   : > { %5541 = vst.msk [vmem:[#allocation3 + $0x34] sm:$0xf] %vm17820_vm12, %v5525_v22  ;;  %5515 = vmatmul.bf16.gmra.mxu0 %v5423_v19  ;;  %vm15720_vm14 = vmor %vm6785_vm11, %vm6786_vm1  ;;  %v15728_v29 = vpop.f32.mrf.mxu2  ;;  %vm5974_vm10 = vweird.f32 %v15615_v55  ;;  %v6792_v45 = vor.u32 1.1754944e-38, %v6791_v25  ;;  %v6807_v25 = vor.u32 1.1754944e-38, %v6806_v34  ;;  %vm6805_vm13 = vcmp.eq.f32.partialorder %v6804_v48, 8.507059e+37 }
 0x699   : > { %v15664_v26 = vpop.eup %11960  ;;  %vm5979_vm4 = vcmp.eq.f32.partialorder %v5978_v32, 8.507059e+37  ;;  %v15750_v58 = vpop.xlane.xlu2 %6758  ;;  %vm6004_vm15 = vweird.f32 %v15555_v50  ;;  %vm5989_vm12 = vweird.f32 %v15569_v23 }
 0x69a   : > { %v15671_v12 = vpop.eup %11962  ;;  %v5970_v7 = vmul.f32 %v15664_v26, %v15615_v55  ;;  %v15678_v4 = vpop.xlane.xlu0 %6752  ;;  %vm5975_vm0 = vweird.f32 %v15664_v26 }
 0x69b   : > { %v7455_v0 = vpop.xlane.xlu1 %7454  ;;  %11970 = vrcp.f32 %v15678_v4  ;;  %v15684_v14 = vpop.eup %11964  ;;  %v5985_v15 = vmul.f32 %v15671_v12, %v15569_v23  ;;  %vm5976_vm6 = vmor %vm5974_vm10, %vm5975_vm0  ;;  %vm5990_vm3 = vweird.f32 %v15671_v12  ;;  %vm6815_vm0 = vweird.f32 %v15678_v4 }
 0x69c   : > { %v5971_v2 = vsub.f32 1.0, %v5970_v7  ;;  %v15692_v3 = vpop.eup %11966  ;;  %v7482_v37 = vsub.f32 %v14996_v60, %v7455_v0  ;;  %v6803_v60 = vsel %vm15703_vm2, %v15571_v51, %v6799_v6  ;;  %v6000_v1 = vmul.f32 %v15684_v14, %v15555_v50  ;;  %vm15783_vm9 = vmor %vm5989_vm12, %vm5990_vm3 }
 0x69d   : > { %17821 = vst [vmem:[#allocation33_spill] sm:$0xff] %v15692_v3  ;;  %v15711_v53 = vpop.eup %11968  ;;  %v5493_v7 = vpop.f32.mrf.mxu0  ;;  %v6788_v51 = vsel %vm15720_vm14, %v15579_v16, %v6784_v38  ;;  %vm6005_vm8 = vweird.f32 %v15684_v14 }
 0x69e   : > { %v5972_v22 = vmul.f32 %v15664_v26, %v5971_v2  ;;  %v7502_v35 = vmul.f32 1.442695, %v7482_v37  ;;  %v5526_v0 = vpack.c.bf16 %v5493_v7, %v5493_v7  ;;  %v5986_v2 = vsub.f32 1.0, %v5985_v15  ;;  %vm15798_vm2 = vmor %vm6004_vm15, %vm6005_vm8 }
 0x69f   : > { %7530 = vadd.xlane.f32.xlu0 %v15692_v3  ;;  %v5981_v37 = vor.u32 1.1754944e-38, %v5980_v11  ;;  %v6826_v16 = vmul.f32 %v15711_v53, %v15617_v41  ;;  %v6001_v15 = vsub.f32 1.0, %v6000_v1  ;;  %vm6831_vm11 = vweird.f32 %v15711_v53 }
 0x6a0   : > { %v5973_v19 = vadd.f32 %v15664_v26, %v5972_v22  ;;  %11972 = vpow2.f32 %v7502_v35  ;;  %5542 = vst.msk [vmem:[#allocation3 + $0x40] sm:$0xf] %vm17828_vm5, %v5526_v0  ;;  %v6793_v22 = vsel %vm15724_vm7, %v6792_v45, %v6788_v51  ;;  %v17829_v35 = vld [vmem:[#allocation54_spill] sm:$0xff]  ;;  %v5987_v3 = vmul.f32 %v15671_v12, %v5986_v2  ;;  %v17830_v0 = vld [vmem:[#allocation59_spill] sm:$0xff] }
 0x6a1   : > { %v15736_v6 = vpop.eup %11970  ;;  %v5968_v7 = vmul.f32 %v17829_v35, %v5967_v46  ;;  %v6794_v47 = vmul.f32 %v17830_v0, %v6793_v22  ;;  %v6827_v61 = vsub.f32 1.0, %v6826_v16  ;;  %v6002_v1 = vmul.f32 %v15684_v14, %v6001_v15  ;;  %v15765_v46 = vpop.f32.mrf.mxu2 }
 0x6a2   : > { %v5977_v13 = vsel %vm5976_vm6, %v15664_v26, %v5973_v19  ;;  %v6811_v38 = vmul.f32 %v15736_v6, %v15678_v4  ;;  %v15746_v55 = vpop.xlane.xlu0 %7452  ;;  %v6808_v19 = vsel %vm6805_vm13, %v6807_v25, %v6803_v60  ;;  %11974 = vrcp.f32 %v15750_v58 }
 0x6a3   : > { %v5982_v11 = vsel %vm5979_vm4, %v5981_v37, %v5977_v13  ;;  %v6809_v51 = vmul.f32 %v17831_v21, %v6808_v19  ;;  %11976 = vrcp.f32 %v15608_v9  ;;  %v5988_v60 = vadd.f32 %v15671_v12, %v5987_v3  ;;  %v15773_v16 = vpop.xlane.xlu1 %5934 }
 0x6a4   : > { %v5983_v26 = vmul.f32 %v14942_v49, %v5982_v11  ;;  %v6812_v32 = vsub.f32 1.0, %v6811_v38  ;;  %v6010_v49 = vand.u32 2147483648, %v15555_v50  ;;  %v5995_v2 = vand.u32 2147483648, %v15569_v23 }
 0x6a5   : > { %v6008_v37 = vand.u32 2147483647, %v15555_v50  ;;  %v6828_v13 = vmul.f32 %v15711_v53, %v6827_v61  ;;  %v7020_v38 = vpack.c.bf16 %v6809_v51, %v6794_v47  ;;  %v6003_v15 = vadd.f32 %v15684_v14, %v6002_v1  ;;  %v15810_v50 = vpop.xlane.xlu2 %7458 }
 0x6a6   : > { %v15756_v34 = vpop.eup %11972  ;;  %v6194_v48 = vpack.c.bf16 %v5983_v26, %v5968_v7  ;;  %v6813_v45 = vmul.f32 %v15736_v6, %v6812_v32  ;;  %v5993_v3 = vand.u32 2147483647, %v15569_v23  ;;  %v4711_v22 = vpack.c.bf16 %v15652_v5, %v15652_v5 }
 0x6a7   : > { %7534 = vadd.xlane.f32.xlu2 %v15756_v34  ;;  %vm6816_vm1 = vweird.f32 %v15736_v6  ;;  %v6011_v26 = vor.u32 1.1754944e-38, %v6010_v49  ;;  %v5996_v32 = vor.u32 1.1754944e-38, %v5995_v2  ;;  %v6821_v23 = vand.u32 2147483648, %v15678_v4 }
 0x6a8   : > { %6274 = vmatmul.bf16.vlgmr.msra.gmra.mxu2 %v6194_v48  ;;  %v6814_v61 = vadd.f32 %v15736_v6, %v6813_v45  ;;  %7084 = vmatmul.bf16.vlgmr.msrb.gmra.mxu0 %v7020_v38  ;;  %v15790_v47 = vpop.eup %11974  ;;  %v5992_v5 = vsel %vm15783_vm9, %v15671_v12, %v5988_v60  ;;  %v6829_v7 = vadd.f32 %v15711_v53, %v6828_v13  ;;  %v6819_v19 = vand.u32 2147483647, %v15678_v4  ;;  %vm15814_vm10 = vmor %vm6815_vm0, %vm6816_vm1 }
 0x6a9   : > { %v15806_v0 = vpop.eup %11976  ;;  %vm5994_vm14 = vcmp.eq.f32.partialorder %v5993_v3, 8.507059e+37  ;;  %vm6830_vm7 = vweird.f32 %v15617_v41  ;;  %v6836_v12 = vand.u32 2147483648, %v15617_v41  ;;  %v6007_v4 = vsel %vm15798_vm2, %v15684_v14, %v6003_v15  ;;  %v4680_v13 = vpop.f32.mrf.mxu2  ;;  %v17840_v3 = vld [vmem:[#allocation31_spill] sm:$0xff] }
 0x6aa   : > { %v15775_v25 = vpop.xlane.xlu0 %6756  ;;  %v6856_v48 = vmul.f32 %v15790_v47, %v15750_v58  ;;  %v6834_v21 = vand.u32 2147483647, %v15617_v41  ;;  %v5997_v51 = vsel %vm5994_vm14, %v5996_v32, %v5992_v5  ;;  %v6818_v49 = vsel %vm15814_vm10, %v15736_v6, %v6814_v61  ;;  %vm15832_vm4 = vmor %vm6830_vm7, %vm6831_vm11  ;;  %v17841_v5 = vld [vmem:[#allocation62_spill] sm:$0xff] }
 0x6ab   : > { %11978 = vrcp.f32 %v15775_v25  ;;  %v4710_v45 = vpack.c.bf16 %v15581_v62, %v15581_v62  ;;  %vm6009_vm6 = vcmp.eq.f32.partialorder %v6008_v37, 8.507059e+37  ;;  %v6822_v14 = vor.u32 1.1754944e-38, %v6821_v23  ;;  %v15849_v32 = vpop.xlane.xlu1 %6760 }
 0x6ac   : > { %v6015_v41 = vmul.f32 %v15806_v0, %v15608_v9  ;;  %vm6820_vm5 = vcmp.eq.f32.partialorder %v6819_v19, 8.507059e+37  ;;  %v6012_v6 = vsel %vm6009_vm6, %v6011_v26, %v6007_v4  ;;  %v6833_v62 = vsel %vm15832_vm4, %v15711_v53, %v6829_v7 }
 0x6ad   : > { %v6837_v37 = vor.u32 1.1754944e-38, %v6836_v12  ;;  %v6823_v11 = vsel %vm6820_vm5, %v6822_v14, %v6818_v49  ;;  %v6857_v61 = vsub.f32 1.0, %v6856_v48  ;;  %vm6835_vm13 = vcmp.eq.f32.partialorder %v6834_v21, 8.507059e+37  ;;  %v15854_v12 = vpop.xlane.xlu2 %5936 }
 0x6ae   : > { %v4714_v26 = vpack.c.bf16 %v4680_v13, %v4680_v13  ;;  %v6013_v35 = vmul.f32 %v17841_v5, %v6012_v6  ;;  %v6824_v7 = vmul.f32 %v14986_v54, %v6823_v11  ;;  %v6016_v19 = vsub.f32 1.0, %v6015_v41 }
 0x6af   : > { %4744 = vrot.lane.b32.xlu1 %v4711_v22, %s12291_s21  ;;  %v5998_v22 = vmul.f32 %v17840_v3, %v5997_v51  ;;  %v6838_v53 = vsel %vm6835_vm13, %v6837_v37, %v6833_v62  ;;  %v6858_v4 = vmul.f32 %v15790_v47, %v6857_v61  ;;  %vm6861_vm3 = vweird.f32 %v15790_v47 }
 0x6b0   : > { %v6839_v21 = vmul.f32 %v14954_v59, %v6838_v53  ;;  %vm6860_vm8 = vweird.f32 %v15750_v58  ;;  %v6866_v41 = vand.u32 2147483648, %v15750_v58  ;;  %v6851_v13 = vand.u32 2147483648, %v15775_v25 }
 0x6b1   : > { %v15836_v2 = vpop.eup %11978  ;;  %v6195_v1 = vpack.c.bf16 %v6013_v35, %v5998_v22  ;;  %v6859_v14 = vadd.f32 %v15790_v47, %v6858_v4  ;;  %v4712_v37 = vpack.c.bf16 %v15728_v29, %v15728_v29  ;;  %vm15882_vm12 = vmor %vm6860_vm8, %vm6861_vm3  ;;  %v6864_v3 = vand.u32 2147483647, %v15750_v58 }
 0x6b2   : > { %v15840_v38 = vpop.xlane.xlu0 %5932  ;;  %v6841_v15 = vmul.f32 %v15836_v2, %v15775_v25  ;;  %v7021_v54 = vpack.c.bf16 %v6839_v21, %v6824_v7  ;;  %vm6846_vm15 = vweird.f32 %v15836_v2  ;;  %vm6845_vm9 = vweird.f32 %v15775_v25 }
 0x6b3   : > { %4742 = vrot.lane.b32.xlu0 %v4710_v45, %s12291_s21  ;;  %11980 = vrcp.f32 %v15840_v38  ;;  %v6017_v45 = vmul.f32 %v15806_v0, %v6016_v19  ;;  %v6849_v22 = vand.u32 2147483647, %v15775_v25  ;;  %v15889_v11 = vpop.xlane.xlu1 %7460  ;;  %vm6020_vm1 = vweird.f32 %v15806_v0  ;;  %vm15895_vm2 = vmor %vm6845_vm9, %vm6846_vm15 }
 0x6b4   : > { %v6842_v23 = vsub.f32 1.0, %v6841_v15  ;;  %11982 = vrcp.f32 %v15849_v32  ;;  %vm6019_vm11 = vweird.f32 %v15608_v9  ;;  %v6025_v35 = vand.u32 2147483648, %v15608_v9 }
 0x6b5   : > { %11984 = vrcp.f32 %v15854_v12  ;;  %v6018_v61 = vadd.f32 %v15806_v0, %v6017_v45  ;;  %v6867_v53 = vor.u32 1.1754944e-38, %v6866_v41  ;;  %v6852_v19 = vor.u32 1.1754944e-38, %v6851_v13  ;;  %vm15921_vm0 = vmor %vm6019_vm11, %vm6020_vm1 }
 0x6b6   : > { %v6843_v48 = vmul.f32 %v15836_v2, %v6842_v23  ;;  %v6863_v23 = vsel %vm15882_vm12, %v15790_v47, %v6859_v14  ;;  %v6023_v47 = vand.u32 2147483647, %v15608_v9  ;;  %vm6865_vm14 = vcmp.eq.f32.partialorder %v6864_v3, 8.507059e+37  ;;  %v15941_v3 = vpop.f32.mrf.mxu2 }
 0x6b7   : > { %4750 = vrot.lane.b32.xlu1 %v4714_v26, %s12291_s21  ;;  %vm6850_vm7 = vcmp.eq.f32.partialorder %v6849_v22, 8.507059e+37  ;;  %v6022_v45 = vsel %vm15921_vm0, %v15806_v0, %v6018_v61  ;;  %v6868_v14 = vsel %vm6865_vm14, %v6867_v53, %v6863_v23  ;;  %v6040_v9 = vand.u32 2147483648, %v15840_v38  ;;  %v17848_v0 = vld [vmem:[#allocation61_spill] sm:$0xff]  ;;  %v17849_v61 = vld [vmem:[#allocation67_spill] sm:$0xff]  ;;  %v17852_v23 = vld [vmem:[#allocation58_spill] sm:$0xff] }
 0x6b8   : > { %6279 = vmatmul.bf16.gmra.mxu2 %v6195_v1  ;;  %v6844_v59 = vadd.f32 %v15836_v2, %v6843_v48  ;;  %7089 = vmatmul.bf16.gmra.mxu0 %v7021_v54  ;;  %v6026_v13 = vor.u32 1.1754944e-38, %v6025_v35  ;;  %v6038_v15 = vand.u32 2147483647, %v15840_v38  ;;  %vm6024_vm6 = vcmp.eq.f32.partialorder %v6023_v47, 8.507059e+37 }
 0x6b9   : > { %v15861_v51 = vpop.eup %11980  ;;  %vm6034_vm4 = vweird.f32 %v15840_v38  ;;  %v7481_v29 = vsub.f32 %v17849_v61, %v15746_v55  ;;  %v6869_v35 = vmul.f32 %v17852_v23, %v6868_v14  ;;  %vm17854_vm15 = vcmask 519168  }
 0x6ba   : > { %v15864_v49 = vpop.xlane.xlu0 %6762  ;;  %v6030_v60 = vmul.f32 %v15861_v51, %v15840_v38  ;;  %v15878_v62 = vpop.eup %11982  ;;  %v6848_v25 = vsel %vm15895_vm2, %v15836_v2, %v6844_v59  ;;  %vm6035_vm10 = vweird.f32 %v15861_v51  ;;  %vm6039_vm13 = vcmp.eq.f32.partialorder %v6038_v15, 8.507059e+37 }
 0x6bb   : > { %11986 = vrcp.f32 %v15864_v49  ;;  %v15899_v26 = vpop.eup %11984  ;;  %v6871_v7 = vmul.f32 %v15878_v62, %v15849_v32  ;;  %vm15947_vm5 = vmor %vm6034_vm4, %vm6035_vm10  ;;  %v15953_v2 = vpop.xlane.xlu1 %5940  ;;  %vm6876_vm12 = vweird.f32 %v15878_v62  ;;  %vm6890_vm9 = vweird.f32 %v15864_v49 }
 0x6bc   : > { %11988 = vrcp.f32 %v15773_v16  ;;  %v6031_v6 = vsub.f32 1.0, %v6030_v60  ;;  %v6060_v54 = vmul.f32 %v15899_v26, %v15854_v12  ;;  %v6853_v60 = vsel %vm6850_vm7, %v6852_v19, %v6848_v25 }
 0x6bd   : > { %v6854_v22 = vmul.f32 %v17848_v0, %v6853_v60  ;;  %v6027_v25 = vsel %vm6024_vm6, %v6026_v13, %v6022_v45  ;;  %v17853_v13 = vld [vmem:[#allocation70_spill] sm:$0xff]  ;;  %v6894_v61 = vand.u32 2147483647, %v15864_v49  ;;  %vm6064_vm1 = vweird.f32 %v15854_v12 }
 0x6be   : > { %v6032_v58 = vmul.f32 %v15861_v51, %v6031_v6  ;;  %v6061_v53 = vsub.f32 1.0, %v6060_v54  ;;  %v6028_v0 = vmul.f32 %v17853_v13, %v6027_v25  ;;  %vm6875_vm2 = vweird.f32 %v15849_v32 }
 0x6bf   : > { %4746 = vrot.lane.b32.xlu2 %v4712_v37, %s12291_s21  ;;  %v6872_v37 = vsub.f32 1.0, %v6871_v7  ;;  %v6041_v7 = vor.u32 1.1754944e-38, %v6040_v9  ;;  %v7022_v14 = vpack.c.bf16 %v6869_v35, %v6854_v22  ;;  %v6896_v22 = vand.u32 2147483648, %v15864_v49  ;;  %vm16004_vm14 = vmor %vm6875_vm2, %vm6876_vm12 }
 0x6c0   : > { %v6033_v59 = vadd.f32 %v15861_v51, %v6032_v58  ;;  %v6881_v58 = vand.u32 2147483648, %v15849_v32  ;;  %vm6065_vm0 = vweird.f32 %v15899_v26  ;;  %vm6895_vm7 = vcmp.eq.f32.partialorder %v6894_v61, 8.507059e+37 }
 0x6c1   : > { %v15910_v5 = vpop.eup %11986  ;;  %v15915_v1 = vpop.xlane.xlu2 %6764  ;;  %v6873_v55 = vmul.f32 %v15878_v62, %v6872_v37  ;;  %vm16021_vm10 = vmor %vm6064_vm1, %vm6065_vm0  ;;  %vm6049_vm6 = vweird.f32 %v15773_v16  ;;  %vm6094_vm2 = vweird.f32 %v15953_v2 }
 0x6c2   : > { %v15917_v4 = vpop.eup %11988  ;;  %v6886_v48 = vmul.f32 %v15910_v5, %v15864_v49  ;;  %v15928_v21 = vpop.xlane.xlu0 %5938  ;;  %v6037_v38 = vsel %vm15947_vm5, %v15861_v51, %v6033_v59  ;;  %v7500_v59 = vmul.f32 1.442695, %v7481_v29  ;;  %vm6891_vm3 = vweird.f32 %v15910_v5  ;;  %vm17861_vm5 = vmmov %vm17854_vm15 }
 0x6c3   : > { %v6045_v6 = vmul.f32 %v15917_v4, %v15773_v16  ;;  %11990 = vrcp.f32 %v15928_v21  ;;  %v6042_v54 = vsel %vm6039_vm13, %v6041_v7, %v6037_v38  ;;  %vm6050_vm8 = vweird.f32 %v15917_v4  ;;  %vm15980_vm11 = vmor %vm6890_vm9, %vm6891_vm3 }
 0x6c4   : > { %v6887_v41 = vsub.f32 1.0, %v6886_v48  ;;  %11992 = vrcp.f32 %v15953_v2  ;;  %v6043_v51 = vmul.f32 %v15123_v10, %v6042_v54  ;;  %v6874_v10 = vadd.f32 %v15878_v62, %v6873_v55  ;;  %vm16040_vm13 = vmor %vm6049_vm6, %vm6050_vm8 }
 0x6c5   : > { %v6046_v48 = vsub.f32 1.0, %v6045_v6  ;;  %v6062_v6 = vmul.f32 %v15899_v26, %v6061_v53  ;;  %11994 = vrcp.f32 %v15915_v1  ;;  %v6879_v49 = vand.u32 2147483647, %v15849_v32  ;;  %v15990_v53 = vpop.f32.mrf.mxu2  ;;  %vm17868_vm8 = vmmov %vm17861_vm5 }
 0x6c6   : > { %v6888_v19 = vmul.f32 %v15910_v5, %v6887_v41  ;;  %v6053_v41 = vand.u32 2147483647, %v15773_v16  ;;  %v6196_v29 = vpack.c.bf16 %v6043_v51, %v6028_v0  ;;  %v6070_v55 = vand.u32 2147483648, %v15854_v12 }
 0x6c7   : > { %v5496_v47 = vpop.f32.mrf.mxu0  ;;  %v6047_v15 = vmul.f32 %v15917_v4, %v6046_v48  ;;  %v6063_v35 = vadd.f32 %v15899_v26, %v6062_v6  ;;  %v6068_v48 = vand.u32 2147483647, %v15854_v12  ;;  %v6897_v54 = vor.u32 1.1754944e-38, %v6896_v22  ;;  %v17862_v22 = vld [vmem:[#allocation71_spill] sm:$0xff] }
 0x6c8   : > { %v5527_v45 = vpack.c.bf16 %v5496_v47, %v5496_v47  ;;  %v6889_v37 = vadd.f32 %v15910_v5, %v6888_v19  ;;  %7094 = vmatmul.bf16.gmra.mxu0 %v7022_v14  ;;  %6284 = vmatmul.bf16.gmra.mxu2 %v6196_v29  ;;  %v6878_v51 = vsel %vm16004_vm14, %v15878_v62, %v6874_v10  ;;  %v6055_v6 = vand.u32 2147483648, %v15773_v16  ;;  %vm17874_vm14 = vmmov %vm17861_vm5 }
 0x6c9   : > { %v15959_v60 = vpop.xlane.xlu2 %5942  ;;  %v15985_v23 = vpop.eup %11990  ;;  %v6048_v38 = vadd.f32 %v15917_v4, %v6047_v15  ;;  %vm6880_vm4 = vcmp.eq.f32.partialorder %v6879_v49, 8.507059e+37  ;;  %v6067_v12 = vsel %vm16021_vm10, %v15899_v26, %v6063_v35  ;;  %v7483_v10 = vsub.f32 %v17862_v22, %v15690_v63 }
 0x6ca   : > { %v7463_v9 = vpop.xlane.xlu0 %7462  ;;  %5543 = vst.msk [vmem:[#allocation3 + $0x4c] sm:$0xf] %vm17854_vm15, %v5527_v45  ;;  %v6893_v19 = vsel %vm15980_vm11, %v15910_v5, %v6889_v37  ;;  %v15995_v47 = vpop.eup %11992  ;;  %v6882_v37 = vor.u32 1.1754944e-38, %v6881_v58  ;;  %11996 = vpow2.f32 %v7500_v59  ;;  %v6071_v29 = vor.u32 1.1754944e-38, %v6070_v55  ;;  %v17865_v55 = vld [vmem:[#allocation46_spill] sm:$0xff] }
 0x6cb   : > { %v7486_v5 = vsub.f32 %v15285_v17, %v7463_v9  ;;  %v6075_v17 = vmul.f32 %v15985_v23, %v15928_v21  ;;  %v6898_v9 = vsel %vm6895_vm7, %v6897_v54, %v6893_v19  ;;  %v6090_v62 = vmul.f32 %v15995_v47, %v15953_v2  ;;  %v16034_v15 = vpop.eup %11994 }
 0x6cc   : > { %v6883_v58 = vsel %vm6880_vm4, %v6882_v37, %v6878_v51  ;;  %vm6069_vm3 = vcmp.eq.f32.partialorder %v6068_v48, 8.507059e+37  ;;  %v6052_v26 = vsel %vm16040_vm13, %v15917_v4, %v6048_v38  ;;  %v6899_v35 = vmul.f32 %v15117_v20, %v6898_v9  ;;  %v17866_v20 = vld [vmem:[#allocation75_spill] sm:$0xff]  ;;  %v17867_v38 = vld [vmem:[#allocation34_spill] sm:$0xff] }
 0x6cd   : > { %v7510_v25 = vmul.f32 1.442695, %v7486_v5  ;;  %vm6054_vm15 = vcmp.eq.f32.partialorder %v6053_v41, 8.507059e+37  ;;  %v6056_v63 = vor.u32 1.1754944e-38, %v6055_v6  ;;  %v6076_v59 = vsub.f32 1.0, %v6075_v17  ;;  %v16058_v41 = vpop.f32.mrf.mxu2 }
 0x6ce   : > { %v6072_v49 = vsel %vm6069_vm3, %v6071_v29, %v6067_v12  ;;  %v6901_v19 = vmul.f32 %v16034_v15, %v15915_v1  ;;  %11998 = vrcp.f32 %v15959_v60  ;;  %v6884_v45 = vmul.f32 %v17865_v55, %v6883_v58 }
 0x6cf   : > { %v5498_v7 = vpop.f32.mrf.mxu0  ;;  %v6057_v5 = vsel %vm6054_vm15, %v6056_v63, %v6052_v26  ;;  %v7484_v16 = vsub.f32 %v17866_v20, %v15810_v50  ;;  %12000 = vpow2.f32 %v7510_v25  ;;  %v7504_v37 = vmul.f32 1.442695, %v7483_v10 }
 0x6d0   : > { %v5528_v13 = vpack.c.bf16 %v5498_v7, %v5498_v7  ;;  %v6091_v7 = vsub.f32 1.0, %v6090_v62  ;;  %v7023_v51 = vpack.c.bf16 %v6899_v35, %v6884_v45  ;;  %v16063_v32 = vpop.eup %11996  ;;  %v6077_v17 = vmul.f32 %v15985_v23, %v6076_v59  ;;  %v17869_v62 = vld [vmem:[#allocation53_spill] sm:$0xff] }
 0x6d1   : > { %v16008_v14 = vpop.xlane.xlu2 %7466  ;;  %v6902_v50 = vsub.f32 1.0, %v6901_v19  ;;  %v6058_v12 = vmul.f32 %v17869_v62, %v6057_v5  ;;  %v7506_v61 = vmul.f32 1.442695, %v7484_v16  ;;  %vm6080_vm12 = vweird.f32 %v15985_v23 }
 0x6d2   : > { %v16011_v0 = vpop.xlane.xlu0 %7464  ;;  %5544 = vst.msk [vmem:[#allocation3 + $0x58] sm:$0xf] %vm17861_vm5, %v5528_v13  ;;  %v6073_v13 = vmul.f32 %v17867_v38, %v6072_v49  ;;  %v6092_v9 = vmul.f32 %v15995_v47, %v6091_v7  ;;  %v6078_v10 = vadd.f32 %v15985_v23, %v6077_v17  ;;  %v6085_v58 = vand.u32 2147483648, %v15928_v21 }
 0x6d3   : > { %vm6095_vm9 = vweird.f32 %v15995_v47  ;;  %v6100_v35 = vand.u32 2147483648, %v15953_v2  ;;  %v6903_v63 = vmul.f32 %v16034_v15, %v6902_v50  ;;  %vm6079_vm1 = vweird.f32 %v15928_v21 }
 0x6d4   : > { %v16071_v22 = vpop.eup %11998  ;;  %v6197_v29 = vpack.c.bf16 %v6073_v13, %v6058_v12  ;;  %v6093_v26 = vadd.f32 %v15995_v47, %v6092_v9  ;;  %v6083_v7 = vand.u32 2147483647, %v15928_v21  ;;  %v6098_v45 = vand.u32 2147483647, %v15953_v2  ;;  %vm16096_vm11 = vmor %vm6079_vm1, %vm6080_vm12 }
 0x6d5   : > { %v16077_v25 = vpop.eup %12000  ;;  %v6105_v19 = vmul.f32 %v16071_v22, %v15959_v60  ;;  %vm16106_vm0 = vmor %vm6094_vm2, %vm6095_vm9  ;;  %v6909_v16 = vand.u32 2147483647, %v15915_v1  ;;  %v6086_v2 = vor.u32 1.1754944e-38, %v6085_v58  ;;  %v6082_v38 = vsel %vm16096_vm11, %v15985_v23, %v6078_v10  ;;  %v16128_v23 = vpop.xlane.xlu1 %5946 }
 0x6d6   : > { %vm6906_vm7 = vweird.f32 %v16034_v15  ;;  %v6097_v9 = vsel %vm16106_vm0, %v15995_v47, %v6093_v26  ;;  %v6101_v62 = vor.u32 1.1754944e-38, %v6100_v35  ;;  %v6911_v12 = vand.u32 2147483648, %v15915_v1 }
 0x6d7   : > { %v5501_v48 = vpop.f32.mrf.mxu0  ;;  %vm6084_vm10 = vcmp.eq.f32.partialorder %v6083_v7, 8.507059e+37  ;;  %vm6099_vm6 = vcmp.eq.f32.partialorder %v6098_v45, 8.507059e+37  ;;  %vm6905_vm4 = vweird.f32 %v15915_v1  ;;  %vm16136_vm13 = vcmp.eq.f32.partialorder %v6909_v16, 8.507059e+37 }
 0x6d8   : > { %v5529_v54 = vpack.c.bf16 %v5501_v48, %v5501_v48  ;;  %7099 = vmatmul.bf16.gmra.mxu0 %v7023_v51  ;;  %6289 = vmatmul.bf16.gmra.mxu2 %v6197_v29  ;;  %v6904_v51 = vadd.f32 %v16034_v15, %v6903_v63  ;;  %v6087_v10 = vsel %vm6084_vm10, %v6086_v2, %v6082_v38  ;;  %vm16132_vm5 = vmor %vm6905_vm4, %vm6906_vm7  ;;  %v6912_v45 = vor.u32 1.1754944e-38, %v6911_v12 }
 0x6d9   : > { %v16054_v4 = vpop.xlane.xlu2 %6768  ;;  %v6102_v63 = vsel %vm6099_vm6, %v6101_v62, %v6097_v9  ;;  %vm6110_vm1 = vweird.f32 %v16071_v22  ;;  %vm6109_vm11 = vweird.f32 %v15959_v60  ;;  %vm17884_vm4 = vcmask 519168  }
 0x6da   : > { %v16061_v6 = vpop.xlane.xlu0 %6766  ;;  %5545 = vst.msk [vmem:[#allocation3 + $0x64] sm:$0xf] %vm17868_vm8, %v5529_v54  ;;  %vm6935_vm6 = vweird.f32 %v16054_v4 }
 0x6db   : > { %12002 = vrcp.f32 %v16061_v6  ;;  %v6926_v35 = vand.u32 2147483648, %v16061_v6  ;;  %v6924_v7 = vand.u32 2147483647, %v16061_v6  ;;  %vm6920_vm15 = vweird.f32 %v16061_v6 }
 0x6dc   : > { %12004 = vrcp.f32 %v16054_v4 }
 0x6dd   : > { %7532 = vadd.xlane.f32.xlu0 %v16063_v32  ;;  %12006 = vpow2.f32 %v7504_v37  ;;  %v16120_v37 = vpop.f32.mrf.mxu2  ;;  %vm6925_vm12 = vcmp.eq.f32.partialorder %v6924_v7, 8.507059e+37 }
 0x6de   : > { %12008 = vpow2.f32 %v7506_v61  ;;  %v6106_v61 = vsub.f32 1.0, %v6105_v19  ;;  %v6908_v19 = vsel %vm16132_vm5, %v16034_v15, %v6904_v51  ;;  %v6103_v15 = vmul.f32 %v15129_v56, %v6102_v63 }
 0x6df   : > { %v5503_v59 = vpop.f32.mrf.mxu0  ;;  %v6927_v51 = vor.u32 1.1754944e-38, %v6926_v35  ;;  %v4713_v56 = vpack.c.bf16 %v15765_v46, %v15765_v46 }
 0x6e0   : > { %v5530_v48 = vpack.c.bf16 %v5503_v59, %v5503_v59  ;;  %v6107_v54 = vmul.f32 %v16071_v22, %v6106_v61 }
 0x6e1   : > { %v16083_v49 = vpop.eup %12002  ;;  %7542 = vadd.xlane.f32.xlu1 %v16077_v25  ;;  %v16090_v55 = vpop.xlane.xlu2 %7468 }
 0x6e2   : > { %v6916_v21 = vmul.f32 %v16083_v49, %v16061_v6  ;;  %v16102_v5 = vpop.xlane.xlu0 %5944  ;;  %5546 = vst.msk [vmem:[#allocation3 + $0x70] sm:$0xf] %vm17874_vm14, %v5530_v48  ;;  %v16116_v13 = vpop.eup %12004  ;;  %vm6921_vm3 = vweird.f32 %v16083_v49  ;;  %vm16217_vm14 = vmor %vm6109_vm11, %vm6110_vm1 }
 0x6e3   : > { %12010 = vrcp.f32 %v16102_v5  ;;  %v16125_v50 = vpop.eup %12006  ;;  %v6931_v26 = vmul.f32 %v16116_v13, %v16054_v4  ;;  %vm6922_vm8 = vmor %vm6920_vm15, %vm6921_vm3  ;;  %v6130_v35 = vand.u32 2147483648, %v16102_v5  ;;  %vm6124_vm2 = vweird.f32 %v16102_v5 }
 0x6e4   : > { %v6917_v17 = vsub.f32 1.0, %v6916_v21  ;;  %v16143_v59 = vpop.eup %12008  ;;  %12012 = vrcp.f32 %v16128_v23  ;;  %v6088_v21 = vmul.f32 %v15230_v31, %v6087_v10  ;;  %v6913_v31 = vsel %vm16136_vm13, %v6912_v45, %v6908_v19  ;;  %vm17887_vm1 = vmmov %vm17884_vm4 }
 0x6e5   : > { %v6932_v38 = vsub.f32 1.0, %v6931_v26  ;;  %v16174_v12 = vpop.f32.mrf.mxu2  ;;  %v6108_v26 = vadd.f32 %v16071_v22, %v6107_v54  ;;  %v4717_v45 = vpack.c.bf16 %v16058_v41, %v16058_v41  ;;  %v6113_v54 = vand.u32 2147483647, %v15959_v60 }
 0x6e6   : > { %v6918_v29 = vmul.f32 %v16083_v49, %v6917_v17  ;;  %v6198_v9 = vpack.c.bf16 %v6103_v15, %v6088_v21  ;;  %v6115_v21 = vand.u32 2147483648, %v15959_v60  ;;  %v6941_v41 = vand.u32 2147483648, %v16054_v4 }
 0x6e7   : > { %v6933_v46 = vmul.f32 %v16116_v13, %v6932_v38  ;;  %vm6936_vm7 = vweird.f32 %v16116_v13  ;;  %vm6114_vm5 = vcmp.eq.f32.partialorder %v6113_v54, 8.507059e+37 }
 0x6e8   : > { %v6919_v1 = vadd.f32 %v16083_v49, %v6918_v29  ;;  %7536 = vadd.xlane.f32.xlu2 %v16125_v50  ;;  %v17879_v29 = vld [vmem:[#allocation39_spill] sm:$0xff]  ;;  %6294 = vmatmul.bf16.gmra.mxu2 %v6198_v9  ;;  %vm16231_vm13 = vmor %vm6935_vm6, %vm6936_vm7  ;;  %vm6139_vm7 = vweird.f32 %v16128_v23 }
 0x6e9   : > { %v16151_v48 = vpop.eup %12010  ;;  %v16157_v20 = vpop.xlane.xlu2 %5948  ;;  %v6914_v10 = vmul.f32 %v17879_v29, %v6913_v31  ;;  %v6939_v29 = vand.u32 2147483647, %v16054_v4  ;;  %vm17890_vm6 = vmmov %vm17887_vm1 }
 0x6ea   : > { %v6120_v16 = vmul.f32 %v16151_v48, %v16102_v5  ;;  %12014 = vrcp.f32 %v16157_v20  ;;  %v16164_v2 = vpop.xlane.xlu0 %6770  ;;  %v6923_v17 = vsel %vm6922_vm8, %v16083_v49, %v6919_v1  ;;  %vm6125_vm9 = vweird.f32 %v16151_v48  ;;  %v16180_v47 = vpop.eup %12012 }
 0x6eb   : > { %12016 = vrcp.f32 %v16164_v2  ;;  %v6928_v62 = vsel %vm6925_vm12, %v6927_v51, %v6923_v17  ;;  %v16184_v49 = vpop.xlane.xlu1 %7472  ;;  %vm16200_vm0 = vmor %vm6124_vm2, %vm6125_vm9  ;;  %v6131_v17 = vor.u32 1.1754944e-38, %v6130_v35  ;;  %vm6950_vm15 = vweird.f32 %v16164_v2 }
 0x6ec   : > { %v6121_v6 = vsub.f32 1.0, %v6120_v16  ;;  %v6929_v58 = vmul.f32 %v15375_v24, %v6928_v62  ;;  %v6128_v24 = vand.u32 2147483647, %v16102_v5  ;;  %v6135_v5 = vmul.f32 %v16180_v47, %v16128_v23 }
 0x6ed   : > { %vm6940_vm8 = vcmp.eq.f32.partialorder %v6939_v29, 8.507059e+37  ;;  %vm6140_vm11 = vweird.f32 %v16180_v47 }
 0x6ee   : > { %v6122_v61 = vmul.f32 %v16151_v48, %v6121_v6  ;;  %v7024_v7 = vpack.c.bf16 %v6929_v58, %v6914_v10  ;;  %v5506_v38 = vpop.f32.mrf.mxu0  ;;  %v6934_v6 = vadd.f32 %v16116_v13, %v6933_v46  ;;  %vm6129_vm10 = vcmp.eq.f32.partialorder %v6128_v24, 8.507059e+37  ;;  %v16235_v46 = vpop.f32.mrf.mxu2  ;;  %v11559_v58 = vld [vmem:[#allocation9 + $0x98] sm:$0xf0] }
 0x6ef   : > { %v6136_v16 = vsub.f32 1.0, %v6135_v5 }
 0x6f0   : > { %v16188_v63 = vpop.eup %12014  ;;  %v6123_v1 = vadd.f32 %v16151_v48, %v6122_v61  ;;  %7538 = vadd.xlane.f32.xlu2 %v16143_v59  ;;  %7104 = vmatmul.bf16.gmra.mxu0 %v7024_v7  ;;  %v6116_v61 = vor.u32 1.1754944e-38, %v6115_v21  ;;  %v6938_v4 = vsel %vm16231_vm13, %v16116_v13, %v6934_v6  ;;  %vm17893_vm13 = vmmov %vm17887_vm1 }
 0x6f1   : > { %v12017_v19 = vpop.eup %12016  ;;  %4748 = vrot.lane.b32.xlu0 %v4713_v56, %s12291_s21  ;;  %v5531_v56 = vpack.c.bf16 %v5506_v38, %v5506_v38  ;;  %v6150_v9 = vmul.f32 %v16188_v63, %v16157_v20  ;;  %vm6155_vm2 = vweird.f32 %v16188_v63 }
 0x6f2   : > { %v6946_v15 = vmul.f32 %v12017_v19, %v16164_v2  ;;  %v16210_v60 = vpop.xlane.xlu0 %7470  ;;  %v6127_v51 = vsel %vm16200_vm0, %v16151_v48, %v6123_v1  ;;  %v6112_v48 = vsel %vm16217_vm14, %v16071_v22, %v6108_v26  ;;  %vm6951_vm3 = vweird.f32 %v12017_v19 }
 0x6f3   : > { %5547 = vst.msk [vmem:[#allocation3 + $0x7c] sm:$0xf] %vm17884_vm4, %v5531_v56  ;;  %v6132_v10 = vsel %vm6129_vm10, %v6131_v17, %v6127_v51  ;;  %v6956_v1 = vand.u32 2147483648, %v16164_v2  ;;  %v6942_v22 = vor.u32 1.1754944e-38, %v6941_v41  ;;  %v6954_v26 = vand.u32 2147483647, %v16164_v2  ;;  %vm6952_vm12 = vmor %vm6950_vm15, %vm6951_vm3 }
 0x6f4   : > { %v6947_v62 = vsub.f32 1.0, %v6946_v15  ;;  %v6117_v24 = vsel %vm6114_vm5, %v6116_v61, %v6112_v48  ;;  %v6151_v7 = vsub.f32 1.0, %v6150_v9  ;;  %v6133_v21 = vmul.f32 %v15428_v18, %v6132_v10  ;;  %v16244_v15 = vpop.xlane.xlu1 %5952  ;;  %v10951_v56 = vld [vmem:[#allocation9 + $0xa8] sm:$0xf]  ;;  %v11562_v9 = vld [vmem:[#allocation9 + $0xb0] sm:$0xf0]  ;;  %vm6141_vm10 = vmor %vm6139_vm7, %vm6140_vm11 }
 0x6f5   : > { %v6957_v38 = vor.u32 1.1754944e-38, %v6956_v1  ;;  %v6118_v51 = vmul.f32 %v15271_v52, %v6117_v24  ;;  %v6943_v13 = vsel %vm6940_vm8, %v6942_v22, %v6938_v4  ;;  %vm6955_vm9 = vcmp.eq.f32.partialorder %v6954_v26, 8.507059e+37  ;;  %v10939_v10 = vld [vmem:[#allocation9 + $0x90] sm:$0xf]  ;;  %v11556_v22 = vld [vmem:[#allocation9 + $0x80] sm:$0xf0] }
 0x6f6   : > { %v6948_v35 = vmul.f32 %v12017_v19, %v6947_v62  ;;  %v5508_v41 = vpop.f32.mrf.mxu0  ;;  %v6152_v18 = vmul.f32 %v16188_v63, %v6151_v7  ;;  %v6944_v52 = vmul.f32 %v15371_v33, %v6943_v13  ;;  %v10952_v62 = vor.u32 %v11562_v9, %v10951_v56  ;;  %v16257_v61 = vpop.f32.mrf.mxu2 }
 0x6f7   : > { %v5532_v17 = vpack.c.bf16 %v5508_v41, %v5508_v41  ;;  %v6199_v2 = vpack.c.bf16 %v6133_v21, %v6118_v51  ;;  %v6160_v33 = vand.u32 2147483648, %v16157_v20  ;;  %vm6154_vm0 = vweird.f32 %v16157_v20 }
 0x6f8   : > { %v6949_v54 = vadd.f32 %v12017_v19, %v6948_v35  ;;  %8663 = vmatpush.bf16.msrb.mxu3 %v10952_v62  ;;  %v6153_v29 = vadd.f32 %v16188_v63, %v6152_v18  ;;  %v10927_v35 = vld [vmem:[#allocation9 + $0x78] sm:$0xf]  ;;  %v6158_v24 = vand.u32 2147483647, %v16157_v20  ;;  %v6145_v21 = vand.u32 2147483648, %v16128_v23  ;;  %vm16275_vm14 = vmor %vm6154_vm0, %vm6155_vm2 }
 0x6f9   : > { %5548 = vst.msk [vmem:[#allocation3 + $0x88] sm:$0xf] %vm17887_vm1, %v5532_v17  ;;  %6299 = vmatmul.bf16.gmra.mxu2 %v6199_v2  ;;  %v10928_v41 = vor.u32 %v11556_v22, %v10927_v35  ;;  %v6143_v20 = vand.u32 2147483647, %v16128_v23  ;;  %v4715_v23 = vpack.c.bf16 %v15941_v3, %v15941_v3  ;;  %v10915_v3 = vld [vmem:[#allocation9 + $0x60] sm:$0xf]  ;;  %vm17898_vm0 = vmmov %vm17890_vm6 }
 0x6fa   : > { %v16247_v31 = vpop.xlane.xlu0 %5950  ;;  %4756 = vrot.lane.b32.xlu1 %v4717_v45, %s12291_s21  ;;  %v6953_v6 = vsel %vm6952_vm12, %v12017_v19, %v6949_v54  ;;  %v6137_v19 = vmul.f32 %v16180_v47, %v6136_v16  ;;  %v6157_v13 = vsel %vm16275_vm14, %v16188_v63, %v6153_v29  ;;  %vm6159_vm4 = vcmp.eq.f32.partialorder %v6158_v24, 8.507059e+37  ;;  %v17891_v29 = vld [vmem:[#allocation76_spill] sm:$0xff]  ;;  %v10903_v22 = vld [vmem:[#allocation9 + $0x48] sm:$0xf] }
 0x6fb   : > { %12018 = vrcp.f32 %v16247_v31  ;;  %v6958_v5 = vsel %vm6955_vm9, %v6957_v38, %v6953_v6  ;;  %v6161_v6 = vor.u32 1.1754944e-38, %v6160_v33  ;;  %v6146_v2 = vor.u32 1.1754944e-38, %v6145_v21  ;;  %v17892_v33 = vld [vmem:[#allocation69_spill] sm:$0xff] }
 0x6fc   : > { %12020 = vrcp.f32 %v16244_v15  ;;  %v6959_v45 = vmul.f32 %v15449_v39, %v6958_v5  ;;  %v10940_v39 = vor.u32 %v11559_v58, %v10939_v10  ;;  %v6138_v26 = vadd.f32 %v16180_v47, %v6137_v19 }
 0x6fd   : > { %v6162_v5 = vsel %vm6159_vm4, %v6161_v6, %v6157_v13  ;;  %vm6144_vm5 = vcmp.eq.f32.partialorder %v6143_v20, 8.507059e+37  ;;  %v7485_v10 = vsub.f32 %v17891_v29, %v15889_v11  ;;  %v11547_v20 = vld [vmem:[#allocation9 + $0x38] sm:$0xf0]  ;;  %v6175_v13 = vand.u32 2147483648, %v16247_v31 }
 0x6fe   : > { %v7025_v48 = vpack.c.bf16 %v6959_v45, %v6944_v52  ;;  %v5511_v4 = vpop.f32.mrf.mxu0  ;;  %8664 = vmatpush.bf16.msrb.mxu3 %v10940_v39  ;;  %v6142_v18 = vsel %vm6141_vm10, %v16180_v47, %v6138_v26  ;;  %v16294_v63 = vpop.f32.mrf.mxu2  ;;  %v6163_v19 = vmul.f32 %v15451_v27, %v6162_v5  ;;  %v11550_v26 = vld [vmem:[#allocation9 + $0x50] sm:$0xf0]  ;;  %vm6169_vm8 = vweird.f32 %v16247_v31 }
 0x6ff   : > { %v5533_v38 = vpack.c.bf16 %v5511_v4, %v5511_v4  ;;  %v6147_v9 = vsel %vm6144_vm5, %v6146_v2, %v6142_v18  ;;  %v7508_v21 = vmul.f32 1.442695, %v7485_v10  ;;  %v10904_v16 = vor.u32 %v11550_v26, %v10903_v22  ;;  %v16325_v5 = vpop.xlane.xlu2 %7474 }
 0x700   : > { %7109 = vmatmul.bf16.gmra.mxu0 %v7025_v48  ;;  %v11553_v48 = vld [vmem:[#allocation9 + $0x68] sm:$0xf0]  ;;  %v6148_v39 = vmul.f32 %v17892_v33, %v6147_v9  ;;  %v6190_v2 = vand.u32 2147483648, %v16244_v15  ;;  %vm6184_vm9 = vweird.f32 %v16244_v15  ;;  %vm4790_vm7 = vcmask 1043968  }
 0x701   : > { %v16261_v1 = vpop.eup %12018  ;;  %5549 = vst.msk [vmem:[#allocation3 + $0x94] sm:$0xf] %vm17890_vm6, %v5533_v38  ;;  %v10916_v27 = vor.u32 %v11553_v48, %v10915_v3  ;;  %v11544_v3 = vld [vmem:[#allocation9 + $0x20] sm:$0xf0]  ;;  %v7488_v48 = vsub.f32 %v15324_v28, %v16008_v14  ;;  %v10867_v28 = vld [vmem:[#allocation9] sm:$0xf] }
 0x702   : > { %v16268_v7 = vpop.xlane.xlu0 %7476  ;;  %v16270_v54 = vpop.eup %12020  ;;  %v6165_v51 = vmul.f32 %v16261_v1, %v16247_v31  ;;  %8665 = vmatpush.bf16.msrb.mxu3 %v10928_v41  ;;  %v6200_v4 = vpack.c.bf16 %v6163_v19, %v6148_v39  ;;  %vm6170_vm3 = vweird.f32 %v16261_v1  ;;  %v10891_v41 = vld [vmem:[#allocation9 + $0x30] sm:$0xf]  ;;  %v10879_v19 = vld [vmem:[#allocation9 + $0x18] sm:$0xf]  ;;  %v11541_v14 = vld [vmem:[#allocation9 + $0x8] sm:$0xf0] }
 0x703   : > { %v6180_v17 = vmul.f32 %v16270_v54, %v16244_v15  ;;  %vm6185_vm15 = vweird.f32 %v16270_v54  ;;  %vm16329_vm12 = vmor %vm6169_vm8, %vm6170_vm3  ;;  %v10892_v9 = vor.u32 %v11547_v20, %v10891_v41  ;;  %v7514_v26 = vmul.f32 1.442695, %v7488_v48 }
 0x704   : > { %v6166_v56 = vsub.f32 1.0, %v6165_v51  ;;  %vm16345_vm1 = vmor %vm6184_vm9, %vm6185_vm15  ;;  %v7487_v48 = vsub.f32 %v15334_v40, %v16011_v0  ;;  %v7491_v40 = vsub.f32 %v15292_v36, %v16184_v49 }
 0x705   : > { %v6181_v45 = vsub.f32 1.0, %v6180_v17  ;;  %v6173_v17 = vand.u32 2147483647, %v16247_v31  ;;  %vm17903_vm3 = vmmov %vm17898_vm0 }
 0x706   : > { %v5513_v62 = vpop.f32.mrf.mxu0  ;;  %v6167_v35 = vmul.f32 %v16261_v1, %v6166_v56  ;;  %8666 = vmatpush.bf16.msrb.mxu3 %v10916_v27  ;;  %v16321_v18 = vpop.f32.mrf.mxu2  ;;  %vm17905_vm9 = vmmov %vm17898_vm0 }
 0x707   : > { %v5534_v58 = vpack.c.bf16 %v5513_v62, %v5513_v62  ;;  %v6182_v24 = vmul.f32 %v16270_v54, %v6181_v45  ;;  %vm6174_vm2 = vcmp.eq.f32.partialorder %v6173_v17, 8.507059e+37 }
 0x708   : > { %4752 = vrot.lane.b32.xlu2 %v4715_v23, %s12291_s21  ;;  %v6168_v11 = vadd.f32 %v16261_v1, %v6167_v35  ;;  %v6188_v23 = vand.u32 2147483647, %v16244_v15  ;;  %v6176_v15 = vor.u32 1.1754944e-38, %v6175_v13  ;;  %v10880_v35 = vor.u32 %v11544_v3, %v10879_v19 }
 0x709   : > { %v16297_v52 = vpop.xlane.xlu1 %7526  ;;  %5550 = vst.msk [vmem:[#allocation3 + $0xa0] sm:$0xf] %vm17893_vm13, %v5534_v58  ;;  %6304 = vmatmul.bf16.gmra.mxu2 %v6200_v4  ;;  %v6183_v6 = vadd.f32 %v16270_v54, %v6182_v24  ;;  %v6191_v58 = vor.u32 1.1754944e-38, %v6190_v2 }
 0x70a   : > { %12022 = vrcp.f32 %v16297_v52  ;;  %v16301_v47 = vpop.xlane.xlu0 %7528  ;;  %8667 = vmatpush.bf16.msrb.mxu3 %v10904_v16  ;;  %v6172_v62 = vsel %vm16329_vm12, %v16261_v1, %v6168_v11  ;;  %vm6189_vm11 = vcmp.eq.f32.partialorder %v6188_v23, 8.507059e+37  ;;  %v10868_v11 = vor.u32 %v11541_v14, %v10867_v28  ;;  %vm17904_vm12 = vmmov %vm17898_vm0 }
 0x70b   : > { %12024 = vrcp.f32 %v16301_v47  ;;  %v6187_v10 = vsel %vm16345_vm1, %v16270_v54, %v6183_v6  ;;  %v6177_v1 = vsel %vm6174_vm2, %v6176_v15, %v6172_v62  ;;  %v7490_v6 = vsub.f32 %v15506_v42, %v16210_v60  ;;  %vm17906_vm1 = vmmov %vm17898_vm0 }
 0x70c   : > { %12026 = vpow2.f32 %v7508_v21  ;;  %v6192_v24 = vsel %vm6189_vm11, %v6191_v58, %v6187_v10  ;;  %v6178_v21 = vmul.f32 %v15531_v30, %v6177_v1  ;;  %vm7563_vm6 = vweird.f32 %v16297_v52  ;;  %vm17907_vm2 = vmmov %vm17898_vm0 }
 0x70d   : > { %v6193_v13 = vmul.f32 %v15326_v43, %v6192_v24  ;;  %12028 = vpow2.f32 %v7514_v26  ;;  %v7518_v43 = vmul.f32 1.442695, %v7490_v6  ;;  %v7569_v42 = vand.u32 2147483648, %v16297_v52  ;;  %vm17908_vm11 = vmmov %vm17898_vm0 }
 0x70e   : > { %8668 = vmatpush.bf16.msrb.mxu3 %v10892_v9  ;;  %v7584_v60 = vand.u32 2147483648, %v16301_v47  ;;  %vm7578_vm5 = vweird.f32 %v16301_v47  ;;  %v7582_v62 = vand.u32 2147483647, %v16301_v47 }
 0x70f   : > { %v6201_v30 = vpack.c.bf16 %v6193_v13, %v6178_v21  ;;  %12030 = vpow2.f32 %v7518_v43  ;;  %v7570_v0 = vor.u32 1.1754944e-38, %v7569_v42 }
 0x710   : > { %v16310_v38 = vpop.eup %12022  ;;  %v7585_v58 = vor.u32 1.1754944e-38, %v7584_v60  ;;  %vm7583_vm8 = vcmp.eq.f32.partialorder %v7582_v62, 8.507059e+37 }
 0x711   : > { %v16314_v51 = vpop.eup %12024  ;;  %v7559_v31 = vmul.f32 %v16310_v38, %v16297_v52  ;;  %vm7564_vm14 = vweird.f32 %v16310_v38 }
 0x712   : > { %v7574_v45 = vmul.f32 %v16314_v51, %v16301_v47  ;;  %v16352_v22 = vpop.eup %12026  ;;  %8669 = vmatpush.bf16.msrb.mxu3 %v10880_v35  ;;  %v16365_v17 = vpop.xlane.xlu0 %7530  ;;  %vm7579_vm10 = vweird.f32 %v16314_v51  ;;  %vm16375_vm4 = vmor %vm7563_vm6, %vm7564_vm14 }
 0x713   : > { %v7560_v33 = vsub.f32 1.0, %v7559_v31  ;;  %v16354_v4 = vpop.f32.mrf.mxu2  ;;  %v16383_v3 = vpop.eup %12028  ;;  %vm16389_vm13 = vmor %vm7578_vm5, %vm7579_vm10  ;;  %vm7593_vm10 = vweird.f32 %v16365_v17 }
 0x714   : > { %v7575_v39 = vsub.f32 1.0, %v7574_v45  ;;  %v7567_v45 = vand.u32 2147483647, %v16297_v52  ;;  %vm17913_vm5 = vmmov %vm17898_vm0 }
 0x715   : > { %v5516_v27 = vpop.f32.mrf.mxu0  ;;  %v7561_v41 = vmul.f32 %v16310_v38, %v7560_v33  ;;  %v7520_v33 = vmul.f32 1.442695, %v7491_v40  ;;  %v16410_v26 = vpop.eup %12030 }
 0x716   : > { %v5535_v16 = vpack.c.bf16 %v5516_v27, %v5516_v27  ;;  %v7576_v20 = vmul.f32 %v16314_v51, %v7575_v39  ;;  %8670 = vmatpush.bf16.msrb.mxu3 %v10868_v11  ;;  %vm7568_vm15 = vcmp.eq.f32.partialorder %v7567_v45, 8.507059e+37  ;;  %v7489_v27 = vsub.f32 %v15341_v57, %v16090_v55 }
 0x717   : > { %v7562_v23 = vadd.f32 %v16310_v38, %v7561_v41  ;;  %v4719_v45 = vpack.c.bf16 %v16174_v12, %v16174_v12 }
 0x718   : > { %5551 = vst.msk [vmem:[#allocation3 + $0xac] sm:$0xf] %vm17898_vm0, %v5535_v16  ;;  %v7577_v2 = vadd.f32 %v16314_v51, %v7576_v20  ;;  %v7516_v41 = vmul.f32 1.442695, %v7489_v27 }
 0x719   : > { %6309 = vmatmul.bf16.gmra.mxu2 %v6201_v30  ;;  %v7566_v52 = vsel %vm16375_vm4, %v16310_v38, %v7562_v23  ;;  %v7512_v38 = vmul.f32 1.442695, %v7487_v48  ;;  %v4718_v48 = vpack.c.bf16 %v16120_v37, %v16120_v37 }
 0x71a   : > { %v16357_v54 = vpop.xlane.xlu2 %7534  ;;  %v7581_v47 = vsel %vm16389_vm13, %v16314_v51, %v7577_v2  ;;  %v7571_v51 = vsel %vm7568_vm15, %v7570_v0, %v7566_v52 }
 0x71b   : > { %7540 = vadd.xlane.f32.xlu0 %v16352_v22  ;;  %v16399_v10 = vpop.f32.mrf.mxu2  ;;  %v7586_v35 = vsel %vm7583_vm8, %v7585_v58, %v7581_v47  ;;  %v7572_v14 = vmul.f32 %v15627_v44, %v7571_v51  ;;  %12032 = vpow2.f32 %v7512_v38  ;;  %v4716_v44 = vpack.c.bf16 %v15990_v53, %v15990_v53 }
 0x71c   : > { %v7587_v36 = vmul.f32 %v15639_v8, %v7586_v35  ;;  %12034 = vpow2.f32 %v7520_v33  ;;  %v4720_v53 = vpack.c.bf16 %v16235_v46, %v16235_v46  ;;  %v17910_v33 = vld [vmem:[#allocation55_spill] sm:$0xff] }
 0x71d   : > { %v5518_v56 = vpop.f32.mrf.mxu0  ;;  %12036 = vpow2.f32 %v7516_v41 }
 0x71e   : > { %v5536_v19 = vpack.c.bf16 %v5518_v56, %v5518_v56  ;;  %v7798_v16 = vpack.c.bf16 %v7587_v36, %v7572_v14  ;;  %12038 = vrcp.f32 %v16365_v17  ;;  %v7597_v14 = vand.u32 2147483647, %v16365_v17 }
 0x720   : > { %5552 = vst.msk [vmem:[#allocation3 + $0xb8] sm:$0xf] %vm17903_vm3, %v5536_v19  ;;  %vm7598_vm13 = vcmp.eq.f32.partialorder %v7597_v14, 8.507059e+37  ;;  %v7629_v14 = vand.u32 2147483648, %v16357_v54 }
 0x721   : > { %v4745_v9 = vpop.permute.xlu1 %4744  ;;  %v16424_v57 = vpop.eup %12032 }
 0x722   : > { %4792 = vst.msk [vmem:[#allocation3 + $0xc] sm:$0xf] %vm4790_vm7, %v4745_v9  ;;  %v4747_v15 = vpop.permute.xlu2 %4746  ;;  %v16427_v13 = vpop.eup %12034 }
 0x723   : > { %4793 = vst.msk [vmem:[#allocation3 + $0x18] sm:$0xf] %vm4790_vm7, %v4747_v15  ;;  %v16436_v30 = vpop.eup %12036  ;;  %v17909_v15 = vld [vmem:[#allocation32_spill] sm:$0xff] }
 0x724   : > { %7546 = vadd.xlane.f32.xlu1 %v16383_v3  ;;  %v12039_v46 = vpop.eup %12038  ;;  %v7492_v52 = vsub.f32 %v17909_v15, %v16325_v5  ;;  %v7599_v5 = vand.u32 2147483648, %v16365_v17 }
 0x725   : > { %v4743_v1 = vpop.permute.xlu0 %4742  ;;  %v7085_v39 = vpop.f32.mrf.mxu0  ;;  %v7589_v62 = vmul.f32 %v12039_v46, %v16365_v17  ;;  %vm7594_vm14 = vweird.f32 %v12039_v46 }
 0x726   : > { %4791 = vst.msk [vmem:[#allocation3] sm:$0xf] %vm4790_vm7, %v4743_v1  ;;  %v7125_v49 = vpack.c.bf16 %v7085_v39, %v7085_v39  ;;  %v7522_v58 = vmul.f32 1.442695, %v7492_v52  ;;  %v7493_v39 = vsub.f32 %v17910_v33, %v16268_v7  ;;  %vm16466_vm6 = vmor %vm7593_vm10, %vm7594_vm14 }
 0x727   : > { %v7590_v19 = vsub.f32 1.0, %v7589_v62 }
 0x728   : > { %7141 = vst.msk [vmem:[#allocation3 + $0x8] sm:$0xf] %vm17904_vm12, %v7125_v49  ;;  %v7524_v17 = vmul.f32 1.442695, %v7493_v39  ;;  %vm17915_vm12 = vmmov %vm17898_vm0 }
 0x729   : > { %v4751_v28 = vpop.permute.xlu1 %4750  ;;  %v11517_v21 = vld [vmem:[#allocation3 + $0x8] sm:$0xf0]  ;;  %7878 = vmatmul.bf16.vlgmr.msrb.gmra.mxu2 %v7798_v16  ;;  %v7591_v12 = vmul.f32 %v12039_v46, %v7590_v19 }
 0x72a   : > { %4795 = vst.msk [vmem:[#allocation3 + $0x30] sm:$0xf] %vm4790_vm7, %v4751_v28 }
 0x72b   : > { %v16415_v24 = vpop.f32.mrf.mxu2  ;;  %v7592_v38 = vadd.f32 %v12039_v46, %v7591_v12 }
 0x72c   : > { %7550 = vadd.xlane.f32.xlu1 %v16410_v26 }
 0x72d   : > { %v10771_v8 = vld [vmem:[#allocation3] sm:$0xf]  ;;  %v7087_v55 = vpop.f32.mrf.mxu0 }
 0x72e   : > { %v16420_v11 = vor.u32 %v11517_v21, %v10771_v8  ;;  %v7126_v20 = vpack.c.bf16 %v7087_v55, %v7087_v55  ;;  %v7596_v8 = vsel %vm16466_vm6, %v12039_v46, %v7592_v38  ;;  %v7600_v55 = vor.u32 1.1754944e-38, %v7599_v5  ;;  %v17916_v38 = vld [vmem:[#allocation17_spill] sm:$0xff] }
 0x72f   : > { %4754 = vrot.lane.b32.xlu0 %v4716_v44, %s12291_s21 }
 0x730   : > { %8671 = vmatmul.bf16.vlgmr.msrb.gmra.mxu3 %v16420_v11  ;;  %7142 = vst.msk [vmem:[#allocation3 + $0x14] sm:$0xf] %vm17905_vm9, %v7126_v20 }
 0x731   : > { %7544 = vadd.xlane.f32.xlu2 %v16424_v57 }
 0x733   : > { %v16433_v6 = vpop.f32.mrf.mxu2 }
 0x734   : > { %7552 = vadd.xlane.f32.xlu1 %v16427_v13 }
 0x735   : > { %v7090_v23 = vpop.f32.mrf.mxu0 }
 0x736   : > { %v7127_v2 = vpack.c.bf16 %v7090_v23, %v7090_v23 }
 0x737   : > { %4762 = vrot.lane.b32.xlu0 %v4720_v53, %s12291_s21 }
 0x738   : > { %7143 = vst.msk [vmem:[#allocation3 + $0x20] sm:$0xf] %vm17906_vm1, %v7127_v2  ;;  %v7601_v2 = vsel %vm7598_vm13, %v7600_v55, %v7596_v8  ;;  %v17920_v8 = vld [vmem:[#allocation65_spill] sm:$0xff] }
 0x739   : > { %7548 = vadd.xlane.f32.xlu2 %v16436_v30 }
 0x73b   : > { %v16440_v43 = vpop.f32.mrf.mxu2 }
 0x73d   : > { %v7092_v42 = vpop.f32.mrf.mxu0 }
 0x73e   : > { %v7128_v60 = vpack.c.bf16 %v7092_v42, %v7092_v42 }
 0x740   : > { %7144 = vst.msk [vmem:[#allocation3 + $0x2c] sm:$0xf] %vm17907_vm2, %v7128_v60  ;;  %vm7623_vm2 = vweird.f32 %v16357_v54 }
 0x743   : > { %v16444_v56 = vpop.f32.mrf.mxu2 }
 0x745   : > { %v7095_v9 = vpop.f32.mrf.mxu0 }
 0x746   : > { %v7129_v31 = vpack.c.bf16 %v7095_v9, %v7095_v9 }
 0x748   : > { %7145 = vst.msk [vmem:[#allocation3 + $0x38] sm:$0xf] %vm17908_vm11, %v7129_v31 }
 0x74b   : > { %v16457_v0 = vpop.f32.mrf.mxu2 }
 0x74d   : > { %4760 = vrot.lane.b32.xlu1 %v4719_v45, %s12291_s21  ;;  %v7097_v47 = vpop.f32.mrf.mxu0  ;;  %v17914_v45 = vld [vmem:[#allocation33_spill] sm:$0xff] }
 0x74e   : > { %v7130_v40 = vpack.c.bf16 %v7097_v47, %v7097_v47  ;;  %v7602_v62 = vmul.f32 %v17914_v45, %v7601_v2  ;;  %v10783_v2 = vld [vmem:[#allocation3 + $0x18] sm:$0xf] }
 0x750   : > { %v7533_v29 = vpop.xlane.xlu0 %7532  ;;  %7146 = vst.msk [vmem:[#allocation3 + $0x44] sm:$0xf] %vm17898_vm0, %v7130_v40 }
 0x751   : > { %12040 = vrcp.f32 %v7533_v29  ;;  %4758 = vrot.lane.b32.xlu2 %v4718_v48, %s12291_s21  ;;  %v7614_v27 = vand.u32 2147483648, %v7533_v29  ;;  %v7612_v7 = vand.u32 2147483647, %v7533_v29  ;;  %vm7608_vm3 = vweird.f32 %v7533_v29 }
 0x752   : > { %12042 = vrcp.f32 %v16357_v54 }
 0x753   : > { %12044 = vpow2.f32 %v7522_v58  ;;  %v16471_v44 = vpop.f32.mrf.mxu2  ;;  %v7615_v23 = vor.u32 1.1754944e-38, %v7614_v27  ;;  %vm7613_vm8 = vcmp.eq.f32.partialorder %v7612_v7, 8.507059e+37 }
 0x754   : > { %v16486_v47 = vpop.xlane.xlu1 %7542 }
 0x755   : > { %v7100_v35 = vpop.f32.mrf.mxu0 }
 0x756   : > { %v7131_v49 = vpack.c.bf16 %v7100_v35, %v7100_v35 }
 0x757   : > { %v12041_v1 = vpop.eup %12040 }
 0x758   : > { %v7604_v37 = vmul.f32 %v12041_v1, %v7533_v29  ;;  %v16460_v51 = vpop.eup %12042  ;;  %vm7609_vm4 = vweird.f32 %v12041_v1  ;;  %7147 = vst.msk [vmem:[#allocation3 + $0x50] sm:$0xf] %vm17913_vm5, %v7131_v49  ;;  %v7627_v49 = vand.u32 2147483647, %v16357_v54 }
 0x759   : > { %v7619_v21 = vmul.f32 %v16460_v51, %v16357_v54  ;;  %v16478_v53 = vpop.eup %12044  ;;  %vm7610_vm15 = vmor %vm7608_vm3, %vm7609_vm4  ;;  %vm7624_vm9 = vweird.f32 %v16460_v51 }
 0x75a   : > { %v7605_v36 = vsub.f32 1.0, %v7604_v37  ;;  %vm16501_vm11 = vmor %vm7623_vm2, %vm7624_vm9  ;;  %vm7628_vm6 = vcmp.eq.f32.partialorder %v7627_v49, 8.507059e+37 }
 0x75b   : > { %v7537_v41 = vpop.xlane.xlu2 %7536  ;;  %v7620_v42 = vsub.f32 1.0, %v7619_v21  ;;  %v16483_v29 = vpop.f32.mrf.mxu2  ;;  %v17921_v21 = vld [vmem:[#allocation44_spill] sm:$0xff]  ;;  %vm17924_vm4 = vmmov %vm17913_vm5 }
 0x75c   : > { %v7606_v16 = vmul.f32 %v12041_v1, %v7605_v36  ;;  %12046 = vrcp.f32 %v7537_v41  ;;  %v7644_v5 = vand.u32 2147483648, %v7537_v41  ;;  %v7642_v28 = vand.u32 2147483647, %v7537_v41  ;;  %vm17927_vm5 = vmmov %vm17924_vm4 }
 0x75d   : > { %v7102_v46 = vpop.f32.mrf.mxu0  ;;  %12048 = vpow2.f32 %v7524_v17  ;;  %v7621_v52 = vmul.f32 %v16460_v51, %v7620_v42  ;;  %vm7638_vm0 = vweird.f32 %v7537_v41  ;;  %v4721_v36 = vpack.c.bf16 %v16257_v61, %v16257_v61  ;;  %vm17928_vm13 = vmmov %vm17924_vm4 }
 0x75e   : > { %v7607_v20 = vadd.f32 %v12041_v1, %v7606_v16  ;;  %v7132_v31 = vpack.c.bf16 %v7102_v46, %v7102_v46  ;;  %v6712_v16 = vsub.f32 %v17921_v21, %v17920_v8  ;;  %v7645_v55 = vor.u32 1.1754944e-38, %v7644_v5  ;;  %vm17929_vm3 = vmmov %vm17924_vm4 }
 0x75f   : > { %v7622_v33 = vadd.f32 %v16460_v51, %v7621_v52  ;;  %vm7643_vm10 = vcmp.eq.f32.partialorder %v7642_v28, 8.507059e+37  ;;  %v7630_v46 = vor.u32 1.1754944e-38, %v7629_v14  ;;  %v4722_v61 = vpack.c.bf16 %v16294_v63, %v16294_v63 }
 0x760   : > { %v7611_v60 = vsel %vm7610_vm15, %v12041_v1, %v7607_v20  ;;  %7148 = vst.msk [vmem:[#allocation3 + $0x5c] sm:$0xf] %vm17915_vm12, %v7132_v31  ;;  %v6740_v31 = vmul.f32 1.442695, %v6712_v16 }
 0x761   : > { %7554 = vadd.xlane.f32.xlu0 %v16478_v53  ;;  %v7616_v9 = vsel %vm7613_vm8, %v7615_v23, %v7611_v60  ;;  %v7626_v60 = vsel %vm16501_vm11, %v16460_v51, %v7622_v33 }
 0x762   : > { %v7617_v19 = vmul.f32 %v16063_v32, %v7616_v9  ;;  %v12047_v48 = vpop.eup %12046  ;;  %v17917_v32 = vld [vmem:[#allocation57_spill] sm:$0xff] }
 0x763   : > { %v4749_v15 = vpop.permute.xlu0 %4748  ;;  %v7634_v40 = vmul.f32 %v12047_v48, %v7537_v41  ;;  %v16489_v12 = vpop.xlane.xlu2 %7538  ;;  %v6713_v37 = vsub.f32 %v17917_v32, %v17916_v38  ;;  %vm7639_vm1 = vweird.f32 %v12047_v48  ;;  %v17925_v38 = vld [vmem:[#allocation36_spill] sm:$0xff] }
 0x764   : > { %v7799_v58 = vpack.c.bf16 %v7617_v19, %v7602_v62  ;;  %4794 = vst.msk [vmem:[#allocation3 + $0x24] sm:$0xf] %vm4790_vm7, %v4749_v15  ;;  %v16495_v35 = vpop.eup %12048  ;;  %vm7640_vm14 = vmor %vm7638_vm0, %vm7639_vm1  ;;  %v16508_v17 = vpop.f32.mrf.mxu2  ;;  %v7631_v62 = vsel %vm7628_vm6, %v7630_v46, %v7626_v60  ;;  %v17922_v19 = vld [vmem:[#allocation68_spill] sm:$0xff]  ;;  %v17923_v15 = vld [vmem:[#allocation43_spill] sm:$0xff]  ;;  %v4725_v60 = vpack.c.bf16 %v16399_v10, %v16399_v10  ;;  %v4724_v10 = vpack.c.bf16 %v16354_v4, %v16354_v4 }
 0x765   : > { %v7635_v1 = vsub.f32 1.0, %v7634_v40  ;;  %v6742_v7 = vmul.f32 1.442695, %v6713_v37  ;;  %v6715_v52 = vsub.f32 %v17923_v15, %v17922_v19  ;;  %v7632_v40 = vmul.f32 %v15756_v34, %v7631_v62  ;;  %v17926_v32 = vld [vmem:[#allocation52_spill] sm:$0xff] }
 0x766   : > { %7883 = vmatmul.bf16.gmra.mxu2 %v7799_v58  ;;  %v6714_v37 = vsub.f32 %v17926_v32, %v17925_v38  ;;  %vm7653_vm8 = vweird.f32 %v16489_v12 }
 0x767   : > { %v7636_v39 = vmul.f32 %v12047_v48, %v7635_v1  ;;  %12050 = vpow2.f32 %v6742_v7  ;;  %v6746_v1 = vmul.f32 1.442695, %v6715_v52 }
 0x768   : > { %12052 = vpow2.f32 %v6740_v31  ;;  %v6315_v31 = vpack.c.bf16 %v16415_v24, %v16415_v24  ;;  %v4723_v24 = vpack.c.bf16 %v16321_v18, %v16321_v18 }
 0x769   : > { %7556 = vadd.xlane.f32.xlu0 %v16495_v35  ;;  %v7637_v27 = vadd.f32 %v12047_v48, %v7636_v39  ;;  %12054 = vpow2.f32 %v6746_v1 }
 0x76b   : > { %v4753_v20 = vpop.permute.xlu2 %4752  ;;  %v11520_v42 = vld [vmem:[#allocation3 + $0x20] sm:$0xf0]  ;;  %v7641_v54 = vsel %vm7640_vm14, %v12047_v48, %v7637_v27  ;;  %v10795_v27 = vld [vmem:[#allocation3 + $0x30] sm:$0xf] }
 0x76c   : > { %v4757_v23 = vpop.permute.xlu1 %4756  ;;  %4796 = vst.msk [vmem:[#allocation3 + $0x3c] sm:$0xf] %vm4790_vm7, %v4753_v20  ;;  %v16514_v41 = vor.u32 %v11520_v42, %v10783_v2  ;;  %v7646_v9 = vsel %vm7643_vm10, %v7645_v55, %v7641_v54  ;;  %v16523_v58 = vpop.f32.mrf.mxu2  ;;  %vm7683_vm10 = vweird.f32 %v16486_v47 }
 0x76d   : > { %4798 = vst.msk [vmem:[#allocation3 + $0x54] sm:$0xf] %vm4790_vm7, %v4757_v23  ;;  %v7105_v45 = vpop.f32.mrf.mxu0  ;;  %v7647_v48 = vmul.f32 %v16125_v50, %v7646_v9  ;;  %v16527_v33 = vpop.eup %12050  ;;  %v6744_v50 = vmul.f32 1.442695, %v6714_v37  ;;  %v6316_v37 = vpack.c.bf16 %v16433_v6, %v16433_v6 }
 0x76e   : > { %8676 = vmatmul.bf16.gmra.mxu3 %v16514_v41  ;;  %v7133_v51 = vpack.c.bf16 %v7105_v45, %v7105_v45  ;;  %v16530_v14 = vpop.eup %12052 }
 0x76f   : > { %v7800_v5 = vpack.c.bf16 %v7647_v48, %v7632_v40  ;;  %12056 = vpow2.f32 %v6744_v50  ;;  %v16541_v21 = vpop.eup %12054  ;;  %v7657_v40 = vand.u32 2147483647, %v16489_v12 }
 0x770   : > { %7149 = vst.msk [vmem:[#allocation3 + $0x68] sm:$0xf] %vm17924_vm4, %v7133_v51  ;;  %12058 = vrcp.f32 %v16489_v12  ;;  %v7659_v51 = vand.u32 2147483648, %v16489_v12 }
 0x771   : > { %vm7658_vm2 = vcmp.eq.f32.partialorder %v7657_v40, 8.507059e+37 }
 0x773   : > { %v11523_v34 = vld [vmem:[#allocation3 + $0x38] sm:$0xf0] }
 0x774   : > { %v16535_v49 = vpop.f32.mrf.mxu2  ;;  %v16539_v8 = vor.u32 %v11523_v34, %v10795_v27 }
 0x775   : > { %v7107_v39 = vpop.f32.mrf.mxu0  ;;  %v16545_v55 = vpop.eup %12056 }
 0x776   : > { %7888 = vmatmul.bf16.gmra.mxu2 %v7800_v5  ;;  %v7134_v28 = vpack.c.bf16 %v7107_v39, %v7107_v39  ;;  %v12059_v2 = vpop.eup %12058  ;;  %v7660_v39 = vor.u32 1.1754944e-38, %v7659_v51 }
 0x777   : > { %6774 = vadd.xlane.f32.xlu1 %v16527_v33  ;;  %v7649_v54 = vmul.f32 %v12059_v2, %v16489_v12  ;;  %vm7654_vm15 = vweird.f32 %v12059_v2 }
 0x778   : > { %7150 = vst.msk [vmem:[#allocation3 + $0x74] sm:$0xf] %vm17927_vm5, %v7134_v28  ;;  %vm16576_vm12 = vmor %vm7653_vm8, %vm7654_vm15 }
 0x779   : > { %v7650_v9 = vsub.f32 1.0, %v7649_v54 }
 0x77a   : > { %6772 = vadd.xlane.f32.xlu2 %v16530_v14 }
 0x77b   : > { %v7651_v45 = vmul.f32 %v12059_v2, %v7650_v9 }
 0x77c   : > { %v16551_v20 = vpop.f32.mrf.mxu2 }
 0x77d   : > { %4764 = vrot.lane.b32.xlu0 %v4721_v36, %s12291_s21  ;;  %v7110_v16 = vpop.f32.mrf.mxu0  ;;  %v7652_v52 = vadd.f32 %v12059_v2, %v7651_v45  ;;  %v11526_v45 = vld [vmem:[#allocation3 + $0x50] sm:$0xf0] }
 0x77e   : > { %8681 = vmatmul.bf16.gmra.mxu3 %v16539_v8  ;;  %v7135_v7 = vpack.c.bf16 %v7110_v16, %v7110_v16 }
 0x77f   : > { %6778 = vadd.xlane.f32.xlu1 %v16541_v21  ;;  %v7656_v18 = vsel %vm16576_vm12, %v12059_v2, %v7652_v52  ;;  %v6317_v2 = vpack.c.bf16 %v16440_v43, %v16440_v43 }
 0x780   : > { %7151 = vst.msk [vmem:[#allocation3 + $0x80] sm:$0xf] %vm17928_vm13, %v7135_v7  ;;  %v7661_v34 = vsel %vm7658_vm2, %v7660_v39, %v7656_v18 }
 0x782   : > { %6776 = vadd.xlane.f32.xlu2 %v16545_v55 }
 0x784   : > { %v16559_v46 = vpop.f32.mrf.mxu2 }
 0x785   : > { %4766 = vrot.lane.b32.xlu0 %v4722_v61, %s12291_s21  ;;  %v7112_v23 = vpop.f32.mrf.mxu0  ;;  %v7662_v61 = vmul.f32 %v16143_v59, %v7661_v34 }
 0x786   : > { %v7136_v42 = vpack.c.bf16 %v7112_v23, %v7112_v23 }
 0x788   : > { %7152 = vst.msk [vmem:[#allocation3 + $0x8c] sm:$0xf] %vm17929_vm3, %v7136_v42 }
 0x78c   : > { %v16564_v62 = vpop.f32.mrf.mxu2 }
 0x78d   : > { %4772 = vrot.lane.b32.xlu0 %v4725_v60, %s12291_s21 }
 0x78e   : > { %v7541_v63 = vpop.xlane.xlu0 %7540 }
 0x78f   : > { %12060 = vrcp.f32 %v7541_v63  ;;  %v7674_v1 = vand.u32 2147483648, %v7541_v63  ;;  %v7672_v32 = vand.u32 2147483647, %v7541_v63  ;;  %vm7668_vm1 = vweird.f32 %v7541_v63 }
 0x790   : > { %12062 = vrcp.f32 %v16486_v47 }
 0x791   : > { %v7675_v28 = vor.u32 1.1754944e-38, %v7674_v1  ;;  %vm7673_vm0 = vcmp.eq.f32.partialorder %v7672_v32, 8.507059e+37  ;;  %v7687_v1 = vand.u32 2147483647, %v16486_v47 }
 0x793   : > { %vm7688_vm5 = vcmp.eq.f32.partialorder %v7687_v1, 8.507059e+37 }
 0x794   : > { %v16582_v5 = vpop.f32.mrf.mxu2 }
 0x795   : > { %v12061_v19 = vpop.eup %12060  ;;  %6347 = vrot.lane.b32.xlu0 %v6315_v31, %s12291_s21 }
 0x796   : > { %v7664_v15 = vmul.f32 %v12061_v19, %v7541_v63  ;;  %vm7669_vm9 = vweird.f32 %v12061_v19  ;;  %v16587_v50 = vpop.eup %12062 }
 0x797   : > { %vm7670_vm11 = vmor %vm7668_vm1, %vm7669_vm9  ;;  %v16590_v36 = vpop.xlane.xlu1 %7546  ;;  %v7679_v16 = vmul.f32 %v16587_v50, %v16486_v47  ;;  %vm7684_vm14 = vweird.f32 %v16587_v50 }
 0x798   : > { %v7665_v48 = vsub.f32 1.0, %v7664_v15  ;;  %4770 = vrot.lane.b32.xlu1 %v4724_v10, %s12291_s21  ;;  %vm16621_vm6 = vmor %vm7683_vm10, %vm7684_vm14  ;;  %vm7713_vm2 = vweird.f32 %v16590_v36 }
 0x799   : > { %v7680_v54 = vsub.f32 1.0, %v7679_v16 }
 0x79a   : > { %v7666_v38 = vmul.f32 %v12061_v19, %v7665_v48  ;;  %4768 = vrot.lane.b32.xlu2 %v4723_v24, %s12291_s21  ;;  %v7689_v24 = vand.u32 2147483648, %v16486_v47 }
 0x79b   : > { %v7681_v9 = vmul.f32 %v16587_v50, %v7680_v54 }
 0x79c   : > { %v7667_v12 = vadd.f32 %v12061_v19, %v7666_v38  ;;  %v16599_v42 = vpop.f32.mrf.mxu2 }
 0x79d   : > { %6349 = vrot.lane.b32.xlu0 %v6316_v37, %s12291_s21  ;;  %v7682_v15 = vadd.f32 %v16587_v50, %v7681_v9 }
 0x79e   : > { %v7671_v6 = vsel %vm7670_vm11, %v12061_v19, %v7667_v12  ;;  %v7690_v12 = vor.u32 1.1754944e-38, %v7689_v24  ;;  %v6318_v24 = vpack.c.bf16 %v16444_v56, %v16444_v56  ;;  %v7717_v56 = vand.u32 2147483647, %v16590_v36 }
 0x79f   : > { %v7676_v27 = vsel %vm7673_vm0, %v7675_v28, %v7671_v6  ;;  %v16604_v59 = vpop.xlane.xlu1 %7550  ;;  %v7686_v32 = vsel %vm16621_vm6, %v16587_v50, %v7682_v15 }
 0x7a0   : > { %v7677_v23 = vmul.f32 %v16352_v22, %v7676_v27  ;;  %vm7718_vm14 = vcmp.eq.f32.partialorder %v7717_v56, 8.507059e+37 }
 0x7a1   : > { %v4755_v7 = vpop.permute.xlu0 %4754 }
 0x7a2   : > { %4797 = vst.msk [vmem:[#allocation3 + $0x48] sm:$0xf] %vm4790_vm7, %v4755_v7  ;;  %v7801_v60 = vpack.c.bf16 %v7677_v23, %v7662_v61  ;;  %v7691_v7 = vsel %vm7688_vm5, %v7690_v12, %v7686_v32 }
 0x7a4   : > { %v7545_v63 = vpop.xlane.xlu2 %7544  ;;  %7893 = vmatmul.bf16.gmra.mxu2 %v7801_v60  ;;  %v16609_v19 = vpop.f32.mrf.mxu2 }
 0x7a5   : > { %6351 = vrot.lane.b32.xlu0 %v6317_v2, %s12291_s21  ;;  %12064 = vrcp.f32 %v7545_v63  ;;  %v7704_v38 = vand.u32 2147483648, %v7545_v63  ;;  %v7702_v39 = vand.u32 2147483647, %v7545_v63  ;;  %vm7698_vm13 = vweird.f32 %v7545_v63 }
 0x7a6   : > { %12066 = vrcp.f32 %v16590_v36 }
 0x7a7   : > { %v16631_v34 = vpop.xlane.xlu1 %7552  ;;  %v7705_v27 = vor.u32 1.1754944e-38, %v7704_v38  ;;  %vm7703_vm15 = vcmp.eq.f32.partialorder %v7702_v39, 8.507059e+37  ;;  %v7719_v38 = vand.u32 2147483648, %v16590_v36 }
 0x7a9   : > { %v4763_v22 = vpop.permute.xlu0 %4762  ;;  %v10807_v31 = vld [vmem:[#allocation3 + $0x48] sm:$0xf] }
 0x7aa   : > { %4801 = vst.msk [vmem:[#allocation3 + $0x78] sm:$0xf] %vm4790_vm7, %v4763_v22  ;;  %v16607_v43 = vor.u32 %v11526_v45, %v10807_v31 }
 0x7ab   : > { %v12065_v10 = vpop.eup %12064 }
 0x7ac   : > { %8686 = vmatmul.bf16.gmra.mxu3 %v16607_v43  ;;  %v7694_v52 = vmul.f32 %v12065_v10, %v7545_v63  ;;  %v16614_v51 = vpop.xlane.xlu2 %7548  ;;  %v16616_v48 = vpop.eup %12066  ;;  %vm7699_vm4 = vweird.f32 %v12065_v10  ;;  %v7692_v63 = vmul.f32 %v16077_v25, %v7691_v7 }
 0x7ad   : > { %12068 = vrcp.f32 %v16614_v51  ;;  %v7709_v37 = vmul.f32 %v16616_v48, %v16590_v36  ;;  %v7879_v6 = vpop.f32.mrf.mxu2  ;;  %vm7700_vm3 = vmor %vm7698_vm13, %vm7699_vm4  ;;  %v7734_v40 = vand.u32 2147483648, %v16614_v51  ;;  %vm7714_vm12 = vweird.f32 %v16616_v48 }
 0x7ae   : > { %v7695_v4 = vsub.f32 1.0, %v7694_v52  ;;  %v7919_v16 = vpack.c.bf16 %v7879_v6, %v7879_v6  ;;  %12070 = vrcp.f32 %v16631_v34  ;;  %vm7728_vm9 = vweird.f32 %v16614_v51  ;;  %vm7715_vm11 = vmor %vm7713_vm2, %vm7714_vm12 }
 0x7af   : > { %v7710_v61 = vsub.f32 1.0, %v7709_v37  ;;  %12072 = vrcp.f32 %v16604_v59  ;;  %v7732_v1 = vand.u32 2147483647, %v16614_v51  ;;  %v7735_v39 = vor.u32 1.1754944e-38, %v7734_v40 }
 0x7b0   : > { %v7696_v18 = vmul.f32 %v12065_v10, %v7695_v4  ;;  %7951 = vrot.lane.b32.xlu2 %v7919_v16, %s12291_s21  ;;  %v7720_v6 = vor.u32 1.1754944e-38, %v7719_v38  ;;  %v6319_v16 = vpack.c.bf16 %v16457_v0, %v16457_v0  ;;  %v11561_v0 = vld [vmem:[#allocation9 + $0xac] sm:$0xf]  ;;  %vm7758_vm4 = vweird.f32 %v16631_v34 }
 0x7b1   : > { %v7711_v22 = vmul.f32 %v16616_v48, %v7710_v61  ;;  %vm7733_vm0 = vcmp.eq.f32.partialorder %v7732_v1, 8.507059e+37  ;;  %v7749_v40 = vand.u32 2147483648, %v16604_v59  ;;  %vm7743_vm13 = vweird.f32 %v16604_v59 }
 0x7b2   : > { %v7697_v28 = vadd.f32 %v12065_v10, %v7696_v18 }
 0x7b3   : > { %v12069_v47 = vpop.eup %12068  ;;  %v7750_v32 = vor.u32 1.1754944e-38, %v7749_v40  ;;  %v11035_v40 = vld [vmem:[#allocation9 + $0x150] sm:$0xf] }
 0x7b4   : > { %v7724_v50 = vmul.f32 %v12069_v47, %v16614_v51  ;;  %v4759_v23 = vpop.permute.xlu2 %4758  ;;  %v7701_v2 = vsel %vm7700_vm3, %v12065_v10, %v7697_v28  ;;  %vm7729_vm8 = vweird.f32 %v12069_v47  ;;  %v16641_v52 = vpop.eup %12070 }
 0x7b5   : > { %4799 = vst.msk [vmem:[#allocation3 + $0x60] sm:$0xf] %vm4790_vm7, %v4759_v23  ;;  %v7706_v60 = vsel %vm7703_vm15, %v7705_v27, %v7701_v2  ;;  %v7881_v10 = vpop.f32.mrf.mxu2  ;;  %v16650_v4 = vpop.eup %12072  ;;  %vm16653_vm1 = vmor %vm7728_vm9, %vm7729_vm8  ;;  %v7754_v37 = vmul.f32 %v16641_v52, %v16631_v34  ;;  %vm7759_vm10 = vweird.f32 %v16641_v52 }
 0x7b6   : > { %v7725_v54 = vsub.f32 1.0, %v7724_v50  ;;  %v7707_v9 = vmul.f32 %v16424_v57, %v7706_v60  ;;  %v7920_v25 = vpack.c.bf16 %v7881_v10, %v7881_v10  ;;  %v7712_v57 = vadd.f32 %v16616_v48, %v7711_v22  ;;  %v11558_v22 = vld [vmem:[#allocation9 + $0x94] sm:$0xf]  ;;  %vm7760_vm5 = vmor %vm7758_vm4, %vm7759_vm10 }
 0x7b7   : > { %v7739_v12 = vmul.f32 %v16650_v4, %v16604_v59  ;;  %v7755_v36 = vsub.f32 1.0, %v7754_v37  ;;  %vm7744_vm6 = vweird.f32 %v16650_v4  ;;  %v7762_v10 = vand.u32 2147483647, %v16631_v34 }
 0x7b8   : > { %v7726_v31 = vmul.f32 %v12069_v47, %v7725_v54  ;;  %v7802_v45 = vpack.c.bf16 %v7707_v9, %v7692_v63  ;;  %6353 = vrot.lane.b32.xlu2 %v6318_v24, %s12291_s21  ;;  %7953 = vrot.lane.b32.xlu1 %v7920_v25, %s12291_s21  ;;  %v7716_v28 = vsel %vm7715_vm11, %v16616_v48, %v7712_v57  ;;  %v10953_v9 = vld [vmem:[#allocation9 + $0xb4] sm:$0xf0]  ;;  %v7747_v25 = vand.u32 2147483647, %v16604_v59  ;;  %vm7745_vm3 = vmor %vm7743_vm13, %vm7744_vm6  ;;  %v10929_v59 = vld [vmem:[#allocation9 + $0x84] sm:$0xf0] }
 0x7b9   : > { %v7721_v7 = vsel %vm7718_vm14, %v7720_v6, %v7716_v28  ;;  %v7740_v61 = vsub.f32 1.0, %v7739_v12  ;;  %v7756_v50 = vmul.f32 %v16641_v52, %v7755_v36  ;;  %vm7763_vm15 = vcmp.eq.f32.partialorder %v7762_v10, 8.507059e+37  ;;  %v10917_v36 = vld [vmem:[#allocation9 + $0x6c] sm:$0xf0]  ;;  %v11047_v10 = vld [vmem:[#allocation9 + $0x168] sm:$0xf] }
 0x7ba   : > { %v7727_v15 = vadd.f32 %v12069_v47, %v7726_v31  ;;  %7898 = vmatmul.bf16.gmra.mxu2 %v7802_v45  ;;  %v7722_v23 = vmul.f32 %v16383_v3, %v7721_v7  ;;  %v10956_v31 = vor.u32 %v11561_v0, %v10953_v9  ;;  %v10941_v45 = vld [vmem:[#allocation9 + $0x9c] sm:$0xf0]  ;;  %v7764_v3 = vand.u32 2147483648, %v16631_v34 }
 0x7bb   : > { %v7741_v54 = vmul.f32 %v16650_v4, %v7740_v61  ;;  %v10944_v24 = vor.u32 %v11558_v22, %v10941_v45  ;;  %vm7748_vm8 = vcmp.eq.f32.partialorder %v7747_v25, 8.507059e+37  ;;  %v11543_v22 = vld [vmem:[#allocation9 + $0x1c] sm:$0xf] }
 0x7bc   : > { %v7731_v18 = vsel %vm16653_vm1, %v12069_v47, %v7727_v15  ;;  %v10819_v2 = vld [vmem:[#allocation3 + $0x60] sm:$0xf]  ;;  %8810 = vmatpush.bf16.msra.mxu2 %v10956_v31  ;;  %v7765_v1 = vor.u32 1.1754944e-38, %v7764_v3  ;;  %v11583_v25 = vld [vmem:[#allocation9 + $0x158] sm:$0xf0] }
 0x7bd   : > { %v7736_v27 = vsel %vm7733_vm0, %v7735_v39, %v7731_v18  ;;  %v7742_v15 = vadd.f32 %v16650_v4, %v7741_v54  ;;  %v11555_v39 = vld [vmem:[#allocation9 + $0x7c] sm:$0xf]  ;;  %v11546_v54 = vld [vmem:[#allocation9 + $0x34] sm:$0xf] }
 0x7be   : > { %v7737_v47 = vmul.f32 %v16436_v30, %v7736_v27  ;;  %v7757_v30 = vadd.f32 %v16641_v52, %v7756_v50 }
 0x7bf   : > { %v4761_v51 = vpop.permute.xlu1 %4760  ;;  %v7746_v38 = vsel %vm7745_vm3, %v16650_v4, %v7742_v15  ;;  %v11552_v4 = vld [vmem:[#allocation9 + $0x64] sm:$0xf] }
 0x7c0   : > { %4800 = vst.msk [vmem:[#allocation3 + $0x6c] sm:$0xf] %vm4790_vm7, %v4761_v51  ;;  %6355 = vrot.lane.b32.xlu2 %v6319_v16, %s12291_s21  ;;  %v7803_v63 = vpack.c.bf16 %v7737_v47, %v7722_v23  ;;  %v7761_v57 = vsel %vm7760_vm5, %v16641_v52, %v7757_v30  ;;  %8811 = vmatpush.bf16.msra.mxu2 %v10944_v24  ;;  %v11549_v47 = vld [vmem:[#allocation9 + $0x4c] sm:$0xf]  ;;  %v10881_v30 = vld [vmem:[#allocation9 + $0x24] sm:$0xf0] }
 0x7c1   : > { %v7766_v56 = vsel %vm7763_vm15, %v7765_v1, %v7761_v57  ;;  %v7751_v37 = vsel %vm7748_vm8, %v7750_v32, %v7746_v38  ;;  %v10932_v52 = vor.u32 %v11555_v39, %v10929_v59  ;;  %v10920_v7 = vor.u32 %v11552_v4, %v10917_v36  ;;  %v11586_v24 = vld [vmem:[#allocation9 + $0x170] sm:$0xf0] }
 0x7c2   : > { %v7767_v51 = vmul.f32 %v16427_v13, %v7766_v56  ;;  %v7752_v18 = vmul.f32 %v16410_v26, %v7751_v37  ;;  %v10905_v13 = vld [vmem:[#allocation9 + $0x54] sm:$0xf0]  ;;  %v10884_v38 = vor.u32 %v11543_v22, %v10881_v30  ;;  %v11048_v32 = vor.u32 %v11586_v24, %v11047_v10  ;;  %v11540_v37 = vld [vmem:[#allocation9 + $0x4] sm:$0xf]  ;;  %v11610_v22 = vld [vmem:[#allocation9 + $0x230] sm:$0xf0] }
 0x7c3   : > { %v10908_v50 = vor.u32 %v11549_v47, %v10905_v13  ;;  %v11011_v30 = vld [vmem:[#allocation9 + $0x120] sm:$0xf] }
 0x7c4   : > { %v7804_v12 = vpack.c.bf16 %v7767_v51, %v7752_v18  ;;  %8812 = vmatpush.bf16.msra.mxu2 %v10932_v52  ;;  %v10869_v51 = vld [vmem:[#allocation9 + $0xc] sm:$0xf0]  ;;  %8712 = vmatpush.bf16.msra.mxu0 %v11048_v32  ;;  %v10831_v32 = vld [vmem:[#allocation3 + $0x78] sm:$0xf] }
 0x7c5   : > { %v10872_v4 = vor.u32 %v11540_v37, %v10869_v51 }
 0x7c7   : > { %v11529_v60 = vld [vmem:[#allocation3 + $0x68] sm:$0xf0] }
 0x7c8   : > { %v16675_v48 = vor.u32 %v11529_v60, %v10819_v2  ;;  %8813 = vmatpush.bf16.msra.mxu2 %v10920_v7 }
 0x7ca   : > { %8691 = vmatmul.bf16.gmra.mxu3 %v16675_v48  ;;  %7903 = vmatmul.bf16.gmra.mxu2 %v7803_v63  ;;  %v10893_v63 = vld [vmem:[#allocation9 + $0x3c] sm:$0xf0] }
 0x7cb   : > { %v10896_v9 = vor.u32 %v11546_v54, %v10893_v63  ;;  %v11585_v63 = vld [vmem:[#allocation9 + $0x16c] sm:$0xf] }
 0x7cc   : > { %8814 = vmatpush.bf16.msra.mxu2 %v10908_v50 }
 0x7d0   : > { %8815 = vmatpush.bf16.msra.mxu2 %v10896_v9  ;;  %v11143_v9 = vld [vmem:[#allocation9 + $0x228] sm:$0xf] }
 0x7d4   : > { %v7555_v34 = vpop.xlane.xlu0 %7554  ;;  %8816 = vmatpush.bf16.msra.mxu2 %v10884_v38 }
 0x7d5   : > { %12074 = vrcp.f32 %v7555_v34  ;;  %v7777_v2 = vand.u32 2147483647, %v7555_v34  ;;  %vm7773_vm9 = vweird.f32 %v7555_v34  ;;  %v7779_v0 = vand.u32 2147483648, %v7555_v34 }
 0x7d7   : > { %vm7778_vm11 = vcmp.eq.f32.partialorder %v7777_v2, 8.507059e+37  ;;  %v7780_v56 = vor.u32 1.1754944e-38, %v7779_v0  ;;  %v6320_v2 = vpack.c.bf16 %v16471_v44, %v16471_v44  ;;  %v11049_v0 = vld [vmem:[#allocation9 + $0x174] sm:$0xf0] }
 0x7d8   : > { %8817 = vmatpush.bf16.msra.mxu2 %v10872_v4  ;;  %v11052_v44 = vor.u32 %v11585_v63, %v11049_v0  ;;  %v11571_v0 = vld [vmem:[#allocation9 + $0xf8] sm:$0xf0] }
 0x7da   : > { %7908 = vmatmul.bf16.gmra.mxu2 %v7804_v12  ;;  %v11036_v12 = vor.u32 %v11583_v25, %v11035_v40  ;;  %v11582_v40 = vld [vmem:[#allocation9 + $0x154] sm:$0xf]  ;;  %v11037_v25 = vld [vmem:[#allocation9 + $0x15c] sm:$0xf0]  ;;  %8859 = vmatpush.bf16.msra.mxu3 %v11052_v44 }
 0x7db   : > { %v12075_v28 = vpop.eup %12074 }
 0x7dc   : > { %v7769_v6 = vmul.f32 %v12075_v28, %v7555_v34  ;;  %v7557_v27 = vpop.xlane.xlu0 %7556  ;;  %vm7774_vm12 = vweird.f32 %v12075_v28  ;;  %8713 = vmatpush.bf16.msra.mxu0 %v11036_v12 }
 0x7dd   : > { %12076 = vrcp.f32 %v7557_v27  ;;  %vm16693_vm1 = vmor %vm7773_vm9, %vm7774_vm12  ;;  %v7792_v3 = vand.u32 2147483647, %v7557_v27  ;;  %v7794_v15 = vand.u32 2147483648, %v7557_v27  ;;  %vm7788_vm0 = vweird.f32 %v7557_v27 }
 0x7de   : > { %v7770_v16 = vsub.f32 1.0, %v7769_v6 }
 0x7df   : > { %v7795_v52 = vor.u32 1.1754944e-38, %v7794_v15  ;;  %vm7793_vm10 = vcmp.eq.f32.partialorder %v7792_v3, 8.507059e+37  ;;  %v11577_v3 = vld [vmem:[#allocation9 + $0x128] sm:$0xf0] }
 0x7e0   : > { %v7771_v61 = vmul.f32 %v12075_v28, %v7770_v16  ;;  %v11012_v24 = vor.u32 %v11577_v3, %v11011_v30  ;;  %v11013_v30 = vld [vmem:[#allocation9 + $0x12c] sm:$0xf0] }
 0x7e2   : > { %v7772_v23 = vadd.f32 %v12075_v28, %v7771_v61 }
 0x7e3   : > { %v12077_v26 = vpop.eup %12076 }
 0x7e4   : > { %v7784_v60 = vmul.f32 %v12077_v26, %v7557_v27  ;;  %vm7789_vm2 = vweird.f32 %v12077_v26  ;;  %v7776_v1 = vsel %vm16693_vm1, %v12075_v28, %v7772_v23  ;;  %v11580_v23 = vld [vmem:[#allocation9 + $0x140] sm:$0xf0] }
 0x7e5   : > { %vm7790_vm14 = vmor %vm7788_vm0, %vm7789_vm2  ;;  %v7781_v28 = vsel %vm7778_vm11, %v7780_v56, %v7776_v1 }
 0x7e6   : > { %v7785_v45 = vsub.f32 1.0, %v7784_v60  ;;  %v7782_v27 = vmul.f32 %v16478_v53, %v7781_v28 }
 0x7e8   : > { %v7786_v57 = vmul.f32 %v12077_v26, %v7785_v45  ;;  %v11144_v45 = vor.u32 %v11610_v22, %v11143_v9  ;;  %v11576_v22 = vld [vmem:[#allocation9 + $0x124] sm:$0xf] }
 0x7e9   : > { %v7884_v34 = vpop.f32.mrf.mxu2 }
 0x7ea   : > { %v7787_v18 = vadd.f32 %v12077_v26, %v7786_v57  ;;  %v7921_v39 = vpack.c.bf16 %v7884_v34, %v7884_v34  ;;  %v16699_v59 = vpop.xlane.xlu1 %6774  ;;  %8761 = vmatpush.bf16.msra.mxu1 %v11144_v45 }
 0x7eb   : > { %12078 = vrcp.f32 %v16699_v59  ;;  %v6984_v10 = vand.u32 2147483647, %v16699_v59  ;;  %vm6980_vm4 = vweird.f32 %v16699_v59  ;;  %v6986_v56 = vand.u32 2147483648, %v16699_v59 }
 0x7ec   : > { %7955 = vrot.lane.b32.xlu1 %v7921_v39, %s12291_s21  ;;  %v7791_v6 = vsel %vm7790_vm14, %v12077_v26, %v7787_v18  ;;  %v11023_v26 = vld [vmem:[#allocation9 + $0x138] sm:$0xf] }
 0x7ed   : > { %v7796_v36 = vsel %vm7793_vm10, %v7795_v52, %v7791_v6  ;;  %v16704_v16 = vpop.xlane.xlu2 %6772  ;;  %v11024_v54 = vor.u32 %v11580_v23, %v11023_v26  ;;  %v11040_v52 = vor.u32 %v11582_v40, %v11037_v25  ;;  %v6321_v6 = vpack.c.bf16 %v16483_v29, %v16483_v29  ;;  %v11579_v26 = vld [vmem:[#allocation9 + $0x13c] sm:$0xf]  ;;  %v11025_v23 = vld [vmem:[#allocation9 + $0x144] sm:$0xf0] }
 0x7ee   : > { %v7797_v7 = vmul.f32 %v16495_v35, %v7796_v36  ;;  %12080 = vrcp.f32 %v16704_v16  ;;  %v6969_v34 = vand.u32 2147483647, %v16704_v16  ;;  %vm16748_vm13 = vcmp.eq.f32.partialorder %v6984_v10, 8.507059e+37  ;;  %v11607_v10 = vld [vmem:[#allocation9 + $0x218] sm:$0xf0] }
 0x7ef   : > { %v4765_v61 = vpop.permute.xlu0 %4764  ;;  %8714 = vmatpush.bf16.msra.mxu0 %v11024_v54  ;;  %v6971_v36 = vand.u32 2147483648, %v16704_v16  ;;  %8860 = vmatpush.bf16.msra.mxu3 %v11040_v52  ;;  %v11028_v63 = vor.u32 %v11579_v26, %v11025_v23  ;;  %vm6965_vm15 = vweird.f32 %v16704_v16  ;;  %v10975_v52 = vld [vmem:[#allocation9 + $0xd8] sm:$0xf]  ;;  %v11570_v26 = vld [vmem:[#allocation9 + $0xf4] sm:$0xf] }
 0x7f0   : > { %4802 = vst.msk [vmem:[#allocation3 + $0x84] sm:$0xf] %vm4790_vm7, %v4765_v61  ;;  %v7805_v47 = vpack.c.bf16 %v7797_v7, %v7782_v27  ;;  %v10999_v7 = vld [vmem:[#allocation9 + $0x108] sm:$0xf]  ;;  %v11574_v61 = vld [vmem:[#allocation9 + $0x110] sm:$0xf0] }
 0x7f1   : > { %v16710_v13 = vpop.eup %12078  ;;  %v7886_v50 = vpop.f32.mrf.mxu2  ;;  %v11000_v54 = vor.u32 %v11574_v61, %v10999_v7  ;;  %vm6970_vm12 = vcmp.eq.f32.partialorder %v6969_v34, 8.507059e+37  ;;  %v11119_v61 = vld [vmem:[#allocation9 + $0x1f8] sm:$0xf] }
 0x7f2   : > { %v6976_v53 = vmul.f32 %v16710_v13, %v16699_v59  ;;  %v7922_v35 = vpack.c.bf16 %v7886_v50, %v7886_v50  ;;  %v16716_v60 = vpop.xlane.xlu1 %6778  ;;  %7913 = vmatmul.bf16.gmra.mxu2 %v7805_v47  ;;  %vm6981_vm6 = vweird.f32 %v16710_v13  ;;  %v11573_v59 = vld [vmem:[#allocation9 + $0x10c] sm:$0xf] }
 0x7f3   : > { %12082 = vrcp.f32 %v16716_v60  ;;  %vm16744_vm5 = vmor %vm6980_vm4, %vm6981_vm6  ;;  %8715 = vmatpush.bf16.msra.mxu0 %v11012_v24  ;;  %8861 = vmatpush.bf16.msra.mxu3 %v11028_v63  ;;  %v7016_v63 = vand.u32 2147483648, %v16716_v60  ;;  %vm7010_vm0 = vweird.f32 %v16716_v60  ;;  %vm17946_vm4 = vcmask 519168  }
 0x7f4   : > { %v6977_v31 = vsub.f32 1.0, %v6976_v53  ;;  %6357 = vrot.lane.b32.xlu1 %v6320_v2, %s12291_s21  ;;  %7957 = vrot.lane.b32.xlu0 %v7922_v35, %s12291_s21  ;;  %v16721_v15 = vpop.eup %12080  ;;  %v10987_v2 = vld [vmem:[#allocation9 + $0xf0] sm:$0xf]  ;;  %v6987_v53 = vor.u32 1.1754944e-38, %v6986_v56 }
 0x7f5   : > { %v6961_v1 = vmul.f32 %v16721_v15, %v16704_v16  ;;  %v16728_v38 = vpop.xlane.xlu2 %6776  ;;  %vm6966_vm3 = vweird.f32 %v16721_v15  ;;  %v10988_v3 = vor.u32 %v11571_v0, %v10987_v2 }
 0x7f6   : > { %v6978_v57 = vmul.f32 %v16710_v13, %v6977_v31  ;;  %12084 = vrcp.f32 %v16728_v38  ;;  %v11131_v31 = vld [vmem:[#allocation9 + $0x210] sm:$0xf]  ;;  %vm6967_vm8 = vmor %vm6965_vm15, %vm6966_vm3  ;;  %vm6995_vm1 = vweird.f32 %v16728_v38  ;;  %v7001_v0 = vand.u32 2147483648, %v16728_v38 }
 0x7f7   : > { %v4767_v37 = vpop.permute.xlu0 %4766  ;;  %v11532_v51 = vld [vmem:[#allocation3 + $0x80] sm:$0xf0]  ;;  %v6962_v39 = vsub.f32 1.0, %v6961_v1  ;;  %8716 = vmatpush.bf16.msra.mxu0 %v11000_v54  ;;  %v11132_v56 = vor.u32 %v11607_v10, %v11131_v31  ;;  %v11601_v54 = vld [vmem:[#allocation9 + $0x1e8] sm:$0xf0]  ;;  %vm17949_vm3 = vmmov %vm17946_vm4 }
 0x7f8   : > { %v6979_v18 = vadd.f32 %v16710_v13, %v6978_v57  ;;  %4803 = vst.msk [vmem:[#allocation3 + $0x90] sm:$0xf] %vm4790_vm7, %v4767_v37  ;;  %v16736_v12 = vor.u32 %v11532_v51, %v10831_v32  ;;  %v11016_v32 = vor.u32 %v11576_v22, %v11013_v30  ;;  %v7014_v37 = vand.u32 2147483647, %v16716_v60 }
 0x7f9   : > { %v16738_v28 = vpop.eup %12082  ;;  %v7889_v27 = vpop.f32.mrf.mxu2  ;;  %v6963_v47 = vmul.f32 %v16721_v15, %v6962_v39  ;;  %v6322_v39 = vpack.c.bf16 %v16508_v17, %v16508_v17  ;;  %8762 = vmatpush.bf16.msra.mxu1 %v11132_v56  ;;  %v6999_v31 = vand.u32 2147483647, %v16728_v38 }
 0x7fa   : > { %v7006_v29 = vmul.f32 %v16738_v28, %v16716_v60  ;;  %v7923_v50 = vpack.c.bf16 %v7889_v27, %v7889_v27  ;;  %8696 = vmatmul.bf16.gmra.mxu3 %v16736_v12  ;;  %v6983_v35 = vsel %vm16744_vm5, %v16710_v13, %v6979_v18  ;;  %v6972_v13 = vor.u32 1.1754944e-38, %v6971_v36  ;;  %v11071_v60 = vld [vmem:[#allocation9 + $0x198] sm:$0xf]  ;;  %vm17947_vm5 = vmmov %vm17946_vm4 }
 0x7fb   : > { %v6964_v9 = vadd.f32 %v16721_v15, %v6963_v47  ;;  %v6988_v45 = vsel %vm16748_vm13, %v6987_v53, %v6983_v35  ;;  %8717 = vmatpush.bf16.msra.mxu0 %v10988_v3  ;;  %8862 = vmatpush.bf16.msra.mxu3 %v11016_v32  ;;  %v10989_v53 = vld [vmem:[#allocation9 + $0xfc] sm:$0xf0]  ;;  %vm7011_vm2 = vweird.f32 %v16738_v28  ;;  %v6323_v32 = vpack.c.bf16 %v16523_v58, %v16523_v58  ;;  %vm17948_vm13 = vmmov %vm17946_vm4 }
 0x7fc   : > { %6359 = vrot.lane.b32.xlu1 %v6321_v6, %s12291_s21  ;;  %7959 = vrot.lane.b32.xlu0 %v7923_v50, %s12291_s21  ;;  %v16765_v44 = vpop.eup %12084  ;;  %v7007_v16 = vsub.f32 1.0, %v7006_v29  ;;  %v6989_v18 = vmul.f32 %v16527_v33, %v6988_v45  ;;  %v11568_v6 = vld [vmem:[#allocation9 + $0xe0] sm:$0xf0]  ;;  %v10963_v29 = vld [vmem:[#allocation9 + $0xc0] sm:$0xf]  ;;  %vm16811_vm14 = vmor %vm7010_vm0, %vm7011_vm2  ;;  %vm7000_vm10 = vcmp.eq.f32.partialorder %v6999_v31, 8.507059e+37 }
 0x7fd   : > { %v6991_v24 = vmul.f32 %v16765_v44, %v16728_v38  ;;  %v4769_v40 = vpop.permute.xlu2 %4768  ;;  %v6968_v25 = vsel %vm6967_vm8, %v16721_v15, %v6964_v9  ;;  %v11604_v33 = vld [vmem:[#allocation9 + $0x200] sm:$0xf0]  ;;  %vm6996_vm9 = vweird.f32 %v16765_v44  ;;  %v10976_v17 = vor.u32 %v11568_v6, %v10975_v52  ;;  %v11565_v50 = vld [vmem:[#allocation9 + $0xc8] sm:$0xf0]  ;;  %v11107_v35 = vld [vmem:[#allocation9 + $0x1e0] sm:$0xf] }
 0x7fe   : > { %4804 = vst.msk [vmem:[#allocation3 + $0x9c] sm:$0xf] %vm4790_vm7, %v4769_v40  ;;  %v6973_v1 = vsel %vm6970_vm12, %v6972_v13, %v6968_v25  ;;  %v7008_v4 = vmul.f32 %v16738_v28, %v7007_v16  ;;  %v11120_v2 = vor.u32 %v11604_v33, %v11119_v61  ;;  %v10964_v9 = vor.u32 %v11565_v50, %v10963_v29  ;;  %vm16795_vm11 = vmor %vm6995_vm1, %vm6996_vm9  ;;  %v11598_v40 = vld [vmem:[#allocation9 + $0x1d0] sm:$0xf0]  ;;  %v11567_v38 = vld [vmem:[#allocation9 + $0xdc] sm:$0xf] }
 0x7ff   : > { %v4773_v57 = vpop.permute.xlu0 %4772  ;;  %v6992_v51 = vsub.f32 1.0, %v6991_v24  ;;  %v6974_v34 = vmul.f32 %v16530_v14, %v6973_v1  ;;  %v11001_v14 = vld [vmem:[#allocation9 + $0x114] sm:$0xf0]  ;;  %8718 = vmatpush.bf16.msra.mxu0 %v10976_v17  ;;  %v11108_v45 = vor.u32 %v11601_v54, %v11107_v35  ;;  %v10843_v10 = vld [vmem:[#allocation3 + $0x90] sm:$0xf]  ;;  %v10992_v16 = vor.u32 %v11570_v26, %v10989_v53 }
 0x800   : > { %4806 = vst.msk [vmem:[#allocation3 + $0xb4] sm:$0xf] %vm4790_vm7, %v4773_v57  ;;  %v11004_v47 = vor.u32 %v11573_v59, %v11001_v14  ;;  %v7009_v22 = vadd.f32 %v16738_v28, %v7008_v4  ;;  %8763 = vmatpush.bf16.msra.mxu1 %v11120_v2  ;;  %v11095_v24 = vld [vmem:[#allocation9 + $0x1c8] sm:$0xf]  ;;  %v11083_v52 = vld [vmem:[#allocation9 + $0x1b0] sm:$0xf] }
 0x801   : > { %v7891_v15 = vpop.f32.mrf.mxu2  ;;  %v6993_v36 = vmul.f32 %v16765_v44, %v6992_v51  ;;  %v7026_v7 = vpack.c.bf16 %v6989_v18, %v6974_v34  ;;  %v10977_v1 = vld [vmem:[#allocation9 + $0xe4] sm:$0xf0]  ;;  %v7002_v51 = vor.u32 1.1754944e-38, %v7001_v0  ;;  %v7017_v34 = vor.u32 1.1754944e-38, %v7016_v63  ;;  %v11595_v6 = vld [vmem:[#allocation9 + $0x1b8] sm:$0xf0]  ;;  %v16833_v63 = vpop.f32.mrf.mxu3 }
 0x802   : > { %v7924_v27 = vpack.c.bf16 %v7891_v15, %v7891_v15  ;;  %8818 = vmatmul.bf16.vlgmr.msra.gmra.mxu2 %v16420_v11  ;;  %8863 = vmatpush.bf16.msra.mxu3 %v11004_v47  ;;  %v10980_v15 = vor.u32 %v11567_v38, %v10977_v1  ;;  %vm7015_vm6 = vcmp.eq.f32.partialorder %v7014_v37, 8.507059e+37  ;;  %v11564_v59 = vld [vmem:[#allocation9 + $0xc4] sm:$0xf]  ;;  %v10965_v4 = vld [vmem:[#allocation9 + $0xcc] sm:$0xf0] }
 0x803   : > { %v6994_v23 = vadd.f32 %v16765_v44, %v6993_v36  ;;  %7114 = vmatmul.bf16.gmra.mxu0 %v7026_v7  ;;  %v10968_v14 = vor.u32 %v11564_v59, %v10965_v4  ;;  %v11592_v37 = vld [vmem:[#allocation9 + $0x1a0] sm:$0xf0]  ;;  %v11589_v29 = vld [vmem:[#allocation9 + $0x188] sm:$0xf0] }
 0x804   : > { %6361 = vrot.lane.b32.xlu0 %v6322_v39, %s12291_s21  ;;  %7961 = vrot.lane.b32.xlu2 %v7924_v27, %s12291_s21  ;;  %v11096_v39 = vor.u32 %v11598_v40, %v11095_v24  ;;  %v11072_v47 = vor.u32 %v11592_v37, %v11071_v60  ;;  %v11584_v59 = vld [vmem:[#allocation9 + $0x160] sm:$0xf0] }
 0x805   : > { %v11535_v13 = vld [vmem:[#allocation3 + $0x98] sm:$0xf0]  ;;  %v6998_v57 = vsel %vm16795_vm11, %v16765_v44, %v6994_v23  ;;  %8719 = vmatpush.bf16.msra.mxu0 %v10964_v9  ;;  %v7013_v44 = vsel %vm16811_vm14, %v16738_v28, %v7009_v22  ;;  %8764 = vmatpush.bf16.msra.mxu1 %v11108_v45  ;;  %v11084_v28 = vor.u32 %v11595_v6, %v11083_v52  ;;  %v11043_v6 = vld [vmem:[#allocation9 + $0x158] sm:$0xf] }
 0x806   : > { %v16802_v25 = vor.u32 %v11535_v13, %v10843_v10  ;;  %v7003_v58 = vsel %vm7000_vm10, %v7002_v51, %v6998_v57  ;;  %8864 = vmatpush.bf16.msra.mxu3 %v10992_v16  ;;  %v7018_v36 = vsel %vm7015_vm6, %v7017_v34, %v7013_v44  ;;  %v6324_v10 = vpack.c.bf16 %v16535_v49, %v16535_v49  ;;  %v11587_v44 = vld [vmem:[#allocation9 + $0x178] sm:$0xf0] }
 0x807   : > { %v6348_v3 = vpop.permute.xlu0 %6347  ;;  %v7004_v27 = vmul.f32 %v16545_v55, %v7003_v58  ;;  %v7019_v33 = vmul.f32 %v16541_v21, %v7018_v36  ;;  %v11059_v55 = vld [vmem:[#allocation9 + $0x180] sm:$0xf]  ;;  %v11538_v2 = vld [vmem:[#allocation3 + $0xb0] sm:$0xf0]  ;;  %v6325_v49 = vpack.c.bf16 %v16551_v20, %v16551_v20  ;;  %v6326_v58 = vpack.c.bf16 %v16559_v46, %v16559_v46  ;;  %v11019_v46 = vld [vmem:[#allocation9 + $0x128] sm:$0xf] }
 0x808   : > { %6395 = vst.msk [vmem:[#allocation3 + $0x4] sm:$0xf] %vm4790_vm7, %v6348_v3  ;;  %v11060_v26 = vor.u32 %v11589_v29, %v11059_v55  ;;  %v11044_v4 = vor.u32 %v11584_v59, %v11043_v6  ;;  %v11031_v36 = vld [vmem:[#allocation9 + $0x140] sm:$0xf] }
 0x809   : > { %8765 = vmatpush.bf16.msra.mxu1 %v11096_v39  ;;  %v7027_v17 = vpack.c.bf16 %v7019_v33, %v7004_v27  ;;  %v16841_v31 = vpop.f32.mrf.mxu3  ;;  %v11581_v27 = vld [vmem:[#allocation9 + $0x148] sm:$0xf0]  ;;  %v11578_v33 = vld [vmem:[#allocation9 + $0x130] sm:$0xf0] }
 0x80a   : > { %v4771_v18 = vpop.permute.xlu1 %4770  ;;  %8701 = vmatmul.bf16.gmra.mxu3 %v16802_v25  ;;  %v7952_v61 = vpop.permute.xlu2 %7951  ;;  %v11020_v37 = vor.u32 %v11578_v33, %v11019_v46 }
 0x80b   : > { %4805 = vst.msk [vmem:[#allocation3 + $0xa8] sm:$0xf] %vm4790_vm7, %v4771_v18  ;;  %8865 = vmatpush.bf16.msra.mxu3 %v10980_v15  ;;  %v11055_v18 = vld [vmem:[#allocation9 + $0x170] sm:$0xf] }
 0x80c   : > { %6363 = vrot.lane.b32.xlu0 %v6323_v32, %s12291_s21  ;;  %7999 = vst.msk [vmem:[#allocation3 + $0x8] sm:$0xf] %vm4790_vm7, %v7952_v61  ;;  %v11056_v39 = vor.u32 %v11587_v44, %v11055_v18  ;;  %v11151_v18 = vld [vmem:[#allocation9 + $0x230] sm:$0xf]  ;;  %v11611_v44 = vld [vmem:[#allocation9 + $0x238] sm:$0xf0] }
 0x80d   : > { %8766 = vmatpush.bf16.msra.mxu1 %v11084_v28  ;;  %v11032_v28 = vor.u32 %v11581_v27, %v11031_v36  ;;  %v10959_v36 = vld [vmem:[#allocation9 + $0xb0] sm:$0xf] }
 0x80e   : > { %9006 = vmatpush.bf16.msrb.mxu2 %v11056_v39  ;;  %v11152_v39 = vor.u32 %v11611_v44, %v11151_v18 }
 0x80f   : > { %v6350_v7 = vpop.permute.xlu0 %6349  ;;  %8866 = vmatpush.bf16.msra.mxu3 %v10968_v14  ;;  %v11516_v0 = vld [vmem:[#allocation3 + $0x4] sm:$0xf]  ;;  %v6327_v14 = vpack.c.bf16 %v16564_v62, %v16564_v62  ;;  %v6328_v62 = vpack.c.bf16 %v16582_v5, %v16582_v5  ;;  %v6329_v5 = vpack.c.bf16 %v16599_v42, %v16599_v42 }
 0x810   : > { %6396 = vst.msk [vmem:[#allocation3 + $0x10] sm:$0xf] %vm4790_vm7, %v6350_v7 }
 0x811   : > { %8767 = vmatpush.bf16.msra.mxu1 %v11072_v47  ;;  %v16850_v57 = vpop.f32.mrf.mxu3  ;;  %v11575_v47 = vld [vmem:[#allocation9 + $0x118] sm:$0xf0] }
 0x812   : > { %8823 = vmatmul.bf16.gmra.mxu2 %v16514_v41  ;;  %v10855_v50 = vld [vmem:[#allocation3 + $0xa8] sm:$0xf]  ;;  %v6354_v53 = vpop.permute.xlu2 %6353 }
 0x813   : > { %7119 = vmatmul.bf16.gmra.mxu0 %v7027_v17  ;;  %v16829_v21 = vor.u32 %v11538_v2, %v10855_v50  ;;  %6398 = vst.msk [vmem:[#allocation3 + $0x28] sm:$0xf] %vm4790_vm7, %v6354_v53  ;;  %v10779_v38 = vld [vmem:[#allocation3 + $0x8] sm:$0xf]  ;;  %9007 = vmatpush.bf16.msrb.mxu2 %v11044_v4  ;;  %v11007_v17 = vld [vmem:[#allocation9 + $0x110] sm:$0xf] }
 0x814   : > { %v11008_v55 = vor.u32 %v11575_v47, %v11007_v17  ;;  %v10983_v2 = vld [vmem:[#allocation9 + $0xe0] sm:$0xf]  ;;  %9055 = vmatpush.bf16.msrb.mxu3 %v11152_v39 }
 0x815   : > { %8768 = vmatpush.bf16.msra.mxu1 %v11060_v26  ;;  %v10995_v26 = vld [vmem:[#allocation9 + $0xf8] sm:$0xf]  ;;  %v11127_v39 = vld [vmem:[#allocation9 + $0x200] sm:$0xf] }
 0x817   : > { %v6352_v23 = vpop.permute.xlu0 %6351  ;;  %v10773_v35 = vld [vmem:[#allocation3 + $0xc] sm:$0xf0]  ;;  %9008 = vmatpush.bf16.msrb.mxu2 %v11032_v28  ;;  %v11563_v28 = vld [vmem:[#allocation9 + $0xb8] sm:$0xf0] }
 0x818   : > { %6397 = vst.msk [vmem:[#allocation3 + $0x1c] sm:$0xf] %vm4790_vm7, %v6352_v23  ;;  %v16836_v9 = vor.u32 %v11516_v0, %v10773_v35  ;;  %v11572_v23 = vld [vmem:[#allocation9 + $0x100] sm:$0xf0] }
 0x819   : > { %v16862_v56 = vpop.f32.mrf.mxu3  ;;  %v10996_v35 = vor.u32 %v11572_v23, %v10995_v26 }
 0x81a   : > { %8706 = vmatmul.bf16.gmra.mxu3 %v16829_v21  ;;  %v6356_v54 = vpop.permute.xlu2 %6355  ;;  %v10785_v24 = vld [vmem:[#allocation3 + $0x24] sm:$0xf0] }
 0x81b   : > { %6399 = vst.msk [vmem:[#allocation3 + $0x34] sm:$0xf] %vm4790_vm7, %v6356_v54  ;;  %9009 = vmatpush.bf16.msrb.mxu2 %v11020_v37  ;;  %v11569_v54 = vld [vmem:[#allocation9 + $0xe8] sm:$0xf0] }
 0x81c   : > { %v10984_v0 = vor.u32 %v11569_v54, %v10983_v2 }
 0x81f   : > { %v11519_v13 = vld [vmem:[#allocation3 + $0x1c] sm:$0xf]  ;;  %9010 = vmatpush.bf16.msrb.mxu2 %v11008_v55  ;;  %v11139_v55 = vld [vmem:[#allocation9 + $0x218] sm:$0xf] }
 0x820   : > { %v16847_v40 = vor.u32 %v11519_v13, %v10785_v24 }
 0x821   : > { %v16868_v15 = vpop.f32.mrf.mxu3 }
 0x822   : > { %8828 = vmatmul.bf16.gmra.mxu2 %v16539_v8 }
 0x823   : > { %8720 = vmatmul.bf16.vlgmr.msra.gmra.mxu0 %v16836_v9  ;;  %9011 = vmatpush.bf16.msrb.mxu2 %v10996_v35 }
 0x827   : > { %v7894_v22 = vpop.f32.mrf.mxu2  ;;  %9012 = vmatpush.bf16.msrb.mxu2 %v10984_v0 }
 0x828   : > { %v7925_v30 = vpack.c.bf16 %v7894_v22, %v7894_v22 }
 0x829   : > { %v16874_v60 = vpop.f32.mrf.mxu3 }
 0x82a   : > { %8867 = vmatmul.bf16.vlgmr.msra.gmra.mxu3 %v16836_v9  ;;  %7963 = vrot.lane.b32.xlu2 %v7925_v30, %s12291_s21  ;;  %v7954_v45 = vpop.permute.xlu1 %7953 }
 0x82b   : > { %8000 = vst.msk [vmem:[#allocation3 + $0x14] sm:$0xf] %vm4790_vm7, %v7954_v45 }
 0x82f   : > { %v7896_v3 = vpop.f32.mrf.mxu2 }
 0x830   : > { %v7926_v16 = vpack.c.bf16 %v7896_v3, %v7896_v3 }
 0x831   : > { %v16881_v53 = vpop.f32.mrf.mxu3 }
 0x832   : > { %8833 = vmatmul.bf16.gmra.mxu2 %v16607_v43  ;;  %6365 = vrot.lane.b32.xlu2 %v6324_v10, %s12291_s21  ;;  %v11518_v1 = vld [vmem:[#allocation3 + $0x10] sm:$0xf0]  ;;  %v10971_v10 = vld [vmem:[#allocation9 + $0xc8] sm:$0xf] }
 0x833   : > { %7965 = vrot.lane.b32.xlu1 %v7926_v16, %s12291_s21  ;;  %8725 = vmatmul.bf16.gmra.mxu0 %v16847_v40  ;;  %v16857_v32 = vor.u32 %v11518_v1, %v10779_v38  ;;  %v11566_v16 = vld [vmem:[#allocation9 + $0xd0] sm:$0xf0]  ;;  %v6330_v1 = vpack.c.bf16 %v16609_v19, %v16609_v19 }
 0x834   : > { %v10972_v24 = vor.u32 %v11566_v16, %v10971_v10 }
 0x835   : > { %8769 = vmatmul.bf16.vlgmr.msra.gmra.mxu1 %v16857_v32 }
 0x836   : > { %9013 = vmatpush.bf16.msrb.mxu2 %v10972_v24 }
 0x839   : > { %v16892_v3 = vpop.f32.mrf.mxu3 }
 0x83a   : > { %8872 = vmatmul.bf16.gmra.mxu3 %v16847_v40  ;;  %6367 = vrot.lane.b32.xlu2 %v6325_v49, %s12291_s21 }
 0x83d   : > { %v7899_v51 = vpop.f32.mrf.mxu2 }
 0x83e   : > { %v7927_v34 = vpack.c.bf16 %v7899_v51, %v7899_v51 }
 0x840   : > { %7967 = vrot.lane.b32.xlu1 %v7927_v34, %s12291_s21 }
 0x842   : > { %8838 = vmatmul.bf16.gmra.mxu2 %v16675_v48 }
 0x845   : > { %v7901_v20 = vpop.f32.mrf.mxu2 }
 0x846   : > { %v7928_v52 = vpack.c.bf16 %v7901_v20, %v7901_v20 }
 0x848   : > { %6369 = vrot.lane.b32.xlu1 %v6326_v58, %s12291_s21  ;;  %7969 = vrot.lane.b32.xlu0 %v7928_v52, %s12291_s21  ;;  %v11522_v58 = vld [vmem:[#allocation3 + $0x34] sm:$0xf] }
 0x84d   : > { %v7904_v7 = vpop.f32.mrf.mxu2  ;;  %v16900_v34 = vpop.f32.mrf.mxu3 }
 0x84e   : > { %v7929_v61 = vpack.c.bf16 %v7904_v7, %v7904_v7  ;;  %v10960_v7 = vor.u32 %v11563_v28, %v10959_v36 }
 0x850   : > { %6371 = vrot.lane.b32.xlu1 %v6327_v14, %s12291_s21  ;;  %7971 = vrot.lane.b32.xlu0 %v7929_v61, %s12291_s21  ;;  %v11609_v14 = vld [vmem:[#allocation9 + $0x22c] sm:$0xf]  ;;  %v11145_v61 = vld [vmem:[#allocation9 + $0x234] sm:$0xf0] }
 0x851   : > { %8957 = vmatpush.bf16.msrb.mxu1 %v10960_v7  ;;  %v11148_v37 = vor.u32 %v11609_v14, %v11145_v61 }
 0x852   : > { %8843 = vmatmul.bf16.gmra.mxu2 %v16736_v12 }
 0x853   : > { %8908 = vmatpush.bf16.msrb.mxu0 %v11148_v37 }
 0x855   : > { %v7906_v29 = vpop.f32.mrf.mxu2  ;;  %v16912_v46 = vpop.f32.mrf.mxu3 }
 0x856   : > { %v7930_v50 = vpack.c.bf16 %v7906_v29, %v7906_v29  ;;  %v11608_v29 = vld [vmem:[#allocation9 + $0x220] sm:$0xf0] }
 0x857   : > { %v11140_v23 = vor.u32 %v11608_v29, %v11139_v55  ;;  %v11603_v55 = vld [vmem:[#allocation9 + $0x1fc] sm:$0xf]  ;;  %v11121_v29 = vld [vmem:[#allocation9 + $0x204] sm:$0xf0] }
 0x858   : > { %6373 = vrot.lane.b32.xlu0 %v6328_v62, %s12291_s21  ;;  %7973 = vrot.lane.b32.xlu2 %v7930_v50, %s12291_s21 }
 0x859   : > { %9056 = vmatpush.bf16.msrb.mxu3 %v11140_v23  ;;  %v11602_v23 = vld [vmem:[#allocation9 + $0x1f0] sm:$0xf0] }
 0x85d   : > { %v7909_v22 = vpop.f32.mrf.mxu2 }
 0x85e   : > { %v7956_v30 = vpop.permute.xlu1 %7955  ;;  %v7931_v13 = vpack.c.bf16 %v7909_v22, %v7909_v22  ;;  %v7962_v45 = vpop.permute.xlu2 %7961 }
 0x85f   : > { %8001 = vst.msk [vmem:[#allocation3 + $0x20] sm:$0xf] %vm4790_vm7, %v7956_v30  ;;  %v10947_v30 = vld [vmem:[#allocation9 + $0x98] sm:$0xf] }
 0x860   : > { %8004 = vst.msk [vmem:[#allocation3 + $0x44] sm:$0xf] %vm4790_vm7, %v7962_v45  ;;  %6375 = vrot.lane.b32.xlu0 %v6329_v5, %s12291_s21  ;;  %7975 = vrot.lane.b32.xlu2 %v7931_v13, %s12291_s21  ;;  %v11560_v5 = vld [vmem:[#allocation9 + $0xa0] sm:$0xf0] }
 0x861   : > { %v10948_v10 = vor.u32 %v11560_v5, %v10947_v30  ;;  %v11109_v30 = vld [vmem:[#allocation9 + $0x1ec] sm:$0xf0] }
 0x862   : > { %8848 = vmatmul.bf16.gmra.mxu2 %v16802_v25 }
 0x863   : > { %8958 = vmatpush.bf16.msrb.mxu1 %v10948_v10 }
 0x865   : > { %v7911_v38 = vpop.f32.mrf.mxu2 }
 0x866   : > { %v6358_v42 = vpop.permute.xlu1 %6357  ;;  %v7932_v49 = vpack.c.bf16 %v7911_v38, %v7911_v38  ;;  %v7958_v51 = vpop.permute.xlu0 %7957  ;;  %v10791_v19 = vld [vmem:[#allocation3 + $0x20] sm:$0xf]  ;;  %v11606_v38 = vld [vmem:[#allocation9 + $0x214] sm:$0xf] }
 0x867   : > { %6400 = vst.msk [vmem:[#allocation3 + $0x40] sm:$0xf] %vm4790_vm7, %v6358_v42  ;;  %v11524_v54 = vld [vmem:[#allocation3 + $0x40] sm:$0xf0]  ;;  %v11133_v42 = vld [vmem:[#allocation9 + $0x21c] sm:$0xf0] }
 0x868   : > { %8002 = vst.msk [vmem:[#allocation3 + $0x2c] sm:$0xf] %vm4790_vm7, %v7958_v51  ;;  %6377 = vrot.lane.b32.xlu2 %v6330_v1, %s12291_s21  ;;  %7977 = vrot.lane.b32.xlu1 %v7932_v49, %s12291_s21  ;;  %v11136_v1 = vor.u32 %v11606_v38, %v11133_v42  ;;  %v16952_v38 = vld [vmem:[#allocation10] sm:$0x7] }
 0x86a   : > { %8909 = vmatpush.bf16.msrb.mxu0 %v11136_v1  ;;  %v11103_v1 = vld [vmem:[#allocation9 + $0x1d0] sm:$0xf] }
 0x86e   : > { %v6360_v20 = vpop.permute.xlu1 %6359  ;;  %v10797_v52 = vld [vmem:[#allocation3 + $0x3c] sm:$0xf0]  ;;  %v7960_v6 = vpop.permute.xlu0 %7959 }
 0x86f   : > { %6401 = vst.msk [vmem:[#allocation3 + $0x4c] sm:$0xf] %vm4790_vm7, %v6360_v20  ;;  %v16903_v59 = vor.u32 %v11522_v58, %v10797_v52  ;;  %v11521_v4 = vld [vmem:[#allocation3 + $0x28] sm:$0xf0] }
 0x870   : > { %8003 = vst.msk [vmem:[#allocation3 + $0x38] sm:$0xf] %vm4790_vm7, %v7960_v6  ;;  %v16906_v27 = vor.u32 %v11521_v4, %v10791_v19  ;;  %v11605_v20 = vld [vmem:[#allocation9 + $0x208] sm:$0xf0] }
 0x871   : > { %8730 = vmatmul.bf16.gmra.mxu0 %v16903_v59  ;;  %8877 = vmatmul.bf16.gmra.mxu3 %v16903_v59  ;;  %v11128_v58 = vor.u32 %v11605_v20, %v11127_v39  ;;  %v11557_v6 = vld [vmem:[#allocation9 + $0x88] sm:$0xf0] }
 0x872   : > { %8774 = vmatmul.bf16.gmra.mxu1 %v16906_v27  ;;  %8853 = vmatmul.bf16.gmra.mxu2 %v16829_v21 }
 0x873   : > { %9057 = vmatpush.bf16.msrb.mxu3 %v11128_v58 }
 0x875   : > { %v7914_v33 = vpop.f32.mrf.mxu2 }
 0x876   : > { %v7933_v17 = vpack.c.bf16 %v7914_v33, %v7914_v33  ;;  %v6362_v47 = vpop.permute.xlu0 %6361  ;;  %v11525_v35 = vld [vmem:[#allocation3 + $0x4c] sm:$0xf] }
 0x877   : > { %6402 = vst.msk [vmem:[#allocation3 + $0x58] sm:$0xf] %vm4790_vm7, %v6362_v47  ;;  %v10803_v26 = vld [vmem:[#allocation3 + $0x38] sm:$0xf] }
 0x878   : > { %7979 = vrot.lane.b32.xlu1 %v7933_v17, %s12291_s21  ;;  %v16922_v45 = vor.u32 %v11524_v54, %v10803_v26  ;;  %v11115_v26 = vld [vmem:[#allocation9 + $0x1e8] sm:$0xf] }
 0x879   : > { %v11116_v54 = vor.u32 %v11602_v23, %v11115_v26 }
 0x87b   : > { %9058 = vmatpush.bf16.msrb.mxu3 %v11116_v54 }
 0x87d   : > { %v7916_v62 = vpop.f32.mrf.mxu2  ;;  %v16916_v50 = vpop.f32.mrf.mxu3 }
 0x87e   : > { %v7934_v2 = vpack.c.bf16 %v7916_v62, %v7916_v62  ;;  %v6364_v0 = vpop.permute.xlu0 %6363  ;;  %v10809_v22 = vld [vmem:[#allocation3 + $0x54] sm:$0xf0] }
 0x87f   : > { %6403 = vst.msk [vmem:[#allocation3 + $0x64] sm:$0xf] %vm4790_vm7, %v6364_v0  ;;  %v16920_v13 = vor.u32 %v11525_v35, %v10809_v22  ;;  %v11554_v0 = vld [vmem:[#allocation9 + $0x70] sm:$0xf0]  ;;  %v11600_v22 = vld [vmem:[#allocation9 + $0x1e4] sm:$0xf] }
 0x880   : > { %7981 = vrot.lane.b32.xlu0 %v7934_v2, %s12291_s21  ;;  %v7115_v16 = vpop.f32.mrf.mxu0  ;;  %v10923_v2 = vld [vmem:[#allocation9 + $0x68] sm:$0xf] }
 0x881   : > { %v7137_v24 = vpack.c.bf16 %v7115_v16, %v7115_v16  ;;  %8735 = vmatmul.bf16.gmra.mxu0 %v16920_v13  ;;  %8882 = vmatmul.bf16.gmra.mxu3 %v16920_v13  ;;  %v10924_v16 = vor.u32 %v11554_v0, %v10923_v2 }
 0x882   : > { %8779 = vmatmul.bf16.gmra.mxu1 %v16922_v45  ;;  %9014 = vmatmul.bf16.vlgmr.msrb.gmra.mxu2 %v16836_v9  ;;  %v10935_v9 = vld [vmem:[#allocation9 + $0x80] sm:$0xf] }
 0x883   : > { %7153 = vst.msk [vmem:[#allocation3 + $0x98] sm:$0xf] %vm17946_vm4, %v7137_v24  ;;  %v10936_v4 = vor.u32 %v11557_v6, %v10935_v9  ;;  %v11112_v24 = vor.u32 %v11600_v22, %v11109_v30  ;;  %v10911_v6 = vld [vmem:[#allocation9 + $0x50] sm:$0xf]  ;;  %v11091_v30 = vld [vmem:[#allocation9 + $0x1b8] sm:$0xf] }
 0x884   : > { %v7964_v49 = vpop.permute.xlu2 %7963 }
 0x885   : > { %v16929_v51 = vpop.f32.mrf.mxu3  ;;  %8005 = vst.msk [vmem:[#allocation3 + $0x50] sm:$0xf] %vm4790_vm7, %v7964_v49  ;;  %8959 = vmatpush.bf16.msrb.mxu1 %v10936_v4  ;;  %v8819_v35 = vpop.f32.mrf.mxu2  ;;  %v11599_v49 = vld [vmem:[#allocation9 + $0x1d8] sm:$0xf0] }
 0x886   : > { %v11528_v61 = vld [vmem:[#allocation3 + $0x64] sm:$0xf]  ;;  %v11104_v20 = vor.u32 %v11599_v49, %v11103_v1  ;;  %v11551_v4 = vld [vmem:[#allocation9 + $0x58] sm:$0xf0] }
 0x888   : > { %v7117_v18 = vpop.f32.mrf.mxu0  ;;  %9059 = vmatpush.bf16.msrb.mxu3 %v11104_v20 }
 0x889   : > { %v7138_v44 = vpack.c.bf16 %v7117_v18, %v7117_v18  ;;  %8960 = vmatpush.bf16.msrb.mxu1 %v10924_v16 }
 0x88b   : > { %7154 = vst.msk [vmem:[#allocation3 + $0xa4] sm:$0xf] %vm17947_vm5, %v7138_v44 }
 0x88c   : > { %v6366_v52 = vpop.permute.xlu2 %6365  ;;  %v10815_v44 = vld [vmem:[#allocation3 + $0x50] sm:$0xf] }
 0x88d   : > { %v16933_v19 = vpop.f32.mrf.mxu3  ;;  %6404 = vst.msk [vmem:[#allocation3 + $0x70] sm:$0xf] %vm4790_vm7, %v6366_v52  ;;  %v16962_v9 = vpop.f32.mrf.mxu2 }
 0x890   : > { %v7120_v36 = vpop.f32.mrf.mxu0 }
 0x891   : > { %v7139_v28 = vpack.c.bf16 %v7120_v36, %v7120_v36  ;;  %v11597_v36 = vld [vmem:[#allocation9 + $0x1cc] sm:$0xf] }
 0x892   : > { %9019 = vmatmul.bf16.gmra.mxu2 %v16847_v40  ;;  %v11124_v40 = vor.u32 %v11603_v55, %v11121_v29 }
 0x893   : > { %7155 = vst.msk [vmem:[#allocation3 + $0xb0] sm:$0xf] %vm17948_vm13, %v7139_v28  ;;  %v10912_v28 = vor.u32 %v11551_v4, %v10911_v6  ;;  %v11085_v4 = vld [vmem:[#allocation9 + $0x1bc] sm:$0xf0] }
 0x894   : > { %v6368_v7 = vpop.permute.xlu2 %6367  ;;  %v10821_v33 = vld [vmem:[#allocation3 + $0x6c] sm:$0xf0]  ;;  %8910 = vmatpush.bf16.msrb.mxu0 %v11124_v40 }
 0x895   : > { %v16938_v14 = vpop.f32.mrf.mxu3  ;;  %6405 = vst.msk [vmem:[#allocation3 + $0x7c] sm:$0xf] %vm4790_vm7, %v6368_v7  ;;  %v16941_v37 = vor.u32 %v11528_v61, %v10821_v33  ;;  %v11097_v7 = vld [vmem:[#allocation9 + $0x1d4] sm:$0xf0]  ;;  %v16966_v61 = vperm.slane %v16952_v38, 0  ;;  %8961 = vmatpush.bf16.msrb.mxu1 %v10912_v28  ;;  %v8824_v2 = vpop.f32.mrf.mxu2 }
 0x896   : > { %v11100_v33 = vor.u32 %v11597_v36, %v11097_v7 }
 0x897   : > { %8740 = vmatmul.bf16.gmra.mxu0 %v16941_v37  ;;  %8887 = vmatmul.bf16.gmra.mxu3 %v16941_v37  ;;  %v8673_v29 = vadd.f32 %v16833_v63, %v16966_v61 }
 0x898   : > { %v7122_v17 = vpop.f32.mrf.mxu0  ;;  %8911 = vmatpush.bf16.msrb.mxu0 %v11112_v24  ;;  %v11596_v24 = vld [vmem:[#allocation9 + $0x1c0] sm:$0xf0] }
 0x899   : > { %v7140_v47 = vpack.c.bf16 %v7122_v17, %v7122_v17  ;;  %v11092_v1 = vor.u32 %v11596_v24, %v11091_v30 }
 0x89b   : > { %7156 = vst.msk [vmem:[#allocation3 + $0xbc] sm:$0xf] %vm17949_vm3, %v7140_v47  ;;  %9060 = vmatpush.bf16.msrb.mxu3 %v11092_v1  ;;  %v11588_v1 = vld [vmem:[#allocation9 + $0x184] sm:$0xf] }
 0x89c   : > { %8912 = vmatpush.bf16.msrb.mxu0 %v11100_v33  ;;  %v11531_v33 = vld [vmem:[#allocation3 + $0x7c] sm:$0xf] }
 0x89d   : > { %v16946_v62 = vpop.f32.mrf.mxu3 }
 0x8a0   : > { %v8721_v17 = vpop.f32.mrf.mxu0 }
 0x8a1   : > { %v8722_v26 = vadd.f32 %v8721_v17, %v8673_v29 }
 0x8a2   : > { %9024 = vmatmul.bf16.gmra.mxu2 %v16903_v59  ;;  %v16955_v59 = vperm.slane %v16952_v38, 1 }
 0x8a4   : > { %v8820_v42 = vadd.f32 %v8819_v35, %v16955_v59  ;;  %v8825_v0 = vadd.f32 %v8824_v2, %v16955_v59 }
 0x8a5   : > { %v7966_v5 = vpop.permute.xlu1 %7965  ;;  %v16949_v10 = vpop.f32.mrf.mxu3 }
 0x8a6   : > { %8006 = vst.msk [vmem:[#allocation3 + $0x5c] sm:$0xf] %vm4790_vm7, %v7966_v5  ;;  %v8675_v5 = vadd.f32 %v16841_v31, %v16966_v61 }
 0x8a8   : > { %v8723_v22 = vpop.f32.mrf.mxu0 }
 0x8a9   : > { %v8724_v49 = vadd.f32 %v8723_v22, %v8675_v5  ;;  %v11073_v22 = vld [vmem:[#allocation9 + $0x1a4] sm:$0xf0]  ;;  %v11545_v5 = vld [vmem:[#allocation9 + $0x28] sm:$0xf0] }
 0x8ad   : > { %v8868_v18 = vpop.f32.mrf.mxu3  ;;  %v11527_v39 = vld [vmem:[#allocation3 + $0x58] sm:$0xf0] }
 0x8ae   : > { %v16958_v58 = vadd.f32 %v8868_v18, %v8820_v42  ;;  %v16960_v52 = vor.u32 %v11527_v39, %v10815_v44  ;;  %v10899_v18 = vld [vmem:[#allocation9 + $0x38] sm:$0xf]  ;;  %v11548_v44 = vld [vmem:[#allocation9 + $0x40] sm:$0xf0]  ;;  %v11594_v39 = vld [vmem:[#allocation9 + $0x1b4] sm:$0xf] }
 0x8af   : > { %v10900_v6 = vor.u32 %v11548_v44, %v10899_v18  ;;  %v11088_v31 = vor.u32 %v11594_v39, %v11085_v4  ;;  %v11067_v18 = vld [vmem:[#allocation9 + $0x188] sm:$0xf]  ;;  %v11590_v4 = vld [vmem:[#allocation9 + $0x190] sm:$0xf0] }
 0x8b0   : > { %8784 = vmatmul.bf16.gmra.mxu1 %v16960_v52 }
 0x8b1   : > { %8962 = vmatpush.bf16.msrb.mxu1 %v10900_v6  ;;  %8913 = vmatpush.bf16.msrb.mxu0 %v11088_v31 }
 0x8b2   : > { %v7968_v47 = vpop.permute.xlu1 %7967  ;;  %v7974_v55 = vpop.permute.xlu2 %7973  ;;  %9029 = vmatmul.bf16.gmra.mxu2 %v16920_v13 }
 0x8b3   : > { %8007 = vst.msk [vmem:[#allocation3 + $0x68] sm:$0xf] %vm4790_vm7, %v7968_v47  ;;  %v8770_v23 = vpop.f32.mrf.mxu1 }
 0x8b4   : > { %8010 = vst.msk [vmem:[#allocation3 + $0x8c] sm:$0xf] %vm4790_vm7, %v7974_v55  ;;  %v8771_v35 = vadd.f32 %v8770_v23, %v8722_v26 }
 0x8b5   : > { %v16973_v40 = vpop.f32.mrf.mxu3 }
 0x8b6   : > { %9104 = vst [vmem:[%s16977_s26] sm:$0xff] %v8771_v35  ;;  %v11079_v35 = vld [vmem:[#allocation9 + $0x1a0] sm:$0xf] }
 0x8ba   : > { %v6370_v13 = vpop.permute.xlu1 %6369  ;;  %v7970_v54 = vpop.permute.xlu0 %7969  ;;  %v10827_v29 = vld [vmem:[#allocation3 + $0x68] sm:$0xf] }
 0x8bb   : > { %6406 = vst.msk [vmem:[#allocation3 + $0x88] sm:$0xf] %vm4790_vm7, %v6370_v13  ;;  %v7976_v63 = vpop.permute.xlu2 %7975  ;;  %v8772_v20 = vpop.f32.mrf.mxu1  ;;  %v11593_v13 = vld [vmem:[#allocation9 + $0x1a8] sm:$0xf0] }
 0x8bc   : > { %8008 = vst.msk [vmem:[#allocation3 + $0x74] sm:$0xf] %vm4790_vm7, %v7970_v54  ;;  %v8773_v36 = vadd.f32 %v8772_v20, %v8724_v49  ;;  %v11080_v54 = vor.u32 %v11593_v13, %v11079_v35  ;;  %v11061_v49 = vld [vmem:[#allocation9 + $0x18c] sm:$0xf0]  ;;  %v11533_v31 = vld [vmem:[#allocation3 + $0x88] sm:$0xf0] }
 0x8bd   : > { %v8873_v16 = vpop.f32.mrf.mxu3  ;;  %8011 = vst.msk [vmem:[#allocation3 + $0x98] sm:$0xf] %vm4790_vm7, %v7976_v63  ;;  %v10887_v63 = vld [vmem:[#allocation9 + $0x20] sm:$0xf]  ;;  %v11064_v6 = vor.u32 %v11588_v1, %v11061_v49 }
 0x8be   : > { %v16986_v42 = vadd.f32 %v8873_v16, %v8825_v0  ;;  %9107 = vst [vmem:[%s16977_s26 + $0x18] sm:$0xff] %v8773_v36  ;;  %9061 = vmatpush.bf16.msrb.mxu3 %v11080_v54  ;;  %v11591_v0 = vld [vmem:[#allocation9 + $0x19c] sm:$0xf]  ;;  %v10888_v24 = vor.u32 %v11545_v5, %v10887_v63  ;;  %v8726_v63 = vpop.f32.mrf.mxu0 }
 0x8bf   : > { %v11076_v30 = vor.u32 %v11591_v0, %v11073_v22 }
 0x8c0   : > { %8963 = vmatpush.bf16.msrb.mxu1 %v10888_v24 }
 0x8c1   : > { %8914 = vmatpush.bf16.msrb.mxu0 %v11076_v30 }
 0x8c2   : > { %v6372_v28 = vpop.permute.xlu1 %6371  ;;  %v7972_v7 = vpop.permute.xlu0 %7971  ;;  %9034 = vmatmul.bf16.gmra.mxu2 %v16941_v37  ;;  %v10833_v17 = vld [vmem:[#allocation3 + $0x84] sm:$0xf0] }
 0x8c3   : > { %6407 = vst.msk [vmem:[#allocation3 + $0x94] sm:$0xf] %vm4790_vm7, %v6372_v28  ;;  %v6378_v47 = vpop.permute.xlu2 %6377  ;;  %v10836_v55 = vor.u32 %v11531_v33, %v10833_v17  ;;  %v11530_v26 = vld [vmem:[#allocation3 + $0x70] sm:$0xf0]  ;;  %v16996_v37 = vpop.f32.mrf.mxu2  ;;  %v11068_v28 = vor.u32 %v11590_v4, %v11067_v18  ;;  %v8680_v4 = vadd.f32 %v16862_v56, %v16966_v61  ;;  %v8683_v56 = vadd.f32 %v16868_v15, %v16966_v61 }
 0x8c4   : > { %8009 = vst.msk [vmem:[#allocation3 + $0x80] sm:$0xf] %vm4790_vm7, %v7972_v7  ;;  %v16992_v23 = vor.u32 %v11530_v26, %v10827_v29  ;;  %v11542_v29 = vld [vmem:[#allocation9 + $0x10] sm:$0xf0]  ;;  %v10851_v13 = vld [vmem:[#allocation3 + $0x98] sm:$0xf] }
 0x8c5   : > { %6410 = vst.msk [vmem:[#allocation3 + $0xb8] sm:$0xf] %vm4790_vm7, %v6378_v47  ;;  %8745 = vmatmul.bf16.gmra.mxu0 %v10836_v55  ;;  %8892 = vmatmul.bf16.gmra.mxu3 %v10836_v55  ;;  %v17012_v24 = vpop.f32.mrf.mxu3 }
 0x8c6   : > { %8789 = vmatmul.bf16.gmra.mxu1 %v16992_v23  ;;  %8915 = vmatpush.bf16.msrb.mxu0 %v11064_v6 }
 0x8c7   : > { %9062 = vmatpush.bf16.msrb.mxu3 %v11068_v28 }
 0x8ca   : > { %v6374_v2 = vpop.permute.xlu0 %6373  ;;  %v11534_v39 = vld [vmem:[#allocation3 + $0x94] sm:$0xf] }
 0x8cb   : > { %6408 = vst.msk [vmem:[#allocation3 + $0xa0] sm:$0xf] %vm4790_vm7, %v6374_v2  ;;  %v10839_v16 = vld [vmem:[#allocation3 + $0x80] sm:$0xf]  ;;  %v8829_v7 = vpop.f32.mrf.mxu2 }
 0x8cc   : > { %v17000_v33 = vor.u32 %v11533_v31, %v10839_v16  ;;  %v10857_v35 = vld [vmem:[#allocation3 + $0xb4] sm:$0xf0]  ;;  %v8678_v16 = vadd.f32 %v16850_v57, %v16966_v61 }
 0x8ce   : > { %v8727_v1 = vadd.f32 %v8726_v63, %v8678_v16 }
 0x8d2   : > { %v6376_v44 = vpop.permute.xlu0 %6375  ;;  %9039 = vmatmul.bf16.gmra.mxu2 %v10836_v55  ;;  %v10845_v20 = vld [vmem:[#allocation3 + $0x9c] sm:$0xf0]  ;;  %v10875_v55 = vld [vmem:[#allocation9 + $0x8] sm:$0xf] }
 0x8d3   : > { %6409 = vst.msk [vmem:[#allocation3 + $0xac] sm:$0xf] %vm4790_vm7, %v6376_v44  ;;  %v10848_v36 = vor.u32 %v11534_v39, %v10845_v20  ;;  %v17004_v47 = vpop.f32.mrf.mxu2  ;;  %v10876_v26 = vor.u32 %v11542_v29, %v10875_v55  ;;  %v8728_v44 = vpop.f32.mrf.mxu0  ;;  %v8830_v20 = vadd.f32 %v8829_v7, %v16955_v59 }
 0x8d4   : > { %v8729_v31 = vadd.f32 %v8728_v44, %v8680_v4 }
 0x8d5   : > { %8750 = vmatmul.bf16.gmra.mxu0 %v10848_v36  ;;  %8897 = vmatmul.bf16.gmra.mxu3 %v10848_v36 }
 0x8d6   : > { %8794 = vmatmul.bf16.gmra.mxu1 %v17000_v33 }
 0x8d7   : > { %8964 = vmatpush.bf16.msrb.mxu1 %v10876_v26 }
 0x8da   : > { %v7978_v17 = vpop.permute.xlu1 %7977  ;;  %v11537_v2 = vld [vmem:[#allocation3 + $0xac] sm:$0xf] }
 0x8db   : > { %8012 = vst.msk [vmem:[#allocation3 + $0xa4] sm:$0xf] %vm4790_vm7, %v7978_v17  ;;  %v10860_v0 = vor.u32 %v11537_v2, %v10857_v35  ;;  %v8834_v30 = vpop.f32.mrf.mxu2 }
 0x8dc   : > { %v8835_v63 = vadd.f32 %v8834_v30, %v16955_v59 }
 0x8e2   : > { %9044 = vmatmul.bf16.gmra.mxu2 %v10848_v36  ;;  %v11536_v54 = vld [vmem:[#allocation3 + $0xa0] sm:$0xf0] }
 0x8e3   : > { %v17006_v22 = vor.u32 %v11536_v54, %v10851_v13  ;;  %v17016_v6 = vpop.f32.mrf.mxu2 }
 0x8e5   : > { %8755 = vmatmul.bf16.gmra.mxu0 %v10860_v0  ;;  %8902 = vmatmul.bf16.gmra.mxu3 %v10860_v0 }
 0x8e6   : > { %8799 = vmatmul.bf16.gmra.mxu1 %v17006_v22 }
 0x8ea   : > { %v7980_v5 = vpop.permute.xlu1 %7979 }
 0x8eb   : > { %8013 = vst.msk [vmem:[#allocation3 + $0xb0] sm:$0xf] %vm4790_vm7, %v7980_v5  ;;  %v8839_v44 = vpop.f32.mrf.mxu2 }
 0x8ee   : > { %v8731_v7 = vpop.f32.mrf.mxu0 }
 0x8ef   : > { %v8775_v49 = vpop.f32.mrf.mxu1  ;;  %v8732_v35 = vadd.f32 %v8731_v7, %v8683_v56 }
 0x8f0   : > { %v8776_v18 = vadd.f32 %v8775_v49, %v8727_v1 }
 0x8f2   : > { %9110 = vst [vmem:[%s16977_s26 + $0x30] sm:$0xff] %v8776_v18  ;;  %v7982_v39 = vpop.permute.xlu0 %7981  ;;  %9049 = vmatmul.bf16.gmra.mxu2 %v10860_v0  ;;  %v10863_v55 = vld [vmem:[#allocation3 + $0xb0] sm:$0xf]  ;;  %v8685_v0 = vadd.f32 %v16874_v60, %v16966_v61  ;;  %v8840_v60 = vadd.f32 %v8839_v44, %v16955_v59 }
 0x8f3   : > { %8014 = vst.msk [vmem:[#allocation3 + $0xbc] sm:$0xf] %vm4790_vm7, %v7982_v39 }
 0x8f4   : > { %v8878_v57 = vpop.f32.mrf.mxu3 }
 0x8f5   : > { %v17021_v36 = vadd.f32 %v8878_v57, %v8830_v20  ;;  %8916 = vmatmul.bf16.vlgmr.msrb.gmra.mxu0 %v16857_v32  ;;  %9063 = vmatmul.bf16.vlgmr.msrb.gmra.mxu3 %v16857_v32 }
 0x8f6   : > { %v8733_v32 = vpop.f32.mrf.mxu0 }
 0x8f7   : > { %v8777_v28 = vpop.f32.mrf.mxu1  ;;  %v8734_v5 = vadd.f32 %v8733_v32, %v8685_v0 }
 0x8f8   : > { %v8778_v17 = vadd.f32 %v8777_v28, %v8729_v31  ;;  %v8688_v31 = vadd.f32 %v16881_v53, %v16966_v61 }
 0x8fa   : > { %9113 = vst [vmem:[%s16977_s26 + $0x48] sm:$0xff] %v8778_v17  ;;  %v11539_v29 = vld [vmem:[#allocation3 + $0xb8] sm:$0xf0] }
 0x8fb   : > { %v17026_v26 = vor.u32 %v11539_v29, %v10863_v55  ;;  %v8690_v55 = vadd.f32 %v16892_v3, %v16966_v61 }
 0x8fc   : > { %v17030_v2 = vpop.f32.mrf.mxu3 }
 0x8fd   : > { %8804 = vmatmul.bf16.gmra.mxu1 %v17026_v26 }
 0x8fe   : > { %v8736_v20 = vpop.f32.mrf.mxu0 }
 0x8ff   : > { %v8780_v13 = vpop.f32.mrf.mxu1  ;;  %v8737_v28 = vadd.f32 %v8736_v20, %v8688_v31  ;;  %v8700_v31 = vadd.f32 %v16929_v51, %v16966_v61 }
 0x900   : > { %v8781_v54 = vadd.f32 %v8780_v13, %v8732_v35 }
 0x902   : > { %9116 = vst [vmem:[%s16977_s26 + $0x60] sm:$0xff] %v8781_v54 }
 0x904   : > { %v8883_v16 = vpop.f32.mrf.mxu3 }
 0x905   : > { %8921 = vmatmul.bf16.gmra.mxu0 %v16906_v27  ;;  %9068 = vmatmul.bf16.gmra.mxu3 %v16906_v27  ;;  %v17039_v15 = vadd.f32 %v8883_v16, %v8835_v63  ;;  %v8841_v27 = vpop.f32.mrf.mxu2 }
 0x906   : > { %v8842_v4 = vadd.f32 %v8841_v27, %v16955_v59 }
 0x907   : > { %v8782_v1 = vpop.f32.mrf.mxu1 }
 0x908   : > { %v8783_v49 = vadd.f32 %v8782_v1, %v8734_v5  ;;  %v8695_v5 = vadd.f32 %v16912_v46, %v16966_v61 }
 0x90a   : > { %9119 = vst [vmem:[%s16977_s26 + $0x78] sm:$0xff] %v8783_v49 }
 0x90c   : > { %v17043_v18 = vpop.f32.mrf.mxu3 }
 0x90d   : > { %8965 = vmatmul.bf16.vlgmr.msrb.gmra.mxu1 %v16420_v11  ;;  %v8844_v29 = vpop.f32.mrf.mxu2 }
 0x915   : > { %8926 = vmatmul.bf16.gmra.mxu0 %v16922_v45  ;;  %9073 = vmatmul.bf16.gmra.mxu3 %v16922_v45  ;;  %v8738_v45 = vpop.f32.mrf.mxu0  ;;  %v8846_v13 = vpop.f32.mrf.mxu2 }
 0x916   : > { %v8739_v56 = vadd.f32 %v8738_v45, %v8690_v55 }
 0x91a   : > { %v8888_v30 = vpop.f32.mrf.mxu3 }
 0x91b   : > { %v17048_v39 = vadd.f32 %v8888_v30, %v8840_v60  ;;  %v8847_v60 = vadd.f32 %v8846_v13, %v16955_v59  ;;  %v8698_v30 = vadd.f32 %v16916_v50, %v16966_v61 }
 0x91d   : > { %8970 = vmatmul.bf16.gmra.mxu1 %v16514_v41  ;;  %v8741_v7 = vpop.f32.mrf.mxu0  ;;  %v8849_v63 = vpop.f32.mrf.mxu2 }
 0x922   : > { %v8890_v11 = vpop.f32.mrf.mxu3 }
 0x923   : > { %v17052_v57 = vadd.f32 %v8890_v11, %v8842_v4 }
 0x925   : > { %8931 = vmatmul.bf16.gmra.mxu0 %v16960_v52  ;;  %9078 = vmatmul.bf16.gmra.mxu3 %v16960_v52  ;;  %v8743_v53 = vpop.f32.mrf.mxu0 }
 0x92d   : > { %v8785_v17 = vpop.f32.mrf.mxu1  ;;  %8975 = vmatmul.bf16.gmra.mxu1 %v16539_v8  ;;  %v8693_v8 = vadd.f32 %v16900_v34, %v16966_v61  ;;  %v8744_v34 = vadd.f32 %v8743_v53, %v8695_v5 }
 0x92e   : > { %v8786_v41 = vadd.f32 %v8785_v17, %v8737_v28 }
 0x92f   : > { %v8742_v54 = vadd.f32 %v8741_v7, %v8693_v8 }
 0x930   : > { %9122 = vst [vmem:[%s16977_s26 + $0x90] sm:$0xff] %v8786_v41 }
 0x935   : > { %v8787_v35 = vpop.f32.mrf.mxu1  ;;  %8936 = vmatmul.bf16.gmra.mxu0 %v16992_v23  ;;  %9083 = vmatmul.bf16.gmra.mxu3 %v16992_v23  ;;  %v8845_v23 = vadd.f32 %v8844_v29, %v16955_v59 }
 0x936   : > { %v8788_v52 = vadd.f32 %v8787_v35, %v8739_v56  ;;  %v8703_v56 = vadd.f32 %v16933_v19, %v16966_v61  ;;  %v8705_v19 = vadd.f32 %v16938_v14, %v16966_v61 }
 0x938   : > { %9125 = vst [vmem:[%s16977_s26 + $0xa8] sm:$0xff] %v8788_v52 }
 0x93d   : > { %8980 = vmatmul.bf16.gmra.mxu1 %v16607_v43 }
 0x942   : > { %v8746_v32 = vpop.f32.mrf.mxu0 }
 0x943   : > { %v8790_v3 = vpop.f32.mrf.mxu1  ;;  %v8747_v46 = vadd.f32 %v8746_v32, %v8698_v30 }
 0x944   : > { %v8791_v0 = vadd.f32 %v8790_v3, %v8742_v54 }
 0x945   : > { %8941 = vmatmul.bf16.gmra.mxu0 %v17000_v33  ;;  %9088 = vmatmul.bf16.gmra.mxu3 %v17000_v33  ;;  %v8851_v33 = vpop.f32.mrf.mxu2 }
 0x946   : > { %9128 = vst [vmem:[%s16977_s26 + $0xc0] sm:$0xff] %v8791_v0 }
 0x948   : > { %v8893_v43 = vpop.f32.mrf.mxu3 }
 0x949   : > { %v17074_v16 = vadd.f32 %v8893_v43, %v8845_v23 }
 0x94a   : > { %v8748_v1 = vpop.f32.mrf.mxu0 }
 0x94b   : > { %v8792_v49 = vpop.f32.mrf.mxu1  ;;  %v8749_v41 = vadd.f32 %v8748_v1, %v8700_v31 }
 0x94c   : > { %v8793_v44 = vadd.f32 %v8792_v49, %v8744_v34 }
 0x94d   : > { %8985 = vmatmul.bf16.gmra.mxu1 %v16675_v48  ;;  %v8850_v48 = vadd.f32 %v8849_v63, %v16955_v59  ;;  %v8854_v50 = vpop.f32.mrf.mxu2 }
 0x94e   : > { %9131 = vst [vmem:[%s16977_s26 + $0xd8] sm:$0xff] %v8793_v44  ;;  %v8708_v44 = vadd.f32 %v16946_v62, %v16966_v61  ;;  %v8710_v62 = vadd.f32 %v16949_v10, %v16966_v61 }
 0x950   : > { %v8895_v27 = vpop.f32.mrf.mxu3 }
 0x951   : > { %v17081_v20 = vadd.f32 %v8895_v27, %v8847_v60  ;;  %v8822_v60 = vadd.f32 %v16962_v9, %v16955_v59 }
 0x952   : > { %v8751_v4 = vpop.f32.mrf.mxu0 }
 0x953   : > { %v8795_v11 = vpop.f32.mrf.mxu1  ;;  %v8752_v51 = vadd.f32 %v8751_v4, %v8703_v56  ;;  %v8871_v27 = vadd.f32 %v16973_v40, %v8822_v60 }
 0x954   : > { %v8796_v45 = vadd.f32 %v8795_v11, %v8747_v46 }
 0x955   : > { %8946 = vmatmul.bf16.gmra.mxu0 %v17006_v22  ;;  %9093 = vmatmul.bf16.gmra.mxu3 %v17006_v22  ;;  %v8852_v22 = vadd.f32 %v8851_v33, %v16955_v59  ;;  %v8856_v13 = vpop.f32.mrf.mxu2 }
 0x956   : > { %9134 = vst [vmem:[%s16977_s26 + $0xf0] sm:$0xff] %v8796_v45 }
 0x958   : > { %v8898_v28 = vpop.f32.mrf.mxu3 }
 0x959   : > { %v17089_v17 = vadd.f32 %v8898_v28, %v8850_v48 }
 0x95a   : > { %v8753_v7 = vpop.f32.mrf.mxu0 }
 0x95b   : > { %v8797_v55 = vpop.f32.mrf.mxu1  ;;  %v8754_v0 = vadd.f32 %v8753_v7, %v8705_v19 }
 0x95c   : > { %v8798_v29 = vadd.f32 %v8797_v55, %v8749_v41  ;;  %v17127_v41 = vperm.slane %v16952_v38, 2 }
 0x95d   : > { %8990 = vmatmul.bf16.gmra.mxu1 %v16736_v12  ;;  %v8855_v12 = vadd.f32 %v8854_v50, %v16955_v59  ;;  %v9015_v43 = vpop.f32.mrf.mxu2 }
 0x95e   : > { %9137 = vst [vmem:[%s16977_s26 + $0x108] sm:$0xff] %v8798_v29 }
 0x960   : > { %v8900_v35 = vpop.f32.mrf.mxu3 }
 0x961   : > { %v17096_v52 = vadd.f32 %v8900_v35, %v8852_v22 }
 0x962   : > { %v8756_v53 = vpop.f32.mrf.mxu0 }
 0x963   : > { %v8800_v8 = vpop.f32.mrf.mxu1  ;;  %v8757_v33 = vadd.f32 %v8756_v53, %v8708_v44 }
 0x964   : > { %v8801_v54 = vadd.f32 %v8800_v8, %v8752_v51 }
 0x965   : > { %8951 = vmatmul.bf16.gmra.mxu0 %v17026_v26  ;;  %9098 = vmatmul.bf16.gmra.mxu3 %v17026_v26  ;;  %v8857_v26 = vadd.f32 %v8856_v13, %v16955_v59 }
 0x966   : > { %9140 = vst [vmem:[%s16977_s26 + $0x120] sm:$0xff] %v8801_v54 }
 0x968   : > { %v8903_v32 = vpop.f32.mrf.mxu3 }
 0x969   : > { %v17104_v3 = vadd.f32 %v8903_v32, %v8855_v12  ;;  %v8832_v12 = vadd.f32 %v17004_v47, %v16955_v59 }
 0x96a   : > { %v8758_v63 = vpop.f32.mrf.mxu0 }
 0x96b   : > { %v8802_v23 = vpop.f32.mrf.mxu1  ;;  %v8881_v32 = vadd.f32 %v17030_v2, %v8832_v12 }
 0x96c   : > { %v8803_v5 = vadd.f32 %v8802_v23, %v8754_v0 }
 0x96d   : > { %8995 = vmatmul.bf16.gmra.mxu1 %v16802_v25  ;;  %v9017_v25 = vpop.f32.mrf.mxu2 }
 0x96e   : > { %9143 = vst [vmem:[%s16977_s26 + $0x138] sm:$0xff] %v8803_v5 }
 0x970   : > { %v8905_v34 = vpop.f32.mrf.mxu3 }
 0x971   : > { %v17109_v1 = vadd.f32 %v8905_v34, %v8857_v26 }
 0x972   : > { %v8917_v49 = vpop.f32.mrf.mxu0 }
 0x973   : > { %v8918_v14 = vadd.f32 %v8917_v49, %v16958_v58  ;;  %v8759_v58 = vadd.f32 %v8758_v63, %v8710_v62 }
 0x975   : > { %9105 = vst [vmem:[%s16977_s26 + $0x8] sm:$0xff] %v8918_v14  ;;  %v9020_v48 = vpop.f32.mrf.mxu2 }
 0x978   : > { %v9064_v30 = vpop.f32.mrf.mxu3 }
 0x97a   : > { %v8805_v46 = vpop.f32.mrf.mxu1  ;;  %v8919_v4 = vpop.f32.mrf.mxu0 }
 0x97b   : > { %v8806_v11 = vadd.f32 %v8805_v46, %v8757_v33  ;;  %v8920_v45 = vadd.f32 %v8919_v4, %v8871_v27 }
 0x97d   : > { %9146 = vst [vmem:[%s16977_s26 + $0x150] sm:$0xff] %v8806_v11  ;;  %9000 = vmatmul.bf16.gmra.mxu1 %v16829_v21  ;;  %v8827_v21 = vadd.f32 %v16996_v37, %v16955_v59  ;;  %v9022_v22 = vpop.f32.mrf.mxu2 }
 0x97e   : > { %9108 = vst [vmem:[%s16977_s26 + $0x20] sm:$0xff] %v8920_v45 }
 0x97f   : > { %v8876_v10 = vadd.f32 %v17012_v24, %v8827_v21 }
 0x980   : > { %v9066_v9 = vpop.f32.mrf.mxu3 }
 0x982   : > { %v8807_v31 = vpop.f32.mrf.mxu1  ;;  %v8922_v28 = vpop.f32.mrf.mxu0 }
 0x983   : > { %v8808_v40 = vadd.f32 %v8807_v31, %v8759_v58  ;;  %v8923_v50 = vadd.f32 %v8922_v28, %v16986_v42 }
 0x985   : > { %9149 = vst [vmem:[%s16977_s26 + $0x168] sm:$0xff] %v8808_v40  ;;  %v9025_v8 = vpop.f32.mrf.mxu2 }
 0x986   : > { %9111 = vst [vmem:[%s16977_s26 + $0x38] sm:$0xff] %v8923_v50 }
 0x988   : > { %v9069_v7 = vpop.f32.mrf.mxu3 }
 0x98a   : > { %v8966_v61 = vpop.f32.mrf.mxu1  ;;  %v8924_v55 = vpop.f32.mrf.mxu0 }
 0x98b   : > { %v8967_v29 = vadd.f32 %v8966_v61, %v17127_v41  ;;  %v8925_v56 = vadd.f32 %v8924_v55, %v8876_v10 }
 0x98d   : > { %v9016_v42 = vadd.f32 %v9015_v43, %v8967_v29  ;;  %9114 = vst [vmem:[%s16977_s26 + $0x50] sm:$0xff] %v8925_v56  ;;  %v9027_v26 = vpop.f32.mrf.mxu2 }
 0x98f   : > { %v9065_v35 = vadd.f32 %v9064_v30, %v9016_v42 }
 0x990   : > { %v9071_v38 = vpop.f32.mrf.mxu3 }
 0x991   : > { %9106 = vst [vmem:[%s16977_s26 + $0x10] sm:$0xff] %v9065_v35 }
 0x992   : > { %v8968_v51 = vpop.f32.mrf.mxu1  ;;  %v8927_v53 = vpop.f32.mrf.mxu0 }
 0x993   : > { %v8969_v37 = vadd.f32 %v8968_v51, %v17127_v41  ;;  %v8928_v24 = vadd.f32 %v8927_v53, %v17021_v36 }
 0x995   : > { %v9018_v13 = vadd.f32 %v9017_v25, %v8969_v37  ;;  %9117 = vst [vmem:[%s16977_s26 + $0x68] sm:$0xff] %v8928_v24  ;;  %v8837_v25 = vadd.f32 %v17016_v6, %v16955_v59  ;;  %v9030_v30 = vpop.f32.mrf.mxu2 }
 0x997   : > { %v9067_v54 = vadd.f32 %v9066_v9, %v9018_v13  ;;  %v8886_v33 = vadd.f32 %v17043_v18, %v8837_v25 }
 0x998   : > { %v9074_v19 = vpop.f32.mrf.mxu3 }
 0x999   : > { %9109 = vst [vmem:[%s16977_s26 + $0x28] sm:$0xff] %v9067_v54 }
 0x99a   : > { %v8971_v0 = vpop.f32.mrf.mxu1  ;;  %v8929_v63 = vpop.f32.mrf.mxu0 }
 0x99b   : > { %v8972_v23 = vadd.f32 %v8971_v0, %v17127_v41  ;;  %v8930_v5 = vadd.f32 %v8929_v63, %v8881_v32 }
 0x99d   : > { %v9021_v36 = vadd.f32 %v9020_v48, %v8972_v23  ;;  %9120 = vst [vmem:[%s16977_s26 + $0x80] sm:$0xff] %v8930_v5  ;;  %v9032_v6 = vpop.f32.mrf.mxu2 }
 0x99f   : > { %v9070_v43 = vadd.f32 %v9069_v7, %v9021_v36 }
 0x9a0   : > { %v9076_v34 = vpop.f32.mrf.mxu3 }
 0x9a1   : > { %9112 = vst [vmem:[%s16977_s26 + $0x40] sm:$0xff] %v9070_v43 }
 0x9a2   : > { %v8973_v49 = vpop.f32.mrf.mxu1  ;;  %v8932_v14 = vpop.f32.mrf.mxu0 }
 0x9a3   : > { %v8974_v47 = vadd.f32 %v8973_v49, %v17127_v41  ;;  %v8933_v2 = vadd.f32 %v8932_v14, %v17039_v15 }
 0x9a5   : > { %v9023_v44 = vadd.f32 %v9022_v22, %v8974_v47  ;;  %9123 = vst [vmem:[%s16977_s26 + $0x98] sm:$0xff] %v8933_v2  ;;  %v9035_v61 = vpop.f32.mrf.mxu2 }
 0x9a7   : > { %v9072_v60 = vadd.f32 %v9071_v38, %v9023_v44 }
 0x9a8   : > { %v9079_v11 = vpop.f32.mrf.mxu3 }
 0x9a9   : > { %9115 = vst [vmem:[%s16977_s26 + $0x58] sm:$0xff] %v9072_v60 }
 0x9aa   : > { %v8976_v27 = vpop.f32.mrf.mxu1  ;;  %v8934_v46 = vpop.f32.mrf.mxu0 }
 0x9ab   : > { %v8977_v4 = vadd.f32 %v8976_v27, %v17127_v41  ;;  %v8935_v45 = vadd.f32 %v8934_v46, %v8886_v33 }
 0x9ad   : > { %v9026_v15 = vadd.f32 %v9025_v8, %v8977_v4  ;;  %9126 = vst [vmem:[%s16977_s26 + $0xb0] sm:$0xff] %v8935_v45  ;;  %v9037_v51 = vpop.f32.mrf.mxu2 }
 0x9af   : > { %v9075_v62 = vadd.f32 %v9074_v19, %v9026_v15 }
 0x9b0   : > { %v9081_v31 = vpop.f32.mrf.mxu3 }
 0x9b1   : > { %9118 = vst [vmem:[%s16977_s26 + $0x70] sm:$0xff] %v9075_v62 }
 0x9b2   : > { %v8978_v58 = vpop.f32.mrf.mxu1  ;;  %v8937_v9 = vpop.f32.mrf.mxu0 }
 0x9b3   : > { %v8979_v59 = vadd.f32 %v8978_v58, %v17127_v41  ;;  %v8938_v18 = vadd.f32 %v8937_v9, %v17048_v39 }
 0x9b5   : > { %v9028_v48 = vadd.f32 %v9027_v26, %v8979_v59  ;;  %9129 = vst [vmem:[%s16977_s26 + $0xc8] sm:$0xff] %v8938_v18  ;;  %v9040_v12 = vpop.f32.mrf.mxu2 }
 0x9b7   : > { %v9077_v28 = vadd.f32 %v9076_v34, %v9028_v48 }
 0x9b8   : > { %v9084_v29 = vpop.f32.mrf.mxu3 }
 0x9b9   : > { %9121 = vst [vmem:[%s16977_s26 + $0x88] sm:$0xff] %v9077_v28 }
 0x9ba   : > { %v8981_v40 = vpop.f32.mrf.mxu1  ;;  %v8939_v50 = vpop.f32.mrf.mxu0 }
 0x9bb   : > { %v8982_v21 = vadd.f32 %v8981_v40, %v17127_v41  ;;  %v8940_v7 = vadd.f32 %v8939_v50, %v17052_v57 }
 0x9bd   : > { %v9031_v10 = vadd.f32 %v9030_v30, %v8982_v21  ;;  %9132 = vst [vmem:[%s16977_s26 + $0xe0] sm:$0xff] %v8940_v7  ;;  %v9042_v26 = vpop.f32.mrf.mxu2 }
 0x9bf   : > { %v9080_v55 = vadd.f32 %v9079_v11, %v9031_v10 }
 0x9c0   : > { %v9086_v57 = vpop.f32.mrf.mxu3 }
 0x9c1   : > { %9124 = vst [vmem:[%s16977_s26 + $0xa0] sm:$0xff] %v9080_v55 }
 0x9c2   : > { %v8983_v39 = vpop.f32.mrf.mxu1  ;;  %v8942_v22 = vpop.f32.mrf.mxu0 }
 0x9c3   : > { %v8984_v56 = vadd.f32 %v8983_v39, %v17127_v41  ;;  %v8943_v42 = vadd.f32 %v8942_v22, %v17074_v16 }
 0x9c5   : > { %v9033_v35 = vadd.f32 %v9032_v6, %v8984_v56  ;;  %9135 = vst [vmem:[%s16977_s26 + $0xf8] sm:$0xff] %v8943_v42  ;;  %v9045_v33 = vpop.f32.mrf.mxu2 }
 0x9c7   : > { %v9082_v38 = vadd.f32 %v9081_v31, %v9033_v35 }
 0x9c8   : > { %v9089_v0 = vpop.f32.mrf.mxu3 }
 0x9c9   : > { %9127 = vst [vmem:[%s16977_s26 + $0xb8] sm:$0xff] %v9082_v38 }
 0x9ca   : > { %v8986_v53 = vpop.f32.mrf.mxu1  ;;  %v8944_v37 = vpop.f32.mrf.mxu0 }
 0x9cb   : > { %v8987_v24 = vadd.f32 %v8986_v53, %v17127_v41  ;;  %v8945_v13 = vadd.f32 %v8944_v37, %v17081_v20 }
 0x9cd   : > { %v9036_v8 = vadd.f32 %v9035_v61, %v8987_v24  ;;  %9138 = vst [vmem:[%s16977_s26 + $0x110] sm:$0xff] %v8945_v13  ;;  %v9047_v62 = vpop.f32.mrf.mxu2 }
 0x9cf   : > { %v9085_v54 = vadd.f32 %v9084_v29, %v9036_v8 }
 0x9d0   : > { %v9091_v14 = vpop.f32.mrf.mxu3 }
 0x9d1   : > { %9130 = vst [vmem:[%s16977_s26 + $0xd0] sm:$0xff] %v9085_v54 }
 0x9d2   : > { %v8988_v16 = vpop.f32.mrf.mxu1  ;;  %v8947_v19 = vpop.f32.mrf.mxu0 }
 0x9d3   : > { %v8989_v32 = vadd.f32 %v8988_v16, %v17127_v41  ;;  %v8948_v63 = vadd.f32 %v8947_v19, %v17089_v17 }
 0x9d5   : > { %v9038_v23 = vadd.f32 %v9037_v51, %v8989_v32  ;;  %9141 = vst [vmem:[%s16977_s26 + $0x128] sm:$0xff] %v8948_v63  ;;  %v9050_v18 = vpop.f32.mrf.mxu2 }
 0x9d7   : > { %v9087_v5 = vadd.f32 %v9086_v57, %v9038_v23 }
 0x9d8   : > { %v9094_v27 = vpop.f32.mrf.mxu3 }
 0x9d9   : > { %9133 = vst [vmem:[%s16977_s26 + $0xe8] sm:$0xff] %v9087_v5 }
 0x9da   : > { %v8991_v36 = vpop.f32.mrf.mxu1  ;;  %v8949_v20 = vpop.f32.mrf.mxu0 }
 0x9db   : > { %v8992_v43 = vadd.f32 %v8991_v36, %v17127_v41  ;;  %v8950_v34 = vadd.f32 %v8949_v20, %v17096_v52 }
 0x9dd   : > { %v9041_v49 = vadd.f32 %v9040_v12, %v8992_v43  ;;  %9144 = vst [vmem:[%s16977_s26 + $0x140] sm:$0xff] %v8950_v34  ;;  %v9052_v7 = vpop.f32.mrf.mxu2 }
 0x9df   : > { %v9090_v47 = vadd.f32 %v9089_v0, %v9041_v49 }
 0x9e1   : > { %9136 = vst [vmem:[%s16977_s26 + $0x100] sm:$0xff] %v9090_v47 }
 0x9e2   : > { %v8993_v17 = vpop.f32.mrf.mxu1  ;;  %v8952_v2 = vpop.f32.mrf.mxu0 }
 0x9e3   : > { %v8994_v44 = vadd.f32 %v8993_v17, %v17127_v41  ;;  %v8953_v60 = vadd.f32 %v8952_v2, %v17104_v3  ;;  %v9096_v3 = vpop.f32.mrf.mxu3 }
 0x9e5   : > { %v9043_v25 = vadd.f32 %v9042_v26, %v8994_v44  ;;  %9147 = vst [vmem:[%s16977_s26 + $0x158] sm:$0xff] %v8953_v60 }
 0x9e7   : > { %v9092_v30 = vadd.f32 %v9091_v14, %v9043_v25 }
 0x9e9   : > { %9139 = vst [vmem:[%s16977_s26 + $0x118] sm:$0xff] %v9092_v30 }
 0x9ea   : > { %v8996_v52 = vpop.f32.mrf.mxu1  ;;  %v8954_v46 = vpop.f32.mrf.mxu0 }
 0x9eb   : > { %v8997_v4 = vadd.f32 %v8996_v52, %v17127_v41  ;;  %v8955_v11 = vadd.f32 %v8954_v46, %v17109_v1  ;;  %v9099_v1 = vpop.f32.mrf.mxu3 }
 0x9ed   : > { %v9046_v45 = vadd.f32 %v9045_v33, %v8997_v4  ;;  %9150 = vst [vmem:[%s16977_s26 + $0x170] sm:$0xff] %v8955_v11 }
 0x9ef   : > { %v9095_v15 = vadd.f32 %v9094_v27, %v9046_v45 }
 0x9f1   : > { %9142 = vst [vmem:[%s16977_s26 + $0x130] sm:$0xff] %v9095_v15 }
 0x9f2   : > { %v8998_v58 = vpop.f32.mrf.mxu1 }
 0x9f3   : > { %v8999_v9 = vadd.f32 %v8998_v58, %v17127_v41  ;;  %v9101_v61 = vpop.f32.mrf.mxu3 }
 0x9f5   : > { %v9048_v59 = vadd.f32 %v9047_v62, %v8999_v9 }
 0x9f7   : > { %v9097_v6 = vadd.f32 %v9096_v3, %v9048_v59 }
 0x9f9   : > { %9145 = vst [vmem:[%s16977_s26 + $0x148] sm:$0xff] %v9097_v6 }
 0x9fa   : > { %v9001_v48 = vpop.f32.mrf.mxu1 }
 0x9fb   : > { %v9002_v31 = vadd.f32 %v9001_v48, %v17127_v41 }
 0x9fd   : > { %v9051_v28 = vadd.f32 %v9050_v18, %v9002_v31 }
 0x9ff   : > { %v9100_v40 = vadd.f32 %v9099_v1, %v9051_v28 }
 0xa01   : > { %9148 = vst [vmem:[%s16977_s26 + $0x160] sm:$0xff] %v9100_v40 }
 0xa02   : > { %v9003_v50 = vpop.f32.mrf.mxu1 }
 0xa03   : > { %v9004_v21 = vadd.f32 %v9003_v50, %v17127_v41 }
 0xa05   : > { %v9053_v10 = vadd.f32 %v9052_v7, %v9004_v21 }
 0xa07   : > { %v9102_v55 = vadd.f32 %v9101_v61, %v9053_v10 }
 0xa09   : > { %9151 = vst [vmem:[%s16977_s26 + $0x178] sm:$0xff] %v9102_v55 }
 0xa0a   : > { %12233 = shalt.err (!%p12230_p10)
}
 0xa0b   : > { %s12292_s10 = smov 384   ;;  %s12293_s24 = smov 24  }
 0xa0c   : > { %11630 = dma.vmem_to_hbm [thread:$0]  (%p12402_p7), %s9166_s27, 6144, %s9168_s28, %s9153_s19, %s12292_s10, %s12292_s10, %s12293_s24  }
 0xa0d PF: > { %s9182_s21 = sand.u32 1, %s12268_s15   ;;  %p17950_p12 = scmp.ge.s32.totalorder %s12280_s18, 2 }
 0xa0e   : > { %s9183_s26 = scalar_lea.sflag [#allocation6], %s9182_s21 }
 0xa0f   : > { %p11647_p13 = pnand %p17950_p12, %p12354_p6 }
 0xa11   : > { %p11648_p0 = pneg %p11647_p13 }
 0xa13   : > { %12263 = dma.done.wait (%p11648_p0), %s9183_s26, 6144  }
 0xa14   : > { %12265 = vsyncadd (%p11648_p0), %s9183_s26, 4294961152  ;;  %p19_p3 = scmp.ge.s32.totalorder %s12388_s25, 4   ;;  %s17951_s15 = smov %s12272_s16 }
 0xa15   : > { %s17952_s16 = smov %s12276_s17  ;;  %s17953_s17 = smov %s12398_s30 }
 0xa16   : > { %s17954_s18 = smov %s12388_s25  ;;  %21 = sbr.rel (!%p19_p3) target bundleno = 7 (0x7), region = 93 }
 0xa1b   :  { %9189 = vsyncpa [#allocation5], 1 }
 0xa1c   :  { %9191 = vsyncpa [#allocation5 + $0x1], 1 }
 0xa1d   :  { %9192 = vsyncpa [#allocation8], 1 }
 0xa1e   :  { %9193 = vsyncpa [#allocation11], 1 }
 0xa1f   :  { %9194 = vsyncpa [#allocation6], 1 }
 0xa20   :  { %9196 = vsyncpa [#allocation6 + $0x1], 1 }

</bundles_post_ra>
